<compile_context>
chip_gen: v6e
topology: v6e:2x2x1
jax: 0.10.0
libtpu: 0.0.40
codegen_flags: <defaults>
</compile_context>

<pallas_src>
import math
import jax
import jax.numpy as jnp
from jax.experimental import pallas as pl
from jax.experimental.pallas import tpu as pltpu  # noqa: F401  (TPU backend / params if needed)

# ---- model config (small, deterministic) ----
D_MODEL = 32
N_HEADS = 4
D_HEAD = D_MODEL // N_HEADS
D_FF = 64
N_LAYERS = 2
VOCAB = 16
EPS = 1e-6


# =====================  Packed-vector layout (biases + LayerNorm params)  =====================
# All 1-D parameters live in a single [NV, 1, 3*D] slab, left-aligned per row.

def _build_vec_layout():
    D, F = D_MODEL, D_FF
    specs = []
    for l in range(N_LAYERS):
        specs += [
            (f"enc{l}_bqkv", 3 * D), (f"enc{l}_bo", D),
            (f"enc{l}_ff1_b", F), (f"enc{l}_ff2_b", D),
            (f"enc{l}_ln1_g", D), (f"enc{l}_ln1_b", D),
            (f"enc{l}_ln2_g", D), (f"enc{l}_ln2_b", D),
        ]
    for l in range(N_LAYERS):
        specs += [
            (f"dec{l}_self_bqkv", 3 * D), (f"dec{l}_self_bo", D),
            (f"dec{l}_cross_bq", D), (f"dec{l}_cross_bkv", 2 * D),
            (f"dec{l}_cross_bo", D),
            (f"dec{l}_ff1_b", F), (f"dec{l}_ff2_b", D),
            (f"dec{l}_ln1_g", D), (f"dec{l}_ln1_b", D),
            (f"dec{l}_ln2_g", D), (f"dec{l}_ln2_b", D),
            (f"dec{l}_ln3_g", D), (f"dec{l}_ln3_b", D),
        ]
    specs += [("enc_norm_g", D_MODEL), ("enc_norm_b", D_MODEL),
              ("dec_norm_g", D_MODEL), ("dec_norm_b", D_MODEL)]
    row = {name: i for i, (name, _) in enumerate(specs)}
    width = dict(specs)
    return specs, row, width


_VEC_SPECS, _VEC_ROW, _VEC_WIDTH = _build_vec_layout()
_N_VECS = len(_VEC_SPECS)


# =====================  Fused Pallas kernel (single program, whole batch)  =====================

def _fused_encode_decode_kernel(xs_ref, xt_ref, m_enc_ref, m_self_ref, m_cross_ref,
                                w_qkv_ref, w_dd_ref, w_d2d_ref, w_2dd_ref, vecs_ref,
                                o_ref):
    D = D_MODEL
    L = N_LAYERS
    scale = 1.0 / math.sqrt(D_HEAD)

    xs = xs_ref[...]          # [B*Ts, D]   embedded source (batch folded into rows)
    xt = xt_ref[...]          # [B*Tt, D]   embedded target
    m_enc = m_enc_ref[...]    # [B*Ts, B*Ts] additive block-diagonal mask (0 / -1e9)
    m_self = m_self_ref[...]  # [B*Tt, B*Tt] additive causal+pad block-diagonal mask
    m_cross = m_cross_ref[...]  # [B*Tt, B*Ts]

    def vec(name):
        v = vecs_ref[_VEC_ROW[name]]          # [1, 3*D]
        return v[:, :_VEC_WIDTH[name]]

    def layer_norm(x, g, b):
        # Annotated-Transformer LayerNorm: g * (x - mean) / (std + eps) + b, unbiased std.
        mean = jnp.mean(x, axis=-1, keepdims=True)
        c = x - mean
        var = jnp.sum(c * c, axis=-1, keepdims=True) / float(D - 1)
        return g * c / (jnp.sqrt(var) + EPS) + b

    def attention(q, k, v, wo, bo, mask_add):
        # q: [Nq, D], k/v: [Nk, D].  Output projection folded in per head (row-slices of wo
        # are 8-aligned in sublanes).  Scores via dot_general -> MXU transposed-operand path.
        acc = None
        for h in range(N_HEADS):
            sl = slice(h * D_HEAD, (h + 1) * D_HEAD)
            qh, kh, vh = q[:, sl], k[:, sl], v[:, sl]
            sc = jax.lax.dot_general(qh, kh, (((1,), (1,)), ((), ())),
                                     preferred_element_type=jnp.float32) * scale
            sc = sc + mask_add
            sc = sc - jnp.max(sc, axis=-1, keepdims=True)
            prob = jnp.exp(sc)
            prob = prob / jnp.sum(prob, axis=-1, keepdims=True)       # exact division
            oh = jnp.dot(prob, vh, preferred_element_type=jnp.float32)        # [Nq, Dh]
            contrib = jnp.dot(oh, wo[sl, :], preferred_element_type=jnp.float32)  # [Nq, D]
            acc = contrib if acc is None else acc + contrib
        return acc + bo

    def self_attn(x_in, wqkv, bqkv, wo, bo, mask_add):
        qkv = jnp.dot(x_in, wqkv, preferred_element_type=jnp.float32) + bqkv  # [N, 3D]
        return attention(qkv[:, :D], qkv[:, D:2 * D], qkv[:, 2 * D:], wo, bo, mask_add)

    def cross_attn(x_in, mem, wq, bq, wkv, bkv, wo, bo, mask_add):
        q = jnp.dot(x_in, wq, preferred_element_type=jnp.float32) + bq        # [Nt, D]
        kv = jnp.dot(mem, wkv, preferred_element_type=jnp.float32) + bkv      # [Ns, 2D]
        return attention(q, kv[:, :D], kv[:, D:], wo, bo, mask_add)

    def feed_forward(x_in, w1, b1, w2, b2):
        h = jnp.maximum(jnp.dot(x_in, w1, preferred_element_type=jnp.float32) + b1, 0.0)
        return jnp.dot(h, w2, preferred_element_type=jnp.float32) + b2

    # ---------- encoder ----------
    x = xs
    for l in range(L):
        y = layer_norm(x, vec(f"enc{l}_ln1_g"), vec(f"enc{l}_ln1_b"))
        x = x + self_attn(y, w_qkv_ref[l], vec(f"enc{l}_bqkv"),
                          w_dd_ref[l], vec(f"enc{l}_bo"), m_enc)
        y = layer_norm(x, vec(f"enc{l}_ln2_g"), vec(f"enc{l}_ln2_b"))
        x = x + feed_forward(y, w_d2d_ref[l], vec(f"enc{l}_ff1_b"),
                             w_2dd_ref[l], vec(f"enc{l}_ff2_b"))
    memory = layer_norm(x, vec("enc_norm_g"), vec("enc_norm_b"))

    # ---------- decoder ----------
    x = xt
    for l in range(L):
        y = layer_norm(x, vec(f"dec{l}_ln1_g"), vec(f"dec{l}_ln1_b"))
        x = x + self_attn(y, w_qkv_ref[L + l], vec(f"dec{l}_self_bqkv"),
                          w_dd_ref[L + l], vec(f"dec{l}_self_bo"), m_self)
        y = layer_norm(x, vec(f"dec{l}_ln2_g"), vec(f"dec{l}_ln2_b"))
        x = x + cross_attn(y, memory,
                           w_dd_ref[2 * L + l], vec(f"dec{l}_cross_bq"),
                           w_d2d_ref[2 * L + l], vec(f"dec{l}_cross_bkv"),
                           w_dd_ref[3 * L + l], vec(f"dec{l}_cross_bo"), m_cross)
        y = layer_norm(x, vec(f"dec{l}_ln3_g"), vec(f"dec{l}_ln3_b"))
        x = x + feed_forward(y, w_d2d_ref[L + l], vec(f"dec{l}_ff1_b"),
                             w_2dd_ref[L + l], vec(f"dec{l}_ff2_b"))

    o_ref[...] = layer_norm(x, vec("dec_norm_g"), vec("dec_norm_b"))


# =====================  Embedding + mask construction (host JAX, cheap XLA)  =====================

def positional_encoding(T, D):
    pos = jnp.arange(T, dtype=jnp.float32)[:, None]
    div = jnp.exp(jnp.arange(0, D, 2, dtype=jnp.float32) * (-math.log(10000.0) / D))
    ang = pos * div
    pe = jnp.zeros((T, D), jnp.float32)
    pe = pe.at[:, 0::2].set(jnp.sin(ang))
    pe = pe.at[:, 1::2].set(jnp.cos(ang))
    return pe


def embed(tokens, table):
    T = tokens.shape[1]
    x = table[tokens] * math.sqrt(D_MODEL)
    return x + positional_encoding(T, D_MODEL)[None, :, :]


def _fold_additive_mask(per_batch_bool):
    """[B, Tq, Tk] bool -> [B*Tq, B*Tk] additive f32 mask, block-diagonal over the batch."""
    B, Tq, Tk = per_batch_bool.shape
    eye = jnp.eye(B, dtype=bool)
    allowed = per_batch_bool[:, :, None, :] & eye[:, None, :, None]   # [B, Tq, B, Tk]
    allowed = allowed.reshape(B * Tq, B * Tk)
    return jnp.where(allowed, 0.0, -1e9).astype(jnp.float32)


def _cost_estimate(B, Ts, Tt, bytes_accessed):
    D, F, H, Dh, L = D_MODEL, D_FF, N_HEADS, D_HEAD, N_LAYERS
    bs, bt = B * Ts, B * Tt

    def attn_flops(nq, nk):
        return H * (2 * nq * nk * Dh + 2 * nq * nk * Dh + 2 * nq * Dh * D)

    flops = 0
    flops += L * (2 * bs * D * 3 * D + attn_flops(bs, bs) + 2 * bs * D * F + 2 * bs * F * D)
    flops += L * (2 * bt * D * 3 * D + attn_flops(bt, bt)
                  + 2 * bt * D * D + 2 * bs * D * 2 * D + attn_flops(bt, bs)
                  + 2 * bt * D * F + 2 * bt * F * D)
    trans = L * H * (bs * bs + bt * bt + bt * bs) + (4 * L + 2) * (bs + bt)
    return pl.CostEstimate(flops=int(flops), transcendentals=int(trans),
                           bytes_accessed=int(bytes_accessed))


# =====================  Forward  =====================

def encode_decode_forward(params, src, tgt, src_mask_bool, tgt_mask_bool):
    """EncodeDecode.forward: decode(encode(src, src_mask), src_mask, tgt, tgt_mask)."""
    B, Ts = src.shape
    Tt = tgt.shape[1]
    D = D_MODEL

    # Batch folded into the row (sublane) dimension.
    xs = embed(src, params["src_emb"]).reshape(B * Ts, D)
    xt = embed(tgt, params["tgt_emb"]).reshape(B * Tt, D)

    # Additive block-diagonal masks (cross-batch attention is killed with -1e9).
    m_enc = _fold_additive_mask(jnp.broadcast_to(src_mask_bool[:, None, :], (B, Ts, Ts)))
    m_self = _fold_additive_mask(tgt_mask_bool)
    m_cross = _fold_additive_mask(jnp.broadcast_to(src_mask_bool[:, None, :], (B, Tt, Ts)))

    kernel_inputs = (xs, xt, m_enc, m_self, m_cross,
                     params["w_qkv"], params["w_dd"], params["w_d2d"],
                     params["w_2dd"], params["vecs"])
    bytes_accessed = sum(int(a.size) * a.dtype.itemsize for a in kernel_inputs) + B * Tt * D * 4

    out_flat = pl.pallas_call(
        _fused_encode_decode_kernel,
        out_shape=jax.ShapeDtypeStruct((B * Tt, D), jnp.float32),
        cost_estimate=_cost_estimate(B, Ts, Tt, bytes_accessed),
    )(*kernel_inputs)

    return out_flat.reshape(B, Tt, D)


# =====================  Deterministic parameter init (pre-packed)  =====================

def init_params(key):
    L, D, F = N_LAYERS, D_MODEL, D_FF
    keys = iter(jax.random.split(key, 16))

    def w(shape):
        return 0.02 * jax.random.normal(next(keys), shape, jnp.float32)

    # Stacked weight matrices, grouped by shape family.
    #   w_qkv [2L, D, 3D] : enc_wqkv[l] at l, dec_self_wqkv[l] at L+l
    #   w_dd  [4L, D,  D] : enc_wo[l] at l, dec_self_wo[l] at L+l,
    #                       dec_cross_wq[l] at 2L+l, dec_cross_wo[l] at 3L+l
    #   w_d2d [3L, D, 2D] : enc_ff1[l] at l, dec_ff1[l] at L+l, dec_cross_wkv[l] at 2L+l
    #   w_2dd [2L, 2D, D] : enc_ff2[l] at l, dec_ff2[l] at L+l
    params = {
        "src_emb": w((VOCAB, D)),
        "tgt_emb": w((VOCAB, D)),
        "w_qkv": w((2 * L, D, 3 * D)),
        "w_dd": w((4 * L, D, D)),
        "w_d2d": w((3 * L, D, 2 * D)),
        "w_2dd": w((2 * L, 2 * D, D)),
    }

    # All biases / LayerNorm vectors packed into one slab: [NV, 1, 3D], left-aligned rows.
    vecs = jnp.zeros((_N_VECS, 1, 3 * D), jnp.float32)
    for name, width in _VEC_SPECS:
        if name.endswith("_g"):                       # LayerNorm gains init to 1
            vecs = vecs.at[_VEC_ROW[name], 0, :width].set(1.0)
    params["vecs"] = vecs
    return params


# =====================  Main  =====================

if __name__ == "__main__":
    B, T_SRC, T_TGT, PAD = 2, 8, 8, 0

    key = jax.random.PRNGKey(0)
    k_params, k_src, k_tgt = jax.random.split(key, 3)

    params = init_params(k_params)

    src = jax.random.randint(k_src, (B, T_SRC), 1, VOCAB, dtype=jnp.int32)
    tgt = jax.random.randint(k_tgt, (B, T_TGT), 1, VOCAB, dtype=jnp.int32)
    # introduce one padded source position to exercise masking
    src = src.at[0, -1].set(PAD)

    src_mask = (src != PAD)                                   # [B, T_src] bool
    causal = jnp.tril(jnp.ones((T_TGT, T_TGT), dtype=bool))   # subsequent-position mask
    tgt_mask = (tgt != PAD)[:, None, :] & causal[None, :, :]  # [B, T_tgt, T_tgt]

    fwd = jax.jit(encode_decode_forward)
    out = jax.block_until_ready(fwd(params, src, tgt, src_mask, tgt_mask))

    assert out.shape == (B, T_TGT, D_MODEL)
    assert bool(jnp.all(jnp.isfinite(out)))
    print("KERNEL_OK")
</pallas_src>

<mosaic_0001>
module attributes {stable_mosaic.version = 11 : i64} {
  func.func @_fused_encode_decode_kernel(%arg0: memref<16x32xf32, #tpu.memory_space<vmem>>, %arg1: memref<16x32xf32, #tpu.memory_space<vmem>>, %arg2: memref<16x16xf32, #tpu.memory_space<vmem>>, %arg3: memref<16x16xf32, #tpu.memory_space<vmem>>, %arg4: memref<16x16xf32, #tpu.memory_space<vmem>>, %arg5: memref<4x32x96xf32, #tpu.memory_space<vmem>>, %arg6: memref<8x32x32xf32, #tpu.memory_space<vmem>>, %arg7: memref<6x32x64xf32, #tpu.memory_space<vmem>>, %arg8: memref<4x64x32xf32, #tpu.memory_space<vmem>>, %arg9: memref<46x1x96xf32, #tpu.memory_space<vmem>>, %arg10: memref<16x32xf32, #tpu.memory_space<vmem>>) attributes {dimension_semantics = [], scalar_prefetch = 0 : i64, scratch_operands = 0 : i64, tpu.core_type = #tpu.core_type<tc>} {
    %c0 = arith.constant 0 : index
    %c0_0 = arith.constant 0 : index
    %0 = vector.load %arg0[%c0, %c0_0] : memref<16x32xf32, #tpu.memory_space<vmem>>, vector<16x32xf32>
    %c0_1 = arith.constant 0 : index
    %c0_2 = arith.constant 0 : index
    %1 = vector.load %arg1[%c0_1, %c0_2] : memref<16x32xf32, #tpu.memory_space<vmem>>, vector<16x32xf32>
    %c0_3 = arith.constant 0 : index
    %c0_4 = arith.constant 0 : index
    %2 = vector.load %arg2[%c0_3, %c0_4] : memref<16x16xf32, #tpu.memory_space<vmem>>, vector<16x16xf32>
    %c0_5 = arith.constant 0 : index
    %c0_6 = arith.constant 0 : index
    %3 = vector.load %arg3[%c0_5, %c0_6] : memref<16x16xf32, #tpu.memory_space<vmem>>, vector<16x16xf32>
    %c0_7 = arith.constant 0 : index
    %c0_8 = arith.constant 0 : index
    %4 = vector.load %arg4[%c0_7, %c0_8] : memref<16x16xf32, #tpu.memory_space<vmem>>, vector<16x16xf32>
    %c4 = arith.constant 4 : index
    %c0_9 = arith.constant 0 : index
    %c0_10 = arith.constant 0 : index
    %5 = vector.load %arg9[%c4, %c0_9, %c0_10] : memref<46x1x96xf32, #tpu.memory_space<vmem>>, vector<1x1x96xf32>
    %6 = vector.shape_cast %5 : vector<1x1x96xf32> to vector<1x96xf32>
    %7 = vector.extract_strided_slice %6 {offsets = [0, 0], sizes = [1, 32], strides = [1, 1]} : vector<1x96xf32> to vector<1x32xf32>
    %c5 = arith.constant 5 : index
    %c0_11 = arith.constant 0 : index
    %c0_12 = arith.constant 0 : index
    %8 = vector.load %arg9[%c5, %c0_11, %c0_12] : memref<46x1x96xf32, #tpu.memory_space<vmem>>, vector<1x1x96xf32>
    %9 = vector.shape_cast %8 : vector<1x1x96xf32> to vector<1x96xf32>
    %10 = vector.extract_strided_slice %9 {offsets = [0, 0], sizes = [1, 32], strides = [1, 1]} : vector<1x96xf32> to vector<1x32xf32>
    %cst = arith.constant dense<0.000000e+00> : vector<16xf32>
    %11 = vector.multi_reduction <add>, %0, %cst [1] : vector<16x32xf32> to vector<16xf32>
    %12 = vector.shape_cast %11 : vector<16xf32> to vector<16x1xf32>
    %cst_13 = arith.constant 3.200000e+01 : f32
    %13 = vector.broadcast %cst_13 : f32 to vector<16x1xf32>
    %14 = arith.divf %12, %13 : vector<16x1xf32>
    %15 = vector.broadcast %14 : vector<16x1xf32> to vector<16x32xf32>
    %16 = arith.subf %0, %15 : vector<16x32xf32>
    %17 = arith.mulf %16, %16 : vector<16x32xf32>
    %cst_14 = arith.constant dense<0.000000e+00> : vector<16xf32>
    %18 = vector.multi_reduction <add>, %17, %cst_14 [1] : vector<16x32xf32> to vector<16xf32>
    %19 = vector.shape_cast %18 : vector<16xf32> to vector<16x1xf32>
    %cst_15 = arith.constant 3.100000e+01 : f32
    %20 = vector.broadcast %cst_15 : f32 to vector<16x1xf32>
    %21 = arith.divf %19, %20 : vector<16x1xf32>
    %22 = vector.broadcast %7 : vector<1x32xf32> to vector<16x32xf32>
    %23 = arith.mulf %22, %16 : vector<16x32xf32>
    %24 = math.sqrt %21 : vector<16x1xf32>
    %cst_16 = arith.constant 9.99999997E-7 : f32
    %25 = vector.broadcast %cst_16 : f32 to vector<16x1xf32>
    %26 = arith.addf %24, %25 : vector<16x1xf32>
    %27 = vector.broadcast %26 : vector<16x1xf32> to vector<16x32xf32>
    %28 = arith.divf %23, %27 : vector<16x32xf32>
    %29 = vector.broadcast %10 : vector<1x32xf32> to vector<16x32xf32>
    %30 = arith.addf %28, %29 : vector<16x32xf32>
    %c0_17 = arith.constant 0 : index
    %c0_18 = arith.constant 0 : index
    %c0_19 = arith.constant 0 : index
    %31 = vector.load %arg5[%c0_17, %c0_18, %c0_19] : memref<4x32x96xf32, #tpu.memory_space<vmem>>, vector<1x32x96xf32>
    %32 = vector.shape_cast %31 : vector<1x32x96xf32> to vector<32x96xf32>
    %c0_20 = arith.constant 0 : index
    %c0_21 = arith.constant 0 : index
    %c0_22 = arith.constant 0 : index
    %33 = vector.load %arg9[%c0_20, %c0_21, %c0_22] : memref<46x1x96xf32, #tpu.memory_space<vmem>>, vector<1x1x96xf32>
    %34 = vector.shape_cast %33 : vector<1x1x96xf32> to vector<1x96xf32>
    %c0_23 = arith.constant 0 : index
    %c0_24 = arith.constant 0 : index
    %c0_25 = arith.constant 0 : index
    %35 = vector.load %arg6[%c0_23, %c0_24, %c0_25] : memref<8x32x32xf32, #tpu.memory_space<vmem>>, vector<1x32x32xf32>
    %36 = vector.shape_cast %35 : vector<1x32x32xf32> to vector<32x32xf32>
    %c1 = arith.constant 1 : index
    %c0_26 = arith.constant 0 : index
    %c0_27 = arith.constant 0 : index
    %37 = vector.load %arg9[%c1, %c0_26, %c0_27] : memref<46x1x96xf32, #tpu.memory_space<vmem>>, vector<1x1x96xf32>
    %38 = vector.shape_cast %37 : vector<1x1x96xf32> to vector<1x96xf32>
    %39 = vector.extract_strided_slice %38 {offsets = [0, 0], sizes = [1, 32], strides = [1, 1]} : vector<1x96xf32> to vector<1x32xf32>
    %cst_28 = arith.constant dense<0.000000e+00> : vector<16x96xf32>
    %40 = tpu.matmul %30, %32, %cst_28 {dimension_numbers = #tpu.dot_dimension_numbers<[1], [0], [0], [1], [0, 0, 1, 1], [], []>} : vector<16x32xf32>, vector<32x96xf32>, vector<16x96xf32> -> vector<16x96xf32>
    %41 = vector.broadcast %34 : vector<1x96xf32> to vector<16x96xf32>
    %42 = arith.addf %40, %41 : vector<16x96xf32>
    %43 = vector.extract_strided_slice %42 {offsets = [0, 0], sizes = [16, 32], strides = [1, 1]} : vector<16x96xf32> to vector<16x32xf32>
    %44 = vector.extract_strided_slice %42 {offsets = [0, 32], sizes = [16, 32], strides = [1, 1]} : vector<16x96xf32> to vector<16x32xf32>
    %45 = vector.extract_strided_slice %42 {offsets = [0, 64], sizes = [16, 32], strides = [1, 1]} : vector<16x96xf32> to vector<16x32xf32>
    %46 = vector.extract_strided_slice %43 {offsets = [0, 0], sizes = [16, 8], strides = [1, 1]} : vector<16x32xf32> to vector<16x8xf32>
    %47 = vector.extract_strided_slice %44 {offsets = [0, 0], sizes = [16, 8], strides = [1, 1]} : vector<16x32xf32> to vector<16x8xf32>
    %48 = vector.extract_strided_slice %45 {offsets = [0, 0], sizes = [16, 8], strides = [1, 1]} : vector<16x32xf32> to vector<16x8xf32>
    %cst_29 = arith.constant dense<0.000000e+00> : vector<16x16xf32>
    %49 = tpu.matmul %46, %47, %cst_29 {dimension_numbers = #tpu.dot_dimension_numbers<[1], [1], [0], [0], [0, 0, 1, 0], [], []>} : vector<16x8xf32>, vector<16x8xf32>, vector<16x16xf32> -> vector<16x16xf32>
    %cst_30 = arith.constant 0.353553385 : f32
    %50 = vector.broadcast %cst_30 : f32 to vector<16x16xf32>
    %51 = arith.mulf %49, %50 : vector<16x16xf32>
    %52 = arith.addf %51, %2 : vector<16x16xf32>
    %cst_31 = arith.constant dense<0xFF800000> : vector<16xf32>
    %53 = vector.multi_reduction <maximumf>, %52, %cst_31 [1] : vector<16x16xf32> to vector<16xf32>
    %54 = vector.shape_cast %53 : vector<16xf32> to vector<16x1xf32>
    %55 = vector.broadcast %54 : vector<16x1xf32> to vector<16x16xf32>
    %56 = arith.subf %52, %55 : vector<16x16xf32>
    %57 = math.exp %56 : vector<16x16xf32>
    %cst_32 = arith.constant dense<0.000000e+00> : vector<16xf32>
    %58 = vector.multi_reduction <add>, %57, %cst_32 [1] : vector<16x16xf32> to vector<16xf32>
    %59 = vector.shape_cast %58 : vector<16xf32> to vector<16x1xf32>
    %60 = vector.broadcast %59 : vector<16x1xf32> to vector<16x16xf32>
    %61 = arith.divf %57, %60 : vector<16x16xf32>
    %cst_33 = arith.constant dense<0.000000e+00> : vector<16x8xf32>
    %62 = tpu.matmul %61, %48, %cst_33 {dimension_numbers = #tpu.dot_dimension_numbers<[1], [0], [0], [1], [0, 0, 1, 1], [], []>} : vector<16x16xf32>, vector<16x8xf32>, vector<16x8xf32> -> vector<16x8xf32>
    %63 = vector.extract_strided_slice %36 {offsets = [0, 0], sizes = [8, 32], strides = [1, 1]} : vector<32x32xf32> to vector<8x32xf32>
    %cst_34 = arith.constant dense<0.000000e+00> : vector<16x32xf32>
    %64 = tpu.matmul %62, %63, %cst_34 {dimension_numbers = #tpu.dot_dimension_numbers<[1], [0], [0], [1], [0, 0, 1, 1], [], []>} : vector<16x8xf32>, vector<8x32xf32>, vector<16x32xf32> -> vector<16x32xf32>
    %65 = vector.extract_strided_slice %43 {offsets = [0, 8], sizes = [16, 8], strides = [1, 1]} : vector<16x32xf32> to vector<16x8xf32>
    %66 = vector.extract_strided_slice %44 {offsets = [0, 8], sizes = [16, 8], strides = [1, 1]} : vector<16x32xf32> to vector<16x8xf32>
    %67 = vector.extract_strided_slice %45 {offsets = [0, 8], sizes = [16, 8], strides = [1, 1]} : vector<16x32xf32> to vector<16x8xf32>
    %cst_35 = arith.constant dense<0.000000e+00> : vector<16x16xf32>
    %68 = tpu.matmul %65, %66, %cst_35 {dimension_numbers = #tpu.dot_dimension_numbers<[1], [1], [0], [0], [0, 0, 1, 0], [], []>} : vector<16x8xf32>, vector<16x8xf32>, vector<16x16xf32> -> vector<16x16xf32>
    %cst_36 = arith.constant 0.353553385 : f32
    %69 = vector.broadcast %cst_36 : f32 to vector<16x16xf32>
    %70 = arith.mulf %68, %69 : vector<16x16xf32>
    %71 = arith.addf %70, %2 : vector<16x16xf32>
    %cst_37 = arith.constant dense<0xFF800000> : vector<16xf32>
    %72 = vector.multi_reduction <maximumf>, %71, %cst_37 [1] : vector<16x16xf32> to vector<16xf32>
    %73 = vector.shape_cast %72 : vector<16xf32> to vector<16x1xf32>
    %74 = vector.broadcast %73 : vector<16x1xf32> to vector<16x16xf32>
    %75 = arith.subf %71, %74 : vector<16x16xf32>
    %76 = math.exp %75 : vector<16x16xf32>
    %cst_38 = arith.constant dense<0.000000e+00> : vector<16xf32>
    %77 = vector.multi_reduction <add>, %76, %cst_38 [1] : vector<16x16xf32> to vector<16xf32>
    %78 = vector.shape_cast %77 : vector<16xf32> to vector<16x1xf32>
    %79 = vector.broadcast %78 : vector<16x1xf32> to vector<16x16xf32>
    %80 = arith.divf %76, %79 : vector<16x16xf32>
    %cst_39 = arith.constant dense<0.000000e+00> : vector<16x8xf32>
    %81 = tpu.matmul %80, %67, %cst_39 {dimension_numbers = #tpu.dot_dimension_numbers<[1], [0], [0], [1], [0, 0, 1, 1], [], []>} : vector<16x16xf32>, vector<16x8xf32>, vector<16x8xf32> -> vector<16x8xf32>
    %82 = vector.extract_strided_slice %36 {offsets = [8, 0], sizes = [8, 32], strides = [1, 1]} : vector<32x32xf32> to vector<8x32xf32>
    %cst_40 = arith.constant dense<0.000000e+00> : vector<16x32xf32>
    %83 = tpu.matmul %81, %82, %cst_40 {dimension_numbers = #tpu.dot_dimension_numbers<[1], [0], [0], [1], [0, 0, 1, 1], [], []>} : vector<16x8xf32>, vector<8x32xf32>, vector<16x32xf32> -> vector<16x32xf32>
    %84 = arith.addf %64, %83 : vector<16x32xf32>
    %85 = vector.extract_strided_slice %43 {offsets = [0, 16], sizes = [16, 8], strides = [1, 1]} : vector<16x32xf32> to vector<16x8xf32>
    %86 = vector.extract_strided_slice %44 {offsets = [0, 16], sizes = [16, 8], strides = [1, 1]} : vector<16x32xf32> to vector<16x8xf32>
    %87 = vector.extract_strided_slice %45 {offsets = [0, 16], sizes = [16, 8], strides = [1, 1]} : vector<16x32xf32> to vector<16x8xf32>
    %cst_41 = arith.constant dense<0.000000e+00> : vector<16x16xf32>
    %88 = tpu.matmul %85, %86, %cst_41 {dimension_numbers = #tpu.dot_dimension_numbers<[1], [1], [0], [0], [0, 0, 1, 0], [], []>} : vector<16x8xf32>, vector<16x8xf32>, vector<16x16xf32> -> vector<16x16xf32>
    %cst_42 = arith.constant 0.353553385 : f32
    %89 = vector.broadcast %cst_42 : f32 to vector<16x16xf32>
    %90 = arith.mulf %88, %89 : vector<16x16xf32>
    %91 = arith.addf %90, %2 : vector<16x16xf32>
    %cst_43 = arith.constant dense<0xFF800000> : vector<16xf32>
    %92 = vector.multi_reduction <maximumf>, %91, %cst_43 [1] : vector<16x16xf32> to vector<16xf32>
    %93 = vector.shape_cast %92 : vector<16xf32> to vector<16x1xf32>
    %94 = vector.broadcast %93 : vector<16x1xf32> to vector<16x16xf32>
    %95 = arith.subf %91, %94 : vector<16x16xf32>
    %96 = math.exp %95 : vector<16x16xf32>
    %cst_44 = arith.constant dense<0.000000e+00> : vector<16xf32>
    %97 = vector.multi_reduction <add>, %96, %cst_44 [1] : vector<16x16xf32> to vector<16xf32>
    %98 = vector.shape_cast %97 : vector<16xf32> to vector<16x1xf32>
    %99 = vector.broadcast %98 : vector<16x1xf32> to vector<16x16xf32>
    %100 = arith.divf %96, %99 : vector<16x16xf32>
    %cst_45 = arith.constant dense<0.000000e+00> : vector<16x8xf32>
    %101 = tpu.matmul %100, %87, %cst_45 {dimension_numbers = #tpu.dot_dimension_numbers<[1], [0], [0], [1], [0, 0, 1, 1], [], []>} : vector<16x16xf32>, vector<16x8xf32>, vector<16x8xf32> -> vector<16x8xf32>
    %102 = vector.extract_strided_slice %36 {offsets = [16, 0], sizes = [8, 32], strides = [1, 1]} : vector<32x32xf32> to vector<8x32xf32>
    %cst_46 = arith.constant dense<0.000000e+00> : vector<16x32xf32>
    %103 = tpu.matmul %101, %102, %cst_46 {dimension_numbers = #tpu.dot_dimension_numbers<[1], [0], [0], [1], [0, 0, 1, 1], [], []>} : vector<16x8xf32>, vector<8x32xf32>, vector<16x32xf32> -> vector<16x32xf32>
    %104 = arith.addf %84, %103 : vector<16x32xf32>
    %105 = vector.extract_strided_slice %43 {offsets = [0, 24], sizes = [16, 8], strides = [1, 1]} : vector<16x32xf32> to vector<16x8xf32>
    %106 = vector.extract_strided_slice %44 {offsets = [0, 24], sizes = [16, 8], strides = [1, 1]} : vector<16x32xf32> to vector<16x8xf32>
    %107 = vector.extract_strided_slice %45 {offsets = [0, 24], sizes = [16, 8], strides = [1, 1]} : vector<16x32xf32> to vector<16x8xf32>
    %cst_47 = arith.constant dense<0.000000e+00> : vector<16x16xf32>
    %108 = tpu.matmul %105, %106, %cst_47 {dimension_numbers = #tpu.dot_dimension_numbers<[1], [1], [0], [0], [0, 0, 1, 0], [], []>} : vector<16x8xf32>, vector<16x8xf32>, vector<16x16xf32> -> vector<16x16xf32>
    %cst_48 = arith.constant 0.353553385 : f32
    %109 = vector.broadcast %cst_48 : f32 to vector<16x16xf32>
    %110 = arith.mulf %108, %109 : vector<16x16xf32>
    %111 = arith.addf %110, %2 : vector<16x16xf32>
    %cst_49 = arith.constant dense<0xFF800000> : vector<16xf32>
    %112 = vector.multi_reduction <maximumf>, %111, %cst_49 [1] : vector<16x16xf32> to vector<16xf32>
    %113 = vector.shape_cast %112 : vector<16xf32> to vector<16x1xf32>
    %114 = vector.broadcast %113 : vector<16x1xf32> to vector<16x16xf32>
    %115 = arith.subf %111, %114 : vector<16x16xf32>
    %116 = math.exp %115 : vector<16x16xf32>
    %cst_50 = arith.constant dense<0.000000e+00> : vector<16xf32>
    %117 = vector.multi_reduction <add>, %116, %cst_50 [1] : vector<16x16xf32> to vector<16xf32>
    %118 = vector.shape_cast %117 : vector<16xf32> to vector<16x1xf32>
    %119 = vector.broadcast %118 : vector<16x1xf32> to vector<16x16xf32>
    %120 = arith.divf %116, %119 : vector<16x16xf32>
    %cst_51 = arith.constant dense<0.000000e+00> : vector<16x8xf32>
    %121 = tpu.matmul %120, %107, %cst_51 {dimension_numbers = #tpu.dot_dimension_numbers<[1], [0], [0], [1], [0, 0, 1, 1], [], []>} : vector<16x16xf32>, vector<16x8xf32>, vector<16x8xf32> -> vector<16x8xf32>
    %122 = vector.extract_strided_slice %36 {offsets = [24, 0], sizes = [8, 32], strides = [1, 1]} : vector<32x32xf32> to vector<8x32xf32>
    %cst_52 = arith.constant dense<0.000000e+00> : vector<16x32xf32>
    %123 = tpu.matmul %121, %122, %cst_52 {dimension_numbers = #tpu.dot_dimension_numbers<[1], [0], [0], [1], [0, 0, 1, 1], [], []>} : vector<16x8xf32>, vector<8x32xf32>, vector<16x32xf32> -> vector<16x32xf32>
    %124 = arith.addf %104, %123 : vector<16x32xf32>
    %125 = vector.broadcast %39 : vector<1x32xf32> to vector<16x32xf32>
    %126 = arith.addf %124, %125 : vector<16x32xf32>
    %127 = arith.addf %0, %126 : vector<16x32xf32>
    %c6 = arith.constant 6 : index
    %c0_53 = arith.constant 0 : index
    %c0_54 = arith.constant 0 : index
    %128 = vector.load %arg9[%c6, %c0_53, %c0_54] : memref<46x1x96xf32, #tpu.memory_space<vmem>>, vector<1x1x96xf32>
    %129 = vector.shape_cast %128 : vector<1x1x96xf32> to vector<1x96xf32>
    %130 = vector.extract_strided_slice %129 {offsets = [0, 0], sizes = [1, 32], strides = [1, 1]} : vector<1x96xf32> to vector<1x32xf32>
    %c7 = arith.constant 7 : index
    %c0_55 = arith.constant 0 : index
    %c0_56 = arith.constant 0 : index
    %131 = vector.load %arg9[%c7, %c0_55, %c0_56] : memref<46x1x96xf32, #tpu.memory_space<vmem>>, vector<1x1x96xf32>
    %132 = vector.shape_cast %131 : vector<1x1x96xf32> to vector<1x96xf32>
    %133 = vector.extract_strided_slice %132 {offsets = [0, 0], sizes = [1, 32], strides = [1, 1]} : vector<1x96xf32> to vector<1x32xf32>
    %cst_57 = arith.constant dense<0.000000e+00> : vector<16xf32>
    %134 = vector.multi_reduction <add>, %127, %cst_57 [1] : vector<16x32xf32> to vector<16xf32>
    %135 = vector.shape_cast %134 : vector<16xf32> to vector<16x1xf32>
    %cst_58 = arith.constant 3.200000e+01 : f32
    %136 = vector.broadcast %cst_58 : f32 to vector<16x1xf32>
    %137 = arith.divf %135, %136 : vector<16x1xf32>
    %138 = vector.broadcast %137 : vector<16x1xf32> to vector<16x32xf32>
    %139 = arith.subf %127, %138 : vector<16x32xf32>
    %140 = arith.mulf %139, %139 : vector<16x32xf32>
    %cst_59 = arith.constant dense<0.000000e+00> : vector<16xf32>
    %141 = vector.multi_reduction <add>, %140, %cst_59 [1] : vector<16x32xf32> to vector<16xf32>
    %142 = vector.shape_cast %141 : vector<16xf32> to vector<16x1xf32>
    %cst_60 = arith.constant 3.100000e+01 : f32
    %143 = vector.broadcast %cst_60 : f32 to vector<16x1xf32>
    %144 = arith.divf %142, %143 : vector<16x1xf32>
    %145 = vector.broadcast %130 : vector<1x32xf32> to vector<16x32xf32>
    %146 = arith.mulf %145, %139 : vector<16x32xf32>
    %147 = math.sqrt %144 : vector<16x1xf32>
    %cst_61 = arith.constant 9.99999997E-7 : f32
    %148 = vector.broadcast %cst_61 : f32 to vector<16x1xf32>
    %149 = arith.addf %147, %148 : vector<16x1xf32>
    %150 = vector.broadcast %149 : vector<16x1xf32> to vector<16x32xf32>
    %151 = arith.divf %146, %150 : vector<16x32xf32>
    %152 = vector.broadcast %133 : vector<1x32xf32> to vector<16x32xf32>
    %153 = arith.addf %151, %152 : vector<16x32xf32>
    %c0_62 = arith.constant 0 : index
    %c0_63 = arith.constant 0 : index
    %c0_64 = arith.constant 0 : index
    %154 = vector.load %arg7[%c0_62, %c0_63, %c0_64] : memref<6x32x64xf32, #tpu.memory_space<vmem>>, vector<1x32x64xf32>
    %155 = vector.shape_cast %154 : vector<1x32x64xf32> to vector<32x64xf32>
    %c2 = arith.constant 2 : index
    %c0_65 = arith.constant 0 : index
    %c0_66 = arith.constant 0 : index
    %156 = vector.load %arg9[%c2, %c0_65, %c0_66] : memref<46x1x96xf32, #tpu.memory_space<vmem>>, vector<1x1x96xf32>
    %157 = vector.shape_cast %156 : vector<1x1x96xf32> to vector<1x96xf32>
    %158 = vector.extract_strided_slice %157 {offsets = [0, 0], sizes = [1, 64], strides = [1, 1]} : vector<1x96xf32> to vector<1x64xf32>
    %c0_67 = arith.constant 0 : index
    %c0_68 = arith.constant 0 : index
    %c0_69 = arith.constant 0 : index
    %159 = vector.load %arg8[%c0_67, %c0_68, %c0_69] : memref<4x64x32xf32, #tpu.memory_space<vmem>>, vector<1x64x32xf32>
    %160 = vector.shape_cast %159 : vector<1x64x32xf32> to vector<64x32xf32>
    %c3 = arith.constant 3 : index
    %c0_70 = arith.constant 0 : index
    %c0_71 = arith.constant 0 : index
    %161 = vector.load %arg9[%c3, %c0_70, %c0_71] : memref<46x1x96xf32, #tpu.memory_space<vmem>>, vector<1x1x96xf32>
    %162 = vector.shape_cast %161 : vector<1x1x96xf32> to vector<1x96xf32>
    %163 = vector.extract_strided_slice %162 {offsets = [0, 0], sizes = [1, 32], strides = [1, 1]} : vector<1x96xf32> to vector<1x32xf32>
    %cst_72 = arith.constant dense<0.000000e+00> : vector<16x64xf32>
    %164 = tpu.matmul %153, %155, %cst_72 {dimension_numbers = #tpu.dot_dimension_numbers<[1], [0], [0], [1], [0, 0, 1, 1], [], []>} : vector<16x32xf32>, vector<32x64xf32>, vector<16x64xf32> -> vector<16x64xf32>
    %165 = vector.broadcast %158 : vector<1x64xf32> to vector<16x64xf32>
    %166 = arith.addf %164, %165 : vector<16x64xf32>
    %cst_73 = arith.constant 0.000000e+00 : f32
    %167 = vector.broadcast %cst_73 : f32 to vector<16x64xf32>
    %168 = arith.maximumf %166, %167 : vector<16x64xf32>
    %cst_74 = arith.constant dense<0.000000e+00> : vector<16x32xf32>
    %169 = tpu.matmul %168, %160, %cst_74 {dimension_numbers = #tpu.dot_dimension_numbers<[1], [0], [0], [1], [0, 0, 1, 1], [], []>} : vector<16x64xf32>, vector<64x32xf32>, vector<16x32xf32> -> vector<16x32xf32>
    %170 = vector.broadcast %163 : vector<1x32xf32> to vector<16x32xf32>
    %171 = arith.addf %169, %170 : vector<16x32xf32>
    %172 = arith.addf %127, %171 : vector<16x32xf32>
    %c12 = arith.constant 12 : index
    %c0_75 = arith.constant 0 : index
    %c0_76 = arith.constant 0 : index
    %173 = vector.load %arg9[%c12, %c0_75, %c0_76] : memref<46x1x96xf32, #tpu.memory_space<vmem>>, vector<1x1x96xf32>
    %174 = vector.shape_cast %173 : vector<1x1x96xf32> to vector<1x96xf32>
    %175 = vector.extract_strided_slice %174 {offsets = [0, 0], sizes = [1, 32], strides = [1, 1]} : vector<1x96xf32> to vector<1x32xf32>
    %c13 = arith.constant 13 : index
    %c0_77 = arith.constant 0 : index
    %c0_78 = arith.constant 0 : index
    %176 = vector.load %arg9[%c13, %c0_77, %c0_78] : memref<46x1x96xf32, #tpu.memory_space<vmem>>, vector<1x1x96xf32>
    %177 = vector.shape_cast %176 : vector<1x1x96xf32> to vector<1x96xf32>
    %178 = vector.extract_strided_slice %177 {offsets = [0, 0], sizes = [1, 32], strides = [1, 1]} : vector<1x96xf32> to vector<1x32xf32>
    %cst_79 = arith.constant dense<0.000000e+00> : vector<16xf32>
    %179 = vector.multi_reduction <add>, %172, %cst_79 [1] : vector<16x32xf32> to vector<16xf32>
    %180 = vector.shape_cast %179 : vector<16xf32> to vector<16x1xf32>
    %cst_80 = arith.constant 3.200000e+01 : f32
    %181 = vector.broadcast %cst_80 : f32 to vector<16x1xf32>
    %182 = arith.divf %180, %181 : vector<16x1xf32>
    %183 = vector.broadcast %182 : vector<16x1xf32> to vector<16x32xf32>
    %184 = arith.subf %172, %183 : vector<16x32xf32>
    %185 = arith.mulf %184, %184 : vector<16x32xf32>
    %cst_81 = arith.constant dense<0.000000e+00> : vector<16xf32>
    %186 = vector.multi_reduction <add>, %185, %cst_81 [1] : vector<16x32xf32> to vector<16xf32>
    %187 = vector.shape_cast %186 : vector<16xf32> to vector<16x1xf32>
    %cst_82 = arith.constant 3.100000e+01 : f32
    %188 = vector.broadcast %cst_82 : f32 to vector<16x1xf32>
    %189 = arith.divf %187, %188 : vector<16x1xf32>
    %190 = vector.broadcast %175 : vector<1x32xf32> to vector<16x32xf32>
    %191 = arith.mulf %190, %184 : vector<16x32xf32>
    %192 = math.sqrt %189 : vector<16x1xf32>
    %cst_83 = arith.constant 9.99999997E-7 : f32
    %193 = vector.broadcast %cst_83 : f32 to vector<16x1xf32>
    %194 = arith.addf %192, %193 : vector<16x1xf32>
    %195 = vector.broadcast %194 : vector<16x1xf32> to vector<16x32xf32>
    %196 = arith.divf %191, %195 : vector<16x32xf32>
    %197 = vector.broadcast %178 : vector<1x32xf32> to vector<16x32xf32>
    %198 = arith.addf %196, %197 : vector<16x32xf32>
    %c1_84 = arith.constant 1 : index
    %c0_85 = arith.constant 0 : index
    %c0_86 = arith.constant 0 : index
    %199 = vector.load %arg5[%c1_84, %c0_85, %c0_86] : memref<4x32x96xf32, #tpu.memory_space<vmem>>, vector<1x32x96xf32>
    %200 = vector.shape_cast %199 : vector<1x32x96xf32> to vector<32x96xf32>
    %c8 = arith.constant 8 : index
    %c0_87 = arith.constant 0 : index
    %c0_88 = arith.constant 0 : index
    %201 = vector.load %arg9[%c8, %c0_87, %c0_88] : memref<46x1x96xf32, #tpu.memory_space<vmem>>, vector<1x1x96xf32>
    %202 = vector.shape_cast %201 : vector<1x1x96xf32> to vector<1x96xf32>
    %c1_89 = arith.constant 1 : index
    %c0_90 = arith.constant 0 : index
    %c0_91 = arith.constant 0 : index
    %203 = vector.load %arg6[%c1_89, %c0_90, %c0_91] : memref<8x32x32xf32, #tpu.memory_space<vmem>>, vector<1x32x32xf32>
    %204 = vector.shape_cast %203 : vector<1x32x32xf32> to vector<32x32xf32>
    %c9 = arith.constant 9 : index
    %c0_92 = arith.constant 0 : index
    %c0_93 = arith.constant 0 : index
    %205 = vector.load %arg9[%c9, %c0_92, %c0_93] : memref<46x1x96xf32, #tpu.memory_space<vmem>>, vector<1x1x96xf32>
    %206 = vector.shape_cast %205 : vector<1x1x96xf32> to vector<1x96xf32>
    %207 = vector.extract_strided_slice %206 {offsets = [0, 0], sizes = [1, 32], strides = [1, 1]} : vector<1x96xf32> to vector<1x32xf32>
    %cst_94 = arith.constant dense<0.000000e+00> : vector<16x96xf32>
    %208 = tpu.matmul %198, %200, %cst_94 {dimension_numbers = #tpu.dot_dimension_numbers<[1], [0], [0], [1], [0, 0, 1, 1], [], []>} : vector<16x32xf32>, vector<32x96xf32>, vector<16x96xf32> -> vector<16x96xf32>
    %209 = vector.broadcast %202 : vector<1x96xf32> to vector<16x96xf32>
    %210 = arith.addf %208, %209 : vector<16x96xf32>
    %211 = vector.extract_strided_slice %210 {offsets = [0, 0], sizes = [16, 32], strides = [1, 1]} : vector<16x96xf32> to vector<16x32xf32>
    %212 = vector.extract_strided_slice %210 {offsets = [0, 32], sizes = [16, 32], strides = [1, 1]} : vector<16x96xf32> to vector<16x32xf32>
    %213 = vector.extract_strided_slice %210 {offsets = [0, 64], sizes = [16, 32], strides = [1, 1]} : vector<16x96xf32> to vector<16x32xf32>
    %214 = vector.extract_strided_slice %211 {offsets = [0, 0], sizes = [16, 8], strides = [1, 1]} : vector<16x32xf32> to vector<16x8xf32>
    %215 = vector.extract_strided_slice %212 {offsets = [0, 0], sizes = [16, 8], strides = [1, 1]} : vector<16x32xf32> to vector<16x8xf32>
    %216 = vector.extract_strided_slice %213 {offsets = [0, 0], sizes = [16, 8], strides = [1, 1]} : vector<16x32xf32> to vector<16x8xf32>
    %cst_95 = arith.constant dense<0.000000e+00> : vector<16x16xf32>
    %217 = tpu.matmul %214, %215, %cst_95 {dimension_numbers = #tpu.dot_dimension_numbers<[1], [1], [0], [0], [0, 0, 1, 0], [], []>} : vector<16x8xf32>, vector<16x8xf32>, vector<16x16xf32> -> vector<16x16xf32>
    %cst_96 = arith.constant 0.353553385 : f32
    %218 = vector.broadcast %cst_96 : f32 to vector<16x16xf32>
    %219 = arith.mulf %217, %218 : vector<16x16xf32>
    %220 = arith.addf %219, %2 : vector<16x16xf32>
    %cst_97 = arith.constant dense<0xFF800000> : vector<16xf32>
    %221 = vector.multi_reduction <maximumf>, %220, %cst_97 [1] : vector<16x16xf32> to vector<16xf32>
    %222 = vector.shape_cast %221 : vector<16xf32> to vector<16x1xf32>
    %223 = vector.broadcast %222 : vector<16x1xf32> to vector<16x16xf32>
    %224 = arith.subf %220, %223 : vector<16x16xf32>
    %225 = math.exp %224 : vector<16x16xf32>
    %cst_98 = arith.constant dense<0.000000e+00> : vector<16xf32>
    %226 = vector.multi_reduction <add>, %225, %cst_98 [1] : vector<16x16xf32> to vector<16xf32>
    %227 = vector.shape_cast %226 : vector<16xf32> to vector<16x1xf32>
    %228 = vector.broadcast %227 : vector<16x1xf32> to vector<16x16xf32>
    %229 = arith.divf %225, %228 : vector<16x16xf32>
    %cst_99 = arith.constant dense<0.000000e+00> : vector<16x8xf32>
    %230 = tpu.matmul %229, %216, %cst_99 {dimension_numbers = #tpu.dot_dimension_numbers<[1], [0], [0], [1], [0, 0, 1, 1], [], []>} : vector<16x16xf32>, vector<16x8xf32>, vector<16x8xf32> -> vector<16x8xf32>
    %231 = vector.extract_strided_slice %204 {offsets = [0, 0], sizes = [8, 32], strides = [1, 1]} : vector<32x32xf32> to vector<8x32xf32>
    %cst_100 = arith.constant dense<0.000000e+00> : vector<16x32xf32>
    %232 = tpu.matmul %230, %231, %cst_100 {dimension_numbers = #tpu.dot_dimension_numbers<[1], [0], [0], [1], [0, 0, 1, 1], [], []>} : vector<16x8xf32>, vector<8x32xf32>, vector<16x32xf32> -> vector<16x32xf32>
    %233 = vector.extract_strided_slice %211 {offsets = [0, 8], sizes = [16, 8], strides = [1, 1]} : vector<16x32xf32> to vector<16x8xf32>
    %234 = vector.extract_strided_slice %212 {offsets = [0, 8], sizes = [16, 8], strides = [1, 1]} : vector<16x32xf32> to vector<16x8xf32>
    %235 = vector.extract_strided_slice %213 {offsets = [0, 8], sizes = [16, 8], strides = [1, 1]} : vector<16x32xf32> to vector<16x8xf32>
    %cst_101 = arith.constant dense<0.000000e+00> : vector<16x16xf32>
    %236 = tpu.matmul %233, %234, %cst_101 {dimension_numbers = #tpu.dot_dimension_numbers<[1], [1], [0], [0], [0, 0, 1, 0], [], []>} : vector<16x8xf32>, vector<16x8xf32>, vector<16x16xf32> -> vector<16x16xf32>
    %cst_102 = arith.constant 0.353553385 : f32
    %237 = vector.broadcast %cst_102 : f32 to vector<16x16xf32>
    %238 = arith.mulf %236, %237 : vector<16x16xf32>
    %239 = arith.addf %238, %2 : vector<16x16xf32>
    %cst_103 = arith.constant dense<0xFF800000> : vector<16xf32>
    %240 = vector.multi_reduction <maximumf>, %239, %cst_103 [1] : vector<16x16xf32> to vector<16xf32>
    %241 = vector.shape_cast %240 : vector<16xf32> to vector<16x1xf32>
    %242 = vector.broadcast %241 : vector<16x1xf32> to vector<16x16xf32>
    %243 = arith.subf %239, %242 : vector<16x16xf32>
    %244 = math.exp %243 : vector<16x16xf32>
    %cst_104 = arith.constant dense<0.000000e+00> : vector<16xf32>
    %245 = vector.multi_reduction <add>, %244, %cst_104 [1] : vector<16x16xf32> to vector<16xf32>
    %246 = vector.shape_cast %245 : vector<16xf32> to vector<16x1xf32>
    %247 = vector.broadcast %246 : vector<16x1xf32> to vector<16x16xf32>
    %248 = arith.divf %244, %247 : vector<16x16xf32>
    %cst_105 = arith.constant dense<0.000000e+00> : vector<16x8xf32>
    %249 = tpu.matmul %248, %235, %cst_105 {dimension_numbers = #tpu.dot_dimension_numbers<[1], [0], [0], [1], [0, 0, 1, 1], [], []>} : vector<16x16xf32>, vector<16x8xf32>, vector<16x8xf32> -> vector<16x8xf32>
    %250 = vector.extract_strided_slice %204 {offsets = [8, 0], sizes = [8, 32], strides = [1, 1]} : vector<32x32xf32> to vector<8x32xf32>
    %cst_106 = arith.constant dense<0.000000e+00> : vector<16x32xf32>
    %251 = tpu.matmul %249, %250, %cst_106 {dimension_numbers = #tpu.dot_dimension_numbers<[1], [0], [0], [1], [0, 0, 1, 1], [], []>} : vector<16x8xf32>, vector<8x32xf32>, vector<16x32xf32> -> vector<16x32xf32>
    %252 = arith.addf %232, %251 : vector<16x32xf32>
    %253 = vector.extract_strided_slice %211 {offsets = [0, 16], sizes = [16, 8], strides = [1, 1]} : vector<16x32xf32> to vector<16x8xf32>
    %254 = vector.extract_strided_slice %212 {offsets = [0, 16], sizes = [16, 8], strides = [1, 1]} : vector<16x32xf32> to vector<16x8xf32>
    %255 = vector.extract_strided_slice %213 {offsets = [0, 16], sizes = [16, 8], strides = [1, 1]} : vector<16x32xf32> to vector<16x8xf32>
    %cst_107 = arith.constant dense<0.000000e+00> : vector<16x16xf32>
    %256 = tpu.matmul %253, %254, %cst_107 {dimension_numbers = #tpu.dot_dimension_numbers<[1], [1], [0], [0], [0, 0, 1, 0], [], []>} : vector<16x8xf32>, vector<16x8xf32>, vector<16x16xf32> -> vector<16x16xf32>
    %cst_108 = arith.constant 0.353553385 : f32
    %257 = vector.broadcast %cst_108 : f32 to vector<16x16xf32>
    %258 = arith.mulf %256, %257 : vector<16x16xf32>
    %259 = arith.addf %258, %2 : vector<16x16xf32>
    %cst_109 = arith.constant dense<0xFF800000> : vector<16xf32>
    %260 = vector.multi_reduction <maximumf>, %259, %cst_109 [1] : vector<16x16xf32> to vector<16xf32>
    %261 = vector.shape_cast %260 : vector<16xf32> to vector<16x1xf32>
    %262 = vector.broadcast %261 : vector<16x1xf32> to vector<16x16xf32>
    %263 = arith.subf %259, %262 : vector<16x16xf32>
    %264 = math.exp %263 : vector<16x16xf32>
    %cst_110 = arith.constant dense<0.000000e+00> : vector<16xf32>
    %265 = vector.multi_reduction <add>, %264, %cst_110 [1] : vector<16x16xf32> to vector<16xf32>
    %266 = vector.shape_cast %265 : vector<16xf32> to vector<16x1xf32>
    %267 = vector.broadcast %266 : vector<16x1xf32> to vector<16x16xf32>
    %268 = arith.divf %264, %267 : vector<16x16xf32>
    %cst_111 = arith.constant dense<0.000000e+00> : vector<16x8xf32>
    %269 = tpu.matmul %268, %255, %cst_111 {dimension_numbers = #tpu.dot_dimension_numbers<[1], [0], [0], [1], [0, 0, 1, 1], [], []>} : vector<16x16xf32>, vector<16x8xf32>, vector<16x8xf32> -> vector<16x8xf32>
    %270 = vector.extract_strided_slice %204 {offsets = [16, 0], sizes = [8, 32], strides = [1, 1]} : vector<32x32xf32> to vector<8x32xf32>
    %cst_112 = arith.constant dense<0.000000e+00> : vector<16x32xf32>
    %271 = tpu.matmul %269, %270, %cst_112 {dimension_numbers = #tpu.dot_dimension_numbers<[1], [0], [0], [1], [0, 0, 1, 1], [], []>} : vector<16x8xf32>, vector<8x32xf32>, vector<16x32xf32> -> vector<16x32xf32>
    %272 = arith.addf %252, %271 : vector<16x32xf32>
    %273 = vector.extract_strided_slice %211 {offsets = [0, 24], sizes = [16, 8], strides = [1, 1]} : vector<16x32xf32> to vector<16x8xf32>
    %274 = vector.extract_strided_slice %212 {offsets = [0, 24], sizes = [16, 8], strides = [1, 1]} : vector<16x32xf32> to vector<16x8xf32>
    %275 = vector.extract_strided_slice %213 {offsets = [0, 24], sizes = [16, 8], strides = [1, 1]} : vector<16x32xf32> to vector<16x8xf32>
    %cst_113 = arith.constant dense<0.000000e+00> : vector<16x16xf32>
    %276 = tpu.matmul %273, %274, %cst_113 {dimension_numbers = #tpu.dot_dimension_numbers<[1], [1], [0], [0], [0, 0, 1, 0], [], []>} : vector<16x8xf32>, vector<16x8xf32>, vector<16x16xf32> -> vector<16x16xf32>
    %cst_114 = arith.constant 0.353553385 : f32
    %277 = vector.broadcast %cst_114 : f32 to vector<16x16xf32>
    %278 = arith.mulf %276, %277 : vector<16x16xf32>
    %279 = arith.addf %278, %2 : vector<16x16xf32>
    %cst_115 = arith.constant dense<0xFF800000> : vector<16xf32>
    %280 = vector.multi_reduction <maximumf>, %279, %cst_115 [1] : vector<16x16xf32> to vector<16xf32>
    %281 = vector.shape_cast %280 : vector<16xf32> to vector<16x1xf32>
    %282 = vector.broadcast %281 : vector<16x1xf32> to vector<16x16xf32>
    %283 = arith.subf %279, %282 : vector<16x16xf32>
    %284 = math.exp %283 : vector<16x16xf32>
    %cst_116 = arith.constant dense<0.000000e+00> : vector<16xf32>
    %285 = vector.multi_reduction <add>, %284, %cst_116 [1] : vector<16x16xf32> to vector<16xf32>
    %286 = vector.shape_cast %285 : vector<16xf32> to vector<16x1xf32>
    %287 = vector.broadcast %286 : vector<16x1xf32> to vector<16x16xf32>
    %288 = arith.divf %284, %287 : vector<16x16xf32>
    %cst_117 = arith.constant dense<0.000000e+00> : vector<16x8xf32>
    %289 = tpu.matmul %288, %275, %cst_117 {dimension_numbers = #tpu.dot_dimension_numbers<[1], [0], [0], [1], [0, 0, 1, 1], [], []>} : vector<16x16xf32>, vector<16x8xf32>, vector<16x8xf32> -> vector<16x8xf32>
    %290 = vector.extract_strided_slice %204 {offsets = [24, 0], sizes = [8, 32], strides = [1, 1]} : vector<32x32xf32> to vector<8x32xf32>
    %cst_118 = arith.constant dense<0.000000e+00> : vector<16x32xf32>
    %291 = tpu.matmul %289, %290, %cst_118 {dimension_numbers = #tpu.dot_dimension_numbers<[1], [0], [0], [1], [0, 0, 1, 1], [], []>} : vector<16x8xf32>, vector<8x32xf32>, vector<16x32xf32> -> vector<16x32xf32>
    %292 = arith.addf %272, %291 : vector<16x32xf32>
    %293 = vector.broadcast %207 : vector<1x32xf32> to vector<16x32xf32>
    %294 = arith.addf %292, %293 : vector<16x32xf32>
    %295 = arith.addf %172, %294 : vector<16x32xf32>
    %c14 = arith.constant 14 : index
    %c0_119 = arith.constant 0 : index
    %c0_120 = arith.constant 0 : index
    %296 = vector.load %arg9[%c14, %c0_119, %c0_120] : memref<46x1x96xf32, #tpu.memory_space<vmem>>, vector<1x1x96xf32>
    %297 = vector.shape_cast %296 : vector<1x1x96xf32> to vector<1x96xf32>
    %298 = vector.extract_strided_slice %297 {offsets = [0, 0], sizes = [1, 32], strides = [1, 1]} : vector<1x96xf32> to vector<1x32xf32>
    %c15 = arith.constant 15 : index
    %c0_121 = arith.constant 0 : index
    %c0_122 = arith.constant 0 : index
    %299 = vector.load %arg9[%c15, %c0_121, %c0_122] : memref<46x1x96xf32, #tpu.memory_space<vmem>>, vector<1x1x96xf32>
    %300 = vector.shape_cast %299 : vector<1x1x96xf32> to vector<1x96xf32>
    %301 = vector.extract_strided_slice %300 {offsets = [0, 0], sizes = [1, 32], strides = [1, 1]} : vector<1x96xf32> to vector<1x32xf32>
    %cst_123 = arith.constant dense<0.000000e+00> : vector<16xf32>
    %302 = vector.multi_reduction <add>, %295, %cst_123 [1] : vector<16x32xf32> to vector<16xf32>
    %303 = vector.shape_cast %302 : vector<16xf32> to vector<16x1xf32>
    %cst_124 = arith.constant 3.200000e+01 : f32
    %304 = vector.broadcast %cst_124 : f32 to vector<16x1xf32>
    %305 = arith.divf %303, %304 : vector<16x1xf32>
    %306 = vector.broadcast %305 : vector<16x1xf32> to vector<16x32xf32>
    %307 = arith.subf %295, %306 : vector<16x32xf32>
    %308 = arith.mulf %307, %307 : vector<16x32xf32>
    %cst_125 = arith.constant dense<0.000000e+00> : vector<16xf32>
    %309 = vector.multi_reduction <add>, %308, %cst_125 [1] : vector<16x32xf32> to vector<16xf32>
    %310 = vector.shape_cast %309 : vector<16xf32> to vector<16x1xf32>
    %cst_126 = arith.constant 3.100000e+01 : f32
    %311 = vector.broadcast %cst_126 : f32 to vector<16x1xf32>
    %312 = arith.divf %310, %311 : vector<16x1xf32>
    %313 = vector.broadcast %298 : vector<1x32xf32> to vector<16x32xf32>
    %314 = arith.mulf %313, %307 : vector<16x32xf32>
    %315 = math.sqrt %312 : vector<16x1xf32>
    %cst_127 = arith.constant 9.99999997E-7 : f32
    %316 = vector.broadcast %cst_127 : f32 to vector<16x1xf32>
    %317 = arith.addf %315, %316 : vector<16x1xf32>
    %318 = vector.broadcast %317 : vector<16x1xf32> to vector<16x32xf32>
    %319 = arith.divf %314, %318 : vector<16x32xf32>
    %320 = vector.broadcast %301 : vector<1x32xf32> to vector<16x32xf32>
    %321 = arith.addf %319, %320 : vector<16x32xf32>
    %c1_128 = arith.constant 1 : index
    %c0_129 = arith.constant 0 : index
    %c0_130 = arith.constant 0 : index
    %322 = vector.load %arg7[%c1_128, %c0_129, %c0_130] : memref<6x32x64xf32, #tpu.memory_space<vmem>>, vector<1x32x64xf32>
    %323 = vector.shape_cast %322 : vector<1x32x64xf32> to vector<32x64xf32>
    %c10 = arith.constant 10 : index
    %c0_131 = arith.constant 0 : index
    %c0_132 = arith.constant 0 : index
    %324 = vector.load %arg9[%c10, %c0_131, %c0_132] : memref<46x1x96xf32, #tpu.memory_space<vmem>>, vector<1x1x96xf32>
    %325 = vector.shape_cast %324 : vector<1x1x96xf32> to vector<1x96xf32>
    %326 = vector.extract_strided_slice %325 {offsets = [0, 0], sizes = [1, 64], strides = [1, 1]} : vector<1x96xf32> to vector<1x64xf32>
    %c1_133 = arith.constant 1 : index
    %c0_134 = arith.constant 0 : index
    %c0_135 = arith.constant 0 : index
    %327 = vector.load %arg8[%c1_133, %c0_134, %c0_135] : memref<4x64x32xf32, #tpu.memory_space<vmem>>, vector<1x64x32xf32>
    %328 = vector.shape_cast %327 : vector<1x64x32xf32> to vector<64x32xf32>
    %c11 = arith.constant 11 : index
    %c0_136 = arith.constant 0 : index
    %c0_137 = arith.constant 0 : index
    %329 = vector.load %arg9[%c11, %c0_136, %c0_137] : memref<46x1x96xf32, #tpu.memory_space<vmem>>, vector<1x1x96xf32>
    %330 = vector.shape_cast %329 : vector<1x1x96xf32> to vector<1x96xf32>
    %331 = vector.extract_strided_slice %330 {offsets = [0, 0], sizes = [1, 32], strides = [1, 1]} : vector<1x96xf32> to vector<1x32xf32>
    %cst_138 = arith.constant dense<0.000000e+00> : vector<16x64xf32>
    %332 = tpu.matmul %321, %323, %cst_138 {dimension_numbers = #tpu.dot_dimension_numbers<[1], [0], [0], [1], [0, 0, 1, 1], [], []>} : vector<16x32xf32>, vector<32x64xf32>, vector<16x64xf32> -> vector<16x64xf32>
    %333 = vector.broadcast %326 : vector<1x64xf32> to vector<16x64xf32>
    %334 = arith.addf %332, %333 : vector<16x64xf32>
    %cst_139 = arith.constant 0.000000e+00 : f32
    %335 = vector.broadcast %cst_139 : f32 to vector<16x64xf32>
    %336 = arith.maximumf %334, %335 : vector<16x64xf32>
    %cst_140 = arith.constant dense<0.000000e+00> : vector<16x32xf32>
    %337 = tpu.matmul %336, %328, %cst_140 {dimension_numbers = #tpu.dot_dimension_numbers<[1], [0], [0], [1], [0, 0, 1, 1], [], []>} : vector<16x64xf32>, vector<64x32xf32>, vector<16x32xf32> -> vector<16x32xf32>
    %338 = vector.broadcast %331 : vector<1x32xf32> to vector<16x32xf32>
    %339 = arith.addf %337, %338 : vector<16x32xf32>
    %340 = arith.addf %295, %339 : vector<16x32xf32>
    %c42 = arith.constant 42 : index
    %c0_141 = arith.constant 0 : index
    %c0_142 = arith.constant 0 : index
    %341 = vector.load %arg9[%c42, %c0_141, %c0_142] : memref<46x1x96xf32, #tpu.memory_space<vmem>>, vector<1x1x96xf32>
    %342 = vector.shape_cast %341 : vector<1x1x96xf32> to vector<1x96xf32>
    %343 = vector.extract_strided_slice %342 {offsets = [0, 0], sizes = [1, 32], strides = [1, 1]} : vector<1x96xf32> to vector<1x32xf32>
    %c43 = arith.constant 43 : index
    %c0_143 = arith.constant 0 : index
    %c0_144 = arith.constant 0 : index
    %344 = vector.load %arg9[%c43, %c0_143, %c0_144] : memref<46x1x96xf32, #tpu.memory_space<vmem>>, vector<1x1x96xf32>
    %345 = vector.shape_cast %344 : vector<1x1x96xf32> to vector<1x96xf32>
    %346 = vector.extract_strided_slice %345 {offsets = [0, 0], sizes = [1, 32], strides = [1, 1]} : vector<1x96xf32> to vector<1x32xf32>
    %cst_145 = arith.constant dense<0.000000e+00> : vector<16xf32>
    %347 = vector.multi_reduction <add>, %340, %cst_145 [1] : vector<16x32xf32> to vector<16xf32>
    %348 = vector.shape_cast %347 : vector<16xf32> to vector<16x1xf32>
    %cst_146 = arith.constant 3.200000e+01 : f32
    %349 = vector.broadcast %cst_146 : f32 to vector<16x1xf32>
    %350 = arith.divf %348, %349 : vector<16x1xf32>
    %351 = vector.broadcast %350 : vector<16x1xf32> to vector<16x32xf32>
    %352 = arith.subf %340, %351 : vector<16x32xf32>
    %353 = arith.mulf %352, %352 : vector<16x32xf32>
    %cst_147 = arith.constant dense<0.000000e+00> : vector<16xf32>
    %354 = vector.multi_reduction <add>, %353, %cst_147 [1] : vector<16x32xf32> to vector<16xf32>
    %355 = vector.shape_cast %354 : vector<16xf32> to vector<16x1xf32>
    %cst_148 = arith.constant 3.100000e+01 : f32
    %356 = vector.broadcast %cst_148 : f32 to vector<16x1xf32>
    %357 = arith.divf %355, %356 : vector<16x1xf32>
    %358 = vector.broadcast %343 : vector<1x32xf32> to vector<16x32xf32>
    %359 = arith.mulf %358, %352 : vector<16x32xf32>
    %360 = math.sqrt %357 : vector<16x1xf32>
    %cst_149 = arith.constant 9.99999997E-7 : f32
    %361 = vector.broadcast %cst_149 : f32 to vector<16x1xf32>
    %362 = arith.addf %360, %361 : vector<16x1xf32>
    %363 = vector.broadcast %362 : vector<16x1xf32> to vector<16x32xf32>
    %364 = arith.divf %359, %363 : vector<16x32xf32>
    %365 = vector.broadcast %346 : vector<1x32xf32> to vector<16x32xf32>
    %366 = arith.addf %364, %365 : vector<16x32xf32>
    %c23 = arith.constant 23 : index
    %c0_150 = arith.constant 0 : index
    %c0_151 = arith.constant 0 : index
    %367 = vector.load %arg9[%c23, %c0_150, %c0_151] : memref<46x1x96xf32, #tpu.memory_space<vmem>>, vector<1x1x96xf32>
    %368 = vector.shape_cast %367 : vector<1x1x96xf32> to vector<1x96xf32>
    %369 = vector.extract_strided_slice %368 {offsets = [0, 0], sizes = [1, 32], strides = [1, 1]} : vector<1x96xf32> to vector<1x32xf32>
    %c24 = arith.constant 24 : index
    %c0_152 = arith.constant 0 : index
    %c0_153 = arith.constant 0 : index
    %370 = vector.load %arg9[%c24, %c0_152, %c0_153] : memref<46x1x96xf32, #tpu.memory_space<vmem>>, vector<1x1x96xf32>
    %371 = vector.shape_cast %370 : vector<1x1x96xf32> to vector<1x96xf32>
    %372 = vector.extract_strided_slice %371 {offsets = [0, 0], sizes = [1, 32], strides = [1, 1]} : vector<1x96xf32> to vector<1x32xf32>
    %cst_154 = arith.constant dense<0.000000e+00> : vector<16xf32>
    %373 = vector.multi_reduction <add>, %1, %cst_154 [1] : vector<16x32xf32> to vector<16xf32>
    %374 = vector.shape_cast %373 : vector<16xf32> to vector<16x1xf32>
    %cst_155 = arith.constant 3.200000e+01 : f32
    %375 = vector.broadcast %cst_155 : f32 to vector<16x1xf32>
    %376 = arith.divf %374, %375 : vector<16x1xf32>
    %377 = vector.broadcast %376 : vector<16x1xf32> to vector<16x32xf32>
    %378 = arith.subf %1, %377 : vector<16x32xf32>
    %379 = arith.mulf %378, %378 : vector<16x32xf32>
    %cst_156 = arith.constant dense<0.000000e+00> : vector<16xf32>
    %380 = vector.multi_reduction <add>, %379, %cst_156 [1] : vector<16x32xf32> to vector<16xf32>
    %381 = vector.shape_cast %380 : vector<16xf32> to vector<16x1xf32>
    %cst_157 = arith.constant 3.100000e+01 : f32
    %382 = vector.broadcast %cst_157 : f32 to vector<16x1xf32>
    %383 = arith.divf %381, %382 : vector<16x1xf32>
    %384 = vector.broadcast %369 : vector<1x32xf32> to vector<16x32xf32>
    %385 = arith.mulf %384, %378 : vector<16x32xf32>
    %386 = math.sqrt %383 : vector<16x1xf32>
    %cst_158 = arith.constant 9.99999997E-7 : f32
    %387 = vector.broadcast %cst_158 : f32 to vector<16x1xf32>
    %388 = arith.addf %386, %387 : vector<16x1xf32>
    %389 = vector.broadcast %388 : vector<16x1xf32> to vector<16x32xf32>
    %390 = arith.divf %385, %389 : vector<16x32xf32>
    %391 = vector.broadcast %372 : vector<1x32xf32> to vector<16x32xf32>
    %392 = arith.addf %390, %391 : vector<16x32xf32>
    %c2_159 = arith.constant 2 : index
    %c0_160 = arith.constant 0 : index
    %c0_161 = arith.constant 0 : index
    %393 = vector.load %arg5[%c2_159, %c0_160, %c0_161] : memref<4x32x96xf32, #tpu.memory_space<vmem>>, vector<1x32x96xf32>
    %394 = vector.shape_cast %393 : vector<1x32x96xf32> to vector<32x96xf32>
    %c16 = arith.constant 16 : index
    %c0_162 = arith.constant 0 : index
    %c0_163 = arith.constant 0 : index
    %395 = vector.load %arg9[%c16, %c0_162, %c0_163] : memref<46x1x96xf32, #tpu.memory_space<vmem>>, vector<1x1x96xf32>
    %396 = vector.shape_cast %395 : vector<1x1x96xf32> to vector<1x96xf32>
    %c2_164 = arith.constant 2 : index
    %c0_165 = arith.constant 0 : index
    %c0_166 = arith.constant 0 : index
    %397 = vector.load %arg6[%c2_164, %c0_165, %c0_166] : memref<8x32x32xf32, #tpu.memory_space<vmem>>, vector<1x32x32xf32>
    %398 = vector.shape_cast %397 : vector<1x32x32xf32> to vector<32x32xf32>
    %c17 = arith.constant 17 : index
    %c0_167 = arith.constant 0 : index
    %c0_168 = arith.constant 0 : index
    %399 = vector.load %arg9[%c17, %c0_167, %c0_168] : memref<46x1x96xf32, #tpu.memory_space<vmem>>, vector<1x1x96xf32>
    %400 = vector.shape_cast %399 : vector<1x1x96xf32> to vector<1x96xf32>
    %401 = vector.extract_strided_slice %400 {offsets = [0, 0], sizes = [1, 32], strides = [1, 1]} : vector<1x96xf32> to vector<1x32xf32>
    %cst_169 = arith.constant dense<0.000000e+00> : vector<16x96xf32>
    %402 = tpu.matmul %392, %394, %cst_169 {dimension_numbers = #tpu.dot_dimension_numbers<[1], [0], [0], [1], [0, 0, 1, 1], [], []>} : vector<16x32xf32>, vector<32x96xf32>, vector<16x96xf32> -> vector<16x96xf32>
    %403 = vector.broadcast %396 : vector<1x96xf32> to vector<16x96xf32>
    %404 = arith.addf %402, %403 : vector<16x96xf32>
    %405 = vector.extract_strided_slice %404 {offsets = [0, 0], sizes = [16, 32], strides = [1, 1]} : vector<16x96xf32> to vector<16x32xf32>
    %406 = vector.extract_strided_slice %404 {offsets = [0, 32], sizes = [16, 32], strides = [1, 1]} : vector<16x96xf32> to vector<16x32xf32>
    %407 = vector.extract_strided_slice %404 {offsets = [0, 64], sizes = [16, 32], strides = [1, 1]} : vector<16x96xf32> to vector<16x32xf32>
    %408 = vector.extract_strided_slice %405 {offsets = [0, 0], sizes = [16, 8], strides = [1, 1]} : vector<16x32xf32> to vector<16x8xf32>
    %409 = vector.extract_strided_slice %406 {offsets = [0, 0], sizes = [16, 8], strides = [1, 1]} : vector<16x32xf32> to vector<16x8xf32>
    %410 = vector.extract_strided_slice %407 {offsets = [0, 0], sizes = [16, 8], strides = [1, 1]} : vector<16x32xf32> to vector<16x8xf32>
    %cst_170 = arith.constant dense<0.000000e+00> : vector<16x16xf32>
    %411 = tpu.matmul %408, %409, %cst_170 {dimension_numbers = #tpu.dot_dimension_numbers<[1], [1], [0], [0], [0, 0, 1, 0], [], []>} : vector<16x8xf32>, vector<16x8xf32>, vector<16x16xf32> -> vector<16x16xf32>
    %cst_171 = arith.constant 0.353553385 : f32
    %412 = vector.broadcast %cst_171 : f32 to vector<16x16xf32>
    %413 = arith.mulf %411, %412 : vector<16x16xf32>
    %414 = arith.addf %413, %3 : vector<16x16xf32>
    %cst_172 = arith.constant dense<0xFF800000> : vector<16xf32>
    %415 = vector.multi_reduction <maximumf>, %414, %cst_172 [1] : vector<16x16xf32> to vector<16xf32>
    %416 = vector.shape_cast %415 : vector<16xf32> to vector<16x1xf32>
    %417 = vector.broadcast %416 : vector<16x1xf32> to vector<16x16xf32>
    %418 = arith.subf %414, %417 : vector<16x16xf32>
    %419 = math.exp %418 : vector<16x16xf32>
    %cst_173 = arith.constant dense<0.000000e+00> : vector<16xf32>
    %420 = vector.multi_reduction <add>, %419, %cst_173 [1] : vector<16x16xf32> to vector<16xf32>
    %421 = vector.shape_cast %420 : vector<16xf32> to vector<16x1xf32>
    %422 = vector.broadcast %421 : vector<16x1xf32> to vector<16x16xf32>
    %423 = arith.divf %419, %422 : vector<16x16xf32>
    %cst_174 = arith.constant dense<0.000000e+00> : vector<16x8xf32>
    %424 = tpu.matmul %423, %410, %cst_174 {dimension_numbers = #tpu.dot_dimension_numbers<[1], [0], [0], [1], [0, 0, 1, 1], [], []>} : vector<16x16xf32>, vector<16x8xf32>, vector<16x8xf32> -> vector<16x8xf32>
    %425 = vector.extract_strided_slice %398 {offsets = [0, 0], sizes = [8, 32], strides = [1, 1]} : vector<32x32xf32> to vector<8x32xf32>
    %cst_175 = arith.constant dense<0.000000e+00> : vector<16x32xf32>
    %426 = tpu.matmul %424, %425, %cst_175 {dimension_numbers = #tpu.dot_dimension_numbers<[1], [0], [0], [1], [0, 0, 1, 1], [], []>} : vector<16x8xf32>, vector<8x32xf32>, vector<16x32xf32> -> vector<16x32xf32>
    %427 = vector.extract_strided_slice %405 {offsets = [0, 8], sizes = [16, 8], strides = [1, 1]} : vector<16x32xf32> to vector<16x8xf32>
    %428 = vector.extract_strided_slice %406 {offsets = [0, 8], sizes = [16, 8], strides = [1, 1]} : vector<16x32xf32> to vector<16x8xf32>
    %429 = vector.extract_strided_slice %407 {offsets = [0, 8], sizes = [16, 8], strides = [1, 1]} : vector<16x32xf32> to vector<16x8xf32>
    %cst_176 = arith.constant dense<0.000000e+00> : vector<16x16xf32>
    %430 = tpu.matmul %427, %428, %cst_176 {dimension_numbers = #tpu.dot_dimension_numbers<[1], [1], [0], [0], [0, 0, 1, 0], [], []>} : vector<16x8xf32>, vector<16x8xf32>, vector<16x16xf32> -> vector<16x16xf32>
    %cst_177 = arith.constant 0.353553385 : f32
    %431 = vector.broadcast %cst_177 : f32 to vector<16x16xf32>
    %432 = arith.mulf %430, %431 : vector<16x16xf32>
    %433 = arith.addf %432, %3 : vector<16x16xf32>
    %cst_178 = arith.constant dense<0xFF800000> : vector<16xf32>
    %434 = vector.multi_reduction <maximumf>, %433, %cst_178 [1] : vector<16x16xf32> to vector<16xf32>
    %435 = vector.shape_cast %434 : vector<16xf32> to vector<16x1xf32>
    %436 = vector.broadcast %435 : vector<16x1xf32> to vector<16x16xf32>
    %437 = arith.subf %433, %436 : vector<16x16xf32>
    %438 = math.exp %437 : vector<16x16xf32>
    %cst_179 = arith.constant dense<0.000000e+00> : vector<16xf32>
    %439 = vector.multi_reduction <add>, %438, %cst_179 [1] : vector<16x16xf32> to vector<16xf32>
    %440 = vector.shape_cast %439 : vector<16xf32> to vector<16x1xf32>
    %441 = vector.broadcast %440 : vector<16x1xf32> to vector<16x16xf32>
    %442 = arith.divf %438, %441 : vector<16x16xf32>
    %cst_180 = arith.constant dense<0.000000e+00> : vector<16x8xf32>
    %443 = tpu.matmul %442, %429, %cst_180 {dimension_numbers = #tpu.dot_dimension_numbers<[1], [0], [0], [1], [0, 0, 1, 1], [], []>} : vector<16x16xf32>, vector<16x8xf32>, vector<16x8xf32> -> vector<16x8xf32>
    %444 = vector.extract_strided_slice %398 {offsets = [8, 0], sizes = [8, 32], strides = [1, 1]} : vector<32x32xf32> to vector<8x32xf32>
    %cst_181 = arith.constant dense<0.000000e+00> : vector<16x32xf32>
    %445 = tpu.matmul %443, %444, %cst_181 {dimension_numbers = #tpu.dot_dimension_numbers<[1], [0], [0], [1], [0, 0, 1, 1], [], []>} : vector<16x8xf32>, vector<8x32xf32>, vector<16x32xf32> -> vector<16x32xf32>
    %446 = arith.addf %426, %445 : vector<16x32xf32>
    %447 = vector.extract_strided_slice %405 {offsets = [0, 16], sizes = [16, 8], strides = [1, 1]} : vector<16x32xf32> to vector<16x8xf32>
    %448 = vector.extract_strided_slice %406 {offsets = [0, 16], sizes = [16, 8], strides = [1, 1]} : vector<16x32xf32> to vector<16x8xf32>
    %449 = vector.extract_strided_slice %407 {offsets = [0, 16], sizes = [16, 8], strides = [1, 1]} : vector<16x32xf32> to vector<16x8xf32>
    %cst_182 = arith.constant dense<0.000000e+00> : vector<16x16xf32>
    %450 = tpu.matmul %447, %448, %cst_182 {dimension_numbers = #tpu.dot_dimension_numbers<[1], [1], [0], [0], [0, 0, 1, 0], [], []>} : vector<16x8xf32>, vector<16x8xf32>, vector<16x16xf32> -> vector<16x16xf32>
    %cst_183 = arith.constant 0.353553385 : f32
    %451 = vector.broadcast %cst_183 : f32 to vector<16x16xf32>
    %452 = arith.mulf %450, %451 : vector<16x16xf32>
    %453 = arith.addf %452, %3 : vector<16x16xf32>
    %cst_184 = arith.constant dense<0xFF800000> : vector<16xf32>
    %454 = vector.multi_reduction <maximumf>, %453, %cst_184 [1] : vector<16x16xf32> to vector<16xf32>
    %455 = vector.shape_cast %454 : vector<16xf32> to vector<16x1xf32>
    %456 = vector.broadcast %455 : vector<16x1xf32> to vector<16x16xf32>
    %457 = arith.subf %453, %456 : vector<16x16xf32>
    %458 = math.exp %457 : vector<16x16xf32>
    %cst_185 = arith.constant dense<0.000000e+00> : vector<16xf32>
    %459 = vector.multi_reduction <add>, %458, %cst_185 [1] : vector<16x16xf32> to vector<16xf32>
    %460 = vector.shape_cast %459 : vector<16xf32> to vector<16x1xf32>
    %461 = vector.broadcast %460 : vector<16x1xf32> to vector<16x16xf32>
    %462 = arith.divf %458, %461 : vector<16x16xf32>
    %cst_186 = arith.constant dense<0.000000e+00> : vector<16x8xf32>
    %463 = tpu.matmul %462, %449, %cst_186 {dimension_numbers = #tpu.dot_dimension_numbers<[1], [0], [0], [1], [0, 0, 1, 1], [], []>} : vector<16x16xf32>, vector<16x8xf32>, vector<16x8xf32> -> vector<16x8xf32>
    %464 = vector.extract_strided_slice %398 {offsets = [16, 0], sizes = [8, 32], strides = [1, 1]} : vector<32x32xf32> to vector<8x32xf32>
    %cst_187 = arith.constant dense<0.000000e+00> : vector<16x32xf32>
    %465 = tpu.matmul %463, %464, %cst_187 {dimension_numbers = #tpu.dot_dimension_numbers<[1], [0], [0], [1], [0, 0, 1, 1], [], []>} : vector<16x8xf32>, vector<8x32xf32>, vector<16x32xf32> -> vector<16x32xf32>
    %466 = arith.addf %446, %465 : vector<16x32xf32>
    %467 = vector.extract_strided_slice %405 {offsets = [0, 24], sizes = [16, 8], strides = [1, 1]} : vector<16x32xf32> to vector<16x8xf32>
    %468 = vector.extract_strided_slice %406 {offsets = [0, 24], sizes = [16, 8], strides = [1, 1]} : vector<16x32xf32> to vector<16x8xf32>
    %469 = vector.extract_strided_slice %407 {offsets = [0, 24], sizes = [16, 8], strides = [1, 1]} : vector<16x32xf32> to vector<16x8xf32>
    %cst_188 = arith.constant dense<0.000000e+00> : vector<16x16xf32>
    %470 = tpu.matmul %467, %468, %cst_188 {dimension_numbers = #tpu.dot_dimension_numbers<[1], [1], [0], [0], [0, 0, 1, 0], [], []>} : vector<16x8xf32>, vector<16x8xf32>, vector<16x16xf32> -> vector<16x16xf32>
    %cst_189 = arith.constant 0.353553385 : f32
    %471 = vector.broadcast %cst_189 : f32 to vector<16x16xf32>
    %472 = arith.mulf %470, %471 : vector<16x16xf32>
    %473 = arith.addf %472, %3 : vector<16x16xf32>
    %cst_190 = arith.constant dense<0xFF800000> : vector<16xf32>
    %474 = vector.multi_reduction <maximumf>, %473, %cst_190 [1] : vector<16x16xf32> to vector<16xf32>
    %475 = vector.shape_cast %474 : vector<16xf32> to vector<16x1xf32>
    %476 = vector.broadcast %475 : vector<16x1xf32> to vector<16x16xf32>
    %477 = arith.subf %473, %476 : vector<16x16xf32>
    %478 = math.exp %477 : vector<16x16xf32>
    %cst_191 = arith.constant dense<0.000000e+00> : vector<16xf32>
    %479 = vector.multi_reduction <add>, %478, %cst_191 [1] : vector<16x16xf32> to vector<16xf32>
    %480 = vector.shape_cast %479 : vector<16xf32> to vector<16x1xf32>
    %481 = vector.broadcast %480 : vector<16x1xf32> to vector<16x16xf32>
    %482 = arith.divf %478, %481 : vector<16x16xf32>
    %cst_192 = arith.constant dense<0.000000e+00> : vector<16x8xf32>
    %483 = tpu.matmul %482, %469, %cst_192 {dimension_numbers = #tpu.dot_dimension_numbers<[1], [0], [0], [1], [0, 0, 1, 1], [], []>} : vector<16x16xf32>, vector<16x8xf32>, vector<16x8xf32> -> vector<16x8xf32>
    %484 = vector.extract_strided_slice %398 {offsets = [24, 0], sizes = [8, 32], strides = [1, 1]} : vector<32x32xf32> to vector<8x32xf32>
    %cst_193 = arith.constant dense<0.000000e+00> : vector<16x32xf32>
    %485 = tpu.matmul %483, %484, %cst_193 {dimension_numbers = #tpu.dot_dimension_numbers<[1], [0], [0], [1], [0, 0, 1, 1], [], []>} : vector<16x8xf32>, vector<8x32xf32>, vector<16x32xf32> -> vector<16x32xf32>
    %486 = arith.addf %466, %485 : vector<16x32xf32>
    %487 = vector.broadcast %401 : vector<1x32xf32> to vector<16x32xf32>
    %488 = arith.addf %486, %487 : vector<16x32xf32>
    %489 = arith.addf %1, %488 : vector<16x32xf32>
    %c25 = arith.constant 25 : index
    %c0_194 = arith.constant 0 : index
    %c0_195 = arith.constant 0 : index
    %490 = vector.load %arg9[%c25, %c0_194, %c0_195] : memref<46x1x96xf32, #tpu.memory_space<vmem>>, vector<1x1x96xf32>
    %491 = vector.shape_cast %490 : vector<1x1x96xf32> to vector<1x96xf32>
    %492 = vector.extract_strided_slice %491 {offsets = [0, 0], sizes = [1, 32], strides = [1, 1]} : vector<1x96xf32> to vector<1x32xf32>
    %c26 = arith.constant 26 : index
    %c0_196 = arith.constant 0 : index
    %c0_197 = arith.constant 0 : index
    %493 = vector.load %arg9[%c26, %c0_196, %c0_197] : memref<46x1x96xf32, #tpu.memory_space<vmem>>, vector<1x1x96xf32>
    %494 = vector.shape_cast %493 : vector<1x1x96xf32> to vector<1x96xf32>
    %495 = vector.extract_strided_slice %494 {offsets = [0, 0], sizes = [1, 32], strides = [1, 1]} : vector<1x96xf32> to vector<1x32xf32>
    %cst_198 = arith.constant dense<0.000000e+00> : vector<16xf32>
    %496 = vector.multi_reduction <add>, %489, %cst_198 [1] : vector<16x32xf32> to vector<16xf32>
    %497 = vector.shape_cast %496 : vector<16xf32> to vector<16x1xf32>
    %cst_199 = arith.constant 3.200000e+01 : f32
    %498 = vector.broadcast %cst_199 : f32 to vector<16x1xf32>
    %499 = arith.divf %497, %498 : vector<16x1xf32>
    %500 = vector.broadcast %499 : vector<16x1xf32> to vector<16x32xf32>
    %501 = arith.subf %489, %500 : vector<16x32xf32>
    %502 = arith.mulf %501, %501 : vector<16x32xf32>
    %cst_200 = arith.constant dense<0.000000e+00> : vector<16xf32>
    %503 = vector.multi_reduction <add>, %502, %cst_200 [1] : vector<16x32xf32> to vector<16xf32>
    %504 = vector.shape_cast %503 : vector<16xf32> to vector<16x1xf32>
    %cst_201 = arith.constant 3.100000e+01 : f32
    %505 = vector.broadcast %cst_201 : f32 to vector<16x1xf32>
    %506 = arith.divf %504, %505 : vector<16x1xf32>
    %507 = vector.broadcast %492 : vector<1x32xf32> to vector<16x32xf32>
    %508 = arith.mulf %507, %501 : vector<16x32xf32>
    %509 = math.sqrt %506 : vector<16x1xf32>
    %cst_202 = arith.constant 9.99999997E-7 : f32
    %510 = vector.broadcast %cst_202 : f32 to vector<16x1xf32>
    %511 = arith.addf %509, %510 : vector<16x1xf32>
    %512 = vector.broadcast %511 : vector<16x1xf32> to vector<16x32xf32>
    %513 = arith.divf %508, %512 : vector<16x32xf32>
    %514 = vector.broadcast %495 : vector<1x32xf32> to vector<16x32xf32>
    %515 = arith.addf %513, %514 : vector<16x32xf32>
    %c4_203 = arith.constant 4 : index
    %c0_204 = arith.constant 0 : index
    %c0_205 = arith.constant 0 : index
    %516 = vector.load %arg6[%c4_203, %c0_204, %c0_205] : memref<8x32x32xf32, #tpu.memory_space<vmem>>, vector<1x32x32xf32>
    %517 = vector.shape_cast %516 : vector<1x32x32xf32> to vector<32x32xf32>
    %c18 = arith.constant 18 : index
    %c0_206 = arith.constant 0 : index
    %c0_207 = arith.constant 0 : index
    %518 = vector.load %arg9[%c18, %c0_206, %c0_207] : memref<46x1x96xf32, #tpu.memory_space<vmem>>, vector<1x1x96xf32>
    %519 = vector.shape_cast %518 : vector<1x1x96xf32> to vector<1x96xf32>
    %520 = vector.extract_strided_slice %519 {offsets = [0, 0], sizes = [1, 32], strides = [1, 1]} : vector<1x96xf32> to vector<1x32xf32>
    %c4_208 = arith.constant 4 : index
    %c0_209 = arith.constant 0 : index
    %c0_210 = arith.constant 0 : index
    %521 = vector.load %arg7[%c4_208, %c0_209, %c0_210] : memref<6x32x64xf32, #tpu.memory_space<vmem>>, vector<1x32x64xf32>
    %522 = vector.shape_cast %521 : vector<1x32x64xf32> to vector<32x64xf32>
    %c19 = arith.constant 19 : index
    %c0_211 = arith.constant 0 : index
    %c0_212 = arith.constant 0 : index
    %523 = vector.load %arg9[%c19, %c0_211, %c0_212] : memref<46x1x96xf32, #tpu.memory_space<vmem>>, vector<1x1x96xf32>
    %524 = vector.shape_cast %523 : vector<1x1x96xf32> to vector<1x96xf32>
    %525 = vector.extract_strided_slice %524 {offsets = [0, 0], sizes = [1, 64], strides = [1, 1]} : vector<1x96xf32> to vector<1x64xf32>
    %c6_213 = arith.constant 6 : index
    %c0_214 = arith.constant 0 : index
    %c0_215 = arith.constant 0 : index
    %526 = vector.load %arg6[%c6_213, %c0_214, %c0_215] : memref<8x32x32xf32, #tpu.memory_space<vmem>>, vector<1x32x32xf32>
    %527 = vector.shape_cast %526 : vector<1x32x32xf32> to vector<32x32xf32>
    %c20 = arith.constant 20 : index
    %c0_216 = arith.constant 0 : index
    %c0_217 = arith.constant 0 : index
    %528 = vector.load %arg9[%c20, %c0_216, %c0_217] : memref<46x1x96xf32, #tpu.memory_space<vmem>>, vector<1x1x96xf32>
    %529 = vector.shape_cast %528 : vector<1x1x96xf32> to vector<1x96xf32>
    %530 = vector.extract_strided_slice %529 {offsets = [0, 0], sizes = [1, 32], strides = [1, 1]} : vector<1x96xf32> to vector<1x32xf32>
    %cst_218 = arith.constant dense<0.000000e+00> : vector<16x32xf32>
    %531 = tpu.matmul %515, %517, %cst_218 {dimension_numbers = #tpu.dot_dimension_numbers<[1], [0], [0], [1], [0, 0, 1, 1], [], []>} : vector<16x32xf32>, vector<32x32xf32>, vector<16x32xf32> -> vector<16x32xf32>
    %532 = vector.broadcast %520 : vector<1x32xf32> to vector<16x32xf32>
    %533 = arith.addf %531, %532 : vector<16x32xf32>
    %cst_219 = arith.constant dense<0.000000e+00> : vector<16x64xf32>
    %534 = tpu.matmul %366, %522, %cst_219 {dimension_numbers = #tpu.dot_dimension_numbers<[1], [0], [0], [1], [0, 0, 1, 1], [], []>} : vector<16x32xf32>, vector<32x64xf32>, vector<16x64xf32> -> vector<16x64xf32>
    %535 = vector.broadcast %525 : vector<1x64xf32> to vector<16x64xf32>
    %536 = arith.addf %534, %535 : vector<16x64xf32>
    %537 = vector.extract_strided_slice %536 {offsets = [0, 0], sizes = [16, 32], strides = [1, 1]} : vector<16x64xf32> to vector<16x32xf32>
    %538 = vector.extract_strided_slice %536 {offsets = [0, 32], sizes = [16, 32], strides = [1, 1]} : vector<16x64xf32> to vector<16x32xf32>
    %539 = vector.extract_strided_slice %533 {offsets = [0, 0], sizes = [16, 8], strides = [1, 1]} : vector<16x32xf32> to vector<16x8xf32>
    %540 = vector.extract_strided_slice %537 {offsets = [0, 0], sizes = [16, 8], strides = [1, 1]} : vector<16x32xf32> to vector<16x8xf32>
    %541 = vector.extract_strided_slice %538 {offsets = [0, 0], sizes = [16, 8], strides = [1, 1]} : vector<16x32xf32> to vector<16x8xf32>
    %cst_220 = arith.constant dense<0.000000e+00> : vector<16x16xf32>
    %542 = tpu.matmul %539, %540, %cst_220 {dimension_numbers = #tpu.dot_dimension_numbers<[1], [1], [0], [0], [0, 0, 1, 0], [], []>} : vector<16x8xf32>, vector<16x8xf32>, vector<16x16xf32> -> vector<16x16xf32>
    %cst_221 = arith.constant 0.353553385 : f32
    %543 = vector.broadcast %cst_221 : f32 to vector<16x16xf32>
    %544 = arith.mulf %542, %543 : vector<16x16xf32>
    %545 = arith.addf %544, %4 : vector<16x16xf32>
    %cst_222 = arith.constant dense<0xFF800000> : vector<16xf32>
    %546 = vector.multi_reduction <maximumf>, %545, %cst_222 [1] : vector<16x16xf32> to vector<16xf32>
    %547 = vector.shape_cast %546 : vector<16xf32> to vector<16x1xf32>
    %548 = vector.broadcast %547 : vector<16x1xf32> to vector<16x16xf32>
    %549 = arith.subf %545, %548 : vector<16x16xf32>
    %550 = math.exp %549 : vector<16x16xf32>
    %cst_223 = arith.constant dense<0.000000e+00> : vector<16xf32>
    %551 = vector.multi_reduction <add>, %550, %cst_223 [1] : vector<16x16xf32> to vector<16xf32>
    %552 = vector.shape_cast %551 : vector<16xf32> to vector<16x1xf32>
    %553 = vector.broadcast %552 : vector<16x1xf32> to vector<16x16xf32>
    %554 = arith.divf %550, %553 : vector<16x16xf32>
    %cst_224 = arith.constant dense<0.000000e+00> : vector<16x8xf32>
    %555 = tpu.matmul %554, %541, %cst_224 {dimension_numbers = #tpu.dot_dimension_numbers<[1], [0], [0], [1], [0, 0, 1, 1], [], []>} : vector<16x16xf32>, vector<16x8xf32>, vector<16x8xf32> -> vector<16x8xf32>
    %556 = vector.extract_strided_slice %527 {offsets = [0, 0], sizes = [8, 32], strides = [1, 1]} : vector<32x32xf32> to vector<8x32xf32>
    %cst_225 = arith.constant dense<0.000000e+00> : vector<16x32xf32>
    %557 = tpu.matmul %555, %556, %cst_225 {dimension_numbers = #tpu.dot_dimension_numbers<[1], [0], [0], [1], [0, 0, 1, 1], [], []>} : vector<16x8xf32>, vector<8x32xf32>, vector<16x32xf32> -> vector<16x32xf32>
    %558 = vector.extract_strided_slice %533 {offsets = [0, 8], sizes = [16, 8], strides = [1, 1]} : vector<16x32xf32> to vector<16x8xf32>
    %559 = vector.extract_strided_slice %537 {offsets = [0, 8], sizes = [16, 8], strides = [1, 1]} : vector<16x32xf32> to vector<16x8xf32>
    %560 = vector.extract_strided_slice %538 {offsets = [0, 8], sizes = [16, 8], strides = [1, 1]} : vector<16x32xf32> to vector<16x8xf32>
    %cst_226 = arith.constant dense<0.000000e+00> : vector<16x16xf32>
    %561 = tpu.matmul %558, %559, %cst_226 {dimension_numbers = #tpu.dot_dimension_numbers<[1], [1], [0], [0], [0, 0, 1, 0], [], []>} : vector<16x8xf32>, vector<16x8xf32>, vector<16x16xf32> -> vector<16x16xf32>
    %cst_227 = arith.constant 0.353553385 : f32
    %562 = vector.broadcast %cst_227 : f32 to vector<16x16xf32>
    %563 = arith.mulf %561, %562 : vector<16x16xf32>
    %564 = arith.addf %563, %4 : vector<16x16xf32>
    %cst_228 = arith.constant dense<0xFF800000> : vector<16xf32>
    %565 = vector.multi_reduction <maximumf>, %564, %cst_228 [1] : vector<16x16xf32> to vector<16xf32>
    %566 = vector.shape_cast %565 : vector<16xf32> to vector<16x1xf32>
    %567 = vector.broadcast %566 : vector<16x1xf32> to vector<16x16xf32>
    %568 = arith.subf %564, %567 : vector<16x16xf32>
    %569 = math.exp %568 : vector<16x16xf32>
    %cst_229 = arith.constant dense<0.000000e+00> : vector<16xf32>
    %570 = vector.multi_reduction <add>, %569, %cst_229 [1] : vector<16x16xf32> to vector<16xf32>
    %571 = vector.shape_cast %570 : vector<16xf32> to vector<16x1xf32>
    %572 = vector.broadcast %571 : vector<16x1xf32> to vector<16x16xf32>
    %573 = arith.divf %569, %572 : vector<16x16xf32>
    %cst_230 = arith.constant dense<0.000000e+00> : vector<16x8xf32>
    %574 = tpu.matmul %573, %560, %cst_230 {dimension_numbers = #tpu.dot_dimension_numbers<[1], [0], [0], [1], [0, 0, 1, 1], [], []>} : vector<16x16xf32>, vector<16x8xf32>, vector<16x8xf32> -> vector<16x8xf32>
    %575 = vector.extract_strided_slice %527 {offsets = [8, 0], sizes = [8, 32], strides = [1, 1]} : vector<32x32xf32> to vector<8x32xf32>
    %cst_231 = arith.constant dense<0.000000e+00> : vector<16x32xf32>
    %576 = tpu.matmul %574, %575, %cst_231 {dimension_numbers = #tpu.dot_dimension_numbers<[1], [0], [0], [1], [0, 0, 1, 1], [], []>} : vector<16x8xf32>, vector<8x32xf32>, vector<16x32xf32> -> vector<16x32xf32>
    %577 = arith.addf %557, %576 : vector<16x32xf32>
    %578 = vector.extract_strided_slice %533 {offsets = [0, 16], sizes = [16, 8], strides = [1, 1]} : vector<16x32xf32> to vector<16x8xf32>
    %579 = vector.extract_strided_slice %537 {offsets = [0, 16], sizes = [16, 8], strides = [1, 1]} : vector<16x32xf32> to vector<16x8xf32>
    %580 = vector.extract_strided_slice %538 {offsets = [0, 16], sizes = [16, 8], strides = [1, 1]} : vector<16x32xf32> to vector<16x8xf32>
    %cst_232 = arith.constant dense<0.000000e+00> : vector<16x16xf32>
    %581 = tpu.matmul %578, %579, %cst_232 {dimension_numbers = #tpu.dot_dimension_numbers<[1], [1], [0], [0], [0, 0, 1, 0], [], []>} : vector<16x8xf32>, vector<16x8xf32>, vector<16x16xf32> -> vector<16x16xf32>
    %cst_233 = arith.constant 0.353553385 : f32
    %582 = vector.broadcast %cst_233 : f32 to vector<16x16xf32>
    %583 = arith.mulf %581, %582 : vector<16x16xf32>
    %584 = arith.addf %583, %4 : vector<16x16xf32>
    %cst_234 = arith.constant dense<0xFF800000> : vector<16xf32>
    %585 = vector.multi_reduction <maximumf>, %584, %cst_234 [1] : vector<16x16xf32> to vector<16xf32>
    %586 = vector.shape_cast %585 : vector<16xf32> to vector<16x1xf32>
    %587 = vector.broadcast %586 : vector<16x1xf32> to vector<16x16xf32>
    %588 = arith.subf %584, %587 : vector<16x16xf32>
    %589 = math.exp %588 : vector<16x16xf32>
    %cst_235 = arith.constant dense<0.000000e+00> : vector<16xf32>
    %590 = vector.multi_reduction <add>, %589, %cst_235 [1] : vector<16x16xf32> to vector<16xf32>
    %591 = vector.shape_cast %590 : vector<16xf32> to vector<16x1xf32>
    %592 = vector.broadcast %591 : vector<16x1xf32> to vector<16x16xf32>
    %593 = arith.divf %589, %592 : vector<16x16xf32>
    %cst_236 = arith.constant dense<0.000000e+00> : vector<16x8xf32>
    %594 = tpu.matmul %593, %580, %cst_236 {dimension_numbers = #tpu.dot_dimension_numbers<[1], [0], [0], [1], [0, 0, 1, 1], [], []>} : vector<16x16xf32>, vector<16x8xf32>, vector<16x8xf32> -> vector<16x8xf32>
    %595 = vector.extract_strided_slice %527 {offsets = [16, 0], sizes = [8, 32], strides = [1, 1]} : vector<32x32xf32> to vector<8x32xf32>
    %cst_237 = arith.constant dense<0.000000e+00> : vector<16x32xf32>
    %596 = tpu.matmul %594, %595, %cst_237 {dimension_numbers = #tpu.dot_dimension_numbers<[1], [0], [0], [1], [0, 0, 1, 1], [], []>} : vector<16x8xf32>, vector<8x32xf32>, vector<16x32xf32> -> vector<16x32xf32>
    %597 = arith.addf %577, %596 : vector<16x32xf32>
    %598 = vector.extract_strided_slice %533 {offsets = [0, 24], sizes = [16, 8], strides = [1, 1]} : vector<16x32xf32> to vector<16x8xf32>
    %599 = vector.extract_strided_slice %537 {offsets = [0, 24], sizes = [16, 8], strides = [1, 1]} : vector<16x32xf32> to vector<16x8xf32>
    %600 = vector.extract_strided_slice %538 {offsets = [0, 24], sizes = [16, 8], strides = [1, 1]} : vector<16x32xf32> to vector<16x8xf32>
    %cst_238 = arith.constant dense<0.000000e+00> : vector<16x16xf32>
    %601 = tpu.matmul %598, %599, %cst_238 {dimension_numbers = #tpu.dot_dimension_numbers<[1], [1], [0], [0], [0, 0, 1, 0], [], []>} : vector<16x8xf32>, vector<16x8xf32>, vector<16x16xf32> -> vector<16x16xf32>
    %cst_239 = arith.constant 0.353553385 : f32
    %602 = vector.broadcast %cst_239 : f32 to vector<16x16xf32>
    %603 = arith.mulf %601, %602 : vector<16x16xf32>
    %604 = arith.addf %603, %4 : vector<16x16xf32>
    %cst_240 = arith.constant dense<0xFF800000> : vector<16xf32>
    %605 = vector.multi_reduction <maximumf>, %604, %cst_240 [1] : vector<16x16xf32> to vector<16xf32>
    %606 = vector.shape_cast %605 : vector<16xf32> to vector<16x1xf32>
    %607 = vector.broadcast %606 : vector<16x1xf32> to vector<16x16xf32>
    %608 = arith.subf %604, %607 : vector<16x16xf32>
    %609 = math.exp %608 : vector<16x16xf32>
    %cst_241 = arith.constant dense<0.000000e+00> : vector<16xf32>
    %610 = vector.multi_reduction <add>, %609, %cst_241 [1] : vector<16x16xf32> to vector<16xf32>
    %611 = vector.shape_cast %610 : vector<16xf32> to vector<16x1xf32>
    %612 = vector.broadcast %611 : vector<16x1xf32> to vector<16x16xf32>
    %613 = arith.divf %609, %612 : vector<16x16xf32>
    %cst_242 = arith.constant dense<0.000000e+00> : vector<16x8xf32>
    %614 = tpu.matmul %613, %600, %cst_242 {dimension_numbers = #tpu.dot_dimension_numbers<[1], [0], [0], [1], [0, 0, 1, 1], [], []>} : vector<16x16xf32>, vector<16x8xf32>, vector<16x8xf32> -> vector<16x8xf32>
    %615 = vector.extract_strided_slice %527 {offsets = [24, 0], sizes = [8, 32], strides = [1, 1]} : vector<32x32xf32> to vector<8x32xf32>
    %cst_243 = arith.constant dense<0.000000e+00> : vector<16x32xf32>
    %616 = tpu.matmul %614, %615, %cst_243 {dimension_numbers = #tpu.dot_dimension_numbers<[1], [0], [0], [1], [0, 0, 1, 1], [], []>} : vector<16x8xf32>, vector<8x32xf32>, vector<16x32xf32> -> vector<16x32xf32>
    %617 = arith.addf %597, %616 : vector<16x32xf32>
    %618 = vector.broadcast %530 : vector<1x32xf32> to vector<16x32xf32>
    %619 = arith.addf %617, %618 : vector<16x32xf32>
    %620 = arith.addf %489, %619 : vector<16x32xf32>
    %c27 = arith.constant 27 : index
    %c0_244 = arith.constant 0 : index
    %c0_245 = arith.constant 0 : index
    %621 = vector.load %arg9[%c27, %c0_244, %c0_245] : memref<46x1x96xf32, #tpu.memory_space<vmem>>, vector<1x1x96xf32>
    %622 = vector.shape_cast %621 : vector<1x1x96xf32> to vector<1x96xf32>
    %623 = vector.extract_strided_slice %622 {offsets = [0, 0], sizes = [1, 32], strides = [1, 1]} : vector<1x96xf32> to vector<1x32xf32>
    %c28 = arith.constant 28 : index
    %c0_246 = arith.constant 0 : index
    %c0_247 = arith.constant 0 : index
    %624 = vector.load %arg9[%c28, %c0_246, %c0_247] : memref<46x1x96xf32, #tpu.memory_space<vmem>>, vector<1x1x96xf32>
    %625 = vector.shape_cast %624 : vector<1x1x96xf32> to vector<1x96xf32>
    %626 = vector.extract_strided_slice %625 {offsets = [0, 0], sizes = [1, 32], strides = [1, 1]} : vector<1x96xf32> to vector<1x32xf32>
    %cst_248 = arith.constant dense<0.000000e+00> : vector<16xf32>
    %627 = vector.multi_reduction <add>, %620, %cst_248 [1] : vector<16x32xf32> to vector<16xf32>
    %628 = vector.shape_cast %627 : vector<16xf32> to vector<16x1xf32>
    %cst_249 = arith.constant 3.200000e+01 : f32
    %629 = vector.broadcast %cst_249 : f32 to vector<16x1xf32>
    %630 = arith.divf %628, %629 : vector<16x1xf32>
    %631 = vector.broadcast %630 : vector<16x1xf32> to vector<16x32xf32>
    %632 = arith.subf %620, %631 : vector<16x32xf32>
    %633 = arith.mulf %632, %632 : vector<16x32xf32>
    %cst_250 = arith.constant dense<0.000000e+00> : vector<16xf32>
    %634 = vector.multi_reduction <add>, %633, %cst_250 [1] : vector<16x32xf32> to vector<16xf32>
    %635 = vector.shape_cast %634 : vector<16xf32> to vector<16x1xf32>
    %cst_251 = arith.constant 3.100000e+01 : f32
    %636 = vector.broadcast %cst_251 : f32 to vector<16x1xf32>
    %637 = arith.divf %635, %636 : vector<16x1xf32>
    %638 = vector.broadcast %623 : vector<1x32xf32> to vector<16x32xf32>
    %639 = arith.mulf %638, %632 : vector<16x32xf32>
    %640 = math.sqrt %637 : vector<16x1xf32>
    %cst_252 = arith.constant 9.99999997E-7 : f32
    %641 = vector.broadcast %cst_252 : f32 to vector<16x1xf32>
    %642 = arith.addf %640, %641 : vector<16x1xf32>
    %643 = vector.broadcast %642 : vector<16x1xf32> to vector<16x32xf32>
    %644 = arith.divf %639, %643 : vector<16x32xf32>
    %645 = vector.broadcast %626 : vector<1x32xf32> to vector<16x32xf32>
    %646 = arith.addf %644, %645 : vector<16x32xf32>
    %c2_253 = arith.constant 2 : index
    %c0_254 = arith.constant 0 : index
    %c0_255 = arith.constant 0 : index
    %647 = vector.load %arg7[%c2_253, %c0_254, %c0_255] : memref<6x32x64xf32, #tpu.memory_space<vmem>>, vector<1x32x64xf32>
    %648 = vector.shape_cast %647 : vector<1x32x64xf32> to vector<32x64xf32>
    %c21 = arith.constant 21 : index
    %c0_256 = arith.constant 0 : index
    %c0_257 = arith.constant 0 : index
    %649 = vector.load %arg9[%c21, %c0_256, %c0_257] : memref<46x1x96xf32, #tpu.memory_space<vmem>>, vector<1x1x96xf32>
    %650 = vector.shape_cast %649 : vector<1x1x96xf32> to vector<1x96xf32>
    %651 = vector.extract_strided_slice %650 {offsets = [0, 0], sizes = [1, 64], strides = [1, 1]} : vector<1x96xf32> to vector<1x64xf32>
    %c2_258 = arith.constant 2 : index
    %c0_259 = arith.constant 0 : index
    %c0_260 = arith.constant 0 : index
    %652 = vector.load %arg8[%c2_258, %c0_259, %c0_260] : memref<4x64x32xf32, #tpu.memory_space<vmem>>, vector<1x64x32xf32>
    %653 = vector.shape_cast %652 : vector<1x64x32xf32> to vector<64x32xf32>
    %c22 = arith.constant 22 : index
    %c0_261 = arith.constant 0 : index
    %c0_262 = arith.constant 0 : index
    %654 = vector.load %arg9[%c22, %c0_261, %c0_262] : memref<46x1x96xf32, #tpu.memory_space<vmem>>, vector<1x1x96xf32>
    %655 = vector.shape_cast %654 : vector<1x1x96xf32> to vector<1x96xf32>
    %656 = vector.extract_strided_slice %655 {offsets = [0, 0], sizes = [1, 32], strides = [1, 1]} : vector<1x96xf32> to vector<1x32xf32>
    %cst_263 = arith.constant dense<0.000000e+00> : vector<16x64xf32>
    %657 = tpu.matmul %646, %648, %cst_263 {dimension_numbers = #tpu.dot_dimension_numbers<[1], [0], [0], [1], [0, 0, 1, 1], [], []>} : vector<16x32xf32>, vector<32x64xf32>, vector<16x64xf32> -> vector<16x64xf32>
    %658 = vector.broadcast %651 : vector<1x64xf32> to vector<16x64xf32>
    %659 = arith.addf %657, %658 : vector<16x64xf32>
    %cst_264 = arith.constant 0.000000e+00 : f32
    %660 = vector.broadcast %cst_264 : f32 to vector<16x64xf32>
    %661 = arith.maximumf %659, %660 : vector<16x64xf32>
    %cst_265 = arith.constant dense<0.000000e+00> : vector<16x32xf32>
    %662 = tpu.matmul %661, %653, %cst_265 {dimension_numbers = #tpu.dot_dimension_numbers<[1], [0], [0], [1], [0, 0, 1, 1], [], []>} : vector<16x64xf32>, vector<64x32xf32>, vector<16x32xf32> -> vector<16x32xf32>
    %663 = vector.broadcast %656 : vector<1x32xf32> to vector<16x32xf32>
    %664 = arith.addf %662, %663 : vector<16x32xf32>
    %665 = arith.addf %620, %664 : vector<16x32xf32>
    %c36 = arith.constant 36 : index
    %c0_266 = arith.constant 0 : index
    %c0_267 = arith.constant 0 : index
    %666 = vector.load %arg9[%c36, %c0_266, %c0_267] : memref<46x1x96xf32, #tpu.memory_space<vmem>>, vector<1x1x96xf32>
    %667 = vector.shape_cast %666 : vector<1x1x96xf32> to vector<1x96xf32>
    %668 = vector.extract_strided_slice %667 {offsets = [0, 0], sizes = [1, 32], strides = [1, 1]} : vector<1x96xf32> to vector<1x32xf32>
    %c37 = arith.constant 37 : index
    %c0_268 = arith.constant 0 : index
    %c0_269 = arith.constant 0 : index
    %669 = vector.load %arg9[%c37, %c0_268, %c0_269] : memref<46x1x96xf32, #tpu.memory_space<vmem>>, vector<1x1x96xf32>
    %670 = vector.shape_cast %669 : vector<1x1x96xf32> to vector<1x96xf32>
    %671 = vector.extract_strided_slice %670 {offsets = [0, 0], sizes = [1, 32], strides = [1, 1]} : vector<1x96xf32> to vector<1x32xf32>
    %cst_270 = arith.constant dense<0.000000e+00> : vector<16xf32>
    %672 = vector.multi_reduction <add>, %665, %cst_270 [1] : vector<16x32xf32> to vector<16xf32>
    %673 = vector.shape_cast %672 : vector<16xf32> to vector<16x1xf32>
    %cst_271 = arith.constant 3.200000e+01 : f32
    %674 = vector.broadcast %cst_271 : f32 to vector<16x1xf32>
    %675 = arith.divf %673, %674 : vector<16x1xf32>
    %676 = vector.broadcast %675 : vector<16x1xf32> to vector<16x32xf32>
    %677 = arith.subf %665, %676 : vector<16x32xf32>
    %678 = arith.mulf %677, %677 : vector<16x32xf32>
    %cst_272 = arith.constant dense<0.000000e+00> : vector<16xf32>
    %679 = vector.multi_reduction <add>, %678, %cst_272 [1] : vector<16x32xf32> to vector<16xf32>
    %680 = vector.shape_cast %679 : vector<16xf32> to vector<16x1xf32>
    %cst_273 = arith.constant 3.100000e+01 : f32
    %681 = vector.broadcast %cst_273 : f32 to vector<16x1xf32>
    %682 = arith.divf %680, %681 : vector<16x1xf32>
    %683 = vector.broadcast %668 : vector<1x32xf32> to vector<16x32xf32>
    %684 = arith.mulf %683, %677 : vector<16x32xf32>
    %685 = math.sqrt %682 : vector<16x1xf32>
    %cst_274 = arith.constant 9.99999997E-7 : f32
    %686 = vector.broadcast %cst_274 : f32 to vector<16x1xf32>
    %687 = arith.addf %685, %686 : vector<16x1xf32>
    %688 = vector.broadcast %687 : vector<16x1xf32> to vector<16x32xf32>
    %689 = arith.divf %684, %688 : vector<16x32xf32>
    %690 = vector.broadcast %671 : vector<1x32xf32> to vector<16x32xf32>
    %691 = arith.addf %689, %690 : vector<16x32xf32>
    %c3_275 = arith.constant 3 : index
    %c0_276 = arith.constant 0 : index
    %c0_277 = arith.constant 0 : index
    %692 = vector.load %arg5[%c3_275, %c0_276, %c0_277] : memref<4x32x96xf32, #tpu.memory_space<vmem>>, vector<1x32x96xf32>
    %693 = vector.shape_cast %692 : vector<1x32x96xf32> to vector<32x96xf32>
    %c29 = arith.constant 29 : index
    %c0_278 = arith.constant 0 : index
    %c0_279 = arith.constant 0 : index
    %694 = vector.load %arg9[%c29, %c0_278, %c0_279] : memref<46x1x96xf32, #tpu.memory_space<vmem>>, vector<1x1x96xf32>
    %695 = vector.shape_cast %694 : vector<1x1x96xf32> to vector<1x96xf32>
    %c3_280 = arith.constant 3 : index
    %c0_281 = arith.constant 0 : index
    %c0_282 = arith.constant 0 : index
    %696 = vector.load %arg6[%c3_280, %c0_281, %c0_282] : memref<8x32x32xf32, #tpu.memory_space<vmem>>, vector<1x32x32xf32>
    %697 = vector.shape_cast %696 : vector<1x32x32xf32> to vector<32x32xf32>
    %c30 = arith.constant 30 : index
    %c0_283 = arith.constant 0 : index
    %c0_284 = arith.constant 0 : index
    %698 = vector.load %arg9[%c30, %c0_283, %c0_284] : memref<46x1x96xf32, #tpu.memory_space<vmem>>, vector<1x1x96xf32>
    %699 = vector.shape_cast %698 : vector<1x1x96xf32> to vector<1x96xf32>
    %700 = vector.extract_strided_slice %699 {offsets = [0, 0], sizes = [1, 32], strides = [1, 1]} : vector<1x96xf32> to vector<1x32xf32>
    %cst_285 = arith.constant dense<0.000000e+00> : vector<16x96xf32>
    %701 = tpu.matmul %691, %693, %cst_285 {dimension_numbers = #tpu.dot_dimension_numbers<[1], [0], [0], [1], [0, 0, 1, 1], [], []>} : vector<16x32xf32>, vector<32x96xf32>, vector<16x96xf32> -> vector<16x96xf32>
    %702 = vector.broadcast %695 : vector<1x96xf32> to vector<16x96xf32>
    %703 = arith.addf %701, %702 : vector<16x96xf32>
    %704 = vector.extract_strided_slice %703 {offsets = [0, 0], sizes = [16, 32], strides = [1, 1]} : vector<16x96xf32> to vector<16x32xf32>
    %705 = vector.extract_strided_slice %703 {offsets = [0, 32], sizes = [16, 32], strides = [1, 1]} : vector<16x96xf32> to vector<16x32xf32>
    %706 = vector.extract_strided_slice %703 {offsets = [0, 64], sizes = [16, 32], strides = [1, 1]} : vector<16x96xf32> to vector<16x32xf32>
    %707 = vector.extract_strided_slice %704 {offsets = [0, 0], sizes = [16, 8], strides = [1, 1]} : vector<16x32xf32> to vector<16x8xf32>
    %708 = vector.extract_strided_slice %705 {offsets = [0, 0], sizes = [16, 8], strides = [1, 1]} : vector<16x32xf32> to vector<16x8xf32>
    %709 = vector.extract_strided_slice %706 {offsets = [0, 0], sizes = [16, 8], strides = [1, 1]} : vector<16x32xf32> to vector<16x8xf32>
    %cst_286 = arith.constant dense<0.000000e+00> : vector<16x16xf32>
    %710 = tpu.matmul %707, %708, %cst_286 {dimension_numbers = #tpu.dot_dimension_numbers<[1], [1], [0], [0], [0, 0, 1, 0], [], []>} : vector<16x8xf32>, vector<16x8xf32>, vector<16x16xf32> -> vector<16x16xf32>
    %cst_287 = arith.constant 0.353553385 : f32
    %711 = vector.broadcast %cst_287 : f32 to vector<16x16xf32>
    %712 = arith.mulf %710, %711 : vector<16x16xf32>
    %713 = arith.addf %712, %3 : vector<16x16xf32>
    %cst_288 = arith.constant dense<0xFF800000> : vector<16xf32>
    %714 = vector.multi_reduction <maximumf>, %713, %cst_288 [1] : vector<16x16xf32> to vector<16xf32>
    %715 = vector.shape_cast %714 : vector<16xf32> to vector<16x1xf32>
    %716 = vector.broadcast %715 : vector<16x1xf32> to vector<16x16xf32>
    %717 = arith.subf %713, %716 : vector<16x16xf32>
    %718 = math.exp %717 : vector<16x16xf32>
    %cst_289 = arith.constant dense<0.000000e+00> : vector<16xf32>
    %719 = vector.multi_reduction <add>, %718, %cst_289 [1] : vector<16x16xf32> to vector<16xf32>
    %720 = vector.shape_cast %719 : vector<16xf32> to vector<16x1xf32>
    %721 = vector.broadcast %720 : vector<16x1xf32> to vector<16x16xf32>
    %722 = arith.divf %718, %721 : vector<16x16xf32>
    %cst_290 = arith.constant dense<0.000000e+00> : vector<16x8xf32>
    %723 = tpu.matmul %722, %709, %cst_290 {dimension_numbers = #tpu.dot_dimension_numbers<[1], [0], [0], [1], [0, 0, 1, 1], [], []>} : vector<16x16xf32>, vector<16x8xf32>, vector<16x8xf32> -> vector<16x8xf32>
    %724 = vector.extract_strided_slice %697 {offsets = [0, 0], sizes = [8, 32], strides = [1, 1]} : vector<32x32xf32> to vector<8x32xf32>
    %cst_291 = arith.constant dense<0.000000e+00> : vector<16x32xf32>
    %725 = tpu.matmul %723, %724, %cst_291 {dimension_numbers = #tpu.dot_dimension_numbers<[1], [0], [0], [1], [0, 0, 1, 1], [], []>} : vector<16x8xf32>, vector<8x32xf32>, vector<16x32xf32> -> vector<16x32xf32>
    %726 = vector.extract_strided_slice %704 {offsets = [0, 8], sizes = [16, 8], strides = [1, 1]} : vector<16x32xf32> to vector<16x8xf32>
    %727 = vector.extract_strided_slice %705 {offsets = [0, 8], sizes = [16, 8], strides = [1, 1]} : vector<16x32xf32> to vector<16x8xf32>
    %728 = vector.extract_strided_slice %706 {offsets = [0, 8], sizes = [16, 8], strides = [1, 1]} : vector<16x32xf32> to vector<16x8xf32>
    %cst_292 = arith.constant dense<0.000000e+00> : vector<16x16xf32>
    %729 = tpu.matmul %726, %727, %cst_292 {dimension_numbers = #tpu.dot_dimension_numbers<[1], [1], [0], [0], [0, 0, 1, 0], [], []>} : vector<16x8xf32>, vector<16x8xf32>, vector<16x16xf32> -> vector<16x16xf32>
    %cst_293 = arith.constant 0.353553385 : f32
    %730 = vector.broadcast %cst_293 : f32 to vector<16x16xf32>
    %731 = arith.mulf %729, %730 : vector<16x16xf32>
    %732 = arith.addf %731, %3 : vector<16x16xf32>
    %cst_294 = arith.constant dense<0xFF800000> : vector<16xf32>
    %733 = vector.multi_reduction <maximumf>, %732, %cst_294 [1] : vector<16x16xf32> to vector<16xf32>
    %734 = vector.shape_cast %733 : vector<16xf32> to vector<16x1xf32>
    %735 = vector.broadcast %734 : vector<16x1xf32> to vector<16x16xf32>
    %736 = arith.subf %732, %735 : vector<16x16xf32>
    %737 = math.exp %736 : vector<16x16xf32>
    %cst_295 = arith.constant dense<0.000000e+00> : vector<16xf32>
    %738 = vector.multi_reduction <add>, %737, %cst_295 [1] : vector<16x16xf32> to vector<16xf32>
    %739 = vector.shape_cast %738 : vector<16xf32> to vector<16x1xf32>
    %740 = vector.broadcast %739 : vector<16x1xf32> to vector<16x16xf32>
    %741 = arith.divf %737, %740 : vector<16x16xf32>
    %cst_296 = arith.constant dense<0.000000e+00> : vector<16x8xf32>
    %742 = tpu.matmul %741, %728, %cst_296 {dimension_numbers = #tpu.dot_dimension_numbers<[1], [0], [0], [1], [0, 0, 1, 1], [], []>} : vector<16x16xf32>, vector<16x8xf32>, vector<16x8xf32> -> vector<16x8xf32>
    %743 = vector.extract_strided_slice %697 {offsets = [8, 0], sizes = [8, 32], strides = [1, 1]} : vector<32x32xf32> to vector<8x32xf32>
    %cst_297 = arith.constant dense<0.000000e+00> : vector<16x32xf32>
    %744 = tpu.matmul %742, %743, %cst_297 {dimension_numbers = #tpu.dot_dimension_numbers<[1], [0], [0], [1], [0, 0, 1, 1], [], []>} : vector<16x8xf32>, vector<8x32xf32>, vector<16x32xf32> -> vector<16x32xf32>
    %745 = arith.addf %725, %744 : vector<16x32xf32>
    %746 = vector.extract_strided_slice %704 {offsets = [0, 16], sizes = [16, 8], strides = [1, 1]} : vector<16x32xf32> to vector<16x8xf32>
    %747 = vector.extract_strided_slice %705 {offsets = [0, 16], sizes = [16, 8], strides = [1, 1]} : vector<16x32xf32> to vector<16x8xf32>
    %748 = vector.extract_strided_slice %706 {offsets = [0, 16], sizes = [16, 8], strides = [1, 1]} : vector<16x32xf32> to vector<16x8xf32>
    %cst_298 = arith.constant dense<0.000000e+00> : vector<16x16xf32>
    %749 = tpu.matmul %746, %747, %cst_298 {dimension_numbers = #tpu.dot_dimension_numbers<[1], [1], [0], [0], [0, 0, 1, 0], [], []>} : vector<16x8xf32>, vector<16x8xf32>, vector<16x16xf32> -> vector<16x16xf32>
    %cst_299 = arith.constant 0.353553385 : f32
    %750 = vector.broadcast %cst_299 : f32 to vector<16x16xf32>
    %751 = arith.mulf %749, %750 : vector<16x16xf32>
    %752 = arith.addf %751, %3 : vector<16x16xf32>
    %cst_300 = arith.constant dense<0xFF800000> : vector<16xf32>
    %753 = vector.multi_reduction <maximumf>, %752, %cst_300 [1] : vector<16x16xf32> to vector<16xf32>
    %754 = vector.shape_cast %753 : vector<16xf32> to vector<16x1xf32>
    %755 = vector.broadcast %754 : vector<16x1xf32> to vector<16x16xf32>
    %756 = arith.subf %752, %755 : vector<16x16xf32>
    %757 = math.exp %756 : vector<16x16xf32>
    %cst_301 = arith.constant dense<0.000000e+00> : vector<16xf32>
    %758 = vector.multi_reduction <add>, %757, %cst_301 [1] : vector<16x16xf32> to vector<16xf32>
    %759 = vector.shape_cast %758 : vector<16xf32> to vector<16x1xf32>
    %760 = vector.broadcast %759 : vector<16x1xf32> to vector<16x16xf32>
    %761 = arith.divf %757, %760 : vector<16x16xf32>
    %cst_302 = arith.constant dense<0.000000e+00> : vector<16x8xf32>
    %762 = tpu.matmul %761, %748, %cst_302 {dimension_numbers = #tpu.dot_dimension_numbers<[1], [0], [0], [1], [0, 0, 1, 1], [], []>} : vector<16x16xf32>, vector<16x8xf32>, vector<16x8xf32> -> vector<16x8xf32>
    %763 = vector.extract_strided_slice %697 {offsets = [16, 0], sizes = [8, 32], strides = [1, 1]} : vector<32x32xf32> to vector<8x32xf32>
    %cst_303 = arith.constant dense<0.000000e+00> : vector<16x32xf32>
    %764 = tpu.matmul %762, %763, %cst_303 {dimension_numbers = #tpu.dot_dimension_numbers<[1], [0], [0], [1], [0, 0, 1, 1], [], []>} : vector<16x8xf32>, vector<8x32xf32>, vector<16x32xf32> -> vector<16x32xf32>
    %765 = arith.addf %745, %764 : vector<16x32xf32>
    %766 = vector.extract_strided_slice %704 {offsets = [0, 24], sizes = [16, 8], strides = [1, 1]} : vector<16x32xf32> to vector<16x8xf32>
    %767 = vector.extract_strided_slice %705 {offsets = [0, 24], sizes = [16, 8], strides = [1, 1]} : vector<16x32xf32> to vector<16x8xf32>
    %768 = vector.extract_strided_slice %706 {offsets = [0, 24], sizes = [16, 8], strides = [1, 1]} : vector<16x32xf32> to vector<16x8xf32>
    %cst_304 = arith.constant dense<0.000000e+00> : vector<16x16xf32>
    %769 = tpu.matmul %766, %767, %cst_304 {dimension_numbers = #tpu.dot_dimension_numbers<[1], [1], [0], [0], [0, 0, 1, 0], [], []>} : vector<16x8xf32>, vector<16x8xf32>, vector<16x16xf32> -> vector<16x16xf32>
    %cst_305 = arith.constant 0.353553385 : f32
    %770 = vector.broadcast %cst_305 : f32 to vector<16x16xf32>
    %771 = arith.mulf %769, %770 : vector<16x16xf32>
    %772 = arith.addf %771, %3 : vector<16x16xf32>
    %cst_306 = arith.constant dense<0xFF800000> : vector<16xf32>
    %773 = vector.multi_reduction <maximumf>, %772, %cst_306 [1] : vector<16x16xf32> to vector<16xf32>
    %774 = vector.shape_cast %773 : vector<16xf32> to vector<16x1xf32>
    %775 = vector.broadcast %774 : vector<16x1xf32> to vector<16x16xf32>
    %776 = arith.subf %772, %775 : vector<16x16xf32>
    %777 = math.exp %776 : vector<16x16xf32>
    %cst_307 = arith.constant dense<0.000000e+00> : vector<16xf32>
    %778 = vector.multi_reduction <add>, %777, %cst_307 [1] : vector<16x16xf32> to vector<16xf32>
    %779 = vector.shape_cast %778 : vector<16xf32> to vector<16x1xf32>
    %780 = vector.broadcast %779 : vector<16x1xf32> to vector<16x16xf32>
    %781 = arith.divf %777, %780 : vector<16x16xf32>
    %cst_308 = arith.constant dense<0.000000e+00> : vector<16x8xf32>
    %782 = tpu.matmul %781, %768, %cst_308 {dimension_numbers = #tpu.dot_dimension_numbers<[1], [0], [0], [1], [0, 0, 1, 1], [], []>} : vector<16x16xf32>, vector<16x8xf32>, vector<16x8xf32> -> vector<16x8xf32>
    %783 = vector.extract_strided_slice %697 {offsets = [24, 0], sizes = [8, 32], strides = [1, 1]} : vector<32x32xf32> to vector<8x32xf32>
    %cst_309 = arith.constant dense<0.000000e+00> : vector<16x32xf32>
    %784 = tpu.matmul %782, %783, %cst_309 {dimension_numbers = #tpu.dot_dimension_numbers<[1], [0], [0], [1], [0, 0, 1, 1], [], []>} : vector<16x8xf32>, vector<8x32xf32>, vector<16x32xf32> -> vector<16x32xf32>
    %785 = arith.addf %765, %784 : vector<16x32xf32>
    %786 = vector.broadcast %700 : vector<1x32xf32> to vector<16x32xf32>
    %787 = arith.addf %785, %786 : vector<16x32xf32>
    %788 = arith.addf %665, %787 : vector<16x32xf32>
    %c38 = arith.constant 38 : index
    %c0_310 = arith.constant 0 : index
    %c0_311 = arith.constant 0 : index
    %789 = vector.load %arg9[%c38, %c0_310, %c0_311] : memref<46x1x96xf32, #tpu.memory_space<vmem>>, vector<1x1x96xf32>
    %790 = vector.shape_cast %789 : vector<1x1x96xf32> to vector<1x96xf32>
    %791 = vector.extract_strided_slice %790 {offsets = [0, 0], sizes = [1, 32], strides = [1, 1]} : vector<1x96xf32> to vector<1x32xf32>
    %c39 = arith.constant 39 : index
    %c0_312 = arith.constant 0 : index
    %c0_313 = arith.constant 0 : index
    %792 = vector.load %arg9[%c39, %c0_312, %c0_313] : memref<46x1x96xf32, #tpu.memory_space<vmem>>, vector<1x1x96xf32>
    %793 = vector.shape_cast %792 : vector<1x1x96xf32> to vector<1x96xf32>
    %794 = vector.extract_strided_slice %793 {offsets = [0, 0], sizes = [1, 32], strides = [1, 1]} : vector<1x96xf32> to vector<1x32xf32>
    %cst_314 = arith.constant dense<0.000000e+00> : vector<16xf32>
    %795 = vector.multi_reduction <add>, %788, %cst_314 [1] : vector<16x32xf32> to vector<16xf32>
    %796 = vector.shape_cast %795 : vector<16xf32> to vector<16x1xf32>
    %cst_315 = arith.constant 3.200000e+01 : f32
    %797 = vector.broadcast %cst_315 : f32 to vector<16x1xf32>
    %798 = arith.divf %796, %797 : vector<16x1xf32>
    %799 = vector.broadcast %798 : vector<16x1xf32> to vector<16x32xf32>
    %800 = arith.subf %788, %799 : vector<16x32xf32>
    %801 = arith.mulf %800, %800 : vector<16x32xf32>
    %cst_316 = arith.constant dense<0.000000e+00> : vector<16xf32>
    %802 = vector.multi_reduction <add>, %801, %cst_316 [1] : vector<16x32xf32> to vector<16xf32>
    %803 = vector.shape_cast %802 : vector<16xf32> to vector<16x1xf32>
    %cst_317 = arith.constant 3.100000e+01 : f32
    %804 = vector.broadcast %cst_317 : f32 to vector<16x1xf32>
    %805 = arith.divf %803, %804 : vector<16x1xf32>
    %806 = vector.broadcast %791 : vector<1x32xf32> to vector<16x32xf32>
    %807 = arith.mulf %806, %800 : vector<16x32xf32>
    %808 = math.sqrt %805 : vector<16x1xf32>
    %cst_318 = arith.constant 9.99999997E-7 : f32
    %809 = vector.broadcast %cst_318 : f32 to vector<16x1xf32>
    %810 = arith.addf %808, %809 : vector<16x1xf32>
    %811 = vector.broadcast %810 : vector<16x1xf32> to vector<16x32xf32>
    %812 = arith.divf %807, %811 : vector<16x32xf32>
    %813 = vector.broadcast %794 : vector<1x32xf32> to vector<16x32xf32>
    %814 = arith.addf %812, %813 : vector<16x32xf32>
    %c5_319 = arith.constant 5 : index
    %c0_320 = arith.constant 0 : index
    %c0_321 = arith.constant 0 : index
    %815 = vector.load %arg6[%c5_319, %c0_320, %c0_321] : memref<8x32x32xf32, #tpu.memory_space<vmem>>, vector<1x32x32xf32>
    %816 = vector.shape_cast %815 : vector<1x32x32xf32> to vector<32x32xf32>
    %c31 = arith.constant 31 : index
    %c0_322 = arith.constant 0 : index
    %c0_323 = arith.constant 0 : index
    %817 = vector.load %arg9[%c31, %c0_322, %c0_323] : memref<46x1x96xf32, #tpu.memory_space<vmem>>, vector<1x1x96xf32>
    %818 = vector.shape_cast %817 : vector<1x1x96xf32> to vector<1x96xf32>
    %819 = vector.extract_strided_slice %818 {offsets = [0, 0], sizes = [1, 32], strides = [1, 1]} : vector<1x96xf32> to vector<1x32xf32>
    %c5_324 = arith.constant 5 : index
    %c0_325 = arith.constant 0 : index
    %c0_326 = arith.constant 0 : index
    %820 = vector.load %arg7[%c5_324, %c0_325, %c0_326] : memref<6x32x64xf32, #tpu.memory_space<vmem>>, vector<1x32x64xf32>
    %821 = vector.shape_cast %820 : vector<1x32x64xf32> to vector<32x64xf32>
    %c32 = arith.constant 32 : index
    %c0_327 = arith.constant 0 : index
    %c0_328 = arith.constant 0 : index
    %822 = vector.load %arg9[%c32, %c0_327, %c0_328] : memref<46x1x96xf32, #tpu.memory_space<vmem>>, vector<1x1x96xf32>
    %823 = vector.shape_cast %822 : vector<1x1x96xf32> to vector<1x96xf32>
    %824 = vector.extract_strided_slice %823 {offsets = [0, 0], sizes = [1, 64], strides = [1, 1]} : vector<1x96xf32> to vector<1x64xf32>
    %c7_329 = arith.constant 7 : index
    %c0_330 = arith.constant 0 : index
    %c0_331 = arith.constant 0 : index
    %825 = vector.load %arg6[%c7_329, %c0_330, %c0_331] : memref<8x32x32xf32, #tpu.memory_space<vmem>>, vector<1x32x32xf32>
    %826 = vector.shape_cast %825 : vector<1x32x32xf32> to vector<32x32xf32>
    %c33 = arith.constant 33 : index
    %c0_332 = arith.constant 0 : index
    %c0_333 = arith.constant 0 : index
    %827 = vector.load %arg9[%c33, %c0_332, %c0_333] : memref<46x1x96xf32, #tpu.memory_space<vmem>>, vector<1x1x96xf32>
    %828 = vector.shape_cast %827 : vector<1x1x96xf32> to vector<1x96xf32>
    %829 = vector.extract_strided_slice %828 {offsets = [0, 0], sizes = [1, 32], strides = [1, 1]} : vector<1x96xf32> to vector<1x32xf32>
    %cst_334 = arith.constant dense<0.000000e+00> : vector<16x32xf32>
    %830 = tpu.matmul %814, %816, %cst_334 {dimension_numbers = #tpu.dot_dimension_numbers<[1], [0], [0], [1], [0, 0, 1, 1], [], []>} : vector<16x32xf32>, vector<32x32xf32>, vector<16x32xf32> -> vector<16x32xf32>
    %831 = vector.broadcast %819 : vector<1x32xf32> to vector<16x32xf32>
    %832 = arith.addf %830, %831 : vector<16x32xf32>
    %cst_335 = arith.constant dense<0.000000e+00> : vector<16x64xf32>
    %833 = tpu.matmul %366, %821, %cst_335 {dimension_numbers = #tpu.dot_dimension_numbers<[1], [0], [0], [1], [0, 0, 1, 1], [], []>} : vector<16x32xf32>, vector<32x64xf32>, vector<16x64xf32> -> vector<16x64xf32>
    %834 = vector.broadcast %824 : vector<1x64xf32> to vector<16x64xf32>
    %835 = arith.addf %833, %834 : vector<16x64xf32>
    %836 = vector.extract_strided_slice %835 {offsets = [0, 0], sizes = [16, 32], strides = [1, 1]} : vector<16x64xf32> to vector<16x32xf32>
    %837 = vector.extract_strided_slice %835 {offsets = [0, 32], sizes = [16, 32], strides = [1, 1]} : vector<16x64xf32> to vector<16x32xf32>
    %838 = vector.extract_strided_slice %832 {offsets = [0, 0], sizes = [16, 8], strides = [1, 1]} : vector<16x32xf32> to vector<16x8xf32>
    %839 = vector.extract_strided_slice %836 {offsets = [0, 0], sizes = [16, 8], strides = [1, 1]} : vector<16x32xf32> to vector<16x8xf32>
    %840 = vector.extract_strided_slice %837 {offsets = [0, 0], sizes = [16, 8], strides = [1, 1]} : vector<16x32xf32> to vector<16x8xf32>
    %cst_336 = arith.constant dense<0.000000e+00> : vector<16x16xf32>
    %841 = tpu.matmul %838, %839, %cst_336 {dimension_numbers = #tpu.dot_dimension_numbers<[1], [1], [0], [0], [0, 0, 1, 0], [], []>} : vector<16x8xf32>, vector<16x8xf32>, vector<16x16xf32> -> vector<16x16xf32>
    %cst_337 = arith.constant 0.353553385 : f32
    %842 = vector.broadcast %cst_337 : f32 to vector<16x16xf32>
    %843 = arith.mulf %841, %842 : vector<16x16xf32>
    %844 = arith.addf %843, %4 : vector<16x16xf32>
    %cst_338 = arith.constant dense<0xFF800000> : vector<16xf32>
    %845 = vector.multi_reduction <maximumf>, %844, %cst_338 [1] : vector<16x16xf32> to vector<16xf32>
    %846 = vector.shape_cast %845 : vector<16xf32> to vector<16x1xf32>
    %847 = vector.broadcast %846 : vector<16x1xf32> to vector<16x16xf32>
    %848 = arith.subf %844, %847 : vector<16x16xf32>
    %849 = math.exp %848 : vector<16x16xf32>
    %cst_339 = arith.constant dense<0.000000e+00> : vector<16xf32>
    %850 = vector.multi_reduction <add>, %849, %cst_339 [1] : vector<16x16xf32> to vector<16xf32>
    %851 = vector.shape_cast %850 : vector<16xf32> to vector<16x1xf32>
    %852 = vector.broadcast %851 : vector<16x1xf32> to vector<16x16xf32>
    %853 = arith.divf %849, %852 : vector<16x16xf32>
    %cst_340 = arith.constant dense<0.000000e+00> : vector<16x8xf32>
    %854 = tpu.matmul %853, %840, %cst_340 {dimension_numbers = #tpu.dot_dimension_numbers<[1], [0], [0], [1], [0, 0, 1, 1], [], []>} : vector<16x16xf32>, vector<16x8xf32>, vector<16x8xf32> -> vector<16x8xf32>
    %855 = vector.extract_strided_slice %826 {offsets = [0, 0], sizes = [8, 32], strides = [1, 1]} : vector<32x32xf32> to vector<8x32xf32>
    %cst_341 = arith.constant dense<0.000000e+00> : vector<16x32xf32>
    %856 = tpu.matmul %854, %855, %cst_341 {dimension_numbers = #tpu.dot_dimension_numbers<[1], [0], [0], [1], [0, 0, 1, 1], [], []>} : vector<16x8xf32>, vector<8x32xf32>, vector<16x32xf32> -> vector<16x32xf32>
    %857 = vector.extract_strided_slice %832 {offsets = [0, 8], sizes = [16, 8], strides = [1, 1]} : vector<16x32xf32> to vector<16x8xf32>
    %858 = vector.extract_strided_slice %836 {offsets = [0, 8], sizes = [16, 8], strides = [1, 1]} : vector<16x32xf32> to vector<16x8xf32>
    %859 = vector.extract_strided_slice %837 {offsets = [0, 8], sizes = [16, 8], strides = [1, 1]} : vector<16x32xf32> to vector<16x8xf32>
    %cst_342 = arith.constant dense<0.000000e+00> : vector<16x16xf32>
    %860 = tpu.matmul %857, %858, %cst_342 {dimension_numbers = #tpu.dot_dimension_numbers<[1], [1], [0], [0], [0, 0, 1, 0], [], []>} : vector<16x8xf32>, vector<16x8xf32>, vector<16x16xf32> -> vector<16x16xf32>
    %cst_343 = arith.constant 0.353553385 : f32
    %861 = vector.broadcast %cst_343 : f32 to vector<16x16xf32>
    %862 = arith.mulf %860, %861 : vector<16x16xf32>
    %863 = arith.addf %862, %4 : vector<16x16xf32>
    %cst_344 = arith.constant dense<0xFF800000> : vector<16xf32>
    %864 = vector.multi_reduction <maximumf>, %863, %cst_344 [1] : vector<16x16xf32> to vector<16xf32>
    %865 = vector.shape_cast %864 : vector<16xf32> to vector<16x1xf32>
    %866 = vector.broadcast %865 : vector<16x1xf32> to vector<16x16xf32>
    %867 = arith.subf %863, %866 : vector<16x16xf32>
    %868 = math.exp %867 : vector<16x16xf32>
    %cst_345 = arith.constant dense<0.000000e+00> : vector<16xf32>
    %869 = vector.multi_reduction <add>, %868, %cst_345 [1] : vector<16x16xf32> to vector<16xf32>
    %870 = vector.shape_cast %869 : vector<16xf32> to vector<16x1xf32>
    %871 = vector.broadcast %870 : vector<16x1xf32> to vector<16x16xf32>
    %872 = arith.divf %868, %871 : vector<16x16xf32>
    %cst_346 = arith.constant dense<0.000000e+00> : vector<16x8xf32>
    %873 = tpu.matmul %872, %859, %cst_346 {dimension_numbers = #tpu.dot_dimension_numbers<[1], [0], [0], [1], [0, 0, 1, 1], [], []>} : vector<16x16xf32>, vector<16x8xf32>, vector<16x8xf32> -> vector<16x8xf32>
    %874 = vector.extract_strided_slice %826 {offsets = [8, 0], sizes = [8, 32], strides = [1, 1]} : vector<32x32xf32> to vector<8x32xf32>
    %cst_347 = arith.constant dense<0.000000e+00> : vector<16x32xf32>
    %875 = tpu.matmul %873, %874, %cst_347 {dimension_numbers = #tpu.dot_dimension_numbers<[1], [0], [0], [1], [0, 0, 1, 1], [], []>} : vector<16x8xf32>, vector<8x32xf32>, vector<16x32xf32> -> vector<16x32xf32>
    %876 = arith.addf %856, %875 : vector<16x32xf32>
    %877 = vector.extract_strided_slice %832 {offsets = [0, 16], sizes = [16, 8], strides = [1, 1]} : vector<16x32xf32> to vector<16x8xf32>
    %878 = vector.extract_strided_slice %836 {offsets = [0, 16], sizes = [16, 8], strides = [1, 1]} : vector<16x32xf32> to vector<16x8xf32>
    %879 = vector.extract_strided_slice %837 {offsets = [0, 16], sizes = [16, 8], strides = [1, 1]} : vector<16x32xf32> to vector<16x8xf32>
    %cst_348 = arith.constant dense<0.000000e+00> : vector<16x16xf32>
    %880 = tpu.matmul %877, %878, %cst_348 {dimension_numbers = #tpu.dot_dimension_numbers<[1], [1], [0], [0], [0, 0, 1, 0], [], []>} : vector<16x8xf32>, vector<16x8xf32>, vector<16x16xf32> -> vector<16x16xf32>
    %cst_349 = arith.constant 0.353553385 : f32
    %881 = vector.broadcast %cst_349 : f32 to vector<16x16xf32>
    %882 = arith.mulf %880, %881 : vector<16x16xf32>
    %883 = arith.addf %882, %4 : vector<16x16xf32>
    %cst_350 = arith.constant dense<0xFF800000> : vector<16xf32>
    %884 = vector.multi_reduction <maximumf>, %883, %cst_350 [1] : vector<16x16xf32> to vector<16xf32>
    %885 = vector.shape_cast %884 : vector<16xf32> to vector<16x1xf32>
    %886 = vector.broadcast %885 : vector<16x1xf32> to vector<16x16xf32>
    %887 = arith.subf %883, %886 : vector<16x16xf32>
    %888 = math.exp %887 : vector<16x16xf32>
    %cst_351 = arith.constant dense<0.000000e+00> : vector<16xf32>
    %889 = vector.multi_reduction <add>, %888, %cst_351 [1] : vector<16x16xf32> to vector<16xf32>
    %890 = vector.shape_cast %889 : vector<16xf32> to vector<16x1xf32>
    %891 = vector.broadcast %890 : vector<16x1xf32> to vector<16x16xf32>
    %892 = arith.divf %888, %891 : vector<16x16xf32>
    %cst_352 = arith.constant dense<0.000000e+00> : vector<16x8xf32>
    %893 = tpu.matmul %892, %879, %cst_352 {dimension_numbers = #tpu.dot_dimension_numbers<[1], [0], [0], [1], [0, 0, 1, 1], [], []>} : vector<16x16xf32>, vector<16x8xf32>, vector<16x8xf32> -> vector<16x8xf32>
    %894 = vector.extract_strided_slice %826 {offsets = [16, 0], sizes = [8, 32], strides = [1, 1]} : vector<32x32xf32> to vector<8x32xf32>
    %cst_353 = arith.constant dense<0.000000e+00> : vector<16x32xf32>
    %895 = tpu.matmul %893, %894, %cst_353 {dimension_numbers = #tpu.dot_dimension_numbers<[1], [0], [0], [1], [0, 0, 1, 1], [], []>} : vector<16x8xf32>, vector<8x32xf32>, vector<16x32xf32> -> vector<16x32xf32>
    %896 = arith.addf %876, %895 : vector<16x32xf32>
    %897 = vector.extract_strided_slice %832 {offsets = [0, 24], sizes = [16, 8], strides = [1, 1]} : vector<16x32xf32> to vector<16x8xf32>
    %898 = vector.extract_strided_slice %836 {offsets = [0, 24], sizes = [16, 8], strides = [1, 1]} : vector<16x32xf32> to vector<16x8xf32>
    %899 = vector.extract_strided_slice %837 {offsets = [0, 24], sizes = [16, 8], strides = [1, 1]} : vector<16x32xf32> to vector<16x8xf32>
    %cst_354 = arith.constant dense<0.000000e+00> : vector<16x16xf32>
    %900 = tpu.matmul %897, %898, %cst_354 {dimension_numbers = #tpu.dot_dimension_numbers<[1], [1], [0], [0], [0, 0, 1, 0], [], []>} : vector<16x8xf32>, vector<16x8xf32>, vector<16x16xf32> -> vector<16x16xf32>
    %cst_355 = arith.constant 0.353553385 : f32
    %901 = vector.broadcast %cst_355 : f32 to vector<16x16xf32>
    %902 = arith.mulf %900, %901 : vector<16x16xf32>
    %903 = arith.addf %902, %4 : vector<16x16xf32>
    %cst_356 = arith.constant dense<0xFF800000> : vector<16xf32>
    %904 = vector.multi_reduction <maximumf>, %903, %cst_356 [1] : vector<16x16xf32> to vector<16xf32>
    %905 = vector.shape_cast %904 : vector<16xf32> to vector<16x1xf32>
    %906 = vector.broadcast %905 : vector<16x1xf32> to vector<16x16xf32>
    %907 = arith.subf %903, %906 : vector<16x16xf32>
    %908 = math.exp %907 : vector<16x16xf32>
    %cst_357 = arith.constant dense<0.000000e+00> : vector<16xf32>
    %909 = vector.multi_reduction <add>, %908, %cst_357 [1] : vector<16x16xf32> to vector<16xf32>
    %910 = vector.shape_cast %909 : vector<16xf32> to vector<16x1xf32>
    %911 = vector.broadcast %910 : vector<16x1xf32> to vector<16x16xf32>
    %912 = arith.divf %908, %911 : vector<16x16xf32>
    %cst_358 = arith.constant dense<0.000000e+00> : vector<16x8xf32>
    %913 = tpu.matmul %912, %899, %cst_358 {dimension_numbers = #tpu.dot_dimension_numbers<[1], [0], [0], [1], [0, 0, 1, 1], [], []>} : vector<16x16xf32>, vector<16x8xf32>, vector<16x8xf32> -> vector<16x8xf32>
    %914 = vector.extract_strided_slice %826 {offsets = [24, 0], sizes = [8, 32], strides = [1, 1]} : vector<32x32xf32> to vector<8x32xf32>
    %cst_359 = arith.constant dense<0.000000e+00> : vector<16x32xf32>
    %915 = tpu.matmul %913, %914, %cst_359 {dimension_numbers = #tpu.dot_dimension_numbers<[1], [0], [0], [1], [0, 0, 1, 1], [], []>} : vector<16x8xf32>, vector<8x32xf32>, vector<16x32xf32> -> vector<16x32xf32>
    %916 = arith.addf %896, %915 : vector<16x32xf32>
    %917 = vector.broadcast %829 : vector<1x32xf32> to vector<16x32xf32>
    %918 = arith.addf %916, %917 : vector<16x32xf32>
    %919 = arith.addf %788, %918 : vector<16x32xf32>
    %c40 = arith.constant 40 : index
    %c0_360 = arith.constant 0 : index
    %c0_361 = arith.constant 0 : index
    %920 = vector.load %arg9[%c40, %c0_360, %c0_361] : memref<46x1x96xf32, #tpu.memory_space<vmem>>, vector<1x1x96xf32>
    %921 = vector.shape_cast %920 : vector<1x1x96xf32> to vector<1x96xf32>
    %922 = vector.extract_strided_slice %921 {offsets = [0, 0], sizes = [1, 32], strides = [1, 1]} : vector<1x96xf32> to vector<1x32xf32>
    %c41 = arith.constant 41 : index
    %c0_362 = arith.constant 0 : index
    %c0_363 = arith.constant 0 : index
    %923 = vector.load %arg9[%c41, %c0_362, %c0_363] : memref<46x1x96xf32, #tpu.memory_space<vmem>>, vector<1x1x96xf32>
    %924 = vector.shape_cast %923 : vector<1x1x96xf32> to vector<1x96xf32>
    %925 = vector.extract_strided_slice %924 {offsets = [0, 0], sizes = [1, 32], strides = [1, 1]} : vector<1x96xf32> to vector<1x32xf32>
    %cst_364 = arith.constant dense<0.000000e+00> : vector<16xf32>
    %926 = vector.multi_reduction <add>, %919, %cst_364 [1] : vector<16x32xf32> to vector<16xf32>
    %927 = vector.shape_cast %926 : vector<16xf32> to vector<16x1xf32>
    %cst_365 = arith.constant 3.200000e+01 : f32
    %928 = vector.broadcast %cst_365 : f32 to vector<16x1xf32>
    %929 = arith.divf %927, %928 : vector<16x1xf32>
    %930 = vector.broadcast %929 : vector<16x1xf32> to vector<16x32xf32>
    %931 = arith.subf %919, %930 : vector<16x32xf32>
    %932 = arith.mulf %931, %931 : vector<16x32xf32>
    %cst_366 = arith.constant dense<0.000000e+00> : vector<16xf32>
    %933 = vector.multi_reduction <add>, %932, %cst_366 [1] : vector<16x32xf32> to vector<16xf32>
    %934 = vector.shape_cast %933 : vector<16xf32> to vector<16x1xf32>
    %cst_367 = arith.constant 3.100000e+01 : f32
    %935 = vector.broadcast %cst_367 : f32 to vector<16x1xf32>
    %936 = arith.divf %934, %935 : vector<16x1xf32>
    %937 = vector.broadcast %922 : vector<1x32xf32> to vector<16x32xf32>
    %938 = arith.mulf %937, %931 : vector<16x32xf32>
    %939 = math.sqrt %936 : vector<16x1xf32>
    %cst_368 = arith.constant 9.99999997E-7 : f32
    %940 = vector.broadcast %cst_368 : f32 to vector<16x1xf32>
    %941 = arith.addf %939, %940 : vector<16x1xf32>
    %942 = vector.broadcast %941 : vector<16x1xf32> to vector<16x32xf32>
    %943 = arith.divf %938, %942 : vector<16x32xf32>
    %944 = vector.broadcast %925 : vector<1x32xf32> to vector<16x32xf32>
    %945 = arith.addf %943, %944 : vector<16x32xf32>
    %c3_369 = arith.constant 3 : index
    %c0_370 = arith.constant 0 : index
    %c0_371 = arith.constant 0 : index
    %946 = vector.load %arg7[%c3_369, %c0_370, %c0_371] : memref<6x32x64xf32, #tpu.memory_space<vmem>>, vector<1x32x64xf32>
    %947 = vector.shape_cast %946 : vector<1x32x64xf32> to vector<32x64xf32>
    %c34 = arith.constant 34 : index
    %c0_372 = arith.constant 0 : index
    %c0_373 = arith.constant 0 : index
    %948 = vector.load %arg9[%c34, %c0_372, %c0_373] : memref<46x1x96xf32, #tpu.memory_space<vmem>>, vector<1x1x96xf32>
    %949 = vector.shape_cast %948 : vector<1x1x96xf32> to vector<1x96xf32>
    %950 = vector.extract_strided_slice %949 {offsets = [0, 0], sizes = [1, 64], strides = [1, 1]} : vector<1x96xf32> to vector<1x64xf32>
    %c3_374 = arith.constant 3 : index
    %c0_375 = arith.constant 0 : index
    %c0_376 = arith.constant 0 : index
    %951 = vector.load %arg8[%c3_374, %c0_375, %c0_376] : memref<4x64x32xf32, #tpu.memory_space<vmem>>, vector<1x64x32xf32>
    %952 = vector.shape_cast %951 : vector<1x64x32xf32> to vector<64x32xf32>
    %c35 = arith.constant 35 : index
    %c0_377 = arith.constant 0 : index
    %c0_378 = arith.constant 0 : index
    %953 = vector.load %arg9[%c35, %c0_377, %c0_378] : memref<46x1x96xf32, #tpu.memory_space<vmem>>, vector<1x1x96xf32>
    %954 = vector.shape_cast %953 : vector<1x1x96xf32> to vector<1x96xf32>
    %955 = vector.extract_strided_slice %954 {offsets = [0, 0], sizes = [1, 32], strides = [1, 1]} : vector<1x96xf32> to vector<1x32xf32>
    %cst_379 = arith.constant dense<0.000000e+00> : vector<16x64xf32>
    %956 = tpu.matmul %945, %947, %cst_379 {dimension_numbers = #tpu.dot_dimension_numbers<[1], [0], [0], [1], [0, 0, 1, 1], [], []>} : vector<16x32xf32>, vector<32x64xf32>, vector<16x64xf32> -> vector<16x64xf32>
    %957 = vector.broadcast %950 : vector<1x64xf32> to vector<16x64xf32>
    %958 = arith.addf %956, %957 : vector<16x64xf32>
    %cst_380 = arith.constant 0.000000e+00 : f32
    %959 = vector.broadcast %cst_380 : f32 to vector<16x64xf32>
    %960 = arith.maximumf %958, %959 : vector<16x64xf32>
    %cst_381 = arith.constant dense<0.000000e+00> : vector<16x32xf32>
    %961 = tpu.matmul %960, %952, %cst_381 {dimension_numbers = #tpu.dot_dimension_numbers<[1], [0], [0], [1], [0, 0, 1, 1], [], []>} : vector<16x64xf32>, vector<64x32xf32>, vector<16x32xf32> -> vector<16x32xf32>
    %962 = vector.broadcast %955 : vector<1x32xf32> to vector<16x32xf32>
    %963 = arith.addf %961, %962 : vector<16x32xf32>
    %964 = arith.addf %919, %963 : vector<16x32xf32>
    %c44 = arith.constant 44 : index
    %c0_382 = arith.constant 0 : index
    %c0_383 = arith.constant 0 : index
    %965 = vector.load %arg9[%c44, %c0_382, %c0_383] : memref<46x1x96xf32, #tpu.memory_space<vmem>>, vector<1x1x96xf32>
    %966 = vector.shape_cast %965 : vector<1x1x96xf32> to vector<1x96xf32>
    %967 = vector.extract_strided_slice %966 {offsets = [0, 0], sizes = [1, 32], strides = [1, 1]} : vector<1x96xf32> to vector<1x32xf32>
    %c45 = arith.constant 45 : index
    %c0_384 = arith.constant 0 : index
    %c0_385 = arith.constant 0 : index
    %968 = vector.load %arg9[%c45, %c0_384, %c0_385] : memref<46x1x96xf32, #tpu.memory_space<vmem>>, vector<1x1x96xf32>
    %969 = vector.shape_cast %968 : vector<1x1x96xf32> to vector<1x96xf32>
    %970 = vector.extract_strided_slice %969 {offsets = [0, 0], sizes = [1, 32], strides = [1, 1]} : vector<1x96xf32> to vector<1x32xf32>
    %cst_386 = arith.constant dense<0.000000e+00> : vector<16xf32>
    %971 = vector.multi_reduction <add>, %964, %cst_386 [1] : vector<16x32xf32> to vector<16xf32>
    %972 = vector.shape_cast %971 : vector<16xf32> to vector<16x1xf32>
    %cst_387 = arith.constant 3.200000e+01 : f32
    %973 = vector.broadcast %cst_387 : f32 to vector<16x1xf32>
    %974 = arith.divf %972, %973 : vector<16x1xf32>
    %975 = vector.broadcast %974 : vector<16x1xf32> to vector<16x32xf32>
    %976 = arith.subf %964, %975 : vector<16x32xf32>
    %977 = arith.mulf %976, %976 : vector<16x32xf32>
    %cst_388 = arith.constant dense<0.000000e+00> : vector<16xf32>
    %978 = vector.multi_reduction <add>, %977, %cst_388 [1] : vector<16x32xf32> to vector<16xf32>
    %979 = vector.shape_cast %978 : vector<16xf32> to vector<16x1xf32>
    %cst_389 = arith.constant 3.100000e+01 : f32
    %980 = vector.broadcast %cst_389 : f32 to vector<16x1xf32>
    %981 = arith.divf %979, %980 : vector<16x1xf32>
    %982 = vector.broadcast %967 : vector<1x32xf32> to vector<16x32xf32>
    %983 = arith.mulf %982, %976 : vector<16x32xf32>
    %984 = math.sqrt %981 : vector<16x1xf32>
    %cst_390 = arith.constant 9.99999997E-7 : f32
    %985 = vector.broadcast %cst_390 : f32 to vector<16x1xf32>
    %986 = arith.addf %984, %985 : vector<16x1xf32>
    %987 = vector.broadcast %986 : vector<16x1xf32> to vector<16x32xf32>
    %988 = arith.divf %983, %987 : vector<16x32xf32>
    %989 = vector.broadcast %970 : vector<1x32xf32> to vector<16x32xf32>
    %990 = arith.addf %988, %989 : vector<16x32xf32>
    %c0_391 = arith.constant 0 : index
    %c0_392 = arith.constant 0 : index
    %991 = vector.load %arg10[%c0_391, %c0_392] : memref<16x32xf32, #tpu.memory_space<vmem>>, vector<16x32xf32>
    tpu.vector_store %arg10[%c0_391, %c0_392], %990 {strides = array<i32>} : memref<16x32xf32, #tpu.memory_space<vmem>>, vector<16x32xf32>,
    return
  }
}

</mosaic_0001>

<bundles_post_ra>
// kernel: encode_decode_forward.1
= control target key start
LH: loop header
LB: loop body
LE: loop exit
PB: predicated region body
PF: predicated region fallthrough
CT: control target
= control target key end

     0   :  { %vm50_vm0 = vcmask 261120   ;;  %s12592_s0 = inlined_call_operand.vmem [shape: f32[16,32], index: 0, kind: input, shape index: {}]   ;;  %s12593_s1 = inlined_call_operand.vmem [shape: f32[16,32], index: 1, kind: input, shape index: {}]   ;;  %s12594_s2 = inlined_call_operand.vmem [shape: f32[16,16], index: 2, kind: input, shape index: {}, may-alias: {2,4}]   ;;  %s12595_s3 = inlined_call_operand.vmem [shape: f32[16,16], index: 3, kind: input, shape index: {}]   ;;  %s12596_s4 = inlined_call_operand.vmem [shape: f32[16,16], index: 4, kind: input, shape index: {}, may-alias: {2,4}]   ;;  %s12597_s5 = inlined_call_operand.vmem [shape: f32[4,32,96], index: 5, kind: input, shape index: {}]   ;;  %s12598_s6 = inlined_call_operand.vmem [shape: f32[8,32,32], index: 6, kind: input, shape index: {}]   ;;  %s12599_s7 = inlined_call_operand.vmem [shape: f32[6,32,64], index: 7, kind: input, shape index: {}]   ;;  %s12600_s8 = inlined_call_operand.vmem [shape: f32[4,64,32], index: 8, kind: input, shape index: {}]   ;;  %s12601_s9 = inlined_call_operand.vmem [shape: f32[46,1,96], index: 9, kind: input, shape index: {}]   ;;  %s12602_s10 = inlined_call_operand.hbm [shape: f32[16,32], index: 10, kind: output, shape index: {}]  }
   0x1   :  { %v11106_v0 = vld [vmem:[%s12592_s0] sm:$0xff]  ;;  %v11111_v1 = vld [vmem:[%s12592_s0 + $0x8] sm:$0xff] }
   0x2   :  { %15 = vsyncpa [#allocation3], 0  ;;  %v51_v2 = vsel %vm50_vm0, %v11106_v0, 0.0  ;;  %v54_v3 = vsel %vm50_vm0, %v11111_v1, 0.0  ;;  %v112_v14 = vld [vmem:[%s12597_s5 + $0x18] sm:$0xff]  ;;  %v111_v15 = vld [vmem:[%s12597_s5 + $0x10] sm:$0xff] }
   0x3   :  { %52 = vadd.xlane.f32.xlu0 %v51_v2  ;;  %10040 = vmatprep.subr.mxu0 %v112_v14  ;;  %v110_v16 = vld [vmem:[%s12597_s5 + $0x8] sm:$0xff]  ;;  %v109_v17 = vld [vmem:[%s12597_s5] sm:$0xff]  ;;  %vm213_vm5 = vcmask 64512   ;;  %s11034_s30 = smov 96   ;;  %s11035_s11 = smov 120   ;;  %vm301_vm6 = vcmask 130048  }
   0x4   :  { %10041 = vmatpush3.msra.mxu0 %v112_v14  ;;  %v9267_v34 = vld [vmem:[%s12601_s9 + $0x4] ss:$0 sm:$0xff]  ;;  %v9268_v37 = vld [vmem:[%s12601_s9 + $0x5] ss:$0 sm:$0xff]  ;;  %v9270_v44 = vld [vmem:[%s12601_s9] ss:$0 sm:$0xff] }
   0x5   :  { %10042 = vmatprep.subr.mxu0 %v111_v15  ;;  %s11036_s12 = smov 88   ;;  %v11177_v56 = vld [vmem:[%s12594_s2 + $0x8] sm:$0xff]  ;;  %v11182_v59 = vld [vmem:[%s12594_s2] sm:$0xff]  ;;  %s11037_s0 = smov 64   ;;  %vm1532_vm11 = vcmask 523264  }
   0x6   :  { %10043 = vmatpush3.msra.mxu0 %v111_v15  ;;  %s11038_s17 = smov 56   ;;  %s11039_s18 = smov 80  }
   0x7   :  { %55 = vadd.xlane.f32.xlu0 %v54_v3  ;;  %10044 = vmatprep.subr.mxu0 %v110_v16  ;;  %s11040_s19 = smov 112   ;;  %s11041_s20 = smov 72  }
   0x8   :  { %10045 = vmatpush3.msra.mxu0 %v110_v16  ;;  %s11042_s21 = smov 104   ;;  %s11043_s26 = smov 48  }
   0x9   :  { %10046 = vmatprep.subr.mxu0 %v109_v17  ;;  %s11044_s27 = smov 40   ;;  %s11045_s24 = smov [#allocation2]  }
   0xa   :  { %10047 = vmatpush3.msra.mxu0 %v109_v17 }
  0x8c   :  { %v53_v4 = vpop.xlane.xlu0 %52 }
  0x8d   :  { %v58_v5 = vmul.f32 0.03125, %v53_v4 }
  0x8f   :  { %v60_v6 = vsub.f32 %v11106_v0, %v58_v5 }
  0x90   :  { %v56_v7 = vpop.xlane.xlu0 %55 }
  0x91   :  { %v59_v8 = vmul.f32 0.03125, %v56_v7  ;;  %v62_v9 = vmul.f32 %v60_v6, %v60_v6  ;;  %v79_v35 = vmul.f32 %v9267_v34, %v60_v6 }
  0x93   :  { %v61_v10 = vsub.f32 %v11111_v1, %v59_v8  ;;  %v64_v11 = vsel %vm50_vm0, %v62_v9, 0.0 }
  0x94   :  { %65 = vadd.xlane.f32.xlu1 %v64_v11 }
  0x95   :  { %v63_v12 = vmul.f32 %v61_v10, %v61_v10  ;;  %v80_v39 = vmul.f32 %v9267_v34, %v61_v10 }
  0x97   :  { %v67_v13 = vsel %vm50_vm0, %v63_v12, 0.0 }
  0x98   :  { %68 = vadd.xlane.f32.xlu1 %v67_v13 }
 0x11d   :  { %v66_v18 = vpop.xlane.xlu1 %65 }
 0x11e   :  { %v71_v19 = vmul.f32 0.032258064, %v66_v18 }
 0x120   :  { %10718 = vrsqrt.f32 %v71_v19  ;;  %vm83_vm1 = vcmp.eq.f32.partialorder %v71_v19, inf  ;;  %v86_v24 = vand.u32 2147483648, %v71_v19  ;;  %vm85_vm2 = vcmp.eq.f32.partialorder %v71_v19, 0.0 }
 0x121   :  { %v69_v20 = vpop.xlane.xlu1 %68 }
 0x122   :  { %v72_v21 = vmul.f32 0.032258064, %v69_v20 }
 0x124   :  { %10720 = vrsqrt.f32 %v72_v21  ;;  %vm90_vm3 = vcmp.eq.f32.partialorder %v72_v21, inf  ;;  %v93_v30 = vand.u32 2147483648, %v72_v21  ;;  %vm92_vm4 = vcmp.eq.f32.partialorder %v72_v21, 0.0 }
 0x12d   :  { %v10719_v22 = vpop.eup %10718 }
 0x12e   :  { %v82_v23 = vmul.f32 %v10719_v22, %v71_v19 }
 0x130   :  { %v84_v25 = vsel %vm83_vm1, %v71_v19, %v82_v23 }
 0x131   :  { %v10721_v26 = vpop.eup %10720  ;;  %v87_v27 = vsel %vm85_vm2, %v86_v24, %v84_v25 }
 0x132   :  { %v89_v28 = vmul.f32 %v10721_v26, %v72_v21  ;;  %v95_v29 = vadd.f32 1e-06, %v87_v27 }
 0x134   :  { %v91_v31 = vsel %vm90_vm3, %v72_v21, %v89_v28  ;;  %10722 = vrcp.f32 %v95_v29 }
 0x135   :  { %v94_v32 = vsel %vm92_vm4, %v93_v30, %v91_v31 }
 0x136   :  { %v96_v33 = vadd.f32 1e-06, %v94_v32 }
 0x138   :  { %10724 = vrcp.f32 %v96_v33 }
 0x141   :  { %v10723_v36 = vpop.eup %10722 }
 0x142   :  { %v98_v38 = vmul.f32 %v10723_v36, %v79_v35 }
 0x144   :  { %v107_v40 = vadd.f32 %v9268_v37, %v98_v38 }
 0x145   :  { %v10725_v41 = vpop.eup %10724 }
 0x146   :  { %v100_v42 = vmul.f32 %v10725_v41, %v80_v39  ;;  %10048 = vmatprep.mubr.msk.f32.mxu0 %vm50_vm0, %v107_v40 }
 0x148   :  { %v108_v43 = vadd.f32 %v9268_v37, %v100_v42 }
 0x14a   :  { %10049 = vmatmul.mubr.msk.f32.vlgmr.msra.gmra.mxu0 %vm50_vm0, %v108_v43 }
 0x20a   :  { %v10050_v45 = vpop.f32.mrf.mxu0 }
 0x20b   :  { %v11144_v46 = vadd.f32 %v10050_v45, %v9270_v44 }
 0x20c   :  { %v198_v47 = vpop.f32.mrf.mxu0 }
 0x20d   :  { %v11146_v48 = vadd.f32 %v9270_v44, %v198_v47  ;;  %211 = vrot.lane.b32.xlu0 %v11144_v46, %s11034_s30 }
 0x20f   :  { %209 = vrot.lane.b32.xlu1 %v11146_v48, %s11034_s30  ;;  %10055 = vmatprep.mubr.msk.f32.mxu1 %vm213_vm5, %v11146_v48 }
 0x211   :  { %411 = vrot.lane.b32.xlu0 %v11146_v48, %s11035_s11 }
 0x213   :  { %417 = vrot.lane.b32.xlu1 %v11144_v46, %s11036_s12 }
 0x217   :  { %415 = vrot.lane.b32.xlu1 %v11146_v48, %s11036_s12 }
 0x21b   :  { %413 = vrot.lane.b32.xlu1 %v11144_v46, %s11035_s11 }
 0x27f   :  { %v212_v49 = vpop.permute.xlu0 %211 }
 0x280   :  { %10051 = vmatprep.subr.msk.mxu1 %vm213_vm5, %v212_v49 }
 0x281   :  { %10052 = vmatpush3.xpose.msk.msra.mxu1 %vm213_vm5, %v212_v49  ;;  %v210_v50 = vpop.permute.xlu1 %209  ;;  %v115_v49 = vld [vmem:[%s12598_s6 + $0x8] sm:$0xff] }
 0x282   :  { %10053 = vmatprep.subr.msk.mxu1 %vm213_vm5, %v210_v50 }
 0x283   :  { %v412_v52 = vpop.permute.xlu0 %411 }
 0x285   :  { %10054 = vmatpush3.xpose.msk.msra.mxu1 %vm213_vm5, %v210_v50  ;;  %v418_v51 = vpop.permute.xlu1 %417  ;;  %v114_v50 = vld [vmem:[%s12598_s6] sm:$0xff] }
 0x286   :  { %10065 = vmatprep.subr.msk.mxu1 %vm213_vm5, %v418_v51 }
 0x288   :  { %10056 = vmatmul.mubr.msk.f32.vlgmr.msra.gmra.mxu1 %vm213_vm5, %v11144_v46 }
 0x289   :  { %v416_v53 = vpop.permute.xlu1 %415  ;;  %10066 = vmatpush3.xpose.msk.msra.mxu1 %vm213_vm5, %v418_v51  ;;  %10069 = vmatprep.mubr.msk.f32.mxu1 %vm213_vm5, %v412_v52 }
 0x28a   :  { %10067 = vmatprep.subr.msk.mxu1 %vm213_vm5, %v416_v53 }
 0x28d   :  { %10068 = vmatpush3.xpose.msk.msra.mxu1 %vm213_vm5, %v416_v53  ;;  %v414_v54 = vpop.permute.xlu1 %413 }
 0x290   :  { %10070 = vmatmul.mubr.msk.f32.vlgmr.msra.gmra.mxu1 %vm213_vm5, %v414_v54 }
 0x348   :  { %v10057_v55 = vpop.f32.mrf.mxu1 }
 0x349   :  { %v298_v57 = vmul.f32 0.35355338, %v10057_v55 }
 0x34a   :  { %v288_v58 = vpop.f32.mrf.mxu1 }
 0x34b   :  { %v297_v60 = vmul.f32 0.35355338, %v288_v58  ;;  %v300_v61 = vadd.f32 %v298_v57, %v11177_v56 }
 0x34d   :  { %v305_v62 = vsel %vm301_vm6, %v300_v61, -inf  ;;  %v299_v63 = vadd.f32 %v297_v60, %v11182_v59 }
 0x34e   :  { %306 = vmax.xlane.f32.xlu1 %v305_v62 }
 0x34f   :  { %v302_v2 = vsel %vm301_vm6, %v299_v63, -inf }
 0x350   :  { %v10071_v3 = vpop.f32.mrf.mxu1  ;;  %303 = vmax.xlane.f32.xlu0 %v302_v2 }
 0x351   :  { %v503_v5 = vmul.f32 0.35355338, %v10071_v3 }
 0x352   :  { %v493_v4 = vpop.f32.mrf.mxu1 }
 0x353   :  { %v502_v6 = vmul.f32 0.35355338, %v493_v4  ;;  %v505_v9 = vadd.f32 %v503_v5, %v11177_v56 }
 0x355   :  { %v504_v7 = vadd.f32 %v502_v6, %v11182_v59  ;;  %v509_v10 = vsel %vm301_vm6, %v505_v9, -inf }
 0x357   :  { %v506_v8 = vsel %vm301_vm6, %v504_v7, -inf }
 0x358   :  { %507 = vmax.xlane.f32.xlu0 %v506_v8 }
 0x35c   :  { %510 = vmax.xlane.f32.xlu0 %v509_v10 }
 0x3d7   :  { %v307_v11 = vpop.xlane.xlu1 %306 }
 0x3d8   :  { %v309_v12 = vsub.f32 %v300_v61, %v307_v11 }
 0x3d9   :  { %v304_v13 = vpop.xlane.xlu0 %303 }
 0x3da   :  { %v312_v14 = vmul.f32 1.442695, %v309_v12  ;;  %v308_v15 = vsub.f32 %v299_v63, %v304_v13 }
 0x3dc   :  { %10726 = vpow2.f32 %v312_v14  ;;  %v310_v16 = vmul.f32 1.442695, %v308_v15 }
 0x3de   :  { %10728 = vpow2.f32 %v310_v16 }
 0x3e1   :  { %v508_v17 = vpop.xlane.xlu0 %507 }
 0x3e2   :  { %v512_v18 = vsub.f32 %v504_v7, %v508_v17 }
 0x3e4   :  { %v514_v19 = vmul.f32 1.442695, %v512_v18 }
 0x3e5   :  { %v511_v20 = vpop.xlane.xlu0 %510 }
 0x3e6   :  { %10730 = vpow2.f32 %v514_v19  ;;  %v513_v21 = vsub.f32 %v505_v9, %v511_v20 }
 0x3e8   :  { %v516_v22 = vmul.f32 1.442695, %v513_v21 }
 0x3e9   :  { %v10727_v23 = vpop.eup %10726 }
 0x3ea   :  { %10732 = vpow2.f32 %v516_v22  ;;  %v317_v24 = vsel %vm301_vm6, %v10727_v23, 0.0 }
 0x3eb   :  { %v10729_v25 = vpop.eup %10728  ;;  %318 = vadd.xlane.f32.xlu1 %v317_v24 }
 0x3ec   :  { %v314_v26 = vsel %vm301_vm6, %v10729_v25, 0.0 }
 0x3ed   :  { %315 = vadd.xlane.f32.xlu0 %v314_v26 }
 0x3f3   :  { %v10731_v27 = vpop.eup %10730 }
 0x3f4   :  { %v518_v28 = vsel %vm301_vm6, %v10731_v27, 0.0 }
 0x3f5   :  { %519 = vadd.xlane.f32.xlu0 %v518_v28 }
 0x3f7   :  { %v10733_v29 = vpop.eup %10732 }
 0x3f8   :  { %v521_v30 = vsel %vm301_vm6, %v10733_v29, 0.0 }
 0x3f9   :  { %522 = vadd.xlane.f32.xlu1 %v521_v30 }
 0x40a   :  { %324 = vrot.lane.b32.xlu1 %v11146_v48, %s11037_s0 }
 0x40b   :  { %326 = vrot.lane.b32.xlu0 %v11144_v46, %s11037_s0 }
 0x40e   :  { %530 = vrot.lane.b32.xlu1 %v11144_v46, %s11038_s17 }
 0x40f   :  { %783 = vrot.lane.b32.xlu0 %v11144_v46, %s11039_s18 }
 0x412   :  { %528 = vrot.lane.b32.xlu1 %v11146_v48, %s11038_s17 }
 0x413   :  { %777 = vrot.lane.b32.xlu0 %v11146_v48, %s11040_s19 }
 0x416   :  { %781 = vrot.lane.b32.xlu1 %v11146_v48, %s11039_s18 }
 0x417   :  { %1070 = vrot.lane.b32.xlu0 %v11144_v46, %s11041_s20 }
 0x41a   :  { %779 = vrot.lane.b32.xlu1 %v11144_v46, %s11040_s19 }
 0x41b   :  { %1064 = vrot.lane.b32.xlu0 %v11146_v48, %s11042_s21 }
 0x41e   :  { %1068 = vrot.lane.b32.xlu1 %v11146_v48, %s11041_s20 }
 0x422   :  { %1066 = vrot.lane.b32.xlu1 %v11144_v46, %s11042_s21 }
 0x474   :  { %v319_v31 = vpop.xlane.xlu1 %318 }
 0x475   :  { %10734 = vrcp.f32 %v319_v31 }
 0x476   :  { %v316_v32 = vpop.xlane.xlu0 %315 }
 0x477   :  { %10736 = vrcp.f32 %v316_v32 }
 0x47e   :  { %v520_v33 = vpop.xlane.xlu0 %519 }
 0x47f   :  { %10738 = vrcp.f32 %v520_v33 }
 0x482   :  { %v523_v34 = vpop.xlane.xlu1 %522  ;;  %v327_v35 = vpop.permute.xlu0 %326 }
 0x483   :  { %v10735_v36 = vpop.eup %10734  ;;  %10740 = vrcp.f32 %v523_v34  ;;  %10058 = vmatprep.subr.mxu0 %v327_v35 }
 0x484   :  { %v10737_v37 = vpop.eup %10736  ;;  %10059 = vmatpush3.msra.mxu0 %v327_v35  ;;  %v323_v40 = vmul.f32 %v10735_v36, %v10727_v23 }
 0x485   :  { %v321_v38 = vmul.f32 %v10737_v37, %v10729_v25 }
 0x486   :  { %v325_v39 = vpop.permute.xlu1 %324  ;;  %v784_v52 = vpop.permute.xlu0 %783 }
 0x487   :  { %10060 = vmatprep.subr.mxu0 %v325_v39  ;;  %10062 = vmatprep.mubr.msk.f32.mxu0 %vm301_vm6, %v321_v38 }
 0x488   :  { %10061 = vmatpush3.msra.mxu0 %v325_v39 }
 0x489   :  { %10063 = vmatmul.mubr.msk.f32.vlgmr.msra.gmra.mxu0 %vm301_vm6, %v323_v40 }
 0x48a   :  { %v531_v41 = vpop.permute.xlu1 %530  ;;  %v778_v57 = vpop.permute.xlu0 %777 }
 0x48b   :  { %10072 = vmatprep.subr.mxu0 %v531_v41 }
 0x48c   :  { %v10739_v42 = vpop.eup %10738  ;;  %10073 = vmatpush3.msra.mxu0 %v531_v41 }
 0x48d   :  { %v525_v43 = vmul.f32 %v10739_v42, %v10731_v27 }
 0x48e   :  { %v529_v44 = vpop.permute.xlu1 %528  ;;  %v1071_v60 = vpop.permute.xlu0 %1070 }
 0x48f   :  { %10074 = vmatprep.subr.mxu0 %v529_v44  ;;  %10076 = vmatprep.mubr.msk.f32.mxu0 %vm301_vm6, %v525_v43 }
 0x490   :  { %v10741_v45 = vpop.eup %10740  ;;  %10075 = vmatpush3.msra.mxu0 %v529_v44  ;;  %v116_v44 = vld [vmem:[%s12598_s6 + $0x10] sm:$0xff] }
 0x491   :  { %v527_v47 = vmul.f32 %v10741_v45, %v10733_v29  ;;  %10079 = vmatprep.subr.mxu0 %v115_v49 }
 0x492   :  { %v782_v58 = vpop.permute.xlu1 %781  ;;  %v1065_v62 = vpop.permute.xlu0 %1064 }
 0x493   :  { %10077 = vmatmul.mubr.msk.f32.vlgmr.msra.gmra.mxu0 %vm301_vm6, %v527_v47 }
 0x494   :  { %10080 = vmatpush3.msra.mxu0 %v115_v49 }
 0x495   :  { %10084 = vmatprep.subr.mxu0 %v114_v50 }
 0x496   :  { %v780_v61 = vpop.permute.xlu1 %779 }
 0x49a   :  { %v1069_v63 = vpop.permute.xlu1 %1068 }
 0x49e   :  { %v1067_v2 = vpop.permute.xlu1 %1066 }
 0x549   :  { %v10064_v51 = vpop.f32.mrf.mxu0 }
 0x54b   :  { %v402_v53 = vpop.f32.mrf.mxu0 }
 0x553   :  { %v10078_v54 = vpop.f32.mrf.mxu0 }
 0x555   :  { %v606_v55 = vpop.f32.mrf.mxu0 }
 0x556   :  { %10081 = vmatprep.mubr.msk.f32.mxu0 %vm213_vm5, %v606_v55 }
 0x557   :  { %10082 = vmatmul.mubr.msk.f32.vlgmr.msra.gmra.mxu0 %vm213_vm5, %v10078_v54 }
 0x558   :  { %10085 = vmatpush3.msra.mxu0 %v114_v50  ;;  %10086 = vmatprep.mubr.msk.f32.mxu0 %vm213_vm5, %v402_v53 }
 0x559   :  { %10089 = vmatprep.subr.msk.mxu0 %vm213_vm5, %v784_v52 }
 0x55b   :  { %10087 = vmatmul.mubr.msk.f32.vlgmr.msra.gmra.mxu0 %vm213_vm5, %v10064_v51 }
 0x55c   :  { %10090 = vmatpush3.xpose.msk.msra.mxu0 %vm213_vm5, %v784_v52  ;;  %10093 = vmatprep.mubr.msk.f32.mxu0 %vm213_vm5, %v778_v57 }
 0x55d   :  { %10091 = vmatprep.subr.msk.mxu0 %vm213_vm5, %v782_v58 }
 0x560   :  { %10092 = vmatpush3.xpose.msk.msra.mxu0 %vm213_vm5, %v782_v58 }
 0x561   :  { %10108 = vmatprep.subr.msk.mxu0 %vm213_vm5, %v1071_v60 }
 0x563   :  { %10094 = vmatmul.mubr.msk.f32.vlgmr.msra.gmra.mxu0 %vm213_vm5, %v780_v61 }
 0x564   :  { %10109 = vmatpush3.xpose.msk.msra.mxu0 %vm213_vm5, %v1071_v60  ;;  %10112 = vmatprep.mubr.msk.f32.mxu0 %vm213_vm5, %v1065_v62 }
 0x565   :  { %10110 = vmatprep.subr.msk.mxu0 %vm213_vm5, %v1069_v63 }
 0x568   :  { %10111 = vmatpush3.xpose.msk.msra.mxu0 %vm213_vm5, %v1069_v63 }
 0x56b   :  { %10113 = vmatmul.mubr.msk.f32.vlgmr.msra.gmra.mxu0 %vm213_vm5, %v1067_v2 }
 0x617   :  { %v10083_v3 = vpop.f32.mrf.mxu0 }
 0x619   :  { %v687_v4 = vpop.f32.mrf.mxu0 }
 0x61b   :  { %v10088_v5 = vpop.f32.mrf.mxu0 }
 0x61c   :  { %v11246_v6 = vadd.f32 %v10088_v5, %v10083_v3 }
 0x61d   :  { %v768_v7 = vpop.f32.mrf.mxu0 }
 0x61e   :  { %v11248_v8 = vadd.f32 %v768_v7, %v687_v4 }
 0x623   :  { %v10095_v9 = vpop.f32.mrf.mxu0 }
 0x624   :  { %v869_v10 = vmul.f32 0.35355338, %v10095_v9 }
 0x625   :  { %v859_v11 = vpop.f32.mrf.mxu0 }
 0x626   :  { %v868_v12 = vmul.f32 0.35355338, %v859_v11  ;;  %v871_v13 = vadd.f32 %v869_v10, %v11177_v56 }
 0x628   :  { %v875_v14 = vsel %vm301_vm6, %v871_v13, -inf  ;;  %v870_v15 = vadd.f32 %v868_v12, %v11182_v59 }
 0x629   :  { %876 = vmax.xlane.f32.xlu1 %v875_v14 }
 0x62a   :  { %v872_v16 = vsel %vm301_vm6, %v870_v15, -inf }
 0x62b   :  { %873 = vmax.xlane.f32.xlu0 %v872_v16  ;;  %v10114_v17 = vpop.f32.mrf.mxu0 }
 0x62c   :  { %v1156_v36 = vmul.f32 0.35355338, %v10114_v17 }
 0x62d   :  { %v1146_v18 = vpop.f32.mrf.mxu0 }
 0x62e   :  { %v1155_v19 = vmul.f32 0.35355338, %v1146_v18  ;;  %v1158_v37 = vadd.f32 %v1156_v36, %v11177_v56  ;;  %v1432_v36 = vld [vmem:[%s12600_s8 + $0x28] sm:$0xff] }
 0x630   :  { %v1157_v20 = vadd.f32 %v1155_v19, %v11182_v59  ;;  %v1162_v38 = vsel %vm301_vm6, %v1158_v37, -inf }
 0x632   :  { %v1159_v21 = vsel %vm301_vm6, %v1157_v20, -inf }
 0x63a   :  { %894 = vrot.lane.b32.xlu1 %v11146_v48, %s11043_s26 }
 0x65e   :  { %1160 = vmax.xlane.f32.xlu1 %v1159_v21 }
 0x6b2   :  { %v877_v22 = vpop.xlane.xlu1 %876 }
 0x6b3   :  { %v879_v23 = vsub.f32 %v871_v13, %v877_v22  ;;  %v9305_v13 = vld [vmem:[%s12601_s9 + $0x1] ss:$0 sm:$0xff] }
 0x6b4   :  { %v874_v24 = vpop.xlane.xlu0 %873 }
 0x6b5   :  { %v882_v25 = vmul.f32 1.442695, %v879_v23  ;;  %v878_v26 = vsub.f32 %v870_v15, %v874_v24 }
 0x6b6   :  { %v895_v32 = vpop.permute.xlu1 %894 }
 0x6b7   :  { %10742 = vpow2.f32 %v882_v25  ;;  %v880_v27 = vmul.f32 1.442695, %v878_v26 }
 0x6b9   :  { %10744 = vpow2.f32 %v880_v27 }
 0x6c4   :  { %v10743_v28 = vpop.eup %10742 }
 0x6c5   :  { %v887_v29 = vsel %vm301_vm6, %v10743_v28, 0.0 }
 0x6c6   :  { %v10745_v30 = vpop.eup %10744  ;;  %888 = vadd.xlane.f32.xlu0 %v887_v29 }
 0x6c7   :  { %v884_v31 = vsel %vm301_vm6, %v10745_v30, 0.0 }
 0x6ca   :  { %885 = vadd.xlane.f32.xlu0 %v884_v31  ;;  %v1423_v31 = vld [vmem:[%s12599_s7 + $0x10] sm:$0xff] }
 0x6e0   :  { %896 = vrot.lane.b32.xlu0 %v11144_v46, %s11043_s26 }
 0x6e7   :  { %v1161_v33 = vpop.xlane.xlu1 %1160 }
 0x6e8   :  { %v1165_v34 = vsub.f32 %v1157_v20, %v1161_v33  ;;  %v1421_v33 = vld [vmem:[%s12599_s7] sm:$0xff] }
 0x6ea   :  { %v1167_v35 = vmul.f32 1.442695, %v1165_v34  ;;  %v1434_v34 = vld [vmem:[%s12600_s8 + $0x38] sm:$0xff] }
 0x6ec   :  { %10746 = vpow2.f32 %v1167_v35  ;;  %v1433_v35 = vld [vmem:[%s12600_s8 + $0x30] sm:$0xff] }
 0x6f9   :  { %v10747_v39 = vpop.eup %10746 }
 0x6fa   :  { %v1171_v40 = vsel %vm301_vm6, %v10747_v39, 0.0 }
 0x6ff   :  { %1163 = vmax.xlane.f32.xlu0 %v1162_v38 }
 0x703   :  { %1172 = vadd.xlane.f32.xlu0 %v1171_v40 }
 0x719   :  { %1183 = vrot.lane.b32.xlu0 %v11144_v46, %s11044_s27 }
 0x74f   :  { %v889_v41 = vpop.xlane.xlu0 %888 }
 0x750   :  { %10748 = vrcp.f32 %v889_v41 }
 0x753   :  { %v886_v42 = vpop.xlane.xlu0 %885 }
 0x754   :  { %10750 = vrcp.f32 %v886_v42 }
 0x757   :  { %v897_v43 = vpop.permute.xlu0 %896 }
 0x758   :  { %10096 = vmatprep.subr.mxu1 %v897_v43 }
 0x759   :  { %10097 = vmatpush3.msra.mxu1 %v897_v43 }
 0x75a   :  { %10098 = vmatprep.subr.mxu1 %v895_v32 }
 0x75b   :  { %10099 = vmatpush3.msra.mxu1 %v895_v32  ;;  %v1422_v32 = vld [vmem:[%s12599_s7 + $0x8] sm:$0xff] }
 0x75c   :  { %10103 = vmatprep.subr.mxu1 %v116_v44 }
 0x75d   :  { %v10749_v45 = vpop.eup %10748 }
 0x75e   :  { %v893_v50 = vmul.f32 %v10749_v45, %v10743_v28 }
 0x761   :  { %v10751_v47 = vpop.eup %10750 }
 0x762   :  { %v891_v49 = vmul.f32 %v10751_v47, %v10745_v30  ;;  %v1424_v30 = vld [vmem:[%s12599_s7 + $0x18] sm:$0xff] }
 0x763   :  { %10127 = vmatprep.subr.mxu0 %v1424_v30 }
 0x764   :  { %10100 = vmatprep.mubr.msk.f32.mxu1 %vm301_vm6, %v891_v49  ;;  %10128 = vmatpush3.msra.mxu0 %v1424_v30 }
 0x765   :  { %10101 = vmatmul.mubr.msk.f32.vlgmr.msra.gmra.mxu1 %vm301_vm6, %v893_v50  ;;  %10129 = vmatprep.subr.mxu0 %v1423_v31 }
 0x766   :  { %10104 = vmatpush3.msra.mxu1 %v116_v44  ;;  %10130 = vmatpush3.msra.mxu0 %v1423_v31 }
 0x767   :  { %10131 = vmatprep.subr.mxu0 %v1422_v32 }
 0x768   :  { %10132 = vmatpush3.msra.mxu0 %v1422_v32  ;;  %v9325_v32 = vld [vmem:[%s12597_s5 + $0x38] sm:$0xff] }
 0x769   :  { %10133 = vmatprep.subr.mxu0 %v1421_v33 }
 0x76a   :  { %10134 = vmatpush3.msra.mxu0 %v1421_v33  ;;  %v9324_v33 = vld [vmem:[%s12597_s5 + $0x30] sm:$0xff] }
 0x76b   :  { %10157 = vmatprep.subr.mxu0 %v9325_v32 }
 0x788   :  { %v1164_v46 = vpop.xlane.xlu0 %1163 }
 0x789   :  { %v1166_v51 = vsub.f32 %v1158_v37, %v1164_v46  ;;  %v1431_v37 = vld [vmem:[%s12600_s8 + $0x20] sm:$0xff] }
 0x78b   :  { %v1169_v52 = vmul.f32 1.442695, %v1166_v51 }
 0x78c   :  { %v1173_v53 = vpop.xlane.xlu0 %1172 }
 0x78d   :  { %10752 = vpow2.f32 %v1169_v52 }
 0x78e   :  { %10754 = vrcp.f32 %v1173_v53 }
 0x790   :  { %v1184_v54 = vpop.permute.xlu0 %1183 }
 0x791   :  { %10115 = vmatprep.subr.mxu1 %v1184_v54 }
 0x79a   :  { %v10753_v55 = vpop.eup %10752 }
 0x79b   :  { %v1174_v57 = vsel %vm301_vm6, %v10753_v55, 0.0  ;;  %v10755_v58 = vpop.eup %10754 }
 0x79c   :  { %1175 = vadd.xlane.f32.xlu1 %v1174_v57  ;;  %v1178_v63 = vmul.f32 %v10755_v58, %v10747_v39 }
 0x7ad   :  { %1181 = vrot.lane.b32.xlu1 %v11146_v48, %s11044_s27  ;;  %v117_v48 = vld [vmem:[%s12598_s6 + $0x18] sm:$0xff] }
 0x825   :  { %v10102_v60 = vpop.f32.mrf.mxu1  ;;  %v1176_v61 = vpop.xlane.xlu1 %1175 }
 0x826   :  { %10756 = vrcp.f32 %v1176_v61 }
 0x827   :  { %v972_v62 = vpop.f32.mrf.mxu1 }
 0x828   :  { %10105 = vmatprep.mubr.msk.f32.mxu1 %vm213_vm5, %v972_v62 }
 0x829   :  { %10106 = vmatmul.mubr.msk.f32.vlgmr.msra.gmra.mxu1 %vm213_vm5, %v10102_v60  ;;  %v1182_v2 = vpop.permute.xlu1 %1181 }
 0x82a   :  { %10116 = vmatpush3.msra.mxu1 %v1184_v54  ;;  %10119 = vmatprep.mubr.msk.f32.mxu1 %vm301_vm6, %v1178_v63  ;;  %v9309_v63 = vld [vmem:[%s12601_s9 + $0x7] ss:$0 sm:$0xff] }
 0x82b   :  { %10117 = vmatprep.subr.mxu1 %v1182_v2 }
 0x82c   :  { %10118 = vmatpush3.msra.mxu1 %v1182_v2 }
 0x82d   :  { %10122 = vmatprep.subr.mxu1 %v117_v48 }
 0x833   :  { %v10757_v3 = vpop.eup %10756 }
 0x834   :  { %v1180_v4 = vmul.f32 %v10757_v3, %v10753_v55  ;;  %v9308_v55 = vld [vmem:[%s12601_s9 + $0x6] ss:$0 sm:$0xff] }
 0x836   :  { %10120 = vmatmul.mubr.msk.f32.vlgmr.msra.gmra.mxu1 %vm301_vm6, %v1180_v4 }
 0x837   :  { %10123 = vmatpush3.msra.mxu1 %v117_v48  ;;  %v1430_v48 = vld [vmem:[%s12600_s8 + $0x18] sm:$0xff] }
 0x838   :  { %10138 = vmatprep.subr.mxu1 %v1434_v34 }
 0x8e9   :  { %v10107_v5 = vpop.f32.mrf.mxu1 }
 0x8ea   :  { %v1063_v7 = vadd.f32 %v10107_v5, %v11246_v6  ;;  %v1429_v5 = vld [vmem:[%s12600_s8 + $0x10] sm:$0xff] }
 0x8eb   :  { %v1053_v9 = vpop.f32.mrf.mxu1 }
 0x8ec   :  { %v1062_v10 = vadd.f32 %v1053_v9, %v11248_v8  ;;  %v1427_v9 = vld [vmem:[%s12600_s8] sm:$0xff] }
 0x8f6   :  { %v10121_v11 = vpop.f32.mrf.mxu1 }
 0x8f8   :  { %v1259_v12 = vpop.f32.mrf.mxu1 }
 0x8f9   :  { %10124 = vmatprep.mubr.msk.f32.mxu1 %vm213_vm5, %v1259_v12 }
 0x8fa   :  { %10125 = vmatmul.mubr.msk.f32.vlgmr.msra.gmra.mxu1 %vm213_vm5, %v10121_v11 }
 0x8fb   :  { %10139 = vmatpush3.msra.mxu1 %v1434_v34  ;;  %v9323_v34 = vld [vmem:[%s12597_s5 + $0x28] sm:$0xff] }
 0x8fc   :  { %10140 = vmatprep.subr.mxu1 %v1433_v35 }
 0x8fd   :  { %10141 = vmatpush3.msra.mxu1 %v1433_v35  ;;  %v9322_v35 = vld [vmem:[%s12597_s5 + $0x20] sm:$0xff] }
 0x8fe   :  { %10142 = vmatprep.subr.mxu1 %v1432_v36 }
 0x8ff   :  { %10143 = vmatpush3.msra.mxu1 %v1432_v36 }
 0x900   :  { %10144 = vmatprep.subr.mxu1 %v1431_v37 }
 0x901   :  { %10145 = vmatpush3.msra.mxu1 %v1431_v37 }
 0x902   :  { %10146 = vmatprep.subr.mxu1 %v1430_v48 }
 0x903   :  { %10147 = vmatpush3.msra.mxu1 %v1430_v48 }
 0x904   :  { %10148 = vmatprep.subr.mxu1 %v1429_v5 }
 0x905   :  { %10149 = vmatpush3.msra.mxu1 %v1429_v5 }
 0x9ba   :  { %v10126_v14 = vpop.f32.mrf.mxu1 }
 0x9bb   :  { %v1350_v15 = vadd.f32 %v10126_v14, %v1063_v7  ;;  %v1428_v7 = vld [vmem:[%s12600_s8 + $0x8] sm:$0xff] }
 0x9bc   :  { %v1340_v16 = vpop.f32.mrf.mxu1  ;;  %10150 = vmatprep.subr.mxu1 %v1428_v7 }
 0x9bd   :  { %v1358_v17 = vadd.f32 %v9305_v13, %v1350_v15  ;;  %v1349_v18 = vadd.f32 %v1340_v16, %v1062_v10  ;;  %10151 = vmatpush3.msra.mxu1 %v1428_v7  ;;  %v9312_v10 = vld [vmem:[%s12601_s9 + $0x2] ss:$0 sm:$0xff] }
 0x9be   :  { %10152 = vmatprep.subr.mxu1 %v1427_v9 }
 0x9bf   :  { %v11290_v6 = vadd.f32 %v1358_v17, %v11111_v1  ;;  %v1357_v19 = vadd.f32 %v9305_v13, %v1349_v18  ;;  %10153 = vmatpush3.msra.mxu1 %v1427_v9  ;;  %v9315_v17 = vld [vmem:[%s12601_s9 + $0x3] ss:$0 sm:$0xff] }
 0x9c1   :  { %v11293_v8 = vadd.f32 %v1357_v19, %v11106_v0  ;;  %v1368_v20 = vsel %vm50_vm0, %v11290_v6, 0.0 }
 0x9c2   :  { %1369 = vadd.xlane.f32.xlu0 %v1368_v20 }
 0x9c3   :  { %v1365_v21 = vsel %vm50_vm0, %v11293_v8, 0.0 }
 0x9c4   :  { %1366 = vadd.xlane.f32.xlu1 %v1365_v21 }
 0xa4b   :  { %v1370_v22 = vpop.xlane.xlu0 %1369 }
 0xa4c   :  { %v1372_v23 = vmul.f32 0.03125, %v1370_v22 }
 0xa4d   :  { %v1367_v24 = vpop.xlane.xlu1 %1366 }
 0xa4e   :  { %v1374_v25 = vsub.f32 %v11290_v6, %v1372_v23  ;;  %v1371_v26 = vmul.f32 0.03125, %v1367_v24 }
 0xa50   :  { %v1373_v1 = vsub.f32 %v11293_v8, %v1371_v26  ;;  %v1376_v27 = vmul.f32 %v1374_v25, %v1374_v25  ;;  %v1392_v58 = vmul.f32 %v9308_v55, %v1374_v25 }
 0xa52   :  { %v1380_v0 = vsel %vm50_vm0, %v1376_v27, 0.0  ;;  %v1375_v28 = vmul.f32 %v1373_v1, %v1373_v1  ;;  %v1391_v60 = vmul.f32 %v9308_v55, %v1373_v1 }
 0xa53   :  { %1381 = vadd.xlane.f32.xlu1 %v1380_v0 }
 0xa54   :  { %v1377_v29 = vsel %vm50_vm0, %v1375_v28, 0.0 }
 0xa55   :  { %1378 = vadd.xlane.f32.xlu0 %v1377_v29 }
 0xadc   :  { %v1382_v38 = vpop.xlane.xlu1 %1381 }
 0xadd   :  { %v1384_v39 = vmul.f32 0.032258064, %v1382_v38 }
 0xade   :  { %v1379_v40 = vpop.xlane.xlu0 %1378 }
 0xadf   :  { %10758 = vrsqrt.f32 %v1384_v39  ;;  %v1383_v41 = vmul.f32 0.032258064, %v1379_v40  ;;  %vm1402_vm7 = vcmp.eq.f32.partialorder %v1384_v39, inf  ;;  %v1405_v44 = vand.u32 2147483648, %v1384_v39 }
 0xae0   :  { %vm1404_vm8 = vcmp.eq.f32.partialorder %v1384_v39, 0.0 }
 0xae1   :  { %10760 = vrsqrt.f32 %v1383_v41  ;;  %vm1395_vm9 = vcmp.eq.f32.partialorder %v1383_v41, inf  ;;  %v1398_v51 = vand.u32 2147483648, %v1383_v41  ;;  %vm1397_vm10 = vcmp.eq.f32.partialorder %v1383_v41, 0.0 }
 0xaec   :  { %v10759_v42 = vpop.eup %10758 }
 0xaed   :  { %v1401_v43 = vmul.f32 %v10759_v42, %v1384_v39 }
 0xaee   :  { %v10761_v45 = vpop.eup %10760 }
 0xaef   :  { %v1403_v47 = vsel %vm1402_vm7, %v1384_v39, %v1401_v43  ;;  %v1394_v50 = vmul.f32 %v10761_v45, %v1383_v41 }
 0xaf0   :  { %v1406_v49 = vsel %vm1404_vm8, %v1405_v44, %v1403_v47 }
 0xaf1   :  { %v1408_v46 = vadd.f32 1e-06, %v1406_v49  ;;  %v1396_v52 = vsel %vm1395_vm9, %v1383_v41, %v1394_v50 }
 0xaf2   :  { %v1399_v53 = vsel %vm1397_vm10, %v1398_v51, %v1396_v52 }
 0xaf3   :  { %10762 = vrcp.f32 %v1408_v46  ;;  %v1407_v54 = vadd.f32 1e-06, %v1399_v53  ;;  %v9320_v53 = vld [vmem:[%s12601_s9 + $0xc] ss:$0 sm:$0xff] }
 0xaf5   :  { %10764 = vrcp.f32 %v1407_v54 }
 0xb00   :  { %v10763_v57 = vpop.eup %10762 }
 0xb01   :  { %v1412_v62 = vmul.f32 %v10763_v57, %v1392_v58 }
 0xb02   :  { %v10765_v61 = vpop.eup %10764 }
 0xb03   :  { %v1410_v2 = vmul.f32 %v10765_v61, %v1391_v60  ;;  %v1420_v4 = vadd.f32 %v9309_v63, %v1412_v62  ;;  %v9321_v61 = vld [vmem:[%s12601_s9 + $0xd] ss:$0 sm:$0xff] }
 0xb05   :  { %v1419_v3 = vadd.f32 %v9309_v63, %v1410_v2 }
 0xb07   :  { %10135 = vmatprep.mubr.msk.f32.mxu0 %vm50_vm0, %v1419_v3  ;;  %v9332_v3 = vld [vmem:[%s12601_s9 + $0x8] ss:$0 sm:$0xff] }
 0xb08   :  { %10136 = vmatmul.mubr.msk.f32.vlgmr.msra.gmra.mxu0 %vm50_vm0, %v1420_v4 }
 0xb09   :  { %10158 = vmatpush3.msra.mxu0 %v9325_v32 }
 0xb0a   :  { %10159 = vmatprep.subr.mxu0 %v9324_v33 }
 0xb0b   :  { %10160 = vmatpush3.msra.mxu0 %v9324_v33 }
 0xb0c   :  { %10161 = vmatprep.subr.mxu0 %v9323_v34 }
 0xb0d   :  { %10162 = vmatpush3.msra.mxu0 %v9323_v34 }
 0xb0e   :  { %10163 = vmatprep.subr.mxu0 %v9322_v35 }
 0xb0f   :  { %10164 = vmatpush3.msra.mxu0 %v9322_v35 }
 0xbc8   :  { %v10137_v11 = vpop.f32.mrf.mxu0 }
 0xbc9   :  { %v1521_v12 = vadd.f32 %v10137_v11, %v9312_v10 }
 0xbca   :  { %v1515_v13 = vpop.f32.mrf.mxu0 }
 0xbcb   :  { %v1516_v14 = vadd.f32 %v9312_v10, %v1515_v13  ;;  %v1525_v16 = vmax.f32 %v1521_v12, 0.0 }
 0xbcd   :  { %v1524_v15 = vmax.f32 %v1516_v14, 0.0 }
 0xbcf   :  { %10154 = vmatprep.mubr.msk.f32.mxu1 %vm1532_vm11, %v1524_v15 }
 0xbd0   :  { %10155 = vmatmul.mubr.msk.f32.vlgmr.msra.gmra.mxu1 %vm1532_vm11, %v1525_v16 }
 0xc90   :  { %v10156_v18 = vpop.f32.mrf.mxu1 }
 0xc91   :  { %v1611_v19 = vadd.f32 %v10156_v18, %v9315_v17 }
 0xc92   :  { %v1605_v20 = vpop.f32.mrf.mxu1 }
 0xc93   :  { %v11356_v21 = vadd.f32 %v1611_v19, %v11290_v6  ;;  %v1606_v22 = vadd.f32 %v9315_v17, %v1605_v20 }
 0xc95   :  { %v11359_v23 = vadd.f32 %v1606_v22, %v11293_v8  ;;  %v1623_v24 = vsel %vm50_vm0, %v11356_v21, 0.0 }
 0xc96   :  { %1624 = vadd.xlane.f32.xlu1 %v1623_v24 }
 0xc97   :  { %v1620_v25 = vsel %vm50_vm0, %v11359_v23, 0.0 }
 0xc98   :  { %1621 = vadd.xlane.f32.xlu0 %v1620_v25 }
 0xd1f   :  { %v1625_v26 = vpop.xlane.xlu1 %1624 }
 0xd20   :  { %v1627_v1 = vmul.f32 0.03125, %v1625_v26 }
 0xd21   :  { %v1622_v27 = vpop.xlane.xlu0 %1621 }
 0xd22   :  { %v1629_v0 = vsub.f32 %v11356_v21, %v1627_v1  ;;  %v1626_v28 = vmul.f32 0.03125, %v1622_v27 }
 0xd24   :  { %v1628_v6 = vsub.f32 %v11359_v23, %v1626_v28  ;;  %v1631_v29 = vmul.f32 %v1629_v0, %v1629_v0  ;;  %v1647_v55 = vmul.f32 %v9320_v53, %v1629_v0 }
 0xd26   :  { %v1635_v8 = vsel %vm50_vm0, %v1631_v29, 0.0  ;;  %v1630_v30 = vmul.f32 %v1628_v6, %v1628_v6  ;;  %v1646_v57 = vmul.f32 %v9320_v53, %v1628_v6 }
 0xd27   :  { %1636 = vadd.xlane.f32.xlu1 %v1635_v8 }
 0xd28   :  { %v1632_v31 = vsel %vm50_vm0, %v1630_v30, 0.0 }
 0xd29   :  { %1633 = vadd.xlane.f32.xlu0 %v1632_v31 }
 0xdb0   :  { %v1637_v36 = vpop.xlane.xlu1 %1636 }
 0xdb1   :  { %v1639_v37 = vmul.f32 0.032258064, %v1637_v36 }
 0xdb2   :  { %v1634_v38 = vpop.xlane.xlu0 %1633 }
 0xdb3   :  { %10766 = vrsqrt.f32 %v1639_v37  ;;  %v1638_v39 = vmul.f32 0.032258064, %v1634_v38  ;;  %vm1657_vm12 = vcmp.eq.f32.partialorder %v1639_v37, inf  ;;  %v1660_v42 = vand.u32 2147483648, %v1639_v37 }
 0xdb4   :  { %vm1659_vm13 = vcmp.eq.f32.partialorder %v1639_v37, 0.0 }
 0xdb5   :  { %10768 = vrsqrt.f32 %v1638_v39  ;;  %vm1650_vm14 = vcmp.eq.f32.partialorder %v1638_v39, inf  ;;  %v1653_v50 = vand.u32 2147483648, %v1638_v39  ;;  %vm1652_vm15 = vcmp.eq.f32.partialorder %v1638_v39, 0.0 }
 0xdc0   :  { %v10767_v40 = vpop.eup %10766 }
 0xdc1   :  { %v1656_v41 = vmul.f32 %v10767_v40, %v1639_v37 }
 0xdc2   :  { %v10769_v43 = vpop.eup %10768 }
 0xdc3   :  { %v1658_v44 = vsel %vm1657_vm12, %v1639_v37, %v1656_v41  ;;  %v1649_v47 = vmul.f32 %v10769_v43, %v1638_v39 }
 0xdc4   :  { %v1661_v45 = vsel %vm1659_vm13, %v1660_v42, %v1658_v44 }
 0xdc5   :  { %v1663_v49 = vadd.f32 1e-06, %v1661_v45  ;;  %v1651_v46 = vsel %vm1650_vm14, %v1638_v39, %v1649_v47  ;;  %v9327_v39 = vld [vmem:[%s12598_s6 + $0x20] sm:$0xff] }
 0xdc6   :  { %v1654_v51 = vsel %vm1652_vm15, %v1653_v50, %v1651_v46 }
 0xdc7   :  { %10770 = vrcp.f32 %v1663_v49  ;;  %v1662_v52 = vadd.f32 1e-06, %v1654_v51 }
 0xdc9   :  { %10772 = vrcp.f32 %v1662_v52 }
 0xdd4   :  { %v10771_v54 = vpop.eup %10770 }
 0xdd5   :  { %v1667_v60 = vmul.f32 %v10771_v54, %v1647_v55 }
 0xdd6   :  { %v10773_v58 = vpop.eup %10772 }
 0xdd7   :  { %v1665_v62 = vmul.f32 %v10773_v58, %v1646_v57  ;;  %v1675_v2 = vadd.f32 %v9321_v61, %v1667_v60 }
 0xdd9   :  { %v1674_v63 = vadd.f32 %v9321_v61, %v1665_v62 }
 0xddb   :  { %10165 = vmatprep.mubr.msk.f32.mxu0 %vm50_vm0, %v1674_v63 }
 0xddc   :  { %10166 = vmatmul.mubr.msk.f32.vlgmr.msra.gmra.mxu0 %vm50_vm0, %v1675_v2 }
 0xe9c   :  { %v10167_v4 = vpop.f32.mrf.mxu0 }
 0xe9d   :  { %v11392_v48 = vadd.f32 %v10167_v4, %v9332_v3 }
 0xe9e   :  { %v1768_v5 = vpop.f32.mrf.mxu0 }
 0xe9f   :  { %v11394_v7 = vadd.f32 %v9332_v3, %v1768_v5  ;;  %1781 = vrot.lane.b32.xlu0 %v11392_v48, %s11034_s30  ;;  %v9328_v3 = vld [vmem:[%s12598_s6 + $0x28] sm:$0xff] }
 0xea1   :  { %1779 = vrot.lane.b32.xlu1 %v11394_v7, %s11034_s30  ;;  %10172 = vmatprep.mubr.msk.f32.mxu0 %vm213_vm5, %v11394_v7 }
 0xf11   :  { %v1782_v9 = vpop.permute.xlu0 %1781 }
 0xf12   :  { %10168 = vmatprep.subr.msk.mxu0 %vm213_vm5, %v1782_v9 }
 0xf13   :  { %10169 = vmatpush3.xpose.msk.msra.mxu0 %vm213_vm5, %v1782_v9  ;;  %v1780_v10 = vpop.permute.xlu1 %1779 }
 0xf14   :  { %10170 = vmatprep.subr.msk.mxu0 %vm213_vm5, %v1780_v10 }
 0xf17   :  { %10171 = vmatpush3.xpose.msk.msra.mxu0 %vm213_vm5, %v1780_v10 }
 0xf1a   :  { %10173 = vmatmul.mubr.msk.f32.vlgmr.msra.gmra.mxu0 %vm213_vm5, %v11392_v48 }
 0xfda   :  { %v10174_v11 = vpop.f32.mrf.mxu0 }
 0xfdb   :  { %v1867_v12 = vmul.f32 0.35355338, %v10174_v11 }
 0xfdc   :  { %v1857_v13 = vpop.f32.mrf.mxu0 }
 0xfdd   :  { %v1866_v14 = vmul.f32 0.35355338, %v1857_v13  ;;  %v1869_v15 = vadd.f32 %v1867_v12, %v11177_v56 }
 0xfdf   :  { %v1873_v16 = vsel %vm301_vm6, %v1869_v15, -inf  ;;  %v1868_v17 = vadd.f32 %v1866_v14, %v11182_v59 }
 0xfe0   :  { %1874 = vmax.xlane.f32.xlu0 %v1873_v16 }
 0xfe1   :  { %v1870_v18 = vsel %vm301_vm6, %v1868_v17, -inf }
 0xfe2   :  { %1871 = vmax.xlane.f32.xlu1 %v1870_v18 }
0x1069   :  { %v1875_v19 = vpop.xlane.xlu0 %1874 }
0x106a   :  { %v1877_v20 = vsub.f32 %v1869_v15, %v1875_v19 }
0x106b   :  { %v1872_v22 = vpop.xlane.xlu1 %1871 }
0x106c   :  { %v1880_v24 = vmul.f32 1.442695, %v1877_v20  ;;  %v1876_v25 = vsub.f32 %v1868_v17, %v1872_v22 }
0x106e   :  { %10774 = vpow2.f32 %v1880_v24  ;;  %v1878_v26 = vmul.f32 1.442695, %v1876_v25 }
0x1070   :  { %10776 = vpow2.f32 %v1878_v26 }
0x107b   :  { %v10775_v1 = vpop.eup %10774 }
0x107c   :  { %v1885_v27 = vsel %vm301_vm6, %v10775_v1, 0.0 }
0x107d   :  { %v10777_v0 = vpop.eup %10776  ;;  %1886 = vadd.xlane.f32.xlu1 %v1885_v27 }
0x107e   :  { %v1882_v28 = vsel %vm301_vm6, %v10777_v0, 0.0 }
0x107f   :  { %1883 = vadd.xlane.f32.xlu0 %v1882_v28 }
0x108e   :  { %1892 = vrot.lane.b32.xlu1 %v11394_v7, %s11037_s0 }
0x1092   :  { %1985 = vrot.lane.b32.xlu1 %v11392_v48, %s11036_s12 }
0x1095   :  { %1894 = vrot.lane.b32.xlu0 %v11392_v48, %s11037_s0 }
0x1096   :  { %1983 = vrot.lane.b32.xlu1 %v11394_v7, %s11036_s12 }
0x1099   :  { %1979 = vrot.lane.b32.xlu0 %v11394_v7, %s11035_s11 }
0x109a   :  { %1981 = vrot.lane.b32.xlu1 %v11392_v48, %s11035_s11 }
0x1106   :  { %v1887_v6 = vpop.xlane.xlu1 %1886 }
0x1107   :  { %10778 = vrcp.f32 %v1887_v6 }
0x1108   :  { %v1884_v29 = vpop.xlane.xlu0 %1883 }
0x1109   :  { %10780 = vrcp.f32 %v1884_v29  ;;  %v11007_v29 = vld [vmem:[%s12594_s2] sm:$0xff] }
0x110a   :  { %v1893_v8 = vpop.permute.xlu1 %1892 }
0x110c   :  { %v1895_v30 = vpop.permute.xlu0 %1894 }
0x110d   :  { %10175 = vmatprep.subr.mxu1 %v1895_v30 }
0x110e   :  { %10176 = vmatpush3.msra.mxu1 %v1895_v30  ;;  %v1986_v31 = vpop.permute.xlu1 %1985 }
0x110f   :  { %10177 = vmatprep.subr.mxu1 %v1893_v8 }
0x1110   :  { %10178 = vmatpush3.msra.mxu1 %v1893_v8  ;;  %v1980_v36 = vpop.permute.xlu0 %1979 }
0x1111   :  { %10182 = vmatprep.subr.msk.mxu1 %vm213_vm5, %v1986_v31 }
0x1112   :  { %v1984_v37 = vpop.permute.xlu1 %1983 }
0x1114   :  { %v10779_v32 = vpop.eup %10778 }
0x1115   :  { %v1891_v35 = vmul.f32 %v10779_v32, %v10775_v1 }
0x1116   :  { %v10781_v33 = vpop.eup %10780  ;;  %v1982_v38 = vpop.permute.xlu1 %1981 }
0x1117   :  { %v1889_v34 = vmul.f32 %v10781_v33, %v10777_v0  ;;  %v11006_v0 = vld [vmem:[%s12594_s2 + $0x8] sm:$0xff] }
0x1119   :  { %10179 = vmatprep.mubr.msk.f32.mxu1 %vm301_vm6, %v1889_v34 }
0x111a   :  { %10180 = vmatmul.mubr.msk.f32.vlgmr.msra.gmra.mxu1 %vm301_vm6, %v1891_v35 }
0x111b   :  { %10183 = vmatpush3.xpose.msk.msra.mxu1 %vm213_vm5, %v1986_v31  ;;  %10186 = vmatprep.mubr.msk.f32.mxu1 %vm213_vm5, %v1980_v36 }
0x111c   :  { %10184 = vmatprep.subr.msk.mxu1 %vm213_vm5, %v1984_v37 }
0x111f   :  { %10185 = vmatpush3.xpose.msk.msra.mxu1 %vm213_vm5, %v1984_v37 }
0x1120   :  { %10201 = vmatprep.subr.mxu1 %v9327_v39 }
0x1122   :  { %10187 = vmatmul.mubr.msk.f32.vlgmr.msra.gmra.mxu1 %vm213_vm5, %v1982_v38 }
0x1123   :  { %10202 = vmatpush3.msra.mxu1 %v9327_v39 }
0x11da   :  { %v10181_v40 = vpop.f32.mrf.mxu1 }
0x11dc   :  { %v1970_v41 = vpop.f32.mrf.mxu1 }
0x11dd   :  { %10203 = vmatprep.mubr.msk.f32.mxu1 %vm213_vm5, %v1970_v41 }
0x11de   :  { %10204 = vmatmul.mubr.msk.f32.vlgmr.msra.gmra.mxu1 %vm213_vm5, %v10181_v40 }
0x11e2   :  { %v10188_v42 = vpop.f32.mrf.mxu1 }
0x11e3   :  { %v2071_v43 = vmul.f32 0.35355338, %v10188_v42 }
0x11e4   :  { %v2061_v44 = vpop.f32.mrf.mxu1 }
0x11e5   :  { %v2070_v45 = vmul.f32 0.35355338, %v2061_v44  ;;  %v2073_v47 = vadd.f32 %v2071_v43, %v11177_v56 }
0x11e7   :  { %v2077_v49 = vsel %vm301_vm6, %v2073_v47, -inf  ;;  %v2072_v50 = vadd.f32 %v2070_v45, %v11182_v59 }
0x11e8   :  { %2078 = vmax.xlane.f32.xlu1 %v2077_v49 }
0x11e9   :  { %v2074_v46 = vsel %vm301_vm6, %v2072_v50, -inf }
0x11ea   :  { %2075 = vmax.xlane.f32.xlu0 %v2074_v46 }
0x11f9   :  { %2096 = vrot.lane.b32.xlu1 %v11394_v7, %s11038_s17 }
0x11fd   :  { %2351 = vrot.lane.b32.xlu1 %v11392_v48, %s11039_s18 }
0x1201   :  { %2349 = vrot.lane.b32.xlu1 %v11394_v7, %s11039_s18 }
0x1205   :  { %2347 = vrot.lane.b32.xlu1 %v11392_v48, %s11040_s19 }
0x1209   :  { %2636 = vrot.lane.b32.xlu1 %v11394_v7, %s11041_s20 }
0x120d   :  { %2634 = vrot.lane.b32.xlu1 %v11392_v48, %s11042_s21 }
0x1271   :  { %v2079_v56 = vpop.xlane.xlu1 %2078 }
0x1272   :  { %v2081_v59 = vsub.f32 %v2073_v47, %v2079_v56 }
0x1273   :  { %v2076_v51 = vpop.xlane.xlu0 %2075 }
0x1274   :  { %v2084_v52 = vmul.f32 1.442695, %v2081_v59  ;;  %v2080_v53 = vsub.f32 %v2072_v50, %v2076_v51 }
0x1275   :  { %v2097_v2 = vpop.permute.xlu1 %2096 }
0x1276   :  { %10782 = vpow2.f32 %v2084_v52  ;;  %v2082_v54 = vmul.f32 1.442695, %v2080_v53 }
0x1278   :  { %10784 = vpow2.f32 %v2082_v54 }
0x1279   :  { %v2352_v11 = vpop.permute.xlu1 %2351 }
0x127d   :  { %v2350_v14 = vpop.permute.xlu1 %2349 }
0x1281   :  { %v2348_v17 = vpop.permute.xlu1 %2347 }
0x1283   :  { %v10783_v55 = vpop.eup %10782 }
0x1284   :  { %v2089_v57 = vsel %vm301_vm6, %v10783_v55, 0.0 }
0x1285   :  { %v10785_v58 = vpop.eup %10784  ;;  %2090 = vadd.xlane.f32.xlu0 %v2089_v57  ;;  %v2637_v19 = vpop.permute.xlu1 %2636 }
0x1286   :  { %v2086_v60 = vsel %vm301_vm6, %v10785_v58, 0.0 }
0x1289   :  { %2087 = vadd.xlane.f32.xlu0 %v2086_v60  ;;  %v2635_v20 = vpop.permute.xlu1 %2634 }
0x129f   :  { %2098 = vrot.lane.b32.xlu0 %v11392_v48, %s11038_s17 }
0x12a3   :  { %2345 = vrot.lane.b32.xlu0 %v11394_v7, %s11040_s19 }
0x12a7   :  { %2638 = vrot.lane.b32.xlu0 %v11392_v48, %s11041_s20 }
0x12ab   :  { %2632 = vrot.lane.b32.xlu0 %v11394_v7, %s11042_s21 }
0x130e   :  { %v2091_v61 = vpop.xlane.xlu0 %2090 }
0x130f   :  { %10786 = vrcp.f32 %v2091_v61 }
0x1312   :  { %v2088_v62 = vpop.xlane.xlu0 %2087 }
0x1313   :  { %10788 = vrcp.f32 %v2088_v62 }
0x1316   :  { %v2099_v63 = vpop.permute.xlu0 %2098 }
0x1317   :  { %10189 = vmatprep.subr.mxu0 %v2099_v63 }
0x1318   :  { %10190 = vmatpush3.msra.mxu0 %v2099_v63 }
0x1319   :  { %10191 = vmatprep.subr.mxu0 %v2097_v2 }
0x131a   :  { %10192 = vmatpush3.msra.mxu0 %v2097_v2  ;;  %v2346_v12 = vpop.permute.xlu0 %2345 }
0x131b   :  { %10196 = vmatprep.subr.mxu0 %v9328_v3 }
0x131c   :  { %v10787_v4 = vpop.eup %10786 }
0x131d   :  { %v2095_v10 = vmul.f32 %v10787_v4, %v10783_v55 }
0x131e   :  { %v2639_v16 = vpop.permute.xlu0 %2638 }
0x1320   :  { %v10789_v5 = vpop.eup %10788 }
0x1321   :  { %v2093_v9 = vmul.f32 %v10789_v5, %v10785_v58  ;;  %v9329_v58 = vld [vmem:[%s12598_s6 + $0x30] sm:$0xff] }
0x1322   :  { %v2633_v18 = vpop.permute.xlu0 %2632 }
0x1323   :  { %10193 = vmatprep.mubr.msk.f32.mxu0 %vm301_vm6, %v2093_v9 }
0x1324   :  { %10194 = vmatmul.mubr.msk.f32.vlgmr.msra.gmra.mxu0 %vm301_vm6, %v2095_v10 }
0x1325   :  { %10197 = vmatpush3.msra.mxu0 %v9328_v3 }
0x1326   :  { %10206 = vmatprep.subr.msk.mxu0 %vm213_vm5, %v2352_v11 }
0x13e4   :  { %v10195_v13 = vpop.f32.mrf.mxu0 }
0x13e6   :  { %v2174_v15 = vpop.f32.mrf.mxu0 }
0x13e7   :  { %10198 = vmatprep.mubr.msk.f32.mxu0 %vm213_vm5, %v2174_v15 }
0x13e8   :  { %10199 = vmatmul.mubr.msk.f32.vlgmr.msra.gmra.mxu0 %vm213_vm5, %v10195_v13 }
0x13e9   :  { %10207 = vmatpush3.xpose.msk.msra.mxu0 %vm213_vm5, %v2352_v11  ;;  %10210 = vmatprep.mubr.msk.f32.mxu0 %vm213_vm5, %v2346_v12  ;;  %v10205_v11 = vpop.f32.mrf.mxu1 }
0x13ea   :  { %10208 = vmatprep.subr.msk.mxu0 %vm213_vm5, %v2350_v14 }
0x13eb   :  { %v2336_v12 = vpop.f32.mrf.mxu1 }
0x13ed   :  { %10209 = vmatpush3.xpose.msk.msra.mxu0 %vm213_vm5, %v2350_v14 }
0x13ee   :  { %10225 = vmatprep.subr.msk.mxu0 %vm213_vm5, %v2639_v16 }
0x13f0   :  { %10211 = vmatmul.mubr.msk.f32.vlgmr.msra.gmra.mxu0 %vm213_vm5, %v2348_v17 }
0x13f1   :  { %10226 = vmatpush3.xpose.msk.msra.mxu0 %vm213_vm5, %v2639_v16  ;;  %10229 = vmatprep.mubr.msk.f32.mxu0 %vm213_vm5, %v2633_v18 }
0x13f2   :  { %10227 = vmatprep.subr.msk.mxu0 %vm213_vm5, %v2637_v19 }
0x13f5   :  { %10228 = vmatpush3.xpose.msk.msra.mxu0 %vm213_vm5, %v2637_v19 }
0x13f8   :  { %10230 = vmatmul.mubr.msk.f32.vlgmr.msra.gmra.mxu0 %vm213_vm5, %v2635_v20  ;;  %v9330_v20 = vld [vmem:[%s12598_s6 + $0x38] sm:$0xff] }
0x14a8   :  { %v11484_v22 = vpop.f32.mrf.mxu0 }
0x14aa   :  { %v11486_v24 = vpop.f32.mrf.mxu0 }
0x14b0   :  { %v10212_v25 = vpop.f32.mrf.mxu0 }
0x14b1   :  { %v2437_v26 = vmul.f32 0.35355338, %v10212_v25  ;;  %v2342_v25 = vadd.f32 %v10205_v11, %v11484_v22 }
0x14b2   :  { %v2427_v1 = vpop.f32.mrf.mxu0 }
0x14b3   :  { %v2436_v27 = vmul.f32 0.35355338, %v2427_v1  ;;  %v2439_v28 = vadd.f32 %v11006_v0, %v2437_v26  ;;  %v2337_v1 = vadd.f32 %v2336_v12, %v11486_v24 }
0x14b5   :  { %v2443_v6 = vsel %vm301_vm6, %v2439_v28, -inf  ;;  %v2438_v8 = vadd.f32 %v11007_v29, %v2436_v27 }
0x14b6   :  { %2444 = vmax.xlane.f32.xlu1 %v2443_v6 }
0x14b7   :  { %v2440_v30 = vsel %vm301_vm6, %v2438_v8, -inf }
0x14b8   :  { %2441 = vmax.xlane.f32.xlu0 %v2440_v30  ;;  %v10231_v31 = vpop.f32.mrf.mxu0 }
0x14b9   :  { %v2724_v56 = vmul.f32 0.35355338, %v10231_v31 }
0x14ba   :  { %v2714_v32 = vpop.f32.mrf.mxu0 }
0x14bb   :  { %v2723_v33 = vmul.f32 0.35355338, %v2714_v32  ;;  %v2726_v59 = vadd.f32 %v11006_v0, %v2724_v56 }
0x14bd   :  { %v2725_v34 = vadd.f32 %v11007_v29, %v2723_v33  ;;  %v2730_v51 = vsel %vm301_vm6, %v2726_v59, -inf }
0x14bf   :  { %v2727_v35 = vsel %vm301_vm6, %v2725_v34, -inf }
0x14c7   :  { %2462 = vrot.lane.b32.xlu1 %v11394_v7, %s11043_s26 }
0x14eb   :  { %2728 = vmax.xlane.f32.xlu1 %v2727_v35  ;;  %v11535_v35 = vld [vmem:[%s12593_s1] sm:$0xff] }
0x153f   :  { %v2445_v36 = vpop.xlane.xlu1 %2444 }
0x1540   :  { %v2447_v37 = vsub.f32 %v2439_v28, %v2445_v36 }
0x1541   :  { %v2442_v38 = vpop.xlane.xlu0 %2441 }
0x1542   :  { %v2450_v39 = vmul.f32 1.442695, %v2447_v37  ;;  %v2446_v40 = vsub.f32 %v2438_v8, %v2442_v38  ;;  %v9367_v8 = vld [vmem:[%s12601_s9 + $0x9] ss:$0 sm:$0xff] }
0x1543   :  { %v2463_v47 = vpop.permute.xlu1 %2462  ;;  %v11545_v38 = vld [vmem:[%s12593_s1 + $0x8] sm:$0xff]  ;;  %s9254_s1 = sshll.u32 %s11045_s24, 4  ;;  %s9255_s1 = int_to_ptr.vmem [resolvable:$true] %s9254_s1 }
0x1544   :  { %10790 = vpow2.f32 %v2450_v39  ;;  %v2448_v41 = vmul.f32 1.442695, %v2446_v40  ;;  %v3249_v39 = vsel %vm50_vm0, %v11535_v35, 0.0  ;;  %s11012_s25 = scalar_lea.vmem %s9255_s1, 256  ;;  %p11017_p1 = scmp.lt.s32.totalorder %s9255_s1, %s9255_s1 }
0x1545   :  { %p11013_p0 = scmp.ne.s32.totalorder %s9255_s1, %s11012_s25  ;;  %p11018_p2 = scmp.lt.s32.totalorder %s11012_s25, %s11012_s25 }
0x1546   :  { %10792 = vpow2.f32 %v2448_v41 }
0x1547   :  { %p11019_p3 = por %p11018_p2, %p11017_p1 }
0x1549   :  { %p11020_p4 = pnand %p11019_p3, %p11013_p0 }
0x1551   :  { %v10791_v42 = vpop.eup %10790 }
0x1552   :  { %v2455_v43 = vsel %vm301_vm6, %v10791_v42, 0.0 }
0x1553   :  { %v10793_v44 = vpop.eup %10792  ;;  %2456 = vadd.xlane.f32.xlu0 %v2455_v43 }
0x1554   :  { %v2452_v45 = vsel %vm301_vm6, %v10793_v44, 0.0 }
0x1557   :  { %2453 = vadd.xlane.f32.xlu0 %v2452_v45 }
0x156d   :  { %2464 = vrot.lane.b32.xlu0 %v11392_v48, %s11043_s26 }
0x1574   :  { %v2729_v49 = vpop.xlane.xlu1 %2728 }
0x1575   :  { %v2733_v50 = vsub.f32 %v2725_v34, %v2729_v49 }
0x1577   :  { %v2735_v46 = vmul.f32 1.442695, %v2733_v50 }
0x1579   :  { %10794 = vpow2.f32 %v2735_v46 }
0x1586   :  { %v10795_v52 = vpop.eup %10794 }
0x1587   :  { %v2739_v53 = vsel %vm301_vm6, %v10795_v52, 0.0 }
0x158c   :  { %2731 = vmax.xlane.f32.xlu0 %v2730_v51 }
0x1590   :  { %2740 = vadd.xlane.f32.xlu0 %v2739_v53 }
0x15a6   :  { %2751 = vrot.lane.b32.xlu0 %v11392_v48, %s11044_s27 }
0x15dc   :  { %v2457_v54 = vpop.xlane.xlu0 %2456 }
0x15dd   :  { %10796 = vrcp.f32 %v2457_v54 }
0x15e0   :  { %v2454_v55 = vpop.xlane.xlu0 %2453 }
0x15e1   :  { %10798 = vrcp.f32 %v2454_v55 }
0x15e4   :  { %v2465_v57 = vpop.permute.xlu0 %2464 }
0x15e5   :  { %10213 = vmatprep.subr.mxu1 %v2465_v57 }
0x15e6   :  { %10214 = vmatpush3.msra.mxu1 %v2465_v57 }
0x15e7   :  { %10215 = vmatprep.subr.mxu1 %v2463_v47 }
0x15e8   :  { %10216 = vmatpush3.msra.mxu1 %v2463_v47 }
0x15e9   :  { %10220 = vmatprep.subr.mxu1 %v9329_v58 }
0x15ea   :  { %v10797_v60 = vpop.eup %10796 }
0x15eb   :  { %v2461_v63 = vmul.f32 %v10797_v60, %v10791_v42 }
0x15ee   :  { %v10799_v61 = vpop.eup %10798 }
0x15ef   :  { %v2459_v62 = vmul.f32 %v10799_v61, %v10793_v44  ;;  %v9375_v61 = vld [vmem:[%s12599_s7 + $0x38] sm:$0xff] }
0x15f0   :  { %10244 = vmatprep.subr.mxu0 %v9375_v61 }
0x15f1   :  { %10217 = vmatprep.mubr.msk.f32.mxu1 %vm301_vm6, %v2459_v62  ;;  %v9374_v62 = vld [vmem:[%s12599_s7 + $0x30] sm:$0xff]  ;;  %10245 = vmatpush3.msra.mxu0 %v9375_v61 }
0x15f2   :  { %10218 = vmatmul.mubr.msk.f32.vlgmr.msra.gmra.mxu1 %vm301_vm6, %v2461_v63  ;;  %v9373_v63 = vld [vmem:[%s12599_s7 + $0x28] sm:$0xff]  ;;  %10246 = vmatprep.subr.mxu0 %v9374_v62 }
0x15f3   :  { %10221 = vmatpush3.msra.mxu1 %v9329_v58  ;;  %10247 = vmatpush3.msra.mxu0 %v9374_v62 }
0x15f4   :  { %10248 = vmatprep.subr.mxu0 %v9373_v63 }
0x15f5   :  { %10249 = vmatpush3.msra.mxu0 %v9373_v63 }
0x1615   :  { %v2732_v48 = vpop.xlane.xlu0 %2731 }
0x1616   :  { %v2734_v2 = vsub.f32 %v2726_v59, %v2732_v48  ;;  %v9372_v48 = vld [vmem:[%s12599_s7 + $0x20] sm:$0xff] }
0x1617   :  { %10250 = vmatprep.subr.mxu0 %v9372_v48 }
0x1618   :  { %v2737_v3 = vmul.f32 1.442695, %v2734_v2  ;;  %10251 = vmatpush3.msra.mxu0 %v9372_v48  ;;  %v11592_v2 = vld [vmem:[%s12597_s5 + $0x58] sm:$0xff]  ;;  %v9400_v48 = vld [vmem:[%s12597_s5 + $0x40] sm:$0xff] }
0x1619   :  { %v2741_v4 = vpop.xlane.xlu0 %2740  ;;  %10274 = vmatprep.subr.mxu0 %v11592_v2 }
0x161a   :  { %10800 = vpow2.f32 %v2737_v3  ;;  %v9384_v3 = vld [vmem:[%s12600_s8 + $0x78] sm:$0xff] }
0x161b   :  { %10802 = vrcp.f32 %v2741_v4  ;;  %v9383_v4 = vld [vmem:[%s12600_s8 + $0x70] sm:$0xff] }
0x161d   :  { %v2752_v5 = vpop.permute.xlu0 %2751 }
0x161e   :  { %10232 = vmatprep.subr.mxu1 %v2752_v5 }
0x1627   :  { %v10801_v9 = vpop.eup %10800 }
0x1628   :  { %v2742_v10 = vsel %vm301_vm6, %v10801_v9, 0.0  ;;  %v10803_v13 = vpop.eup %10802 }
0x1629   :  { %2743 = vadd.xlane.f32.xlu1 %v2742_v10  ;;  %v2746_v17 = vmul.f32 %v10803_v13, %v10795_v52 }
0x163a   :  { %2749 = vrot.lane.b32.xlu1 %v11394_v7, %s11044_s27 }
0x16b2   :  { %v10219_v14 = vpop.f32.mrf.mxu1  ;;  %v2744_v15 = vpop.xlane.xlu1 %2743 }
0x16b3   :  { %10804 = vrcp.f32 %v2744_v15 }
0x16b4   :  { %v2540_v16 = vpop.f32.mrf.mxu1 }
0x16b5   :  { %10222 = vmatprep.mubr.msk.f32.mxu1 %vm213_vm5, %v2540_v16 }
0x16b6   :  { %10223 = vmatmul.mubr.msk.f32.vlgmr.msra.gmra.mxu1 %vm213_vm5, %v10219_v14  ;;  %v2750_v18 = vpop.permute.xlu1 %2749 }
0x16b7   :  { %10233 = vmatpush3.msra.mxu1 %v2752_v5  ;;  %10236 = vmatprep.mubr.msk.f32.mxu1 %vm301_vm6, %v2746_v17  ;;  %v9382_v5 = vld [vmem:[%s12600_s8 + $0x68] sm:$0xff] }
0x16b8   :  { %10234 = vmatprep.subr.mxu1 %v2750_v18 }
0x16b9   :  { %10235 = vmatpush3.msra.mxu1 %v2750_v18 }
0x16ba   :  { %10239 = vmatprep.subr.mxu1 %v9330_v20 }
0x16c0   :  { %v10805_v7 = vpop.eup %10804 }
0x16c1   :  { %v2748_v19 = vmul.f32 %v10805_v7, %v10801_v9  ;;  %v9381_v9 = vld [vmem:[%s12600_s8 + $0x60] sm:$0xff] }
0x16c3   :  { %10237 = vmatmul.mubr.msk.f32.vlgmr.msra.gmra.mxu1 %vm301_vm6, %v2748_v19 }
0x16c4   :  { %10240 = vmatpush3.msra.mxu1 %v9330_v20 }
0x16c5   :  { %10255 = vmatprep.subr.mxu1 %v9384_v3 }
0x1776   :  { %v10224_v26 = vpop.f32.mrf.mxu1 }
0x1777   :  { %v2631_v27 = vadd.f32 %v10224_v26, %v2342_v25 }
0x1778   :  { %v2621_v0 = vpop.f32.mrf.mxu1 }
0x1779   :  { %v2630_v28 = vadd.f32 %v2621_v0, %v2337_v1 }
0x1783   :  { %v10238_v6 = vpop.f32.mrf.mxu1 }
0x1785   :  { %v2827_v29 = vpop.f32.mrf.mxu1 }
0x1786   :  { %10241 = vmatprep.mubr.msk.f32.mxu1 %vm213_vm5, %v2827_v29 }
0x1787   :  { %10242 = vmatmul.mubr.msk.f32.vlgmr.msra.gmra.mxu1 %vm213_vm5, %v10238_v6 }
0x1788   :  { %10256 = vmatpush3.msra.mxu1 %v9384_v3  ;;  %v9379_v3 = vld [vmem:[%s12600_s8 + $0x50] sm:$0xff] }
0x1789   :  { %10257 = vmatprep.subr.mxu1 %v9383_v4 }
0x178a   :  { %10258 = vmatpush3.msra.mxu1 %v9383_v4  ;;  %v9378_v4 = vld [vmem:[%s12600_s8 + $0x48] sm:$0xff] }
0x178b   :  { %10259 = vmatprep.subr.mxu1 %v9382_v5 }
0x178c   :  { %10260 = vmatpush3.msra.mxu1 %v9382_v5  ;;  %v9377_v5 = vld [vmem:[%s12600_s8 + $0x40] sm:$0xff] }
0x178d   :  { %10261 = vmatprep.subr.mxu1 %v9381_v9 }
0x178e   :  { %10262 = vmatpush3.msra.mxu1 %v9381_v9  ;;  %v9386_v9 = vld [vmem:[%s12601_s9 + $0xa] ss:$0 sm:$0xff] }
0x1847   :  { %v10243_v30 = vpop.f32.mrf.mxu1 }
0x1848   :  { %v2918_v31 = vadd.f32 %v10243_v30, %v2631_v27 }
0x1849   :  { %v2908_v32 = vpop.f32.mrf.mxu1 }
0x184a   :  { %v2926_v22 = vadd.f32 %v9367_v8, %v2918_v31  ;;  %v2917_v33 = vadd.f32 %v2908_v32, %v2630_v28 }
0x184c   :  { %v11530_v24 = vadd.f32 %v2926_v22, %v11356_v21  ;;  %v2925_v34 = vadd.f32 %v9367_v8, %v2917_v33 }
0x184e   :  { %v11538_v36 = vadd.f32 %v2925_v34, %v11359_v23  ;;  %v2936_v37 = vsel %vm50_vm0, %v11530_v24, 0.0  ;;  %v3252_v23 = vsel %vm50_vm0, %v11545_v38, 0.0 }
0x184f   :  { %2937 = vadd.xlane.f32.xlu0 %v2936_v37 }
0x1850   :  { %v2933_v21 = vsel %vm50_vm0, %v11538_v36, 0.0 }
0x1851   :  { %2934 = vadd.xlane.f32.xlu1 %v2933_v21 }
0x1853   :  { %3250 = vadd.xlane.f32.xlu0 %v3249_v39 }
0x1855   :  { %3253 = vadd.xlane.f32.xlu1 %v3252_v23 }
0x18d8   :  { %v2938_v40 = vpop.xlane.xlu0 %2937 }
0x18d9   :  { %v2940_v41 = vmul.f32 0.03125, %v2938_v40 }
0x18da   :  { %v2935_v42 = vpop.xlane.xlu1 %2934 }
0x18db   :  { %v11554_v43 = vsub.f32 %v11530_v24, %v2940_v41  ;;  %v2939_v44 = vmul.f32 0.03125, %v2935_v42  ;;  %v9370_v41 = vld [vmem:[%s12601_s9 + $0xe] ss:$0 sm:$0xff] }
0x18dc   :  { %v3251_v45 = vpop.xlane.xlu0 %3250 }
0x18dd   :  { %v11557_v47 = vsub.f32 %v11538_v36, %v2939_v44  ;;  %v3255_v49 = vmul.f32 0.03125, %v3251_v45  ;;  %v2944_v50 = vmul.f32 %v11554_v43, %v11554_v43  ;;  %v2960_v44 = vmul.f32 %v9370_v41, %v11554_v43  ;;  %v9399_v43 = vld [vmem:[%s12601_s9 + $0x18] ss:$0 sm:$0xff] }
0x18de   :  { %v3254_v46 = vpop.xlane.xlu1 %3253 }
0x18df   :  { %v11562_v56 = vsub.f32 %v11535_v35, %v3255_v49  ;;  %v3256_v59 = vmul.f32 0.03125, %v3254_v46  ;;  %v2948_v51 = vsel %vm50_vm0, %v2944_v50, 0.0  ;;  %v2943_v52 = vmul.f32 %v11557_v47, %v11557_v47  ;;  %v9398_v50 = vld [vmem:[%s12601_s9 + $0x17] ss:$0 sm:$0xff] }
0x18e0   :  { %2949 = vadd.xlane.f32.xlu1 %v2948_v51  ;;  %v2959_v45 = vmul.f32 %v9370_v41, %v11557_v47 }
0x18e1   :  { %v11568_v53 = vsub.f32 %v11545_v38, %v3256_v59  ;;  %v3259_v54 = vmul.f32 %v11562_v56, %v11562_v56  ;;  %v2945_v55 = vsel %vm50_vm0, %v2943_v52, 0.0  ;;  %v9371_v59 = vld [vmem:[%s12601_s9 + $0xf] ss:$0 sm:$0xff]  ;;  %v3275_v52 = vmul.f32 %v9398_v50, %v11562_v56 }
0x18e2   :  { %2946 = vadd.xlane.f32.xlu0 %v2945_v55  ;;  %v9401_v56 = vld [vmem:[%s12597_s5 + $0x48] sm:$0xff] }
0x18e3   :  { %v3260_v57 = vmul.f32 %v11568_v53, %v11568_v53  ;;  %v3261_v58 = vsel %vm50_vm0, %v3259_v54, 0.0  ;;  %v3276_v61 = vmul.f32 %v9398_v50, %v11568_v53 }
0x18e5   :  { %v3264_v60 = vsel %vm50_vm0, %v3260_v57, 0.0 }
0x18e6   :  { %3265 = vadd.xlane.f32.xlu1 %v3264_v60  ;;  %3262 = vadd.xlane.f32.xlu0 %v3261_v58  ;;  %v9402_v58 = vld [vmem:[%s12597_s5 + $0x50] sm:$0xff] }
0x1969   :  { %v2950_v10 = vpop.xlane.xlu1 %2949 }
0x196a   :  { %v2952_v11 = vmul.f32 0.032258064, %v2950_v10 }
0x196b   :  { %v2947_v12 = vpop.xlane.xlu0 %2946 }
0x196c   :  { %10806 = vrsqrt.f32 %v2952_v11  ;;  %v2951_v13 = vmul.f32 0.032258064, %v2947_v12  ;;  %vm2970_vm1 = vcmp.eq.f32.partialorder %v2952_v11, inf  ;;  %v2973_v19 = vand.u32 2147483648, %v2952_v11 }
0x196d   :  { %vm2972_vm2 = vcmp.eq.f32.partialorder %v2952_v11, 0.0 }
0x196e   :  { %10808 = vrsqrt.f32 %v2951_v13  ;;  %vm2963_vm3 = vcmp.eq.f32.partialorder %v2951_v13, inf  ;;  %v2966_v0 = vand.u32 2147483648, %v2951_v13  ;;  %vm2965_vm4 = vcmp.eq.f32.partialorder %v2951_v13, 0.0 }
0x196f   :  { %v3266_v14 = vpop.xlane.xlu1 %3265  ;;  %v3263_v15 = vpop.xlane.xlu0 %3262 }
0x1970   :  { %v3268_v16 = vmul.f32 0.032258064, %v3266_v14  ;;  %v3267_v17 = vmul.f32 0.032258064, %v3263_v15 }
0x1972   :  { %10810 = vrsqrt.f32 %v3268_v16  ;;  %vm3286_vm7 = vcmp.eq.f32.partialorder %v3268_v16, inf  ;;  %v3289_v22 = vand.u32 2147483648, %v3268_v16  ;;  %vm3279_vm8 = vcmp.eq.f32.partialorder %v3267_v17, inf }
0x1973   :  { %10812 = vrsqrt.f32 %v3267_v17  ;;  %v3282_v33 = vand.u32 2147483648, %v3267_v17  ;;  %vm3288_vm9 = vcmp.eq.f32.partialorder %v3268_v16, 0.0  ;;  %vm3281_vm10 = vcmp.eq.f32.partialorder %v3267_v17, 0.0 }
0x1979   :  { %v10807_v18 = vpop.eup %10806 }
0x197a   :  { %v2969_v7 = vmul.f32 %v10807_v18, %v2952_v11 }
0x197b   :  { %v10809_v20 = vpop.eup %10808 }
0x197c   :  { %v2971_v25 = vsel %vm2970_vm1, %v2952_v11, %v2969_v7  ;;  %v2962_v1 = vmul.f32 %v10809_v20, %v2951_v13 }
0x197d   :  { %v2974_v26 = vsel %vm2972_vm2, %v2973_v19, %v2971_v25 }
0x197e   :  { %v2976_v27 = vadd.f32 1e-06, %v2974_v26  ;;  %v2964_v6 = vsel %vm2963_vm3, %v2951_v13, %v2962_v1  ;;  %v11676_v26 = vld [vmem:[%s12595_s3 + $0x8] sm:$0xff] }
0x197f   :  { %v10811_v28 = vpop.eup %10810  ;;  %v2967_v8 = vsel %vm2965_vm4, %v2966_v0, %v2964_v6  ;;  %v11681_v0 = vld [vmem:[%s12595_s3] sm:$0xff] }
0x1980   :  { %v10813_v29 = vpop.eup %10812  ;;  %10814 = vrcp.f32 %v2976_v27  ;;  %v3285_v30 = vmul.f32 %v10811_v28, %v3268_v16  ;;  %v2975_v31 = vadd.f32 1e-06, %v2967_v8 }
0x1981   :  { %v3278_v32 = vmul.f32 %v10813_v29, %v3267_v17 }
0x1982   :  { %v3287_v34 = vsel %vm3286_vm7, %v3268_v16, %v3285_v30  ;;  %10816 = vrcp.f32 %v2975_v31  ;;  %v9410_v16 = vld [vmem:[%s12601_s9 + $0x10] ss:$0 sm:$0xff] }
0x1983   :  { %v3280_v37 = vsel %vm3279_vm8, %v3267_v17, %v3278_v32  ;;  %v3290_v21 = vsel %vm3288_vm9, %v3289_v22, %v3287_v34 }
0x1984   :  { %v3283_v39 = vsel %vm3281_vm10, %v3282_v33, %v3280_v37  ;;  %v3292_v23 = vadd.f32 1e-06, %v3290_v21 }
0x1985   :  { %v3291_v40 = vadd.f32 1e-06, %v3283_v39 }
0x1987   :  { %10818 = vrcp.f32 %v3291_v40 }
0x1988   :  { %10820 = vrcp.f32 %v3292_v23 }
0x198d   :  { %v10815_v42 = vpop.eup %10814 }
0x198e   :  { %v2980_v46 = vmul.f32 %v10815_v42, %v2960_v44 }
0x198f   :  { %v10817_v49 = vpop.eup %10816 }
0x1990   :  { %v2978_v51 = vmul.f32 %v10817_v49, %v2959_v45  ;;  %v2988_v57 = vadd.f32 %v9371_v59, %v2980_v46 }
0x1992   :  { %v2987_v54 = vadd.f32 %v9371_v59, %v2978_v51 }
0x1994   :  { %v10819_v55 = vpop.eup %10818  ;;  %10252 = vmatprep.mubr.msk.f32.mxu0 %vm50_vm0, %v2987_v54 }
0x1995   :  { %v10821_v47 = vpop.eup %10820  ;;  %v3294_v60 = vmul.f32 %v10819_v55, %v3275_v52  ;;  %10253 = vmatmul.mubr.msk.f32.vlgmr.msra.gmra.mxu0 %vm50_vm0, %v2988_v57 }
0x1996   :  { %10275 = vmatpush3.msra.mxu0 %v11592_v2  ;;  %v3296_v63 = vmul.f32 %v10821_v47, %v3276_v61  ;;  %v9380_v2 = vld [vmem:[%s12600_s8 + $0x58] sm:$0xff] }
0x1997   :  { %v3303_v62 = vadd.f32 %v9399_v43, %v3294_v60  ;;  %10276 = vmatprep.subr.mxu0 %v9402_v58  ;;  %10263 = vmatprep.subr.mxu1 %v9380_v2 }
0x1998   :  { %10277 = vmatpush3.msra.mxu0 %v9402_v58  ;;  %v3304_v53 = vadd.f32 %v9399_v43, %v3296_v63  ;;  %10264 = vmatpush3.msra.mxu1 %v9380_v2  ;;  %v9405_v43 = vld [vmem:[%s12598_s6 + $0x40] sm:$0xff] }
0x1999   :  { %10282 = vmatprep.mubr.msk.f32.mxu0 %vm50_vm0, %v3303_v62  ;;  %10278 = vmatprep.subr.mxu0 %v9401_v56 }
0x199a   :  { %10279 = vmatpush3.msra.mxu0 %v9401_v56  ;;  %10265 = vmatprep.subr.mxu1 %v9379_v3 }
0x199b   :  { %10280 = vmatprep.subr.mxu0 %v9400_v48  ;;  %10266 = vmatpush3.msra.mxu1 %v9379_v3 }
0x199c   :  { %10281 = vmatpush3.msra.mxu0 %v9400_v48  ;;  %10267 = vmatprep.subr.mxu1 %v9378_v4 }
0x199d   :  { %10283 = vmatmul.mubr.msk.f32.vlgmr.msra.gmra.mxu0 %vm50_vm0, %v3304_v53  ;;  %10268 = vmatpush3.msra.mxu1 %v9378_v4 }
0x199e   :  { %10269 = vmatprep.subr.mxu1 %v9377_v5 }
0x199f   :  { %10270 = vmatpush3.msra.mxu1 %v9377_v5 }
0x1a55   :  { %v10254_v10 = vpop.f32.mrf.mxu0 }
0x1a56   :  { %v3091_v11 = vadd.f32 %v10254_v10, %v9386_v9 }
0x1a57   :  { %v3085_v12 = vpop.f32.mrf.mxu0 }
0x1a58   :  { %v3086_v13 = vadd.f32 %v9386_v9, %v3085_v12  ;;  %v3095_v15 = vmax.f32 %v3091_v11, 0.0 }
0x1a5a   :  { %v3094_v14 = vmax.f32 %v3086_v13, 0.0 }
0x1a5c   :  { %10271 = vmatprep.mubr.msk.f32.mxu1 %vm1532_vm11, %v3094_v14 }
0x1a5d   :  { %v10284_v17 = vpop.f32.mrf.mxu0  ;;  %10272 = vmatmul.mubr.msk.f32.vlgmr.msra.gmra.mxu1 %vm1532_vm11, %v3095_v15 }
0x1a5e   :  { %v11657_v18 = vadd.f32 %v10284_v17, %v9410_v16 }
0x1a5f   :  { %v3397_v7 = vpop.f32.mrf.mxu0 }
0x1a60   :  { %v11659_v19 = vadd.f32 %v9410_v16, %v3397_v7  ;;  %3410 = vrot.lane.b32.xlu0 %v11657_v18, %s11034_s30 }
0x1a62   :  { %3408 = vrot.lane.b32.xlu1 %v11659_v19, %s11034_s30  ;;  %10289 = vmatprep.mubr.msk.f32.mxu0 %vm213_vm5, %v11659_v19 }
0x1ad2   :  { %v3411_v20 = vpop.permute.xlu0 %3410 }
0x1ad3   :  { %10285 = vmatprep.subr.msk.mxu0 %vm213_vm5, %v3411_v20 }
0x1ad4   :  { %10286 = vmatpush3.xpose.msk.msra.mxu0 %vm213_vm5, %v3411_v20  ;;  %v3409_v25 = vpop.permute.xlu1 %3408 }
0x1ad5   :  { %10287 = vmatprep.subr.msk.mxu0 %vm213_vm5, %v3409_v25 }
0x1ad8   :  { %10288 = vmatpush3.xpose.msk.msra.mxu0 %vm213_vm5, %v3409_v25 }
0x1adb   :  { %10290 = vmatmul.mubr.msk.f32.vlgmr.msra.gmra.mxu0 %vm213_vm5, %v11657_v18 }
0x1b1d   :  { %v11712_v47 = vpop.f32.mrf.mxu1 }
0x1b1f   :  { %v11714_v58 = vpop.f32.mrf.mxu1 }
0x1b9b   :  { %v10291_v1 = vpop.f32.mrf.mxu0 }
0x1b9c   :  { %v3496_v27 = vmul.f32 0.35355338, %v10291_v1 }
0x1b9d   :  { %v3486_v28 = vpop.f32.mrf.mxu0 }
0x1b9e   :  { %v3498_v6 = vadd.f32 %v3496_v27, %v11676_v26  ;;  %v3495_v29 = vmul.f32 0.35355338, %v3486_v28  ;;  %v9406_v27 = vld [vmem:[%s12598_s6 + $0x48] sm:$0xff] }
0x1ba0   :  { %v3497_v8 = vadd.f32 %v3495_v29, %v11681_v0  ;;  %v3502_v30 = vsel %vm301_vm6, %v3498_v6, -inf }
0x1ba1   :  { %3503 = vmax.xlane.f32.xlu0 %v3502_v30 }
0x1ba2   :  { %v3499_v31 = vsel %vm301_vm6, %v3497_v8, -inf }
0x1ba3   :  { %3500 = vmax.xlane.f32.xlu1 %v3499_v31 }
0x1c2a   :  { %v3504_v32 = vpop.xlane.xlu0 %3503 }
0x1c2b   :  { %v3506_v22 = vsub.f32 %v3498_v6, %v3504_v32 }
0x1c2c   :  { %v3501_v33 = vpop.xlane.xlu1 %3500 }
0x1c2d   :  { %v3509_v34 = vmul.f32 1.442695, %v3506_v22  ;;  %v3505_v37 = vsub.f32 %v3497_v8, %v3501_v33 }
0x1c2f   :  { %10822 = vpow2.f32 %v3509_v34  ;;  %v3507_v21 = vmul.f32 1.442695, %v3505_v37 }
0x1c31   :  { %10824 = vpow2.f32 %v3507_v21 }
0x1c3c   :  { %v10823_v39 = vpop.eup %10822 }
0x1c3d   :  { %v3514_v23 = vsel %vm301_vm6, %v10823_v39, 0.0 }
0x1c3e   :  { %v10825_v40 = vpop.eup %10824  ;;  %3515 = vadd.xlane.f32.xlu1 %v3514_v23 }
0x1c3f   :  { %v3511_v41 = vsel %vm301_vm6, %v10825_v40, 0.0 }
0x1c40   :  { %3512 = vadd.xlane.f32.xlu0 %v3511_v41 }
0x1c4f   :  { %3521 = vrot.lane.b32.xlu1 %v11659_v19, %s11037_s0 }
0x1c53   :  { %3614 = vrot.lane.b32.xlu1 %v11657_v18, %s11036_s12 }
0x1c56   :  { %3523 = vrot.lane.b32.xlu0 %v11657_v18, %s11037_s0 }
0x1c57   :  { %3612 = vrot.lane.b32.xlu1 %v11659_v19, %s11036_s12 }
0x1c5a   :  { %3608 = vrot.lane.b32.xlu0 %v11659_v19, %s11035_s11 }
0x1c5b   :  { %3610 = vrot.lane.b32.xlu1 %v11657_v18, %s11035_s11 }
0x1cc7   :  { %v3516_v42 = vpop.xlane.xlu1 %3515 }
0x1cc8   :  { %10826 = vrcp.f32 %v3516_v42 }
0x1cc9   :  { %v3513_v44 = vpop.xlane.xlu0 %3512 }
0x1cca   :  { %10828 = vrcp.f32 %v3513_v44 }
0x1ccb   :  { %v3522_v45 = vpop.permute.xlu1 %3521 }
0x1ccd   :  { %v3524_v49 = vpop.permute.xlu0 %3523 }
0x1cce   :  { %10292 = vmatprep.subr.mxu1 %v3524_v49 }
0x1ccf   :  { %10293 = vmatpush3.msra.mxu1 %v3524_v49  ;;  %v3615_v50 = vpop.permute.xlu1 %3614 }
0x1cd0   :  { %10294 = vmatprep.subr.mxu1 %v3522_v45 }
0x1cd1   :  { %10295 = vmatpush3.msra.mxu1 %v3522_v45  ;;  %v3609_v54 = vpop.permute.xlu0 %3608 }
0x1cd2   :  { %10299 = vmatprep.subr.msk.mxu1 %vm213_vm5, %v3615_v50 }
0x1cd3   :  { %v3613_v55 = vpop.permute.xlu1 %3612 }
0x1cd5   :  { %v10827_v46 = vpop.eup %10826 }
0x1cd6   :  { %v3520_v52 = vmul.f32 %v10827_v46, %v10823_v39 }
0x1cd7   :  { %v10829_v59 = vpop.eup %10828  ;;  %v3611_v57 = vpop.permute.xlu1 %3610 }
0x1cd8   :  { %v3518_v51 = vmul.f32 %v10829_v59, %v10825_v40 }
0x1cda   :  { %10296 = vmatprep.mubr.msk.f32.mxu1 %vm301_vm6, %v3518_v51 }
0x1cdb   :  { %10297 = vmatmul.mubr.msk.f32.vlgmr.msra.gmra.mxu1 %vm301_vm6, %v3520_v52 }
0x1cdc   :  { %10300 = vmatpush3.xpose.msk.msra.mxu1 %vm213_vm5, %v3615_v50  ;;  %10303 = vmatprep.mubr.msk.f32.mxu1 %vm213_vm5, %v3609_v54 }
0x1cdd   :  { %10301 = vmatprep.subr.msk.mxu1 %vm213_vm5, %v3613_v55 }
0x1ce0   :  { %10302 = vmatpush3.xpose.msk.msra.mxu1 %vm213_vm5, %v3613_v55 }
0x1ce1   :  { %10318 = vmatprep.subr.mxu1 %v9405_v43 }
0x1ce3   :  { %10304 = vmatmul.mubr.msk.f32.vlgmr.msra.gmra.mxu1 %vm213_vm5, %v3611_v57 }
0x1ce4   :  { %10319 = vmatpush3.msra.mxu1 %v9405_v43 }
0x1d9b   :  { %v10298_v60 = vpop.f32.mrf.mxu1 }
0x1d9d   :  { %v3599_v61 = vpop.f32.mrf.mxu1 }
0x1d9e   :  { %10320 = vmatprep.mubr.msk.f32.mxu1 %vm213_vm5, %v3599_v61 }
0x1d9f   :  { %10321 = vmatmul.mubr.msk.f32.vlgmr.msra.gmra.mxu1 %vm213_vm5, %v10298_v60 }
0x1da3   :  { %v10305_v56 = vpop.f32.mrf.mxu1 }
0x1da4   :  { %v3700_v62 = vmul.f32 0.35355338, %v10305_v56 }
0x1da5   :  { %v3690_v63 = vpop.f32.mrf.mxu1 }
0x1da6   :  { %v3702_v48 = vadd.f32 %v3700_v62, %v11676_v26  ;;  %v3699_v53 = vmul.f32 0.35355338, %v3690_v63 }
0x1da8   :  { %v3701_v2 = vadd.f32 %v3699_v53, %v11681_v0  ;;  %v3706_v3 = vsel %vm301_vm6, %v3702_v48, -inf }
0x1da9   :  { %3707 = vmax.xlane.f32.xlu1 %v3706_v3 }
0x1daa   :  { %v3703_v4 = vsel %vm301_vm6, %v3701_v2, -inf }
0x1dab   :  { %3704 = vmax.xlane.f32.xlu0 %v3703_v4 }
0x1dba   :  { %3725 = vrot.lane.b32.xlu1 %v11659_v19, %s11038_s17 }
0x1dbe   :  { %3980 = vrot.lane.b32.xlu1 %v11657_v18, %s11039_s18 }
0x1dc2   :  { %3978 = vrot.lane.b32.xlu1 %v11659_v19, %s11039_s18 }
0x1dc6   :  { %3976 = vrot.lane.b32.xlu1 %v11657_v18, %s11040_s19 }
0x1dca   :  { %4265 = vrot.lane.b32.xlu1 %v11659_v19, %s11041_s20 }
0x1dce   :  { %4263 = vrot.lane.b32.xlu1 %v11657_v18, %s11042_s21 }
0x1e32   :  { %v3708_v5 = vpop.xlane.xlu1 %3707 }
0x1e33   :  { %v3710_v9 = vsub.f32 %v3702_v48, %v3708_v5 }
0x1e34   :  { %v3705_v10 = vpop.xlane.xlu0 %3704 }
0x1e35   :  { %v3713_v11 = vmul.f32 1.442695, %v3710_v9  ;;  %v3709_v12 = vsub.f32 %v3701_v2, %v3705_v10 }
0x1e36   :  { %v3726_v1 = vpop.permute.xlu1 %3725 }
0x1e37   :  { %10830 = vpow2.f32 %v3713_v11  ;;  %v3711_v13 = vmul.f32 1.442695, %v3709_v12 }
0x1e39   :  { %10832 = vpow2.f32 %v3711_v13 }
0x1e3a   :  { %v3981_v30 = vpop.permute.xlu1 %3980 }
0x1e3e   :  { %v3979_v22 = vpop.permute.xlu1 %3978 }
0x1e42   :  { %v3977_v37 = vpop.permute.xlu1 %3976 }
0x1e44   :  { %v10831_v14 = vpop.eup %10830 }
0x1e45   :  { %v3718_v15 = vsel %vm301_vm6, %v10831_v14, 0.0 }
0x1e46   :  { %v10833_v16 = vpop.eup %10832  ;;  %3719 = vadd.xlane.f32.xlu0 %v3718_v15  ;;  %v4266_v39 = vpop.permute.xlu1 %4265 }
0x1e47   :  { %v3715_v17 = vsel %vm301_vm6, %v10833_v16, 0.0 }
0x1e4a   :  { %3716 = vadd.xlane.f32.xlu0 %v3715_v17  ;;  %v4264_v23 = vpop.permute.xlu1 %4263 }
0x1e60   :  { %3727 = vrot.lane.b32.xlu0 %v11657_v18, %s11038_s17 }
0x1e64   :  { %3974 = vrot.lane.b32.xlu0 %v11659_v19, %s11040_s19 }
0x1e68   :  { %4267 = vrot.lane.b32.xlu0 %v11657_v18, %s11041_s20 }
0x1e6c   :  { %4261 = vrot.lane.b32.xlu0 %v11659_v19, %s11042_s21 }
0x1ecf   :  { %v3720_v7 = vpop.xlane.xlu0 %3719 }
0x1ed0   :  { %10834 = vrcp.f32 %v3720_v7 }
0x1ed3   :  { %v3717_v20 = vpop.xlane.xlu0 %3716 }
0x1ed4   :  { %10836 = vrcp.f32 %v3717_v20 }
0x1ed7   :  { %v3728_v25 = vpop.permute.xlu0 %3727 }
0x1ed8   :  { %10306 = vmatprep.subr.mxu0 %v3728_v25 }
0x1ed9   :  { %10307 = vmatpush3.msra.mxu0 %v3728_v25 }
0x1eda   :  { %10308 = vmatprep.subr.mxu0 %v3726_v1 }
0x1edb   :  { %10309 = vmatpush3.msra.mxu0 %v3726_v1  ;;  %v3975_v31 = vpop.permute.xlu0 %3974 }
0x1edc   :  { %10313 = vmatprep.subr.mxu0 %v9406_v27 }
0x1edd   :  { %v10835_v28 = vpop.eup %10834 }
0x1ede   :  { %v3724_v8 = vmul.f32 %v10835_v28, %v10831_v14 }
0x1edf   :  { %v4268_v34 = vpop.permute.xlu0 %4267 }
0x1ee1   :  { %v10837_v6 = vpop.eup %10836 }
0x1ee2   :  { %v3722_v29 = vmul.f32 %v10837_v6, %v10833_v16  ;;  %v9389_v16 = vld [vmem:[%s12601_s9 + $0xb] ss:$0 sm:$0xff] }
0x1ee3   :  { %v4262_v21 = vpop.permute.xlu0 %4261  ;;  %v3180_v17 = vadd.f32 %v11712_v47, %v9389_v16 }
0x1ee4   :  { %10310 = vmatprep.mubr.msk.f32.mxu0 %vm301_vm6, %v3722_v29 }
0x1ee5   :  { %10311 = vmatmul.mubr.msk.f32.vlgmr.msra.gmra.mxu0 %vm301_vm6, %v3724_v8  ;;  %v11789_v7 = vadd.f32 %v3180_v17, %v11530_v24  ;;  %v9455_v17 = vld [vmem:[%s12599_s7 + $0x80] sm:$0xff] }
0x1ee6   :  { %10314 = vmatpush3.msra.mxu0 %v9406_v27 }
0x1ee7   :  { %10323 = vmatprep.subr.msk.mxu0 %vm213_vm5, %v3981_v30 }
0x1fa5   :  { %v10312_v32 = vpop.f32.mrf.mxu0 }
0x1fa7   :  { %v3803_v33 = vpop.f32.mrf.mxu0 }
0x1fa8   :  { %10315 = vmatprep.mubr.msk.f32.mxu0 %vm213_vm5, %v3803_v33  ;;  %v3175_v33 = vadd.f32 %v9389_v16, %v11714_v58  ;;  %v9456_v16 = vld [vmem:[%s12599_s7 + $0x88] sm:$0xff] }
0x1fa9   :  { %10316 = vmatmul.mubr.msk.f32.vlgmr.msra.gmra.mxu0 %vm213_vm5, %v10312_v32 }
0x1faa   :  { %10324 = vmatpush3.xpose.msk.msra.mxu0 %vm213_vm5, %v3981_v30  ;;  %10327 = vmatprep.mubr.msk.f32.mxu0 %vm213_vm5, %v3975_v31 }
0x1fab   :  { %10325 = vmatprep.subr.msk.mxu0 %vm213_vm5, %v3979_v22 }
0x1fae   :  { %10326 = vmatpush3.xpose.msk.msra.mxu0 %vm213_vm5, %v3979_v22 }
0x1faf   :  { %10342 = vmatprep.subr.msk.mxu0 %vm213_vm5, %v4268_v34 }
0x1fb1   :  { %10328 = vmatmul.mubr.msk.f32.vlgmr.msra.gmra.mxu0 %vm213_vm5, %v3977_v37 }
0x1fb2   :  { %10343 = vmatpush3.xpose.msk.msra.mxu0 %vm213_vm5, %v4268_v34  ;;  %10346 = vmatprep.mubr.msk.f32.mxu0 %vm213_vm5, %v4262_v21  ;;  %v3183_v34 = vadd.f32 %v3175_v33, %v11538_v36  ;;  %v10322_v21 = vpop.f32.mrf.mxu1 }
0x1fb3   :  { %10344 = vmatprep.subr.msk.mxu0 %vm213_vm5, %v4266_v39 }
0x1fb4   :  { %v3189_v37 = vsel %vm50_vm0, %v3183_v34, 0.0 }
0x1fb6   :  { %10345 = vmatpush3.xpose.msk.msra.mxu0 %vm213_vm5, %v4266_v39  ;;  %v3965_v39 = vpop.f32.mrf.mxu1 }
0x1fb9   :  { %10347 = vmatmul.mubr.msk.f32.vlgmr.msra.gmra.mxu0 %vm213_vm5, %v4264_v23 }
0x2069   :  { %v11763_v40 = vpop.f32.mrf.mxu0 }
0x206b   :  { %v11765_v41 = vpop.f32.mrf.mxu0 }
0x2071   :  { %v10329_v42 = vpop.f32.mrf.mxu0 }
0x2072   :  { %v4066_v44 = vmul.f32 0.35355338, %v10329_v42 }
0x2073   :  { %v4056_v45 = vpop.f32.mrf.mxu0 }
0x2074   :  { %v4068_v49 = vadd.f32 %v4066_v44, %v11676_v26  ;;  %v4065_v50 = vmul.f32 0.35355338, %v4056_v45 }
0x2076   :  { %v4067_v46 = vadd.f32 %v4065_v50, %v11681_v0  ;;  %v4072_v59 = vsel %vm301_vm6, %v4068_v49, -inf  ;;  %v9408_v50 = vld [vmem:[%s12598_s6 + $0x58] sm:$0xff] }
0x2077   :  { %4073 = vmax.xlane.f32.xlu1 %v4072_v59 }
0x2078   :  { %v4069_v51 = vsel %vm301_vm6, %v4067_v46, -inf }
0x2079   :  { %4070 = vmax.xlane.f32.xlu0 %v4069_v51  ;;  %v10348_v52 = vpop.f32.mrf.mxu0  ;;  %v3966_v51 = vadd.f32 %v3965_v39, %v11765_v41 }
0x207a   :  { %v4353_v11 = vmul.f32 0.35355338, %v10348_v52 }
0x207b   :  { %v4343_v54 = vpop.f32.mrf.mxu0 }
0x207c   :  { %v4352_v55 = vmul.f32 0.35355338, %v4343_v54  ;;  %v4355_v12 = vadd.f32 %v4353_v11, %v11676_v26  ;;  %v3192_v26 = vsel %vm50_vm0, %v11789_v7, 0.0 }
0x207e   :  { %v4354_v57 = vadd.f32 %v4352_v55, %v11681_v0  ;;  %v4359_v13 = vsel %vm301_vm6, %v4355_v12, -inf }
0x2080   :  { %v4356_v43 = vsel %vm301_vm6, %v4354_v57, -inf }
0x2088   :  { %4091 = vrot.lane.b32.xlu1 %v11659_v19, %s11043_s26 }
0x20ac   :  { %4357 = vmax.xlane.f32.xlu1 %v4356_v43 }
0x2100   :  { %v4074_v60 = vpop.xlane.xlu1 %4073 }
0x2101   :  { %v4076_v61 = vsub.f32 %v4068_v49, %v4074_v60 }
0x2102   :  { %v4071_v56 = vpop.xlane.xlu0 %4070 }
0x2103   :  { %v4079_v62 = vmul.f32 1.442695, %v4076_v61  ;;  %v4075_v63 = vsub.f32 %v4067_v46, %v4071_v56  ;;  %v3971_v46 = vadd.f32 %v10322_v21, %v11763_v40 }
0x2104   :  { %v4092_v0 = vpop.permute.xlu1 %4091 }
0x2105   :  { %10838 = vpow2.f32 %v4079_v62  ;;  %v4077_v48 = vmul.f32 1.442695, %v4075_v63  ;;  %v9445_v62 = vld [vmem:[%s12601_s9 + $0x11] ss:$0 sm:$0xff] }
0x2107   :  { %10840 = vpow2.f32 %v4077_v48 }
0x2112   :  { %v10839_v53 = vpop.eup %10838 }
0x2113   :  { %v4084_v2 = vsel %vm301_vm6, %v10839_v53, 0.0 }
0x2114   :  { %v10841_v3 = vpop.eup %10840  ;;  %4085 = vadd.xlane.f32.xlu0 %v4084_v2 }
0x2115   :  { %v4081_v4 = vsel %vm301_vm6, %v10841_v3, 0.0 }
0x2118   :  { %4082 = vadd.xlane.f32.xlu0 %v4081_v4 }
0x212e   :  { %4093 = vrot.lane.b32.xlu0 %v11657_v18, %s11043_s26 }
0x2135   :  { %v4358_v5 = vpop.xlane.xlu1 %4357 }
0x2136   :  { %v4362_v9 = vsub.f32 %v4354_v57, %v4358_v5 }
0x2138   :  { %v4364_v10 = vmul.f32 1.442695, %v4362_v9 }
0x213a   :  { %10842 = vpow2.f32 %v4364_v10 }
0x2147   :  { %v10843_v14 = vpop.eup %10842 }
0x2148   :  { %v4368_v15 = vsel %vm301_vm6, %v10843_v14, 0.0 }
0x214d   :  { %4360 = vmax.xlane.f32.xlu0 %v4359_v13 }
0x2151   :  { %4369 = vadd.xlane.f32.xlu0 %v4368_v15  ;;  %v9457_v15 = vld [vmem:[%s12599_s7 + $0x90] sm:$0xff] }
0x2167   :  { %4380 = vrot.lane.b32.xlu0 %v11657_v18, %s11044_s27  ;;  %v9407_v18 = vld [vmem:[%s12598_s6 + $0x50] sm:$0xff] }
0x2186   :  { %3193 = vadd.xlane.f32.xlu0 %v3192_v26 }
0x219d   :  { %v4086_v20 = vpop.xlane.xlu0 %4085 }
0x219e   :  { %10844 = vrcp.f32 %v4086_v20 }
0x21a1   :  { %v4083_v25 = vpop.xlane.xlu0 %4082 }
0x21a2   :  { %10846 = vrcp.f32 %v4083_v25 }
0x21a5   :  { %v4094_v1 = vpop.permute.xlu0 %4093 }
0x21a6   :  { %10330 = vmatprep.subr.mxu1 %v4094_v1 }
0x21a7   :  { %10331 = vmatpush3.msra.mxu1 %v4094_v1 }
0x21a8   :  { %10332 = vmatprep.subr.mxu1 %v4092_v0 }
0x21a9   :  { %10333 = vmatpush3.msra.mxu1 %v4092_v0 }
0x21aa   :  { %10337 = vmatprep.subr.mxu1 %v9407_v18 }
0x21ab   :  { %v10845_v24 = vpop.eup %10844 }
0x21ac   :  { %v4090_v28 = vmul.f32 %v10845_v24, %v10839_v53 }
0x21af   :  { %v10847_v47 = vpop.eup %10846 }
0x21b0   :  { %v4088_v27 = vmul.f32 %v10847_v47, %v10841_v3 }
0x21b2   :  { %10334 = vmatprep.mubr.msk.f32.mxu1 %vm301_vm6, %v4088_v27 }
0x21b3   :  { %10335 = vmatmul.mubr.msk.f32.vlgmr.msra.gmra.mxu1 %vm301_vm6, %v4090_v28 }
0x21b4   :  { %10338 = vmatpush3.msra.mxu1 %v9407_v18 }
0x21d6   :  { %v4361_v6 = vpop.xlane.xlu0 %4360 }
0x21d7   :  { %v4363_v29 = vsub.f32 %v4355_v12, %v4361_v6 }
0x21d9   :  { %v4366_v8 = vmul.f32 1.442695, %v4363_v29 }
0x21da   :  { %v4370_v30 = vpop.xlane.xlu0 %4369 }
0x21db   :  { %10848 = vpow2.f32 %v4366_v8 }
0x21dc   :  { %10850 = vrcp.f32 %v4370_v30 }
0x21de   :  { %v4381_v31 = vpop.permute.xlu0 %4380 }
0x21df   :  { %10349 = vmatprep.subr.mxu1 %v4381_v31 }
0x21e8   :  { %v10849_v32 = vpop.eup %10848 }
0x21e9   :  { %v4371_v22 = vsel %vm301_vm6, %v10849_v32, 0.0  ;;  %v10851_v23 = vpop.eup %10850 }
0x21ea   :  { %4372 = vadd.xlane.f32.xlu1 %v4371_v22  ;;  %v4375_v49 = vmul.f32 %v10851_v23, %v10843_v14  ;;  %v9458_v14 = vld [vmem:[%s12599_s7 + $0x98] sm:$0xff] }
0x21fb   :  { %4378 = vrot.lane.b32.xlu1 %v11659_v19, %s11044_s27 }
0x220f   :  { %v3194_v60 = vpop.xlane.xlu0 %3193 }
0x2210   :  { %v3196_v56 = vmul.f32 0.03125, %v3194_v60  ;;  %v9450_v60 = vld [vmem:[%s12598_s6 + $0x80] sm:$0xff] }
0x2212   :  { %v11819_v53 = vsub.f32 %v11789_v7, %v3196_v56 }
0x2214   :  { %v3200_v11 = vmul.f32 %v11819_v53, %v11819_v53 }
0x221f   :  { %3190 = vadd.xlane.f32.xlu1 %v3189_v37 }
0x2273   :  { %v10336_v42 = vpop.f32.mrf.mxu1  ;;  %v4373_v44 = vpop.xlane.xlu1 %4372 }
0x2274   :  { %10852 = vrcp.f32 %v4373_v44 }
0x2275   :  { %v4169_v45 = vpop.f32.mrf.mxu1 }
0x2276   :  { %10339 = vmatprep.mubr.msk.f32.mxu1 %vm213_vm5, %v4169_v45 }
0x2277   :  { %10340 = vmatmul.mubr.msk.f32.vlgmr.msra.gmra.mxu1 %vm213_vm5, %v10336_v42  ;;  %v4379_v19 = vpop.permute.xlu1 %4378 }
0x2278   :  { %10350 = vmatpush3.msra.mxu1 %v4381_v31  ;;  %10353 = vmatprep.mubr.msk.f32.mxu1 %vm301_vm6, %v4375_v49  ;;  %v9394_v49 = vld [vmem:[%s12601_s9 + $0x2a] ss:$0 sm:$0xff] }
0x2279   :  { %10351 = vmatprep.subr.mxu1 %v4379_v19 }
0x227a   :  { %10352 = vmatpush3.msra.mxu1 %v4379_v19 }
0x227b   :  { %10356 = vmatprep.subr.mxu1 %v9408_v50 }
0x2281   :  { %v10853_v36 = vpop.eup %10852 }
0x2282   :  { %v4377_v58 = vmul.f32 %v10853_v36, %v10849_v32  ;;  %v3216_v36 = vmul.f32 %v9394_v49, %v11819_v53 }
0x2284   :  { %10354 = vmatmul.mubr.msk.f32.vlgmr.msra.gmra.mxu1 %vm301_vm6, %v4377_v58 }
0x2285   :  { %10357 = vmatpush3.msra.mxu1 %v9408_v50 }
0x2286   :  { %10372 = vmatprep.subr.mxu1 %v9458_v14 }
0x22a8   :  { %v3191_v61 = vpop.xlane.xlu1 %3190 }
0x22a9   :  { %v3195_v63 = vmul.f32 0.03125, %v3191_v61 }
0x22ab   :  { %v11821_v4 = vsub.f32 %v3183_v34, %v3195_v63 }
0x22ad   :  { %v3199_v13 = vmul.f32 %v11821_v4, %v11821_v4  ;;  %v3215_v58 = vmul.f32 %v9394_v49, %v11821_v4 }
0x2337   :  { %v10341_v59 = vpop.f32.mrf.mxu1 }
0x2338   :  { %v4260_v52 = vadd.f32 %v10341_v59, %v3971_v46  ;;  %v9395_v59 = vld [vmem:[%s12601_s9 + $0x2b] ss:$0 sm:$0xff] }
0x2339   :  { %v4250_v54 = vpop.f32.mrf.mxu1 }
0x233a   :  { %v4259_v55 = vadd.f32 %v4250_v54, %v3966_v51  ;;  %v9452_v54 = vld [vmem:[%s12598_s6 + $0x90] sm:$0xff] }
0x2344   :  { %v10355_v57 = vpop.f32.mrf.mxu1 }
0x2346   :  { %v4456_v43 = vpop.f32.mrf.mxu1 }
0x2347   :  { %10358 = vmatprep.mubr.msk.f32.mxu1 %vm213_vm5, %v4456_v43 }
0x2348   :  { %10359 = vmatmul.mubr.msk.f32.vlgmr.msra.gmra.mxu1 %vm213_vm5, %v10355_v57  ;;  %v9451_v57 = vld [vmem:[%s12598_s6 + $0x88] sm:$0xff] }
0x2349   :  { %10373 = vmatpush3.msra.mxu1 %v9458_v14 }
0x234a   :  { %10374 = vmatprep.subr.mxu1 %v9457_v15 }
0x234b   :  { %10375 = vmatpush3.msra.mxu1 %v9457_v15 }
0x234c   :  { %10376 = vmatprep.subr.mxu1 %v9456_v16 }
0x234d   :  { %10377 = vmatpush3.msra.mxu1 %v9456_v16 }
0x234e   :  { %10378 = vmatprep.subr.mxu1 %v9455_v17 }
0x234f   :  { %10379 = vmatpush3.msra.mxu1 %v9455_v17 }
0x2408   :  { %v10360_v40 = vpop.f32.mrf.mxu1 }
0x2409   :  { %v4547_v48 = vadd.f32 %v10360_v40, %v4260_v52  ;;  %v9453_v52 = vld [vmem:[%s12598_s6 + $0x98] sm:$0xff] }
0x240a   :  { %v4537_v41 = vpop.f32.mrf.mxu1  ;;  %10361 = vmatprep.subr.mxu0 %v9453_v52 }
0x240b   :  { %v4555_v2 = vadd.f32 %v9445_v62, %v4547_v48  ;;  %v4546_v3 = vadd.f32 %v4537_v41, %v4259_v55  ;;  %10362 = vmatpush3.msra.mxu0 %v9453_v52 }
0x240c   :  { %10363 = vmatprep.subr.mxu0 %v9452_v54 }
0x240d   :  { %v11824_v0 = vadd.f32 %v4555_v2, %v11545_v38  ;;  %v4554_v5 = vadd.f32 %v9445_v62, %v4546_v3  ;;  %v3204_v38 = vsel %vm50_vm0, %v3200_v11, 0.0  ;;  %10364 = vmatpush3.msra.mxu0 %v9452_v54 }
0x240e   :  { %10365 = vmatprep.subr.mxu0 %v9451_v57 }
0x240f   :  { %v11827_v9 = vadd.f32 %v4554_v5, %v11535_v35  ;;  %v4565_v10 = vsel %vm50_vm0, %v11824_v0, 0.0  ;;  %v3201_v35 = vsel %vm50_vm0, %v3199_v13, 0.0  ;;  %10366 = vmatpush3.msra.mxu0 %v9451_v57 }
0x2410   :  { %4566 = vadd.xlane.f32.xlu1 %v4565_v10  ;;  %10367 = vmatprep.subr.mxu0 %v9450_v60 }
0x2411   :  { %v4562_v12 = vsel %vm50_vm0, %v11827_v9, 0.0  ;;  %10368 = vmatpush3.msra.mxu0 %v9450_v60 }
0x2412   :  { %4563 = vadd.xlane.f32.xlu0 %v4562_v12 }
0x2414   :  { %3205 = vadd.xlane.f32.xlu1 %v3204_v38  ;;  %v9448_v38 = vld [vmem:[%s12601_s9 + $0x19] ss:$0 sm:$0xff] }
0x2416   :  { %3202 = vadd.xlane.f32.xlu0 %v3201_v35 }
0x2499   :  { %v4567_v7 = vpop.xlane.xlu1 %4566 }
0x249a   :  { %v4569_v26 = vmul.f32 0.03125, %v4567_v7  ;;  %v9449_v7 = vld [vmem:[%s12601_s9 + $0x1a] ss:$0 sm:$0xff] }
0x249b   :  { %v4564_v20 = vpop.xlane.xlu0 %4563 }
0x249c   :  { %v11852_v25 = vsub.f32 %v11824_v0, %v4569_v26  ;;  %v4568_v1 = vmul.f32 0.03125, %v4564_v20 }
0x249d   :  { %v3206_v18 = vpop.xlane.xlu1 %3205 }
0x249e   :  { %v11855_v24 = vsub.f32 %v11827_v9, %v4568_v1  ;;  %v3208_v47 = vmul.f32 0.032258064, %v3206_v18  ;;  %v4573_v27 = vmul.f32 %v11852_v25, %v11852_v25  ;;  %v4589_v14 = vmul.f32 %v9448_v38, %v11852_v25  ;;  %v9468_v18 = vld [vmem:[%s12601_s9 + $0x13] ss:$0 sm:$0xff] }
0x249f   :  { %v3203_v28 = vpop.xlane.xlu0 %3202 }
0x24a0   :  { %10854 = vrsqrt.f32 %v3208_v47  ;;  %v3207_v6 = vmul.f32 0.032258064, %v3203_v28  ;;  %v4577_v29 = vsel %vm50_vm0, %v4573_v27, 0.0  ;;  %v4572_v8 = vmul.f32 %v11855_v24, %v11855_v24 }
0x24a1   :  { %4578 = vadd.xlane.f32.xlu1 %v4577_v29  ;;  %vm3226_vm12 = vcmp.eq.f32.partialorder %v3208_v47, inf  ;;  %v3229_v22 = vand.u32 2147483648, %v3208_v47  ;;  %vm3228_vm13 = vcmp.eq.f32.partialorder %v3208_v47, 0.0  ;;  %v4588_v15 = vmul.f32 %v9448_v38, %v11855_v24 }
0x24a2   :  { %10856 = vrsqrt.f32 %v3207_v6  ;;  %v4574_v30 = vsel %vm50_vm0, %v4572_v8, 0.0  ;;  %vm3219_vm14 = vcmp.eq.f32.partialorder %v3207_v6, inf  ;;  %v3222_v23 = vand.u32 2147483648, %v3207_v6 }
0x24a3   :  { %4575 = vadd.xlane.f32.xlu0 %v4574_v30  ;;  %vm3221_vm15 = vcmp.eq.f32.partialorder %v3207_v6, 0.0 }
0x24ad   :  { %v10855_v31 = vpop.eup %10854 }
0x24ae   :  { %v3225_v32 = vmul.f32 %v10855_v31, %v3208_v47  ;;  %v11930_v31 = vld [vmem:[%s12596_s4 + $0x8] sm:$0xff] }
0x24af   :  { %v10857_v33 = vpop.eup %10856 }
0x24b0   :  { %v3227_v34 = vsel %vm3226_vm12, %v3208_v47, %v3225_v32  ;;  %v3218_v21 = vmul.f32 %v10857_v33, %v3207_v6  ;;  %v11935_v33 = vld [vmem:[%s12596_s4] sm:$0xff] }
0x24b1   :  { %v3230_v37 = vsel %vm3228_vm13, %v3229_v22, %v3227_v34 }
0x24b2   :  { %v3232_v39 = vadd.f32 1e-06, %v3230_v37  ;;  %v3220_v42 = vsel %vm3219_vm14, %v3207_v6, %v3218_v21  ;;  %v9465_v6 = vld [vmem:[%s12601_s9 + $0x12] ss:$0 sm:$0xff] }
0x24b3   :  { %v3223_v44 = vsel %vm3221_vm15, %v3222_v23, %v3220_v42 }
0x24b4   :  { %10858 = vrcp.f32 %v3232_v39  ;;  %v3231_v45 = vadd.f32 1e-06, %v3223_v44 }
0x24b6   :  { %10860 = vrcp.f32 %v3231_v45 }
0x24c1   :  { %v10859_v19 = vpop.eup %10858 }
0x24c2   :  { %v3236_v46 = vmul.f32 %v10859_v19, %v3216_v36 }
0x24c3   :  { %v10861_v50 = vpop.eup %10860 }
0x24c4   :  { %v3234_v51 = vmul.f32 %v10861_v50, %v3215_v58  ;;  %v11882_v43 = vadd.f32 %v9395_v59, %v3236_v46 }
0x24c6   :  { %v11877_v55 = vadd.f32 %v9395_v59, %v3234_v51 }
0x24c8   :  { %10380 = vmatprep.mubr.msk.f32.mxu1 %vm50_vm0, %v11877_v55 }
0x24c9   :  { %10381 = vmatmul.mubr.msk.f32.vlgmr.msra.gmra.mxu1 %vm50_vm0, %v11882_v43 }
0x252a   :  { %v4579_v61 = vpop.xlane.xlu1 %4578 }
0x252b   :  { %v4581_v56 = vmul.f32 0.032258064, %v4579_v61 }
0x252c   :  { %v4576_v62 = vpop.xlane.xlu0 %4575 }
0x252d   :  { %10862 = vrsqrt.f32 %v4581_v56  ;;  %v4580_v40 = vmul.f32 0.032258064, %v4576_v62  ;;  %vm4599_vm1 = vcmp.eq.f32.partialorder %v4581_v56, inf  ;;  %v4602_v41 = vand.u32 2147483648, %v4581_v56 }
0x252e   :  { %vm4601_vm2 = vcmp.eq.f32.partialorder %v4581_v56, 0.0 }
0x252f   :  { %10864 = vrsqrt.f32 %v4580_v40  ;;  %vm4592_vm3 = vcmp.eq.f32.partialorder %v4580_v40, inf  ;;  %v4595_v10 = vand.u32 2147483648, %v4580_v40  ;;  %vm4594_vm4 = vcmp.eq.f32.partialorder %v4580_v40, 0.0 }
0x253a   :  { %v10863_v63 = vpop.eup %10862 }
0x253b   :  { %v4598_v48 = vmul.f32 %v10863_v63, %v4581_v56 }
0x253c   :  { %v10865_v53 = vpop.eup %10864 }
0x253d   :  { %v4600_v2 = vsel %vm4599_vm1, %v4581_v56, %v4598_v48  ;;  %v4591_v4 = vmul.f32 %v10865_v53, %v4580_v40 }
0x253e   :  { %v4603_v3 = vsel %vm4601_vm2, %v4602_v41, %v4600_v2  ;;  %v9460_v2 = vld [vmem:[%s12598_s6 + $0xc0] sm:$0xff] }
0x253f   :  { %v4605_v5 = vadd.f32 1e-06, %v4603_v3  ;;  %v4593_v11 = vsel %vm4592_vm3, %v4580_v40, %v4591_v4 }
0x2540   :  { %v4596_v12 = vsel %vm4594_vm4, %v4595_v10, %v4593_v11 }
0x2541   :  { %10866 = vrcp.f32 %v4605_v5  ;;  %v4604_v13 = vadd.f32 1e-06, %v4596_v12 }
0x2543   :  { %10868 = vrcp.f32 %v4604_v13 }
0x254e   :  { %v10867_v35 = vpop.eup %10866 }
0x254f   :  { %v4609_v17 = vmul.f32 %v10867_v35, %v4589_v14 }
0x2550   :  { %v10869_v16 = vpop.eup %10868 }
0x2551   :  { %v4607_v26 = vmul.f32 %v10869_v16, %v4588_v15  ;;  %v4617_v1 = vadd.f32 %v9449_v7, %v4609_v17 }
0x2553   :  { %v4616_v20 = vadd.f32 %v9449_v7, %v4607_v26 }
0x2555   :  { %10369 = vmatprep.mubr.msk.f32.mxu0 %vm50_vm0, %v4616_v20 }
0x2556   :  { %10370 = vmatmul.mubr.msk.f32.vlgmr.msra.gmra.mxu0 %vm50_vm0, %v4617_v1 }
0x2589   :  { %v10382_v25 = vpop.f32.mrf.mxu1 }
0x258a   :  { %v11904_v47 = vadd.f32 %v10382_v25, %v9468_v18 }
0x258b   :  { %v4804_v24 = vpop.f32.mrf.mxu1 }
0x258c   :  { %v11906_v27 = vadd.f32 %v9468_v18, %v4804_v24  ;;  %10383 = vmatprep.subr.msk.mxu0 %vm213_vm5, %v11904_v47 }
0x258d   :  { %10384 = vmatpush3.xpose.msk.msra.mxu0 %vm213_vm5, %v11904_v47 }
0x258e   :  { %10385 = vmatprep.subr.msk.mxu0 %vm213_vm5, %v11906_v27 }
0x2591   :  { %10386 = vmatpush3.xpose.msk.msra.mxu0 %vm213_vm5, %v11906_v27 }
0x2616   :  { %v10371_v28 = vpop.f32.mrf.mxu0 }
0x2617   :  { %v11921_v30 = vadd.f32 %v10371_v28, %v9465_v6 }
0x2618   :  { %v4717_v29 = vpop.f32.mrf.mxu0 }
0x2619   :  { %v11919_v8 = vadd.f32 %v9465_v6, %v4717_v29 }
0x261b   :  { %10387 = vmatprep.mubr.msk.f32.mxu0 %vm213_vm5, %v11919_v8 }
0x261c   :  { %10388 = vmatmul.mubr.msk.f32.vlgmr.msra.gmra.mxu0 %vm213_vm5, %v11921_v30 }
0x26dc   :  { %v10389_v32 = vpop.f32.mrf.mxu0 }
0x26dd   :  { %v4901_v22 = vmul.f32 0.35355338, %v10389_v32  ;;  %v9461_v32 = vld [vmem:[%s12598_s6 + $0xc8] sm:$0xff] }
0x26de   :  { %v4891_v34 = vpop.f32.mrf.mxu0 }
0x26df   :  { %v4903_v37 = vadd.f32 %v4901_v22, %v11930_v31  ;;  %v4900_v21 = vmul.f32 0.35355338, %v4891_v34 }
0x26e1   :  { %v4902_v39 = vadd.f32 %v4900_v21, %v11935_v33  ;;  %v4907_v23 = vsel %vm301_vm6, %v4903_v37, -inf }
0x26e2   :  { %4908 = vmax.xlane.f32.xlu1 %v4907_v23 }
0x26e3   :  { %v4904_v42 = vsel %vm301_vm6, %v4902_v39, -inf }
0x26e4   :  { %4905 = vmax.xlane.f32.xlu0 %v4904_v42 }
0x276b   :  { %v4909_v44 = vpop.xlane.xlu1 %4908 }
0x276c   :  { %v4911_v45 = vsub.f32 %v4903_v37, %v4909_v44 }
0x276d   :  { %v4906_v49 = vpop.xlane.xlu0 %4905 }
0x276e   :  { %v4914_v19 = vmul.f32 1.442695, %v4911_v45  ;;  %v4910_v36 = vsub.f32 %v4902_v39, %v4906_v49 }
0x2770   :  { %10870 = vpow2.f32 %v4914_v19  ;;  %v4912_v58 = vmul.f32 1.442695, %v4910_v36 }
0x2772   :  { %10872 = vpow2.f32 %v4912_v58 }
0x277d   :  { %v10871_v50 = vpop.eup %10870 }
0x277e   :  { %v4919_v46 = vsel %vm301_vm6, %v10871_v50, 0.0 }
0x277f   :  { %v10873_v59 = vpop.eup %10872  ;;  %4920 = vadd.xlane.f32.xlu1 %v4919_v46 }
0x2780   :  { %v4916_v51 = vsel %vm301_vm6, %v10873_v59, 0.0 }
0x2781   :  { %4917 = vadd.xlane.f32.xlu0 %v4916_v51 }
0x2790   :  { %4926 = vrot.lane.b32.xlu1 %v11906_v27, %s11034_s30 }
0x2794   :  { %5019 = vrot.lane.b32.xlu1 %v11904_v47, %s11035_s11 }
0x2797   :  { %4928 = vrot.lane.b32.xlu0 %v11904_v47, %s11034_s30 }
0x2798   :  { %5017 = vrot.lane.b32.xlu1 %v11906_v27, %s11035_s11 }
0x279b   :  { %5013 = vrot.lane.b32.xlu0 %v11919_v8, %s11035_s11 }
0x279c   :  { %5015 = vrot.lane.b32.xlu1 %v11921_v30, %s11035_s11 }
0x2808   :  { %v4921_v52 = vpop.xlane.xlu1 %4920 }
0x2809   :  { %10874 = vrcp.f32 %v4921_v52 }
0x280a   :  { %v4918_v54 = vpop.xlane.xlu0 %4917 }
0x280b   :  { %10876 = vrcp.f32 %v4918_v54 }
0x280c   :  { %v4927_v57 = vpop.permute.xlu1 %4926 }
0x280e   :  { %v4929_v60 = vpop.permute.xlu0 %4928 }
0x280f   :  { %10390 = vmatprep.subr.mxu1 %v4929_v60 }
0x2810   :  { %10391 = vmatpush3.msra.mxu1 %v4929_v60  ;;  %v5020_v61 = vpop.permute.xlu1 %5019 }
0x2811   :  { %10392 = vmatprep.subr.mxu1 %v4927_v57 }
0x2812   :  { %10393 = vmatpush3.msra.mxu1 %v4927_v57  ;;  %v5014_v48 = vpop.permute.xlu0 %5013 }
0x2813   :  { %10397 = vmatprep.subr.msk.mxu1 %vm213_vm5, %v5020_v61 }
0x2814   :  { %v5018_v41 = vpop.permute.xlu1 %5017 }
0x2816   :  { %v10875_v56 = vpop.eup %10874 }
0x2817   :  { %v4925_v63 = vmul.f32 %v10875_v56, %v10871_v50 }
0x2818   :  { %v10877_v62 = vpop.eup %10876  ;;  %v5016_v53 = vpop.permute.xlu1 %5015 }
0x2819   :  { %v4923_v40 = vmul.f32 %v10877_v62, %v10873_v59 }
0x281b   :  { %10394 = vmatprep.mubr.msk.f32.mxu1 %vm301_vm6, %v4923_v40 }
0x281c   :  { %10395 = vmatmul.mubr.msk.f32.vlgmr.msra.gmra.mxu1 %vm301_vm6, %v4925_v63 }
0x281d   :  { %10398 = vmatpush3.xpose.msk.msra.mxu1 %vm213_vm5, %v5020_v61  ;;  %10401 = vmatprep.mubr.msk.f32.mxu1 %vm213_vm5, %v5014_v48 }
0x281e   :  { %10399 = vmatprep.subr.msk.mxu1 %vm213_vm5, %v5018_v41 }
0x2821   :  { %10400 = vmatpush3.xpose.msk.msra.mxu1 %vm213_vm5, %v5018_v41 }
0x2822   :  { %10416 = vmatprep.subr.mxu1 %v9460_v2 }
0x2824   :  { %10402 = vmatmul.mubr.msk.f32.vlgmr.msra.gmra.mxu1 %vm213_vm5, %v5016_v53 }
0x2825   :  { %10417 = vmatpush3.msra.mxu1 %v9460_v2 }
0x28dc   :  { %v10396_v3 = vpop.f32.mrf.mxu1 }
0x28de   :  { %v5004_v4 = vpop.f32.mrf.mxu1 }
0x28df   :  { %10418 = vmatprep.mubr.msk.f32.mxu1 %vm213_vm5, %v5004_v4 }
0x28e0   :  { %10419 = vmatmul.mubr.msk.f32.vlgmr.msra.gmra.mxu1 %vm213_vm5, %v10396_v3 }
0x28e4   :  { %v10403_v5 = vpop.f32.mrf.mxu1 }
0x28e5   :  { %v5105_v10 = vmul.f32 0.35355338, %v10403_v5 }
0x28e6   :  { %v5095_v11 = vpop.f32.mrf.mxu1 }
0x28e7   :  { %v5107_v12 = vadd.f32 %v5105_v10, %v11930_v31  ;;  %v5104_v13 = vmul.f32 0.35355338, %v5095_v11 }
0x28e9   :  { %v5106_v38 = vadd.f32 %v5104_v13, %v11935_v33  ;;  %v5111_v35 = vsel %vm301_vm6, %v5107_v12, -inf }
0x28ea   :  { %5112 = vmax.xlane.f32.xlu1 %v5111_v35 }
0x28eb   :  { %v5108_v14 = vsel %vm301_vm6, %v5106_v38, -inf }
0x28ec   :  { %5109 = vmax.xlane.f32.xlu0 %v5108_v14 }
0x28fb   :  { %5130 = vrot.lane.b32.xlu1 %v11906_v27, %s11036_s12 }
0x28ff   :  { %5385 = vrot.lane.b32.xlu1 %v11904_v47, %s11040_s19 }
0x2903   :  { %5383 = vrot.lane.b32.xlu1 %v11906_v27, %s11040_s19 }
0x2907   :  { %5381 = vrot.lane.b32.xlu1 %v11921_v30, %s11040_s19 }
0x290b   :  { %5670 = vrot.lane.b32.xlu1 %v11906_v27, %s11042_s21 }
0x290f   :  { %5668 = vrot.lane.b32.xlu1 %v11921_v30, %s11042_s21 }
0x2973   :  { %v5113_v15 = vpop.xlane.xlu1 %5112 }
0x2974   :  { %v5115_v16 = vsub.f32 %v5107_v12, %v5113_v15 }
0x2975   :  { %v5110_v17 = vpop.xlane.xlu0 %5109 }
0x2976   :  { %v5118_v7 = vmul.f32 1.442695, %v5115_v16  ;;  %v5114_v26 = vsub.f32 %v5106_v38, %v5110_v17 }
0x2977   :  { %v5131_v30 = vpop.permute.xlu1 %5130 }
0x2978   :  { %10878 = vpow2.f32 %v5118_v7  ;;  %v5116_v20 = vmul.f32 1.442695, %v5114_v26 }
0x297a   :  { %10880 = vpow2.f32 %v5116_v20 }
0x2985   :  { %v10879_v1 = vpop.eup %10878 }
0x2986   :  { %v5123_v18 = vsel %vm301_vm6, %v10879_v1, 0.0 }
0x2987   :  { %v10881_v25 = vpop.eup %10880  ;;  %5124 = vadd.xlane.f32.xlu0 %v5123_v18 }
0x2988   :  { %v5120_v24 = vsel %vm301_vm6, %v10881_v25, 0.0 }
0x298b   :  { %5121 = vadd.xlane.f32.xlu0 %v5120_v24 }
0x29a1   :  { %5132 = vrot.lane.b32.xlu0 %v11904_v47, %s11036_s12 }
0x29a5   :  { %5379 = vrot.lane.b32.xlu0 %v11919_v8, %s11040_s19 }
0x29a9   :  { %5672 = vrot.lane.b32.xlu0 %v11904_v47, %s11042_s21 }
0x29ad   :  { %5666 = vrot.lane.b32.xlu0 %v11919_v8, %s11042_s21  ;;  %v5386_v8 = vpop.permute.xlu1 %5385 }
0x29b1   :  { %v5384_v42 = vpop.permute.xlu1 %5383 }
0x29b5   :  { %v5382_v49 = vpop.permute.xlu1 %5381 }
0x29b9   :  { %v5671_v36 = vpop.permute.xlu1 %5670 }
0x29bd   :  { %v5669_v58 = vpop.permute.xlu1 %5668 }
0x2a10   :  { %v5125_v28 = vpop.xlane.xlu0 %5124 }
0x2a11   :  { %10882 = vrcp.f32 %v5125_v28 }
0x2a14   :  { %v5122_v6 = vpop.xlane.xlu0 %5121 }
0x2a15   :  { %10884 = vrcp.f32 %v5122_v6 }
0x2a18   :  { %v5133_v29 = vpop.permute.xlu0 %5132 }
0x2a19   :  { %10404 = vmatprep.subr.mxu0 %v5133_v29 }
0x2a1a   :  { %10405 = vmatpush3.msra.mxu0 %v5133_v29 }
0x2a1b   :  { %10406 = vmatprep.subr.mxu0 %v5131_v30 }
0x2a1c   :  { %10407 = vmatpush3.msra.mxu0 %v5131_v30  ;;  %v5380_v39 = vpop.permute.xlu0 %5379 }
0x2a1d   :  { %10411 = vmatprep.subr.mxu0 %v9461_v32 }
0x2a1e   :  { %v10883_v22 = vpop.eup %10882 }
0x2a1f   :  { %v5129_v21 = vmul.f32 %v10883_v22, %v10879_v1 }
0x2a20   :  { %v5673_v45 = vpop.permute.xlu0 %5672 }
0x2a22   :  { %v10885_v34 = vpop.eup %10884 }
0x2a23   :  { %v5127_v37 = vmul.f32 %v10885_v34, %v10881_v25 }
0x2a24   :  { %v5667_v19 = vpop.permute.xlu0 %5666 }
0x2a25   :  { %10408 = vmatprep.mubr.msk.f32.mxu0 %vm301_vm6, %v5127_v37 }
0x2a26   :  { %10409 = vmatmul.mubr.msk.f32.vlgmr.msra.gmra.mxu0 %vm301_vm6, %v5129_v21 }
0x2a27   :  { %10412 = vmatpush3.msra.mxu0 %v9461_v32 }
0x2a28   :  { %10421 = vmatprep.subr.msk.mxu0 %vm213_vm5, %v5386_v8 }
0x2ae6   :  { %v10410_v23 = vpop.f32.mrf.mxu0 }
0x2ae8   :  { %v5208_v44 = vpop.f32.mrf.mxu0 }
0x2ae9   :  { %10413 = vmatprep.mubr.msk.f32.mxu0 %vm213_vm5, %v5208_v44 }
0x2aea   :  { %10414 = vmatmul.mubr.msk.f32.vlgmr.msra.gmra.mxu0 %vm213_vm5, %v10410_v23 }
0x2aeb   :  { %10422 = vmatpush3.xpose.msk.msra.mxu0 %vm213_vm5, %v5386_v8  ;;  %10425 = vmatprep.mubr.msk.f32.mxu0 %vm213_vm5, %v5380_v39  ;;  %v10420_v8 = vpop.f32.mrf.mxu1 }
0x2aec   :  { %10423 = vmatprep.subr.msk.mxu0 %vm213_vm5, %v5384_v42 }
0x2aed   :  { %v5370_v39 = vpop.f32.mrf.mxu1 }
0x2aef   :  { %10424 = vmatpush3.xpose.msk.msra.mxu0 %vm213_vm5, %v5384_v42 }
0x2af0   :  { %10440 = vmatprep.subr.msk.mxu0 %vm213_vm5, %v5673_v45 }
0x2af2   :  { %10426 = vmatmul.mubr.msk.f32.vlgmr.msra.gmra.mxu0 %vm213_vm5, %v5382_v49 }
0x2af3   :  { %10441 = vmatpush3.xpose.msk.msra.mxu0 %vm213_vm5, %v5673_v45  ;;  %10444 = vmatprep.mubr.msk.f32.mxu0 %vm213_vm5, %v5667_v19 }
0x2af4   :  { %10442 = vmatprep.subr.msk.mxu0 %vm213_vm5, %v5671_v36 }
0x2af7   :  { %10443 = vmatpush3.xpose.msk.msra.mxu0 %vm213_vm5, %v5671_v36 }
0x2afa   :  { %10445 = vmatmul.mubr.msk.f32.vlgmr.msra.gmra.mxu0 %vm213_vm5, %v5669_v58  ;;  %v9463_v58 = vld [vmem:[%s12598_s6 + $0xd8] sm:$0xff] }
0x2baa   :  { %v12013_v50 = vpop.f32.mrf.mxu0 }
0x2bac   :  { %v12015_v46 = vpop.f32.mrf.mxu0 }
0x2bb2   :  { %v10427_v59 = vpop.f32.mrf.mxu0 }
0x2bb3   :  { %v5471_v51 = vmul.f32 0.35355338, %v10427_v59  ;;  %v5376_v59 = vadd.f32 %v10420_v8, %v12013_v50 }
0x2bb4   :  { %v5461_v52 = vpop.f32.mrf.mxu0 }
0x2bb5   :  { %v5473_v54 = vadd.f32 %v5471_v51, %v11930_v31  ;;  %v5470_v57 = vmul.f32 0.35355338, %v5461_v52  ;;  %v5371_v52 = vadd.f32 %v5370_v39, %v12015_v46 }
0x2bb7   :  { %v5472_v60 = vadd.f32 %v5470_v57, %v11935_v33  ;;  %v5477_v61 = vsel %vm301_vm6, %v5473_v54, -inf }
0x2bb8   :  { %5478 = vmax.xlane.f32.xlu1 %v5477_v61 }
0x2bb9   :  { %v5474_v56 = vsel %vm301_vm6, %v5472_v60, -inf }
0x2bba   :  { %5475 = vmax.xlane.f32.xlu0 %v5474_v56  ;;  %v10446_v62 = vpop.f32.mrf.mxu0 }
0x2bbb   :  { %v5758_v16 = vmul.f32 0.35355338, %v10446_v62  ;;  %v9503_v62 = vld [vmem:[%s12601_s9 + $0x14] ss:$0 sm:$0xff] }
0x2bbc   :  { %v5748_v40 = vpop.f32.mrf.mxu0 }
0x2bbd   :  { %v5757_v63 = vmul.f32 0.35355338, %v5748_v40  ;;  %v5760_v17 = vadd.f32 %v5758_v16, %v11930_v31  ;;  %v9462_v31 = vld [vmem:[%s12598_s6 + $0xd0] sm:$0xff]  ;;  %v9509_v16 = vld [vmem:[%s12599_s7 + $0x48] sm:$0xff] }
0x2bbf   :  { %v5759_v48 = vadd.f32 %v5757_v63, %v11935_v33  ;;  %v5764_v7 = vsel %vm301_vm6, %v5760_v17, -inf }
0x2bc1   :  { %v5761_v41 = vsel %vm301_vm6, %v5759_v48, -inf }
0x2bc9   :  { %5496 = vrot.lane.b32.xlu1 %v11906_v27, %s11039_s18 }
0x2bed   :  { %5762 = vmax.xlane.f32.xlu1 %v5761_v41 }
0x2c41   :  { %v5479_v53 = vpop.xlane.xlu1 %5478 }
0x2c42   :  { %v5481_v2 = vsub.f32 %v5473_v54, %v5479_v53 }
0x2c43   :  { %v5476_v3 = vpop.xlane.xlu0 %5475 }
0x2c44   :  { %v5484_v4 = vmul.f32 1.442695, %v5481_v2  ;;  %v5480_v5 = vsub.f32 %v5472_v60, %v5476_v3 }
0x2c45   :  { %v5497_v33 = vpop.permute.xlu1 %5496 }
0x2c46   :  { %10886 = vpow2.f32 %v5484_v4  ;;  %v5482_v10 = vmul.f32 1.442695, %v5480_v5 }
0x2c48   :  { %10888 = vpow2.f32 %v5482_v10 }
0x2c53   :  { %v10887_v11 = vpop.eup %10886 }
0x2c54   :  { %v5489_v12 = vsel %vm301_vm6, %v10887_v11, 0.0 }
0x2c55   :  { %v10889_v13 = vpop.eup %10888  ;;  %5490 = vadd.xlane.f32.xlu0 %v5489_v12 }
0x2c56   :  { %v5486_v38 = vsel %vm301_vm6, %v10889_v13, 0.0 }
0x2c59   :  { %5487 = vadd.xlane.f32.xlu0 %v5486_v38 }
0x2c6f   :  { %5498 = vrot.lane.b32.xlu0 %v11904_v47, %s11039_s18 }
0x2c76   :  { %v5763_v35 = vpop.xlane.xlu1 %5762 }
0x2c77   :  { %v5767_v14 = vsub.f32 %v5759_v48, %v5763_v35 }
0x2c79   :  { %v5769_v15 = vmul.f32 1.442695, %v5767_v14  ;;  %v9511_v14 = vld [vmem:[%s12599_s7 + $0x58] sm:$0xff] }
0x2c7a   :  { %10459 = vmatprep.subr.mxu0 %v9511_v14 }
0x2c7b   :  { %10890 = vpow2.f32 %v5769_v15  ;;  %v9510_v15 = vld [vmem:[%s12599_s7 + $0x50] sm:$0xff]  ;;  %10460 = vmatpush3.msra.mxu0 %v9511_v14 }
0x2c7c   :  { %10461 = vmatprep.subr.mxu0 %v9510_v15 }
0x2c7d   :  { %10462 = vmatpush3.msra.mxu0 %v9510_v15 }
0x2c7e   :  { %10463 = vmatprep.subr.mxu0 %v9509_v16 }
0x2c7f   :  { %10464 = vmatpush3.msra.mxu0 %v9509_v16  ;;  %v9535_v16 = vld [vmem:[%s12597_s5 + $0x78] sm:$0xff] }
0x2c88   :  { %v10891_v26 = vpop.eup %10890 }
0x2c89   :  { %v5773_v20 = vsel %vm301_vm6, %v10891_v26, 0.0 }
0x2c8e   :  { %5765 = vmax.xlane.f32.xlu0 %v5764_v7  ;;  %v9520_v7 = vld [vmem:[%s12600_s8 + $0xb8] sm:$0xff] }
0x2c92   :  { %5774 = vadd.xlane.f32.xlu0 %v5773_v20  ;;  %v9518_v20 = vld [vmem:[%s12600_s8 + $0xa8] sm:$0xff] }
0x2ca8   :  { %5785 = vrot.lane.b32.xlu0 %v11904_v47, %s11041_s20 }
0x2cde   :  { %v5491_v1 = vpop.xlane.xlu0 %5490 }
0x2cdf   :  { %10892 = vrcp.f32 %v5491_v1  ;;  %v9517_v1 = vld [vmem:[%s12600_s8 + $0xa0] sm:$0xff] }
0x2ce2   :  { %v5488_v18 = vpop.xlane.xlu0 %5487 }
0x2ce3   :  { %10894 = vrcp.f32 %v5488_v18 }
0x2ce6   :  { %v5499_v25 = vpop.permute.xlu0 %5498 }
0x2ce7   :  { %10428 = vmatprep.subr.mxu1 %v5499_v25 }
0x2ce8   :  { %10429 = vmatpush3.msra.mxu1 %v5499_v25 }
0x2ce9   :  { %10430 = vmatprep.subr.mxu1 %v5497_v33 }
0x2cea   :  { %10431 = vmatpush3.msra.mxu1 %v5497_v33 }
0x2ceb   :  { %10435 = vmatprep.subr.mxu1 %v9462_v31 }
0x2cec   :  { %v10893_v24 = vpop.eup %10892 }
0x2ced   :  { %v5495_v29 = vmul.f32 %v10893_v24, %v10887_v11 }
0x2cf0   :  { %v10895_v28 = vpop.eup %10894 }
0x2cf1   :  { %v5493_v6 = vmul.f32 %v10895_v28, %v10889_v13 }
0x2cf3   :  { %10432 = vmatprep.mubr.msk.f32.mxu1 %vm301_vm6, %v5493_v6 }
0x2cf4   :  { %10433 = vmatmul.mubr.msk.f32.vlgmr.msra.gmra.mxu1 %vm301_vm6, %v5495_v29 }
0x2cf5   :  { %10436 = vmatpush3.msra.mxu1 %v9462_v31 }
0x2d17   :  { %v5766_v47 = vpop.xlane.xlu0 %5765 }
0x2d18   :  { %v5768_v30 = vsub.f32 %v5760_v17, %v5766_v47  ;;  %v9508_v17 = vld [vmem:[%s12599_s7 + $0x40] sm:$0xff] }
0x2d19   :  { %10465 = vmatprep.subr.mxu0 %v9508_v17 }
0x2d1a   :  { %v5771_v32 = vmul.f32 1.442695, %v5768_v30  ;;  %10466 = vmatpush3.msra.mxu0 %v9508_v17  ;;  %v9534_v17 = vld [vmem:[%s12597_s5 + $0x70] sm:$0xff] }
0x2d1b   :  { %v5775_v22 = vpop.xlane.xlu0 %5774  ;;  %10489 = vmatprep.subr.mxu0 %v9535_v16 }
0x2d1c   :  { %10896 = vpow2.f32 %v5771_v32 }
0x2d1d   :  { %10898 = vrcp.f32 %v5775_v22 }
0x2d1f   :  { %v5786_v34 = vpop.permute.xlu0 %5785 }
0x2d20   :  { %10447 = vmatprep.subr.mxu1 %v5786_v34 }
0x2d29   :  { %v10897_v37 = vpop.eup %10896 }
0x2d2a   :  { %v5776_v21 = vsel %vm301_vm6, %v10897_v37, 0.0  ;;  %v10899_v23 = vpop.eup %10898 }
0x2d2b   :  { %5777 = vadd.xlane.f32.xlu1 %v5776_v21  ;;  %v5780_v49 = vmul.f32 %v10899_v23, %v10891_v26  ;;  %v9519_v26 = vld [vmem:[%s12600_s8 + $0xb0] sm:$0xff]  ;;  %v9506_v23 = vld [vmem:[%s12601_s9 + $0x1b] ss:$0 sm:$0xff] }
0x2d3c   :  { %5783 = vrot.lane.b32.xlu1 %v11906_v27, %s11041_s20 }
0x2db4   :  { %v10434_v42 = vpop.f32.mrf.mxu1  ;;  %v5778_v44 = vpop.xlane.xlu1 %5777 }
0x2db5   :  { %10900 = vrcp.f32 %v5778_v44 }
0x2db6   :  { %v5574_v45 = vpop.f32.mrf.mxu1 }
0x2db7   :  { %10437 = vmatprep.mubr.msk.f32.mxu1 %vm213_vm5, %v5574_v45 }
0x2db8   :  { %10438 = vmatmul.mubr.msk.f32.vlgmr.msra.gmra.mxu1 %vm213_vm5, %v10434_v42  ;;  %v5784_v19 = vpop.permute.xlu1 %5783 }
0x2db9   :  { %10448 = vmatpush3.msra.mxu1 %v5786_v34  ;;  %10451 = vmatprep.mubr.msk.f32.mxu1 %vm301_vm6, %v5780_v49 }
0x2dba   :  { %10449 = vmatprep.subr.mxu1 %v5784_v19 }
0x2dbb   :  { %10450 = vmatpush3.msra.mxu1 %v5784_v19 }
0x2dbc   :  { %10454 = vmatprep.subr.mxu1 %v9463_v58 }
0x2dc2   :  { %v10901_v27 = vpop.eup %10900 }
0x2dc3   :  { %v5782_v36 = vmul.f32 %v10901_v27, %v10897_v37  ;;  %v9507_v27 = vld [vmem:[%s12601_s9 + $0x1c] ss:$0 sm:$0xff] }
0x2dc5   :  { %10452 = vmatmul.mubr.msk.f32.vlgmr.msra.gmra.mxu1 %vm301_vm6, %v5782_v36 }
0x2dc6   :  { %10455 = vmatpush3.msra.mxu1 %v9463_v58 }
0x2dc7   :  { %10470 = vmatprep.subr.mxu1 %v9520_v7 }
0x2e78   :  { %v10439_v51 = vpop.f32.mrf.mxu1 }
0x2e79   :  { %v5665_v54 = vadd.f32 %v10439_v51, %v5376_v59  ;;  %v9516_v51 = vld [vmem:[%s12600_s8 + $0x98] sm:$0xff] }
0x2e7a   :  { %v5655_v57 = vpop.f32.mrf.mxu1 }
0x2e7b   :  { %v5664_v60 = vadd.f32 %v5655_v57, %v5371_v52  ;;  %v9515_v52 = vld [vmem:[%s12600_s8 + $0x90] sm:$0xff]  ;;  %v9513_v57 = vld [vmem:[%s12600_s8 + $0x80] sm:$0xff] }
0x2e85   :  { %v10453_v61 = vpop.f32.mrf.mxu1 }
0x2e87   :  { %v5861_v56 = vpop.f32.mrf.mxu1 }
0x2e88   :  { %10456 = vmatprep.mubr.msk.f32.mxu1 %vm213_vm5, %v5861_v56 }
0x2e89   :  { %10457 = vmatmul.mubr.msk.f32.vlgmr.msra.gmra.mxu1 %vm213_vm5, %v10453_v61 }
0x2e8a   :  { %10471 = vmatpush3.msra.mxu1 %v9520_v7  ;;  %v9533_v7 = vld [vmem:[%s12597_s5 + $0x68] sm:$0xff] }
0x2e8b   :  { %10472 = vmatprep.subr.mxu1 %v9519_v26 }
0x2e8c   :  { %10473 = vmatpush3.msra.mxu1 %v9519_v26  ;;  %v9532_v26 = vld [vmem:[%s12597_s5 + $0x60] sm:$0xff] }
0x2e8d   :  { %10474 = vmatprep.subr.mxu1 %v9518_v20 }
0x2e8e   :  { %10475 = vmatpush3.msra.mxu1 %v9518_v20 }
0x2e8f   :  { %10476 = vmatprep.subr.mxu1 %v9517_v1 }
0x2e90   :  { %10477 = vmatpush3.msra.mxu1 %v9517_v1 }
0x2e91   :  { %10478 = vmatprep.subr.mxu1 %v9516_v51 }
0x2e92   :  { %10479 = vmatpush3.msra.mxu1 %v9516_v51 }
0x2e93   :  { %10480 = vmatprep.subr.mxu1 %v9515_v52 }
0x2e94   :  { %10481 = vmatpush3.msra.mxu1 %v9515_v52 }
0x2f49   :  { %v10458_v40 = vpop.f32.mrf.mxu1 }
0x2f4a   :  { %v5952_v63 = vadd.f32 %v10458_v40, %v5665_v54  ;;  %v9514_v54 = vld [vmem:[%s12600_s8 + $0x88] sm:$0xff] }
0x2f4b   :  { %v5942_v48 = vpop.f32.mrf.mxu1  ;;  %10482 = vmatprep.subr.mxu1 %v9514_v54 }
0x2f4c   :  { %v5960_v50 = vadd.f32 %v9503_v62, %v5952_v63  ;;  %v5951_v41 = vadd.f32 %v5942_v48, %v5664_v60  ;;  %10483 = vmatpush3.msra.mxu1 %v9514_v54  ;;  %v9522_v60 = vld [vmem:[%s12601_s9 + $0x15] ss:$0 sm:$0xff] }
0x2f4d   :  { %10484 = vmatprep.subr.mxu1 %v9513_v57 }
0x2f4e   :  { %v12057_v46 = vadd.f32 %v5960_v50, %v11824_v0  ;;  %v5959_v53 = vadd.f32 %v9503_v62, %v5951_v41  ;;  %10485 = vmatpush3.msra.mxu1 %v9513_v57  ;;  %v9525_v50 = vld [vmem:[%s12601_s9 + $0x16] ss:$0 sm:$0xff] }
0x2f50   :  { %v12060_v2 = vadd.f32 %v5959_v53, %v11827_v9  ;;  %v5970_v3 = vsel %vm50_vm0, %v12057_v46, 0.0 }
0x2f51   :  { %5971 = vadd.xlane.f32.xlu0 %v5970_v3 }
0x2f52   :  { %v5967_v4 = vsel %vm50_vm0, %v12060_v2, 0.0 }
0x2f53   :  { %5968 = vadd.xlane.f32.xlu1 %v5967_v4 }
0x2fda   :  { %v5972_v5 = vpop.xlane.xlu0 %5971 }
0x2fdb   :  { %v5974_v10 = vmul.f32 0.03125, %v5972_v5 }
0x2fdc   :  { %v5969_v11 = vpop.xlane.xlu1 %5968 }
0x2fdd   :  { %v5976_v12 = vsub.f32 %v12057_v46, %v5974_v10  ;;  %v5973_v13 = vmul.f32 0.03125, %v5969_v11 }
0x2fdf   :  { %v5975_v0 = vsub.f32 %v12060_v2, %v5973_v13  ;;  %v5978_v38 = vmul.f32 %v5976_v12, %v5976_v12  ;;  %v5994_v44 = vmul.f32 %v9506_v23, %v5976_v12 }
0x2fe1   :  { %v5982_v9 = vsel %vm50_vm0, %v5978_v38, 0.0  ;;  %v5977_v33 = vmul.f32 %v5975_v0, %v5975_v0  ;;  %v5993_v45 = vmul.f32 %v9506_v23, %v5975_v0 }
0x2fe2   :  { %5983 = vadd.xlane.f32.xlu1 %v5982_v9 }
0x2fe3   :  { %v5979_v35 = vsel %vm50_vm0, %v5977_v33, 0.0 }
0x2fe4   :  { %5980 = vadd.xlane.f32.xlu0 %v5979_v35 }
0x306b   :  { %v5984_v18 = vpop.xlane.xlu1 %5983 }
0x306c   :  { %v5986_v25 = vmul.f32 0.032258064, %v5984_v18 }
0x306d   :  { %v5981_v31 = vpop.xlane.xlu0 %5980 }
0x306e   :  { %10902 = vrsqrt.f32 %v5986_v25  ;;  %v5985_v24 = vmul.f32 0.032258064, %v5981_v31  ;;  %vm6004_vm7 = vcmp.eq.f32.partialorder %v5986_v25, inf  ;;  %v6007_v29 = vand.u32 2147483648, %v5986_v25 }
0x306f   :  { %vm6006_vm8 = vcmp.eq.f32.partialorder %v5986_v25, 0.0 }
0x3070   :  { %10904 = vrsqrt.f32 %v5985_v24  ;;  %vm5997_vm9 = vcmp.eq.f32.partialorder %v5985_v24, inf  ;;  %v6000_v37 = vand.u32 2147483648, %v5985_v24  ;;  %vm5999_vm10 = vcmp.eq.f32.partialorder %v5985_v24, 0.0 }
0x307b   :  { %v10903_v28 = vpop.eup %10902 }
0x307c   :  { %v6003_v6 = vmul.f32 %v10903_v28, %v5986_v25 }
0x307d   :  { %v10905_v47 = vpop.eup %10904 }
0x307e   :  { %v6005_v30 = vsel %vm6004_vm7, %v5986_v25, %v6003_v6  ;;  %v5996_v22 = vmul.f32 %v10905_v47, %v5985_v24 }
0x307f   :  { %v6008_v32 = vsel %vm6006_vm8, %v6007_v29, %v6005_v30 }
0x3080   :  { %v6010_v34 = vadd.f32 1e-06, %v6008_v32  ;;  %v5998_v21 = vsel %vm5997_vm9, %v5985_v24, %v5996_v22 }
0x3081   :  { %v6001_v8 = vsel %vm5999_vm10, %v6000_v37, %v5998_v21 }
0x3082   :  { %10906 = vrcp.f32 %v6010_v34  ;;  %v6009_v39 = vadd.f32 1e-06, %v6001_v8  ;;  %v9530_v8 = vld [vmem:[%s12601_s9 + $0x24] ss:$0 sm:$0xff] }
0x3084   :  { %10908 = vrcp.f32 %v6009_v39 }
0x308f   :  { %v10907_v42 = vpop.eup %10906 }
0x3090   :  { %v6014_v19 = vmul.f32 %v10907_v42, %v5994_v44 }
0x3091   :  { %v10909_v49 = vpop.eup %10908 }
0x3092   :  { %v6012_v36 = vmul.f32 %v10909_v49, %v5993_v45  ;;  %v6022_v59 = vadd.f32 %v9507_v27, %v6014_v19  ;;  %v9531_v49 = vld [vmem:[%s12601_s9 + $0x25] ss:$0 sm:$0xff] }
0x3094   :  { %v6021_v58 = vadd.f32 %v9507_v27, %v6012_v36 }
0x3096   :  { %10467 = vmatprep.mubr.msk.f32.mxu0 %vm50_vm0, %v6021_v58  ;;  %v9542_v58 = vld [vmem:[%s12601_s9 + $0x1d] ss:$0 sm:$0xff] }
0x3097   :  { %10468 = vmatmul.mubr.msk.f32.vlgmr.msra.gmra.mxu0 %vm50_vm0, %v6022_v59 }
0x3098   :  { %10490 = vmatpush3.msra.mxu0 %v9535_v16 }
0x3099   :  { %10491 = vmatprep.subr.mxu0 %v9534_v17 }
0x309a   :  { %10492 = vmatpush3.msra.mxu0 %v9534_v17 }
0x309b   :  { %10493 = vmatprep.subr.mxu0 %v9533_v7 }
0x309c   :  { %10494 = vmatpush3.msra.mxu0 %v9533_v7 }
0x309d   :  { %10495 = vmatprep.subr.mxu0 %v9532_v26 }
0x309e   :  { %10496 = vmatpush3.msra.mxu0 %v9532_v26 }
0x3157   :  { %v10469_v61 = vpop.f32.mrf.mxu0 }
0x3158   :  { %v6125_v56 = vadd.f32 %v10469_v61, %v9522_v60 }
0x3159   :  { %v6119_v62 = vpop.f32.mrf.mxu0 }
0x315a   :  { %v6120_v40 = vadd.f32 %v9522_v60, %v6119_v62  ;;  %v6129_v48 = vmax.f32 %v6125_v56, 0.0 }
0x315c   :  { %v6128_v63 = vmax.f32 %v6120_v40, 0.0  ;;  %v12178_v40 = vld [vmem:[%s12595_s3 + $0x8] sm:$0xff] }
0x315e   :  { %10486 = vmatprep.mubr.msk.f32.mxu1 %vm1532_vm11, %v6128_v63 }
0x315f   :  { %10487 = vmatmul.mubr.msk.f32.vlgmr.msra.gmra.mxu1 %vm1532_vm11, %v6129_v48 }
0x321f   :  { %v10488_v41 = vpop.f32.mrf.mxu1 }
0x3220   :  { %v6214_v53 = vadd.f32 %v10488_v41, %v9525_v50 }
0x3221   :  { %v6208_v3 = vpop.f32.mrf.mxu1 }
0x3222   :  { %v12123_v4 = vadd.f32 %v6214_v53, %v12057_v46  ;;  %v6209_v5 = vadd.f32 %v9525_v50, %v6208_v3  ;;  %v12184_v50 = vld [vmem:[%s12595_s3] sm:$0xff] }
0x3224   :  { %v12126_v10 = vadd.f32 %v6209_v5, %v12060_v2  ;;  %v6226_v11 = vsel %vm50_vm0, %v12123_v4, 0.0 }
0x3225   :  { %6227 = vadd.xlane.f32.xlu1 %v6226_v11 }
0x3226   :  { %v6223_v12 = vsel %vm50_vm0, %v12126_v10, 0.0 }
0x3227   :  { %6224 = vadd.xlane.f32.xlu0 %v6223_v12 }
0x32ae   :  { %v6228_v13 = vpop.xlane.xlu1 %6227 }
0x32af   :  { %v6230_v0 = vmul.f32 0.03125, %v6228_v13 }
0x32b0   :  { %v6225_v38 = vpop.xlane.xlu0 %6224 }
0x32b1   :  { %v6232_v9 = vsub.f32 %v12123_v4, %v6230_v0  ;;  %v6229_v33 = vmul.f32 0.03125, %v6225_v38 }
0x32b3   :  { %v6231_v46 = vsub.f32 %v12126_v10, %v6229_v33  ;;  %v6234_v35 = vmul.f32 %v6232_v9, %v6232_v9  ;;  %v6250_v23 = vmul.f32 %v9530_v8, %v6232_v9 }
0x32b5   :  { %v6238_v2 = vsel %vm50_vm0, %v6234_v35, 0.0  ;;  %v6233_v14 = vmul.f32 %v6231_v46, %v6231_v46  ;;  %v6249_v42 = vmul.f32 %v9530_v8, %v6231_v46 }
0x32b6   :  { %6239 = vadd.xlane.f32.xlu1 %v6238_v2 }
0x32b7   :  { %v6235_v15 = vsel %vm50_vm0, %v6233_v14, 0.0 }
0x32b8   :  { %6236 = vadd.xlane.f32.xlu0 %v6235_v15 }
0x333f   :  { %v6240_v20 = vpop.xlane.xlu1 %6239 }
0x3340   :  { %v6242_v1 = vmul.f32 0.032258064, %v6240_v20 }
0x3341   :  { %v6237_v18 = vpop.xlane.xlu0 %6236 }
0x3342   :  { %10910 = vrsqrt.f32 %v6242_v1  ;;  %v6241_v25 = vmul.f32 0.032258064, %v6237_v18  ;;  %vm6260_vm12 = vcmp.eq.f32.partialorder %v6242_v1, inf  ;;  %v6263_v28 = vand.u32 2147483648, %v6242_v1 }
0x3343   :  { %vm6262_vm13 = vcmp.eq.f32.partialorder %v6242_v1, 0.0 }
0x3344   :  { %10912 = vrsqrt.f32 %v6241_v25  ;;  %vm6253_vm14 = vcmp.eq.f32.partialorder %v6241_v25, inf  ;;  %v6256_v22 = vand.u32 2147483648, %v6241_v25  ;;  %vm6255_vm15 = vcmp.eq.f32.partialorder %v6241_v25, 0.0 }
0x334f   :  { %v10911_v31 = vpop.eup %10910 }
0x3350   :  { %v6259_v24 = vmul.f32 %v10911_v31, %v6242_v1 }
0x3351   :  { %v10913_v6 = vpop.eup %10912 }
0x3352   :  { %v6261_v29 = vsel %vm6260_vm12, %v6242_v1, %v6259_v24  ;;  %v6252_v30 = vmul.f32 %v10913_v6, %v6241_v25  ;;  %v9537_v24 = vld [vmem:[%s12598_s6 + $0x60] sm:$0xff] }
0x3353   :  { %v6264_v47 = vsel %vm6262_vm13, %v6263_v28, %v6261_v29 }
0x3354   :  { %v6266_v32 = vadd.f32 1e-06, %v6264_v47  ;;  %v6254_v34 = vsel %vm6253_vm14, %v6241_v25, %v6252_v30 }
0x3355   :  { %v6257_v37 = vsel %vm6255_vm15, %v6256_v22, %v6254_v34 }
0x3356   :  { %10914 = vrcp.f32 %v6266_v32  ;;  %v6265_v21 = vadd.f32 1e-06, %v6257_v37 }
0x3358   :  { %10916 = vrcp.f32 %v6265_v21 }
0x3363   :  { %v10915_v39 = vpop.eup %10914 }
0x3364   :  { %v6270_v45 = vmul.f32 %v10915_v39, %v6250_v23 }
0x3365   :  { %v10917_v44 = vpop.eup %10916 }
0x3366   :  { %v6268_v19 = vmul.f32 %v10917_v44, %v6249_v42  ;;  %v6278_v36 = vadd.f32 %v9531_v49, %v6270_v45 }
0x3368   :  { %v6277_v27 = vadd.f32 %v9531_v49, %v6268_v19 }
0x336a   :  { %10497 = vmatprep.mubr.msk.f32.mxu0 %vm50_vm0, %v6277_v27 }
0x336b   :  { %10498 = vmatmul.mubr.msk.f32.vlgmr.msra.gmra.mxu0 %vm50_vm0, %v6278_v36 }
0x342b   :  { %v10499_v59 = vpop.f32.mrf.mxu0 }
0x342c   :  { %v12159_v51 = vadd.f32 %v10499_v59, %v9542_v58 }
0x342d   :  { %v6371_v52 = vpop.f32.mrf.mxu0 }
0x342e   :  { %v12161_v54 = vadd.f32 %v9542_v58, %v6371_v52  ;;  %6384 = vrot.lane.b32.xlu0 %v12159_v51, %s11034_s30 }
0x3430   :  { %6382 = vrot.lane.b32.xlu1 %v12161_v54, %s11034_s30  ;;  %10504 = vmatprep.mubr.msk.f32.mxu0 %vm213_vm5, %v12161_v54 }
0x34a0   :  { %v6385_v57 = vpop.permute.xlu0 %6384 }
0x34a1   :  { %10500 = vmatprep.subr.msk.mxu0 %vm213_vm5, %v6385_v57 }
0x34a2   :  { %10501 = vmatpush3.xpose.msk.msra.mxu0 %vm213_vm5, %v6385_v57  ;;  %v6383_v60 = vpop.permute.xlu1 %6382 }
0x34a3   :  { %10502 = vmatprep.subr.msk.mxu0 %vm213_vm5, %v6383_v60 }
0x34a6   :  { %10503 = vmatpush3.xpose.msk.msra.mxu0 %vm213_vm5, %v6383_v60  ;;  %v9538_v60 = vld [vmem:[%s12598_s6 + $0x68] sm:$0xff] }
0x34a9   :  { %10505 = vmatmul.mubr.msk.f32.vlgmr.msra.gmra.mxu0 %vm213_vm5, %v12159_v51 }
0x3569   :  { %v10506_v61 = vpop.f32.mrf.mxu0 }
0x356a   :  { %v6470_v56 = vmul.f32 0.35355338, %v10506_v61 }
0x356b   :  { %v6460_v62 = vpop.f32.mrf.mxu0 }
0x356c   :  { %v6472_v63 = vadd.f32 %v12178_v40, %v6470_v56  ;;  %v6469_v48 = vmul.f32 0.35355338, %v6460_v62 }
0x356e   :  { %v6471_v41 = vadd.f32 %v12184_v50, %v6469_v48  ;;  %v6476_v53 = vsel %vm301_vm6, %v6472_v63, -inf }
0x356f   :  { %6477 = vmax.xlane.f32.xlu0 %v6476_v53 }
0x3570   :  { %v6473_v3 = vsel %vm301_vm6, %v6471_v41, -inf }
0x3571   :  { %6474 = vmax.xlane.f32.xlu1 %v6473_v3 }
0x35f8   :  { %v6478_v5 = vpop.xlane.xlu0 %6477 }
0x35f9   :  { %v6480_v11 = vsub.f32 %v6472_v63, %v6478_v5 }
0x35fa   :  { %v6475_v12 = vpop.xlane.xlu1 %6474 }
0x35fb   :  { %v6483_v13 = vmul.f32 1.442695, %v6480_v11  ;;  %v6479_v0 = vsub.f32 %v6471_v41, %v6475_v12 }
0x35fd   :  { %10918 = vpow2.f32 %v6483_v13  ;;  %v6481_v38 = vmul.f32 1.442695, %v6479_v0 }
0x35ff   :  { %10920 = vpow2.f32 %v6481_v38 }
0x360a   :  { %v10919_v9 = vpop.eup %10918 }
0x360b   :  { %v6488_v33 = vsel %vm301_vm6, %v10919_v9, 0.0 }
0x360c   :  { %v10921_v46 = vpop.eup %10920  ;;  %6489 = vadd.xlane.f32.xlu1 %v6488_v33 }
0x360d   :  { %v6485_v35 = vsel %vm301_vm6, %v10921_v46, 0.0 }
0x360e   :  { %6486 = vadd.xlane.f32.xlu0 %v6485_v35 }
0x361d   :  { %6495 = vrot.lane.b32.xlu1 %v12161_v54, %s11037_s0 }
0x3621   :  { %6588 = vrot.lane.b32.xlu1 %v12159_v51, %s11036_s12 }
0x3624   :  { %6497 = vrot.lane.b32.xlu0 %v12159_v51, %s11037_s0 }
0x3625   :  { %6586 = vrot.lane.b32.xlu1 %v12161_v54, %s11036_s12 }
0x3628   :  { %6582 = vrot.lane.b32.xlu0 %v12161_v54, %s11035_s11 }
0x3629   :  { %6584 = vrot.lane.b32.xlu1 %v12159_v51, %s11035_s11 }
0x3695   :  { %v6490_v2 = vpop.xlane.xlu1 %6489 }
0x3696   :  { %10922 = vrcp.f32 %v6490_v2 }
0x3697   :  { %v6487_v14 = vpop.xlane.xlu0 %6486 }
0x3698   :  { %10924 = vrcp.f32 %v6487_v14 }
0x3699   :  { %v6496_v15 = vpop.permute.xlu1 %6495 }
0x369b   :  { %v6498_v16 = vpop.permute.xlu0 %6497 }
0x369c   :  { %10507 = vmatprep.subr.mxu1 %v6498_v16 }
0x369d   :  { %10508 = vmatpush3.msra.mxu1 %v6498_v16  ;;  %v6589_v17 = vpop.permute.xlu1 %6588 }
0x369e   :  { %10509 = vmatprep.subr.mxu1 %v6496_v15 }
0x369f   :  { %10510 = vmatpush3.msra.mxu1 %v6496_v15  ;;  %v6583_v18 = vpop.permute.xlu0 %6582 }
0x36a0   :  { %10514 = vmatprep.subr.msk.mxu1 %vm213_vm5, %v6589_v17 }
0x36a1   :  { %v6587_v25 = vpop.permute.xlu1 %6586 }
0x36a3   :  { %v10923_v7 = vpop.eup %10922 }
0x36a4   :  { %v6494_v1 = vmul.f32 %v10923_v7, %v10919_v9 }
0x36a5   :  { %v10925_v26 = vpop.eup %10924  ;;  %v6585_v31 = vpop.permute.xlu1 %6584 }
0x36a6   :  { %v6492_v20 = vmul.f32 %v10925_v26, %v10921_v46 }
0x36a8   :  { %10511 = vmatprep.mubr.msk.f32.mxu1 %vm301_vm6, %v6492_v20 }
0x36a9   :  { %10512 = vmatmul.mubr.msk.f32.vlgmr.msra.gmra.mxu1 %vm301_vm6, %v6494_v1 }
0x36aa   :  { %10515 = vmatpush3.xpose.msk.msra.mxu1 %vm213_vm5, %v6589_v17  ;;  %10518 = vmatprep.mubr.msk.f32.mxu1 %vm213_vm5, %v6583_v18 }
0x36ab   :  { %10516 = vmatprep.subr.msk.mxu1 %vm213_vm5, %v6587_v25 }
0x36ae   :  { %10517 = vmatpush3.xpose.msk.msra.mxu1 %vm213_vm5, %v6587_v25 }
0x36af   :  { %10533 = vmatprep.subr.mxu1 %v9537_v24 }
0x36b1   :  { %10519 = vmatmul.mubr.msk.f32.vlgmr.msra.gmra.mxu1 %vm213_vm5, %v6585_v31 }
0x36b2   :  { %10534 = vmatpush3.msra.mxu1 %v9537_v24 }
0x3769   :  { %v10513_v28 = vpop.f32.mrf.mxu1 }
0x376b   :  { %v6573_v6 = vpop.f32.mrf.mxu1 }
0x376c   :  { %10535 = vmatprep.mubr.msk.f32.mxu1 %vm213_vm5, %v6573_v6 }
0x376d   :  { %10536 = vmatmul.mubr.msk.f32.vlgmr.msra.gmra.mxu1 %vm213_vm5, %v10513_v28 }
0x3771   :  { %v10520_v29 = vpop.f32.mrf.mxu1 }
0x3772   :  { %v6674_v47 = vmul.f32 0.35355338, %v10520_v29 }
0x3773   :  { %v6664_v30 = vpop.f32.mrf.mxu1 }
0x3774   :  { %v6676_v32 = vadd.f32 %v12178_v40, %v6674_v47  ;;  %v6673_v22 = vmul.f32 0.35355338, %v6664_v30 }
0x3776   :  { %v6675_v34 = vadd.f32 %v12184_v50, %v6673_v22  ;;  %v6680_v37 = vsel %vm301_vm6, %v6676_v32, -inf }
0x3777   :  { %6681 = vmax.xlane.f32.xlu1 %v6680_v37 }
0x3778   :  { %v6677_v21 = vsel %vm301_vm6, %v6675_v34, -inf }
0x3779   :  { %6678 = vmax.xlane.f32.xlu0 %v6677_v21 }
0x3788   :  { %6699 = vrot.lane.b32.xlu1 %v12161_v54, %s11038_s17 }
0x378c   :  { %6954 = vrot.lane.b32.xlu1 %v12159_v51, %s11039_s18 }
0x3790   :  { %6952 = vrot.lane.b32.xlu1 %v12161_v54, %s11039_s18 }
0x3794   :  { %6950 = vrot.lane.b32.xlu1 %v12159_v51, %s11040_s19 }
0x3798   :  { %7239 = vrot.lane.b32.xlu1 %v12161_v54, %s11041_s20 }
0x379c   :  { %7237 = vrot.lane.b32.xlu1 %v12159_v51, %s11042_s21 }
0x3800   :  { %v6682_v8 = vpop.xlane.xlu1 %6681 }
0x3801   :  { %v6684_v39 = vsub.f32 %v6676_v32, %v6682_v8 }
0x3802   :  { %v6679_v23 = vpop.xlane.xlu0 %6678 }
0x3803   :  { %v6687_v42 = vmul.f32 1.442695, %v6684_v39  ;;  %v6683_v44 = vsub.f32 %v6675_v34, %v6679_v23 }
0x3804   :  { %v6700_v57 = vpop.permute.xlu1 %6699 }
0x3805   :  { %10926 = vpow2.f32 %v6687_v42  ;;  %v6685_v45 = vmul.f32 1.442695, %v6683_v44 }
0x3807   :  { %10928 = vpow2.f32 %v6685_v45 }
0x3808   :  { %v6955_v48 = vpop.permute.xlu1 %6954 }
0x380c   :  { %v6953_v3 = vpop.permute.xlu1 %6952 }
0x3810   :  { %v6951_v12 = vpop.permute.xlu1 %6950 }
0x3812   :  { %v10927_v49 = vpop.eup %10926 }
0x3813   :  { %v6692_v19 = vsel %vm301_vm6, %v10927_v49, 0.0 }
0x3814   :  { %v10929_v27 = vpop.eup %10928  ;;  %6693 = vadd.xlane.f32.xlu0 %v6692_v19  ;;  %v7240_v0 = vpop.permute.xlu1 %7239 }
0x3815   :  { %v6689_v36 = vsel %vm301_vm6, %v10929_v27, 0.0 }
0x3818   :  { %6690 = vadd.xlane.f32.xlu0 %v6689_v36  ;;  %v7238_v38 = vpop.permute.xlu1 %7237 }
0x382e   :  { %6701 = vrot.lane.b32.xlu0 %v12159_v51, %s11038_s17 }
0x3832   :  { %6948 = vrot.lane.b32.xlu0 %v12161_v54, %s11040_s19 }
0x3836   :  { %7241 = vrot.lane.b32.xlu0 %v12159_v51, %s11041_s20 }
0x383a   :  { %7235 = vrot.lane.b32.xlu0 %v12161_v54, %s11042_s21 }
0x389d   :  { %v6694_v58 = vpop.xlane.xlu0 %6693 }
0x389e   :  { %10930 = vrcp.f32 %v6694_v58 }
0x38a1   :  { %v6691_v59 = vpop.xlane.xlu0 %6690 }
0x38a2   :  { %10932 = vrcp.f32 %v6691_v59 }
0x38a5   :  { %v6702_v52 = vpop.permute.xlu0 %6701 }
0x38a6   :  { %10521 = vmatprep.subr.mxu0 %v6702_v52 }
0x38a7   :  { %10522 = vmatpush3.msra.mxu0 %v6702_v52 }
0x38a8   :  { %10523 = vmatprep.subr.mxu0 %v6700_v57 }
0x38a9   :  { %10524 = vmatpush3.msra.mxu0 %v6700_v57  ;;  %v6949_v41 = vpop.permute.xlu0 %6948 }
0x38aa   :  { %10528 = vmatprep.subr.mxu0 %v9538_v60 }
0x38ab   :  { %v10931_v61 = vpop.eup %10930 }
0x38ac   :  { %v6698_v63 = vmul.f32 %v10931_v61, %v10927_v49 }
0x38ad   :  { %v7242_v11 = vpop.permute.xlu0 %7241 }
0x38af   :  { %v10933_v56 = vpop.eup %10932 }
0x38b0   :  { %v6696_v62 = vmul.f32 %v10933_v56, %v10929_v27 }
0x38b1   :  { %v7236_v13 = vpop.permute.xlu0 %7235 }
0x38b2   :  { %10525 = vmatprep.mubr.msk.f32.mxu0 %vm301_vm6, %v6696_v62 }
0x38b3   :  { %10526 = vmatmul.mubr.msk.f32.vlgmr.msra.gmra.mxu0 %vm301_vm6, %v6698_v63 }
0x38b4   :  { %10529 = vmatpush3.msra.mxu0 %v9538_v60 }
0x38b5   :  { %10538 = vmatprep.subr.msk.mxu0 %vm213_vm5, %v6955_v48 }
0x3973   :  { %v10527_v53 = vpop.f32.mrf.mxu0 }
0x3975   :  { %v6777_v5 = vpop.f32.mrf.mxu0 }
0x3976   :  { %10530 = vmatprep.mubr.msk.f32.mxu0 %vm213_vm5, %v6777_v5 }
0x3977   :  { %10531 = vmatmul.mubr.msk.f32.vlgmr.msra.gmra.mxu0 %vm213_vm5, %v10527_v53 }
0x3978   :  { %10539 = vmatpush3.xpose.msk.msra.mxu0 %vm213_vm5, %v6955_v48  ;;  %10542 = vmatprep.mubr.msk.f32.mxu0 %vm213_vm5, %v6949_v41  ;;  %v10537_v48 = vpop.f32.mrf.mxu1 }
0x3979   :  { %10540 = vmatprep.subr.msk.mxu0 %vm213_vm5, %v6953_v3 }
0x397a   :  { %v6939_v41 = vpop.f32.mrf.mxu1 }
0x397c   :  { %10541 = vmatpush3.xpose.msk.msra.mxu0 %vm213_vm5, %v6953_v3 }
0x397d   :  { %10557 = vmatprep.subr.msk.mxu0 %vm213_vm5, %v7242_v11 }
0x397f   :  { %10543 = vmatmul.mubr.msk.f32.vlgmr.msra.gmra.mxu0 %vm213_vm5, %v6951_v12 }
0x3980   :  { %10558 = vmatpush3.xpose.msk.msra.mxu0 %vm213_vm5, %v7242_v11  ;;  %10561 = vmatprep.mubr.msk.f32.mxu0 %vm213_vm5, %v7236_v13 }
0x3981   :  { %10559 = vmatprep.subr.msk.mxu0 %vm213_vm5, %v7240_v0 }
0x3984   :  { %10560 = vmatpush3.xpose.msk.msra.mxu0 %vm213_vm5, %v7240_v0 }
0x3987   :  { %10562 = vmatmul.mubr.msk.f32.vlgmr.msra.gmra.mxu0 %vm213_vm5, %v7238_v38  ;;  %v9540_v38 = vld [vmem:[%s12598_s6 + $0x78] sm:$0xff] }
0x3a37   :  { %v12261_v9 = vpop.f32.mrf.mxu0 }
0x3a39   :  { %v12263_v33 = vpop.f32.mrf.mxu0 }
0x3a3f   :  { %v10544_v46 = vpop.f32.mrf.mxu0 }
0x3a40   :  { %v7040_v35 = vmul.f32 0.35355338, %v10544_v46  ;;  %v9590_v46 = vld [vmem:[%s12599_s7 + $0xb8] sm:$0xff] }
0x3a41   :  { %v7030_v2 = vpop.f32.mrf.mxu0 }
0x3a42   :  { %v7042_v14 = vadd.f32 %v12178_v40, %v7040_v35  ;;  %v7039_v15 = vmul.f32 0.35355338, %v7030_v2  ;;  %v6945_v35 = vadd.f32 %v10537_v48, %v12261_v9  ;;  %v9588_v9 = vld [vmem:[%s12599_s7 + $0xa8] sm:$0xff] }
0x3a44   :  { %v7041_v16 = vadd.f32 %v12184_v50, %v7039_v15  ;;  %v7046_v17 = vsel %vm301_vm6, %v7042_v14, -inf }
0x3a45   :  { %7047 = vmax.xlane.f32.xlu1 %v7046_v17 }
0x3a46   :  { %v7043_v7 = vsel %vm301_vm6, %v7041_v16, -inf }
0x3a47   :  { %7044 = vmax.xlane.f32.xlu0 %v7043_v7  ;;  %v10563_v26 = vpop.f32.mrf.mxu0 }
0x3a48   :  { %v7327_v39 = vmul.f32 0.35355338, %v10563_v26 }
0x3a49   :  { %v7317_v20 = vpop.f32.mrf.mxu0 }
0x3a4a   :  { %v7326_v1 = vmul.f32 0.35355338, %v7317_v20  ;;  %v7329_v23 = vadd.f32 %v12178_v40, %v7327_v39  ;;  %v9539_v40 = vld [vmem:[%s12598_s6 + $0x70] sm:$0xff] }
0x3a4b   :  { %v9589_v20 = vld [vmem:[%s12599_s7 + $0xb0] sm:$0xff] }
0x3a4c   :  { %v7328_v18 = vadd.f32 %v12184_v50, %v7326_v1  ;;  %v7333_v42 = vsel %vm301_vm6, %v7329_v23, -inf  ;;  %v9584_v1 = vld [vmem:[%s12598_s6 + $0xb0] sm:$0xff] }
0x3a4e   :  { %v7330_v25 = vsel %vm301_vm6, %v7328_v18, -inf }
0x3a56   :  { %7065 = vrot.lane.b32.xlu1 %v12161_v54, %s11043_s26 }
0x3a7a   :  { %7331 = vmax.xlane.f32.xlu1 %v7330_v25  ;;  %v9577_v25 = vld [vmem:[%s12601_s9 + $0x1e] ss:$0 sm:$0xff] }
0x3ace   :  { %v7048_v31 = vpop.xlane.xlu1 %7047 }
0x3acf   :  { %v7050_v24 = vsub.f32 %v7042_v14, %v7048_v31  ;;  %v6940_v14 = vadd.f32 %v6939_v41, %v12263_v33  ;;  %v9587_v33 = vld [vmem:[%s12599_s7 + $0xa0] sm:$0xff] }
0x3ad0   :  { %v7045_v28 = vpop.xlane.xlu0 %7044 }
0x3ad1   :  { %v7053_v6 = vmul.f32 1.442695, %v7050_v24  ;;  %v7049_v29 = vsub.f32 %v7041_v16, %v7045_v28 }
0x3ad2   :  { %v7066_v50 = vpop.permute.xlu1 %7065 }
0x3ad3   :  { %10934 = vpow2.f32 %v7053_v6  ;;  %v7051_v47 = vmul.f32 1.442695, %v7049_v29 }
0x3ad5   :  { %10936 = vpow2.f32 %v7051_v47 }
0x3ae0   :  { %v10935_v30 = vpop.eup %10934 }
0x3ae1   :  { %v7058_v32 = vsel %vm301_vm6, %v10935_v30, 0.0 }
0x3ae2   :  { %v10937_v22 = vpop.eup %10936  ;;  %7059 = vadd.xlane.f32.xlu0 %v7058_v32  ;;  %v9600_v32 = vld [vmem:[%s12601_s9 + $0x20] ss:$0 sm:$0xff] }
0x3ae3   :  { %v7055_v34 = vsel %vm301_vm6, %v10937_v22, 0.0 }
0x3ae6   :  { %7056 = vadd.xlane.f32.xlu0 %v7055_v34 }
0x3afc   :  { %7067 = vrot.lane.b32.xlu0 %v12159_v51, %s11043_s26 }
0x3b03   :  { %v7332_v37 = vpop.xlane.xlu1 %7331 }
0x3b04   :  { %v7336_v21 = vsub.f32 %v7328_v18, %v7332_v37  ;;  %v9583_v18 = vld [vmem:[%s12598_s6 + $0xa8] sm:$0xff] }
0x3b06   :  { %v7338_v8 = vmul.f32 1.442695, %v7336_v21 }
0x3b08   :  { %10938 = vpow2.f32 %v7338_v8 }
0x3b15   :  { %v10939_v44 = vpop.eup %10938 }
0x3b16   :  { %v7342_v45 = vsel %vm301_vm6, %v10939_v44, 0.0 }
0x3b1b   :  { %7334 = vmax.xlane.f32.xlu0 %v7333_v42 }
0x3b1f   :  { %7343 = vadd.xlane.f32.xlu0 %v7342_v45 }
0x3b35   :  { %7354 = vrot.lane.b32.xlu0 %v12159_v51, %s11044_s27 }
0x3b6b   :  { %v7060_v49 = vpop.xlane.xlu0 %7059 }
0x3b6c   :  { %10940 = vrcp.f32 %v7060_v49 }
0x3b6f   :  { %v7057_v19 = vpop.xlane.xlu0 %7056 }
0x3b70   :  { %10942 = vrcp.f32 %v7057_v19 }
0x3b73   :  { %v7068_v27 = vpop.permute.xlu0 %7067 }
0x3b74   :  { %10545 = vmatprep.subr.mxu1 %v7068_v27 }
0x3b75   :  { %10546 = vmatpush3.msra.mxu1 %v7068_v27 }
0x3b76   :  { %10547 = vmatprep.subr.mxu1 %v7066_v50 }
0x3b77   :  { %10548 = vmatpush3.msra.mxu1 %v7066_v50 }
0x3b78   :  { %10552 = vmatprep.subr.mxu1 %v9539_v40 }
0x3b79   :  { %v10941_v36 = vpop.eup %10940 }
0x3b7a   :  { %v7064_v52 = vmul.f32 %v10941_v36, %v10935_v30 }
0x3b7d   :  { %v10943_v58 = vpop.eup %10942 }
0x3b7e   :  { %v7062_v59 = vmul.f32 %v10943_v58, %v10937_v22 }
0x3b80   :  { %10549 = vmatprep.mubr.msk.f32.mxu1 %vm301_vm6, %v7062_v59 }
0x3b81   :  { %10550 = vmatmul.mubr.msk.f32.vlgmr.msra.gmra.mxu1 %vm301_vm6, %v7064_v52 }
0x3b82   :  { %10553 = vmatpush3.msra.mxu1 %v9539_v40 }
0x3ba4   :  { %v7335_v51 = vpop.xlane.xlu0 %7334 }
0x3ba5   :  { %v7337_v57 = vsub.f32 %v7329_v23, %v7335_v51 }
0x3ba7   :  { %v7340_v60 = vmul.f32 1.442695, %v7337_v57 }
0x3ba8   :  { %v7344_v61 = vpop.xlane.xlu0 %7343 }
0x3ba9   :  { %10944 = vpow2.f32 %v7340_v60 }
0x3baa   :  { %10946 = vrcp.f32 %v7344_v61 }
0x3bac   :  { %v7355_v56 = vpop.permute.xlu0 %7354 }
0x3bad   :  { %10564 = vmatprep.subr.mxu1 %v7355_v56 }
0x3bb6   :  { %v10945_v62 = vpop.eup %10944 }
0x3bb7   :  { %v7345_v63 = vsel %vm301_vm6, %v10945_v62, 0.0  ;;  %v10947_v53 = vpop.eup %10946 }
0x3bb8   :  { %7346 = vadd.xlane.f32.xlu1 %v7345_v63  ;;  %v7349_v12 = vmul.f32 %v10947_v53, %v10939_v44 }
0x3bc9   :  { %7352 = vrot.lane.b32.xlu1 %v12161_v54, %s11044_s27 }
0x3c41   :  { %v10551_v3 = vpop.f32.mrf.mxu1  ;;  %v7347_v5 = vpop.xlane.xlu1 %7346 }
0x3c42   :  { %10948 = vrcp.f32 %v7347_v5 }
0x3c43   :  { %v7143_v11 = vpop.f32.mrf.mxu1 }
0x3c44   :  { %10554 = vmatprep.mubr.msk.f32.mxu1 %vm213_vm5, %v7143_v11 }
0x3c45   :  { %10555 = vmatmul.mubr.msk.f32.vlgmr.msra.gmra.mxu1 %vm213_vm5, %v10551_v3  ;;  %v7353_v13 = vpop.permute.xlu1 %7352  ;;  %v9580_v3 = vld [vmem:[%s12601_s9 + $0x26] ss:$0 sm:$0xff] }
0x3c46   :  { %10565 = vmatpush3.msra.mxu1 %v7355_v56  ;;  %10568 = vmatprep.mubr.msk.f32.mxu1 %vm301_vm6, %v7349_v12 }
0x3c47   :  { %10566 = vmatprep.subr.mxu1 %v7353_v13 }
0x3c48   :  { %10567 = vmatpush3.msra.mxu1 %v7353_v13 }
0x3c49   :  { %10571 = vmatprep.subr.mxu1 %v9540_v38 }
0x3c4f   :  { %v10949_v54 = vpop.eup %10948 }
0x3c50   :  { %v7351_v0 = vmul.f32 %v10949_v54, %v10945_v62 }
0x3c52   :  { %10569 = vmatmul.mubr.msk.f32.vlgmr.msra.gmra.mxu1 %vm301_vm6, %v7351_v0  ;;  %v9581_v0 = vld [vmem:[%s12601_s9 + $0x27] ss:$0 sm:$0xff] }
0x3c53   :  { %10572 = vmatpush3.msra.mxu1 %v9540_v38 }
0x3c54   :  { %10587 = vmatprep.subr.mxu1 %v9590_v46 }
0x3d05   :  { %v10556_v2 = vpop.f32.mrf.mxu1 }
0x3d06   :  { %v7234_v15 = vadd.f32 %v10556_v2, %v6945_v35 }
0x3d07   :  { %v7224_v16 = vpop.f32.mrf.mxu1 }
0x3d08   :  { %v7233_v17 = vadd.f32 %v7224_v16, %v6940_v14  ;;  %v9597_v16 = vld [vmem:[%s12601_s9 + $0x1f] ss:$0 sm:$0xff] }
0x3d12   :  { %v10570_v7 = vpop.f32.mrf.mxu1 }
0x3d14   :  { %v7430_v26 = vpop.f32.mrf.mxu1 }
0x3d15   :  { %10573 = vmatprep.mubr.msk.f32.mxu1 %vm213_vm5, %v7430_v26 }
0x3d16   :  { %10574 = vmatmul.mubr.msk.f32.vlgmr.msra.gmra.mxu1 %vm213_vm5, %v10570_v7 }
0x3d17   :  { %10588 = vmatpush3.msra.mxu1 %v9590_v46  ;;  %10595 = vmatprep.mubr.msk.f32.mxu1 %vm50_vm0, %v11877_v55  ;;  %v9585_v55 = vld [vmem:[%s12598_s6 + $0xb8] sm:$0xff] }
0x3d18   :  { %10589 = vmatprep.subr.mxu1 %v9589_v20  ;;  %10576 = vmatprep.subr.mxu0 %v9585_v55 }
0x3d19   :  { %10590 = vmatpush3.msra.mxu1 %v9589_v20  ;;  %10577 = vmatpush3.msra.mxu0 %v9585_v55  ;;  %v12383_v55 = vld [vmem:[%s12596_s4 + $0x8] sm:$0xff] }
0x3d1a   :  { %10591 = vmatprep.subr.mxu1 %v9588_v9  ;;  %10578 = vmatprep.subr.mxu0 %v9584_v1 }
0x3d1b   :  { %10592 = vmatpush3.msra.mxu1 %v9588_v9  ;;  %10579 = vmatpush3.msra.mxu0 %v9584_v1 }
0x3d1c   :  { %10593 = vmatprep.subr.mxu1 %v9587_v33  ;;  %10580 = vmatprep.subr.mxu0 %v9583_v18 }
0x3d1d   :  { %10594 = vmatpush3.msra.mxu1 %v9587_v33  ;;  %10581 = vmatpush3.msra.mxu0 %v9583_v18 }
0x3d1e   :  { %10596 = vmatmul.mubr.msk.f32.vlgmr.msra.gmra.mxu1 %vm50_vm0, %v11882_v43  ;;  %v9582_v43 = vld [vmem:[%s12598_s6 + $0xa0] sm:$0xff] }
0x3d1f   :  { %10582 = vmatprep.subr.mxu0 %v9582_v43 }
0x3d20   :  { %10583 = vmatpush3.msra.mxu0 %v9582_v43  ;;  %v12389_v43 = vld [vmem:[%s12596_s4] sm:$0xff] }
0x3dd6   :  { %v10575_v31 = vpop.f32.mrf.mxu1 }
0x3dd7   :  { %v7521_v24 = vadd.f32 %v10575_v31, %v7234_v15 }
0x3dd8   :  { %v7511_v28 = vpop.f32.mrf.mxu1 }
0x3dd9   :  { %v7529_v6 = vadd.f32 %v9577_v25, %v7521_v24  ;;  %v7520_v29 = vadd.f32 %v7511_v28, %v7233_v17 }
0x3ddb   :  { %v12333_v47 = vadd.f32 %v7529_v6, %v12123_v4  ;;  %v7528_v30 = vadd.f32 %v9577_v25, %v7520_v29 }
0x3ddd   :  { %v12339_v22 = vadd.f32 %v7528_v30, %v12126_v10  ;;  %v7539_v34 = vsel %vm50_vm0, %v12333_v47, 0.0 }
0x3dde   :  { %v10597_v50 = vpop.f32.mrf.mxu1  ;;  %7540 = vadd.xlane.f32.xlu0 %v7539_v34 }
0x3ddf   :  { %v12343_v37 = vadd.f32 %v10597_v50, %v9600_v32  ;;  %v7536_v21 = vsel %vm50_vm0, %v12339_v22, 0.0 }
0x3de0   :  { %7537 = vadd.xlane.f32.xlu1 %v7536_v21  ;;  %v7772_v46 = vpop.f32.mrf.mxu1 }
0x3de1   :  { %10598 = vmatprep.subr.msk.mxu0 %vm213_vm5, %v12343_v37  ;;  %v12360_v14 = vadd.f32 %v9600_v32, %v7772_v46 }
0x3e67   :  { %v7541_v4 = vpop.xlane.xlu0 %7540 }
0x3e68   :  { %v7543_v8 = vmul.f32 0.03125, %v7541_v4 }
0x3e69   :  { %v7538_v39 = vpop.xlane.xlu1 %7537 }
0x3e6a   :  { %v7545_v10 = vsub.f32 %v12333_v47, %v7543_v8  ;;  %v7542_v23 = vmul.f32 0.03125, %v7538_v39 }
0x3e6c   :  { %v7544_v42 = vsub.f32 %v12339_v22, %v7542_v23  ;;  %v7547_v44 = vmul.f32 %v7545_v10, %v7545_v10  ;;  %v7563_v11 = vmul.f32 %v9580_v3, %v7545_v10 }
0x3e6e   :  { %v7551_v45 = vsel %vm50_vm0, %v7547_v44, 0.0  ;;  %v7546_v49 = vmul.f32 %v7544_v42, %v7544_v42  ;;  %v7562_v12 = vmul.f32 %v9580_v3, %v7544_v42 }
0x3e6f   :  { %7552 = vadd.xlane.f32.xlu1 %v7551_v45 }
0x3e70   :  { %v7548_v19 = vsel %vm50_vm0, %v7546_v49, 0.0 }
0x3e71   :  { %7549 = vadd.xlane.f32.xlu0 %v7548_v19 }
0x3ef8   :  { %v7553_v27 = vpop.xlane.xlu1 %7552 }
0x3ef9   :  { %v7555_v40 = vmul.f32 0.032258064, %v7553_v27 }
0x3efa   :  { %v7550_v36 = vpop.xlane.xlu0 %7549 }
0x3efb   :  { %10950 = vrsqrt.f32 %v7555_v40  ;;  %v7554_v58 = vmul.f32 0.032258064, %v7550_v36  ;;  %vm7573_vm1 = vcmp.eq.f32.partialorder %v7555_v40, inf  ;;  %v7576_v51 = vand.u32 2147483648, %v7555_v40 }
0x3efc   :  { %vm7575_vm2 = vcmp.eq.f32.partialorder %v7555_v40, 0.0 }
0x3efd   :  { %10952 = vrsqrt.f32 %v7554_v58  ;;  %vm7566_vm3 = vcmp.eq.f32.partialorder %v7554_v58, inf  ;;  %v7569_v63 = vand.u32 2147483648, %v7554_v58  ;;  %vm7568_vm4 = vcmp.eq.f32.partialorder %v7554_v58, 0.0 }
0x3f08   :  { %v10951_v59 = vpop.eup %10950 }
0x3f09   :  { %v7572_v52 = vmul.f32 %v10951_v59, %v7555_v40  ;;  %v9592_v59 = vld [vmem:[%s12598_s6 + $0xe0] sm:$0xff] }
0x3f0a   :  { %v10953_v57 = vpop.eup %10952 }
0x3f0b   :  { %v7574_v60 = vsel %vm7573_vm1, %v7555_v40, %v7572_v52  ;;  %v7565_v56 = vmul.f32 %v10953_v57, %v7554_v58 }
0x3f0c   :  { %v7577_v61 = vsel %vm7575_vm2, %v7576_v51, %v7574_v60 }
0x3f0d   :  { %v7579_v62 = vadd.f32 1e-06, %v7577_v61  ;;  %v7567_v48 = vsel %vm7566_vm3, %v7554_v58, %v7565_v56 }
0x3f0e   :  { %v7570_v41 = vsel %vm7568_vm4, %v7569_v63, %v7567_v48 }
0x3f0f   :  { %10954 = vrcp.f32 %v7579_v62  ;;  %v7578_v53 = vadd.f32 1e-06, %v7570_v41 }
0x3f11   :  { %10956 = vrcp.f32 %v7578_v53 }
0x3f1c   :  { %v10955_v5 = vpop.eup %10954 }
0x3f1d   :  { %v7583_v54 = vmul.f32 %v10955_v5, %v7563_v11 }
0x3f1e   :  { %v10957_v13 = vpop.eup %10956 }
0x3f1f   :  { %v7581_v38 = vmul.f32 %v10957_v13, %v7562_v12  ;;  %v7591_v2 = vadd.f32 %v9581_v0, %v7583_v54 }
0x3f21   :  { %v7590_v35 = vadd.f32 %v9581_v0, %v7581_v38 }
0x3f23   :  { %10584 = vmatprep.mubr.msk.f32.mxu0 %vm50_vm0, %v7590_v35 }
0x3f24   :  { %10585 = vmatmul.mubr.msk.f32.vlgmr.msra.gmra.mxu0 %vm50_vm0, %v7591_v2 }
0x3f25   :  { %10599 = vmatpush3.xpose.msk.msra.mxu0 %vm213_vm5, %v12343_v37 }
0x3f26   :  { %10600 = vmatprep.subr.msk.mxu0 %vm213_vm5, %v12360_v14 }
0x3f29   :  { %10601 = vmatpush3.xpose.msk.msra.mxu0 %vm213_vm5, %v12360_v14 }
0x3fe4   :  { %v10586_v15 = vpop.f32.mrf.mxu0 }
0x3fe5   :  { %v12374_v26 = vadd.f32 %v10586_v15, %v9597_v16 }
0x3fe6   :  { %v7691_v17 = vpop.f32.mrf.mxu0 }
0x3fe7   :  { %v12372_v7 = vadd.f32 %v9597_v16, %v7691_v17  ;;  %v9593_v17 = vld [vmem:[%s12598_s6 + $0xe8] sm:$0xff] }
0x3fe9   :  { %10602 = vmatprep.mubr.msk.f32.mxu0 %vm213_vm5, %v12372_v7 }
0x3fea   :  { %10603 = vmatmul.mubr.msk.f32.vlgmr.msra.gmra.mxu0 %vm213_vm5, %v12374_v26 }
0x40aa   :  { %v10604_v20 = vpop.f32.mrf.mxu0 }
0x40ab   :  { %v7869_v9 = vmul.f32 0.35355338, %v10604_v20 }
0x40ac   :  { %v7859_v33 = vpop.f32.mrf.mxu0 }
0x40ad   :  { %v7871_v1 = vadd.f32 %v12383_v55, %v7869_v9  ;;  %v7868_v18 = vmul.f32 0.35355338, %v7859_v33 }
0x40af   :  { %v7870_v25 = vadd.f32 %v12389_v43, %v7868_v18  ;;  %v7875_v31 = vsel %vm301_vm6, %v7871_v1, -inf }
0x40b0   :  { %7876 = vmax.xlane.f32.xlu1 %v7875_v31 }
0x40b1   :  { %v7872_v24 = vsel %vm301_vm6, %v7870_v25, -inf }
0x40b2   :  { %7873 = vmax.xlane.f32.xlu0 %v7872_v24 }
0x4139   :  { %v7877_v28 = vpop.xlane.xlu1 %7876 }
0x413a   :  { %v7879_v6 = vsub.f32 %v7871_v1, %v7877_v28 }
0x413b   :  { %v7874_v29 = vpop.xlane.xlu0 %7873 }
0x413c   :  { %v7882_v30 = vmul.f32 1.442695, %v7879_v6  ;;  %v7878_v32 = vsub.f32 %v7870_v25, %v7874_v29 }
0x413e   :  { %10958 = vpow2.f32 %v7882_v30  ;;  %v7880_v34 = vmul.f32 1.442695, %v7878_v32 }
0x4140   :  { %10960 = vpow2.f32 %v7880_v34 }
0x414b   :  { %v10959_v50 = vpop.eup %10958 }
0x414c   :  { %v7887_v21 = vsel %vm301_vm6, %v10959_v50, 0.0 }
0x414d   :  { %v10961_v4 = vpop.eup %10960  ;;  %7888 = vadd.xlane.f32.xlu1 %v7887_v21 }
0x414e   :  { %v7884_v8 = vsel %vm301_vm6, %v10961_v4, 0.0 }
0x414f   :  { %7885 = vadd.xlane.f32.xlu0 %v7884_v8 }
0x415e   :  { %7894 = vrot.lane.b32.xlu1 %v12360_v14, %s11034_s30 }
0x4162   :  { %7987 = vrot.lane.b32.xlu1 %v12343_v37, %s11035_s11 }
0x4165   :  { %7896 = vrot.lane.b32.xlu0 %v12343_v37, %s11034_s30 }
0x4166   :  { %7985 = vrot.lane.b32.xlu1 %v12360_v14, %s11035_s11 }
0x4169   :  { %7981 = vrot.lane.b32.xlu0 %v12372_v7, %s11035_s11 }
0x416a   :  { %7983 = vrot.lane.b32.xlu1 %v12374_v26, %s11035_s11 }
0x41d6   :  { %v7889_v39 = vpop.xlane.xlu1 %7888 }
0x41d7   :  { %10962 = vrcp.f32 %v7889_v39 }
0x41d8   :  { %v7886_v10 = vpop.xlane.xlu0 %7885 }
0x41d9   :  { %10964 = vrcp.f32 %v7886_v10 }
0x41da   :  { %v7895_v23 = vpop.permute.xlu1 %7894 }
0x41dc   :  { %v7897_v42 = vpop.permute.xlu0 %7896 }
0x41dd   :  { %10605 = vmatprep.subr.mxu1 %v7897_v42 }
0x41de   :  { %10606 = vmatpush3.msra.mxu1 %v7897_v42  ;;  %v7988_v44 = vpop.permute.xlu1 %7987 }
0x41df   :  { %10607 = vmatprep.subr.mxu1 %v7895_v23 }
0x41e0   :  { %10608 = vmatpush3.msra.mxu1 %v7895_v23  ;;  %v7982_v40 = vpop.permute.xlu0 %7981 }
0x41e1   :  { %10612 = vmatprep.subr.msk.mxu1 %vm213_vm5, %v7988_v44 }
0x41e2   :  { %v7986_v36 = vpop.permute.xlu1 %7985 }
0x41e4   :  { %v10963_v45 = vpop.eup %10962 }
0x41e5   :  { %v7893_v27 = vmul.f32 %v10963_v45, %v10959_v50 }
0x41e6   :  { %v10965_v49 = vpop.eup %10964  ;;  %v7984_v58 = vpop.permute.xlu1 %7983 }
0x41e7   :  { %v7891_v19 = vmul.f32 %v10965_v49, %v10961_v4 }
0x41e9   :  { %10609 = vmatprep.mubr.msk.f32.mxu1 %vm301_vm6, %v7891_v19 }
0x41ea   :  { %10610 = vmatmul.mubr.msk.f32.vlgmr.msra.gmra.mxu1 %vm301_vm6, %v7893_v27 }
0x41eb   :  { %10613 = vmatpush3.xpose.msk.msra.mxu1 %vm213_vm5, %v7988_v44  ;;  %10616 = vmatprep.mubr.msk.f32.mxu1 %vm213_vm5, %v7982_v40 }
0x41ec   :  { %10614 = vmatprep.subr.msk.mxu1 %vm213_vm5, %v7986_v36 }
0x41ef   :  { %10615 = vmatpush3.xpose.msk.msra.mxu1 %vm213_vm5, %v7986_v36 }
0x41f0   :  { %10631 = vmatprep.subr.mxu1 %v9592_v59 }
0x41f2   :  { %10617 = vmatmul.mubr.msk.f32.vlgmr.msra.gmra.mxu1 %vm213_vm5, %v7984_v58 }
0x41f3   :  { %10632 = vmatpush3.msra.mxu1 %v9592_v59 }
0x42aa   :  { %v10611_v52 = vpop.f32.mrf.mxu1 }
0x42ac   :  { %v7972_v51 = vpop.f32.mrf.mxu1 }
0x42ad   :  { %10633 = vmatprep.mubr.msk.f32.mxu1 %vm213_vm5, %v7972_v51 }
0x42ae   :  { %10634 = vmatmul.mubr.msk.f32.vlgmr.msra.gmra.mxu1 %vm213_vm5, %v10611_v52 }
0x42b2   :  { %v10618_v57 = vpop.f32.mrf.mxu1 }
0x42b3   :  { %v8073_v60 = vmul.f32 0.35355338, %v10618_v57 }
0x42b4   :  { %v8063_v61 = vpop.f32.mrf.mxu1 }
0x42b5   :  { %v8075_v56 = vadd.f32 %v12383_v55, %v8073_v60  ;;  %v8072_v62 = vmul.f32 0.35355338, %v8063_v61 }
0x42b7   :  { %v8074_v63 = vadd.f32 %v12389_v43, %v8072_v62  ;;  %v8079_v48 = vsel %vm301_vm6, %v8075_v56, -inf }
0x42b8   :  { %8080 = vmax.xlane.f32.xlu1 %v8079_v48 }
0x42b9   :  { %v8076_v41 = vsel %vm301_vm6, %v8074_v63, -inf }
0x42ba   :  { %8077 = vmax.xlane.f32.xlu0 %v8076_v41 }
0x42c9   :  { %8098 = vrot.lane.b32.xlu1 %v12360_v14, %s11036_s12 }
0x42cd   :  { %8353 = vrot.lane.b32.xlu1 %v12343_v37, %s11040_s19 }
0x42d1   :  { %8351 = vrot.lane.b32.xlu1 %v12360_v14, %s11040_s19 }
0x42d5   :  { %8349 = vrot.lane.b32.xlu1 %v12374_v26, %s11040_s19 }
0x42d9   :  { %8638 = vrot.lane.b32.xlu1 %v12360_v14, %s11042_s21 }
0x42dd   :  { %8636 = vrot.lane.b32.xlu1 %v12374_v26, %s11042_s21 }
0x4341   :  { %v8081_v53 = vpop.xlane.xlu1 %8080 }
0x4342   :  { %v8083_v3 = vsub.f32 %v8075_v56, %v8081_v53 }
0x4343   :  { %v8078_v5 = vpop.xlane.xlu0 %8077 }
0x4344   :  { %v8086_v11 = vmul.f32 1.442695, %v8083_v3  ;;  %v8082_v12 = vsub.f32 %v8074_v63, %v8078_v5 }
0x4345   :  { %v8099_v16 = vpop.permute.xlu1 %8098 }
0x4346   :  { %10966 = vpow2.f32 %v8086_v11  ;;  %v8084_v13 = vmul.f32 1.442695, %v8082_v12 }
0x4348   :  { %10968 = vpow2.f32 %v8084_v13 }
0x4353   :  { %v10967_v54 = vpop.eup %10966 }
0x4354   :  { %v8091_v0 = vsel %vm301_vm6, %v10967_v54, 0.0 }
0x4355   :  { %v10969_v38 = vpop.eup %10968  ;;  %8092 = vadd.xlane.f32.xlu0 %v8091_v0 }
0x4356   :  { %v8088_v46 = vsel %vm301_vm6, %v10969_v38, 0.0 }
0x4359   :  { %8089 = vadd.xlane.f32.xlu0 %v8088_v46 }
0x436f   :  { %8100 = vrot.lane.b32.xlu0 %v12343_v37, %s11036_s12 }
0x4373   :  { %8347 = vrot.lane.b32.xlu0 %v12372_v7, %s11040_s19 }
0x4377   :  { %8640 = vrot.lane.b32.xlu0 %v12343_v37, %s11042_s21 }
0x437b   :  { %8634 = vrot.lane.b32.xlu0 %v12372_v7, %s11042_s21  ;;  %v8354_v7 = vpop.permute.xlu1 %8353 }
0x437f   :  { %v8352_v25 = vpop.permute.xlu1 %8351 }
0x4383   :  { %v8350_v28 = vpop.permute.xlu1 %8349 }
0x4387   :  { %v8639_v29 = vpop.permute.xlu1 %8638 }
0x438b   :  { %v8637_v30 = vpop.permute.xlu1 %8636 }
0x43de   :  { %v8093_v35 = vpop.xlane.xlu0 %8092 }
0x43df   :  { %10970 = vrcp.f32 %v8093_v35 }
0x43e2   :  { %v8090_v2 = vpop.xlane.xlu0 %8089 }
0x43e3   :  { %10972 = vrcp.f32 %v8090_v2 }
0x43e6   :  { %v8101_v15 = vpop.permute.xlu0 %8100 }
0x43e7   :  { %10619 = vmatprep.subr.mxu0 %v8101_v15 }
0x43e8   :  { %10620 = vmatpush3.msra.mxu0 %v8101_v15 }
0x43e9   :  { %10621 = vmatprep.subr.mxu0 %v8099_v16 }
0x43ea   :  { %10622 = vmatpush3.msra.mxu0 %v8099_v16  ;;  %v8348_v1 = vpop.permute.xlu0 %8347 }
0x43eb   :  { %10626 = vmatprep.subr.mxu0 %v9593_v17 }
0x43ec   :  { %v10971_v26 = vpop.eup %10970 }
0x43ed   :  { %v8097_v33 = vmul.f32 %v10971_v26, %v10967_v54 }
0x43ee   :  { %v8641_v24 = vpop.permute.xlu0 %8640 }
0x43f0   :  { %v10973_v20 = vpop.eup %10972 }
0x43f1   :  { %v8095_v9 = vmul.f32 %v10973_v20, %v10969_v38 }
0x43f2   :  { %v8635_v6 = vpop.permute.xlu0 %8634 }
0x43f3   :  { %10623 = vmatprep.mubr.msk.f32.mxu0 %vm301_vm6, %v8095_v9  ;;  %v10635_v9 = vpop.f32.mrf.mxu1 }
0x43f4   :  { %10624 = vmatmul.mubr.msk.f32.vlgmr.msra.gmra.mxu0 %vm301_vm6, %v8097_v33 }
0x43f5   :  { %10627 = vmatpush3.msra.mxu0 %v9593_v17  ;;  %v8338_v33 = vpop.f32.mrf.mxu1 }
0x43f6   :  { %10636 = vmatprep.subr.msk.mxu0 %vm213_vm5, %v8354_v7 }
0x44b4   :  { %v10625_v18 = vpop.f32.mrf.mxu0 }
0x44b6   :  { %v8176_v31 = vpop.f32.mrf.mxu0 }
0x44b7   :  { %10628 = vmatprep.mubr.msk.f32.mxu0 %vm213_vm5, %v8176_v31 }
0x44b8   :  { %10629 = vmatmul.mubr.msk.f32.vlgmr.msra.gmra.mxu0 %vm213_vm5, %v10625_v18 }
0x44b9   :  { %10637 = vmatpush3.xpose.msk.msra.mxu0 %vm213_vm5, %v8354_v7  ;;  %10640 = vmatprep.mubr.msk.f32.mxu0 %vm213_vm5, %v8348_v1 }
0x44ba   :  { %10638 = vmatprep.subr.msk.mxu0 %vm213_vm5, %v8352_v25 }
0x44bd   :  { %10639 = vmatpush3.xpose.msk.msra.mxu0 %vm213_vm5, %v8352_v25 }
0x44be   :  { %10655 = vmatprep.subr.msk.mxu0 %vm213_vm5, %v8641_v24 }
0x44c0   :  { %10641 = vmatmul.mubr.msk.f32.vlgmr.msra.gmra.mxu0 %vm213_vm5, %v8350_v28 }
0x44c1   :  { %10656 = vmatpush3.xpose.msk.msra.mxu0 %vm213_vm5, %v8641_v24  ;;  %10659 = vmatprep.mubr.msk.f32.mxu0 %vm213_vm5, %v8635_v6  ;;  %v9595_v6 = vld [vmem:[%s12598_s6 + $0xf8] sm:$0xff] }
0x44c2   :  { %10657 = vmatprep.subr.msk.mxu0 %vm213_vm5, %v8639_v29 }
0x44c5   :  { %10658 = vmatpush3.xpose.msk.msra.mxu0 %vm213_vm5, %v8639_v29 }
0x44c8   :  { %10660 = vmatmul.mubr.msk.f32.vlgmr.msra.gmra.mxu0 %vm213_vm5, %v8637_v30 }
0x4578   :  { %v12466_v32 = vpop.f32.mrf.mxu0 }
0x4579   :  { %v8344_v29 = vadd.f32 %v10635_v9, %v12466_v32  ;;  %v9638_v9 = vld [vmem:[%s12601_s9 + $0x28] ss:$0 sm:$0xff] }
0x457a   :  { %v12468_v34 = vpop.f32.mrf.mxu0 }
0x4580   :  { %v10642_v50 = vpop.f32.mrf.mxu0 }
0x4581   :  { %v8439_v21 = vmul.f32 0.35355338, %v10642_v50  ;;  %v8339_v50 = vadd.f32 %v8338_v33, %v12468_v34 }
0x4582   :  { %v8429_v4 = vpop.f32.mrf.mxu0 }
0x4583   :  { %v8441_v8 = vadd.f32 %v12383_v55, %v8439_v21  ;;  %v8438_v39 = vmul.f32 0.35355338, %v8429_v4 }
0x4585   :  { %v8440_v10 = vadd.f32 %v12389_v43, %v8438_v39  ;;  %v8445_v23 = vsel %vm301_vm6, %v8441_v8, -inf }
0x4586   :  { %8446 = vmax.xlane.f32.xlu1 %v8445_v23  ;;  %v9635_v23 = vld [vmem:[%s12601_s9 + $0x21] ss:$0 sm:$0xff] }
0x4587   :  { %v8442_v42 = vsel %vm301_vm6, %v8440_v10, -inf }
0x4588   :  { %8443 = vmax.xlane.f32.xlu0 %v8442_v42  ;;  %v10661_v44 = vpop.f32.mrf.mxu0 }
0x4589   :  { %v8726_v41 = vmul.f32 0.35355338, %v10661_v44 }
0x458a   :  { %v8716_v45 = vpop.f32.mrf.mxu0 }
0x458b   :  { %v8725_v49 = vmul.f32 0.35355338, %v8716_v45  ;;  %v8728_v53 = vadd.f32 %v12383_v55, %v8726_v41  ;;  %v9594_v55 = vld [vmem:[%s12598_s6 + $0xf0] sm:$0xff]  ;;  %v9652_v41 = vld [vmem:[%s12600_s8 + $0xf8] sm:$0xff] }
0x458d   :  { %v8727_v19 = vadd.f32 %v12389_v43, %v8725_v49  ;;  %v8732_v3 = vsel %vm301_vm6, %v8728_v53, -inf }
0x458f   :  { %v8729_v27 = vsel %vm301_vm6, %v8727_v19, -inf }
0x4597   :  { %8464 = vrot.lane.b32.xlu1 %v12360_v14, %s11039_s18 }
0x45bb   :  { %8730 = vmax.xlane.f32.xlu1 %v8729_v27 }
0x460f   :  { %v8447_v40 = vpop.xlane.xlu1 %8446 }
0x4610   :  { %v8449_v36 = vsub.f32 %v8441_v8, %v8447_v40 }
0x4611   :  { %v8444_v58 = vpop.xlane.xlu0 %8443 }
0x4612   :  { %v8452_v59 = vmul.f32 1.442695, %v8449_v36  ;;  %v8448_v52 = vsub.f32 %v8440_v10, %v8444_v58 }
0x4613   :  { %v8465_v43 = vpop.permute.xlu1 %8464 }
0x4614   :  { %10974 = vpow2.f32 %v8452_v59  ;;  %v8450_v51 = vmul.f32 1.442695, %v8448_v52 }
0x4616   :  { %10976 = vpow2.f32 %v8450_v51 }
0x4621   :  { %v10975_v57 = vpop.eup %10974 }
0x4622   :  { %v8457_v60 = vsel %vm301_vm6, %v10975_v57, 0.0 }
0x4623   :  { %v10977_v61 = vpop.eup %10976  ;;  %8458 = vadd.xlane.f32.xlu0 %v8457_v60 }
0x4624   :  { %v8454_v56 = vsel %vm301_vm6, %v10977_v61, 0.0 }
0x4627   :  { %8455 = vadd.xlane.f32.xlu0 %v8454_v56 }
0x463d   :  { %8466 = vrot.lane.b32.xlu0 %v12343_v37, %s11039_s18 }
0x4644   :  { %v8731_v62 = vpop.xlane.xlu1 %8730 }
0x4645   :  { %v8735_v63 = vsub.f32 %v8727_v19, %v8731_v62  ;;  %v9642_v62 = vld [vmem:[%s12599_s7 + $0x70] sm:$0xff] }
0x4647   :  { %v8737_v48 = vmul.f32 1.442695, %v8735_v63  ;;  %v9641_v63 = vld [vmem:[%s12599_s7 + $0x68] sm:$0xff] }
0x4649   :  { %10978 = vpow2.f32 %v8737_v48  ;;  %v9640_v48 = vld [vmem:[%s12599_s7 + $0x60] sm:$0xff] }
0x4656   :  { %v10979_v5 = vpop.eup %10978 }
0x4657   :  { %v8741_v11 = vsel %vm301_vm6, %v10979_v5, 0.0 }
0x465c   :  { %8733 = vmax.xlane.f32.xlu0 %v8732_v3  ;;  %v9650_v3 = vld [vmem:[%s12600_s8 + $0xe8] sm:$0xff] }
0x4660   :  { %8742 = vadd.xlane.f32.xlu0 %v8741_v11 }
0x4676   :  { %8753 = vrot.lane.b32.xlu0 %v12343_v37, %s11041_s20 }
0x46ac   :  { %v8459_v12 = vpop.xlane.xlu0 %8458 }
0x46ad   :  { %10980 = vrcp.f32 %v8459_v12 }
0x46b0   :  { %v8456_v13 = vpop.xlane.xlu0 %8455 }
0x46b1   :  { %10982 = vrcp.f32 %v8456_v13 }
0x46b4   :  { %v8467_v54 = vpop.permute.xlu0 %8466 }
0x46b5   :  { %10643 = vmatprep.subr.mxu1 %v8467_v54 }
0x46b6   :  { %10644 = vmatpush3.msra.mxu1 %v8467_v54 }
0x46b7   :  { %10645 = vmatprep.subr.mxu1 %v8465_v43 }
0x46b8   :  { %10646 = vmatpush3.msra.mxu1 %v8465_v43  ;;  %v9643_v43 = vld [vmem:[%s12599_s7 + $0x78] sm:$0xff] }
0x46b9   :  { %10650 = vmatprep.subr.mxu1 %v9594_v55  ;;  %10674 = vmatprep.subr.mxu0 %v9643_v43 }
0x46ba   :  { %v10981_v0 = vpop.eup %10980  ;;  %10675 = vmatpush3.msra.mxu0 %v9643_v43 }
0x46bb   :  { %v8463_v35 = vmul.f32 %v10981_v0, %v10975_v57  ;;  %10676 = vmatprep.subr.mxu0 %v9642_v62 }
0x46bc   :  { %10677 = vmatpush3.msra.mxu0 %v9642_v62 }
0x46bd   :  { %10678 = vmatprep.subr.mxu0 %v9641_v63 }
0x46be   :  { %v10983_v38 = vpop.eup %10982  ;;  %10679 = vmatpush3.msra.mxu0 %v9641_v63 }
0x46bf   :  { %v8461_v46 = vmul.f32 %v10983_v38, %v10977_v61  ;;  %10680 = vmatprep.subr.mxu0 %v9640_v48 }
0x46c0   :  { %10681 = vmatpush3.msra.mxu0 %v9640_v48 }
0x46c1   :  { %10647 = vmatprep.mubr.msk.f32.mxu1 %vm301_vm6, %v8461_v46 }
0x46c2   :  { %10648 = vmatmul.mubr.msk.f32.vlgmr.msra.gmra.mxu1 %vm301_vm6, %v8463_v35 }
0x46c3   :  { %10651 = vmatpush3.msra.mxu1 %v9594_v55 }
0x46e5   :  { %v8734_v37 = vpop.xlane.xlu0 %8733 }
0x46e6   :  { %v8736_v2 = vsub.f32 %v8728_v53, %v8734_v37  ;;  %v9651_v53 = vld [vmem:[%s12600_s8 + $0xf0] sm:$0xff] }
0x46e8   :  { %v8739_v15 = vmul.f32 1.442695, %v8736_v2 }
0x46e9   :  { %v8743_v16 = vpop.xlane.xlu0 %8742 }
0x46ea   :  { %10984 = vpow2.f32 %v8739_v15 }
0x46eb   :  { %10986 = vrcp.f32 %v8743_v16 }
0x46ed   :  { %v8754_v17 = vpop.permute.xlu0 %8753 }
0x46ee   :  { %10662 = vmatprep.subr.mxu1 %v8754_v17 }
0x46f7   :  { %v10985_v26 = vpop.eup %10984 }
0x46f8   :  { %v8744_v20 = vsel %vm301_vm6, %v10985_v26, 0.0  ;;  %v10987_v7 = vpop.eup %10986 }
0x46f9   :  { %8745 = vadd.xlane.f32.xlu1 %v8744_v20  ;;  %v8748_v31 = vmul.f32 %v10987_v7, %v10979_v5  ;;  %v9649_v5 = vld [vmem:[%s12600_s8 + $0xe0] sm:$0xff] }
0x470a   :  { %8751 = vrot.lane.b32.xlu1 %v12360_v14, %s11041_s20 }
0x4782   :  { %v10649_v1 = vpop.f32.mrf.mxu1  ;;  %v8746_v18 = vpop.xlane.xlu1 %8745 }
0x4783   :  { %10988 = vrcp.f32 %v8746_v18 }
0x4784   :  { %v8542_v25 = vpop.f32.mrf.mxu1 }
0x4785   :  { %10652 = vmatprep.mubr.msk.f32.mxu1 %vm213_vm5, %v8542_v25 }
0x4786   :  { %10653 = vmatmul.mubr.msk.f32.vlgmr.msra.gmra.mxu1 %vm213_vm5, %v10649_v1  ;;  %v8752_v24 = vpop.permute.xlu1 %8751 }
0x4787   :  { %10663 = vmatpush3.msra.mxu1 %v8754_v17  ;;  %10666 = vmatprep.mubr.msk.f32.mxu1 %vm301_vm6, %v8748_v31  ;;  %v9639_v31 = vld [vmem:[%s12601_s9 + $0x29] ss:$0 sm:$0xff] }
0x4788   :  { %10664 = vmatprep.subr.mxu1 %v8752_v24 }
0x4789   :  { %10665 = vmatpush3.msra.mxu1 %v8752_v24 }
0x478a   :  { %10669 = vmatprep.subr.mxu1 %v9595_v6 }
0x4790   :  { %v10989_v14 = vpop.eup %10988 }
0x4791   :  { %v8750_v28 = vmul.f32 %v10989_v14, %v10985_v26 }
0x4793   :  { %10667 = vmatmul.mubr.msk.f32.vlgmr.msra.gmra.mxu1 %vm301_vm6, %v8750_v28 }
0x4794   :  { %10670 = vmatpush3.msra.mxu1 %v9595_v6  ;;  %v9648_v6 = vld [vmem:[%s12600_s8 + $0xd8] sm:$0xff] }
0x4795   :  { %10685 = vmatprep.subr.mxu1 %v9652_v41 }
0x4846   :  { %v10654_v30 = vpop.f32.mrf.mxu1 }
0x4847   :  { %v8633_v21 = vadd.f32 %v10654_v30, %v8344_v29  ;;  %v9647_v29 = vld [vmem:[%s12600_s8 + $0xd0] sm:$0xff]  ;;  %v9646_v30 = vld [vmem:[%s12600_s8 + $0xc8] sm:$0xff] }
0x4848   :  { %v8623_v4 = vpop.f32.mrf.mxu1 }
0x4849   :  { %v8632_v8 = vadd.f32 %v8623_v4, %v8339_v50  ;;  %v9645_v50 = vld [vmem:[%s12600_s8 + $0xc0] sm:$0xff] }
0x4853   :  { %v10668_v39 = vpop.f32.mrf.mxu1 }
0x4855   :  { %v8829_v10 = vpop.f32.mrf.mxu1 }
0x4856   :  { %10671 = vmatprep.mubr.msk.f32.mxu1 %vm213_vm5, %v8829_v10 }
0x4857   :  { %10672 = vmatmul.mubr.msk.f32.vlgmr.msra.gmra.mxu1 %vm213_vm5, %v10668_v39 }
0x4858   :  { %10686 = vmatpush3.msra.mxu1 %v9652_v41 }
0x4859   :  { %10687 = vmatprep.subr.mxu1 %v9651_v53 }
0x485a   :  { %10688 = vmatpush3.msra.mxu1 %v9651_v53 }
0x485b   :  { %10689 = vmatprep.subr.mxu1 %v9650_v3 }
0x485c   :  { %10690 = vmatpush3.msra.mxu1 %v9650_v3 }
0x485d   :  { %10691 = vmatprep.subr.mxu1 %v9649_v5 }
0x485e   :  { %10692 = vmatpush3.msra.mxu1 %v9649_v5 }
0x485f   :  { %10693 = vmatprep.subr.mxu1 %v9648_v6 }
0x4860   :  { %10694 = vmatpush3.msra.mxu1 %v9648_v6 }
0x4861   :  { %10695 = vmatprep.subr.mxu1 %v9647_v29 }
0x4862   :  { %10696 = vmatpush3.msra.mxu1 %v9647_v29 }
0x4863   :  { %10697 = vmatprep.subr.mxu1 %v9646_v30 }
0x4864   :  { %10698 = vmatpush3.msra.mxu1 %v9646_v30 }
0x4865   :  { %10699 = vmatprep.subr.mxu1 %v9645_v50 }
0x4866   :  { %10700 = vmatpush3.msra.mxu1 %v9645_v50 }
0x4917   :  { %v10673_v42 = vpop.f32.mrf.mxu1 }
0x4918   :  { %v8920_v44 = vadd.f32 %v10673_v42, %v8633_v21  ;;  %v9654_v21 = vld [vmem:[%s12601_s9 + $0x22] ss:$0 sm:$0xff] }
0x4919   :  { %v8910_v45 = vpop.f32.mrf.mxu1 }
0x491a   :  { %v8928_v32 = vadd.f32 %v9635_v23, %v8920_v44  ;;  %v8919_v49 = vadd.f32 %v8910_v45, %v8632_v8  ;;  %v9657_v44 = vld [vmem:[%s12601_s9 + $0x23] ss:$0 sm:$0xff] }
0x491c   :  { %v12510_v34 = vadd.f32 %v8928_v32, %v12333_v47  ;;  %v8927_v19 = vadd.f32 %v9635_v23, %v8919_v49 }
0x491e   :  { %v12513_v27 = vadd.f32 %v8927_v19, %v12339_v22  ;;  %v8938_v40 = vsel %vm50_vm0, %v12510_v34, 0.0 }
0x491f   :  { %8939 = vadd.xlane.f32.xlu0 %v8938_v40 }
0x4920   :  { %v8935_v36 = vsel %vm50_vm0, %v12513_v27, 0.0 }
0x4921   :  { %8936 = vadd.xlane.f32.xlu1 %v8935_v36 }
0x49a8   :  { %v8940_v58 = vpop.xlane.xlu0 %8939 }
0x49a9   :  { %v8942_v59 = vmul.f32 0.03125, %v8940_v58 }
0x49aa   :  { %v8937_v52 = vpop.xlane.xlu1 %8936 }
0x49ab   :  { %v8944_v51 = vsub.f32 %v12510_v34, %v8942_v59  ;;  %v8941_v57 = vmul.f32 0.03125, %v8937_v52 }
0x49ad   :  { %v8943_v47 = vsub.f32 %v12513_v27, %v8941_v57  ;;  %v8946_v60 = vmul.f32 %v8944_v51, %v8944_v51  ;;  %v8962_v7 = vmul.f32 %v9638_v9, %v8944_v51 }
0x49af   :  { %v8950_v22 = vsel %vm50_vm0, %v8946_v60, 0.0  ;;  %v8945_v61 = vmul.f32 %v8943_v47, %v8943_v47  ;;  %v8961_v1 = vmul.f32 %v9638_v9, %v8943_v47 }
0x49b0   :  { %8951 = vadd.xlane.f32.xlu1 %v8950_v22 }
0x49b1   :  { %v8947_v56 = vsel %vm50_vm0, %v8945_v61, 0.0 }
0x49b2   :  { %8948 = vadd.xlane.f32.xlu0 %v8947_v56 }
0x4a39   :  { %v8952_v11 = vpop.xlane.xlu1 %8951 }
0x4a3a   :  { %v8954_v12 = vmul.f32 0.032258064, %v8952_v11 }
0x4a3b   :  { %v8949_v13 = vpop.xlane.xlu0 %8948 }
0x4a3c   :  { %10990 = vrsqrt.f32 %v8954_v12  ;;  %v8953_v54 = vmul.f32 0.032258064, %v8949_v13  ;;  %vm8972_vm5 = vcmp.eq.f32.partialorder %v8954_v12, inf  ;;  %v8975_v38 = vand.u32 2147483648, %v8954_v12 }
0x4a3d   :  { %vm8974_vm6 = vcmp.eq.f32.partialorder %v8954_v12, 0.0 }
0x4a3e   :  { %10992 = vrsqrt.f32 %v8953_v54  ;;  %vm8965_vm7 = vcmp.eq.f32.partialorder %v8953_v54, inf  ;;  %v8968_v16 = vand.u32 2147483648, %v8953_v54  ;;  %vm8967_vm8 = vcmp.eq.f32.partialorder %v8953_v54, 0.0 }
0x4a49   :  { %v10991_v55 = vpop.eup %10990 }
0x4a4a   :  { %v8971_v0 = vmul.f32 %v10991_v55, %v8954_v12 }
0x4a4b   :  { %v10993_v46 = vpop.eup %10992 }
0x4a4c   :  { %v8973_v35 = vsel %vm8972_vm5, %v8954_v12, %v8971_v0  ;;  %v8964_v2 = vmul.f32 %v10993_v46, %v8953_v54 }
0x4a4d   :  { %v8976_v37 = vsel %vm8974_vm6, %v8975_v38, %v8973_v35  ;;  %v9662_v35 = vld [vmem:[%s12601_s9 + $0x2c] ss:$0 sm:$0xff] }
0x4a4e   :  { %v8978_v15 = vadd.f32 1e-06, %v8976_v37  ;;  %v8966_v17 = vsel %vm8965_vm7, %v8953_v54, %v8964_v2 }
0x4a4f   :  { %v8969_v26 = vsel %vm8967_vm8, %v8968_v16, %v8966_v17 }
0x4a50   :  { %10994 = vrcp.f32 %v8978_v15  ;;  %v8977_v20 = vadd.f32 1e-06, %v8969_v26  ;;  %v9663_v15 = vld [vmem:[%s12601_s9 + $0x2d] ss:$0 sm:$0xff] }
0x4a52   :  { %10996 = vrcp.f32 %v8977_v20 }
0x4a5d   :  { %v10995_v33 = vpop.eup %10994 }
0x4a5e   :  { %v8982_v25 = vmul.f32 %v10995_v33, %v8962_v7 }
0x4a5f   :  { %v10997_v18 = vpop.eup %10996 }
0x4a60   :  { %v8980_v24 = vmul.f32 %v10997_v18, %v8961_v1  ;;  %v8990_v28 = vadd.f32 %v9639_v31, %v8982_v25 }
0x4a62   :  { %v8989_v14 = vadd.f32 %v9639_v31, %v8980_v24 }
0x4a64   :  { %10682 = vmatprep.mubr.msk.f32.mxu0 %vm50_vm0, %v8989_v14 }
0x4a65   :  { %10683 = vmatmul.mubr.msk.f32.vlgmr.msra.gmra.mxu0 %vm50_vm0, %v8990_v28 }
0x4b25   :  { %v10684_v4 = vpop.f32.mrf.mxu0 }
0x4b26   :  { %v9093_v8 = vadd.f32 %v10684_v4, %v9654_v21 }
0x4b27   :  { %v9087_v39 = vpop.f32.mrf.mxu0 }
0x4b28   :  { %v9088_v10 = vadd.f32 %v9654_v21, %v9087_v39  ;;  %v9097_v42 = vmax.f32 %v9093_v8, 0.0 }
0x4b2a   :  { %v9096_v23 = vmax.f32 %v9088_v10, 0.0 }
0x4b2c   :  { %10701 = vmatprep.mubr.msk.f32.mxu1 %vm1532_vm11, %v9096_v23 }
0x4b2d   :  { %10702 = vmatmul.mubr.msk.f32.vlgmr.msra.gmra.mxu1 %vm1532_vm11, %v9097_v42 }
0x4bed   :  { %v10703_v45 = vpop.f32.mrf.mxu1 }
0x4bee   :  { %v9182_v32 = vadd.f32 %v10703_v45, %v9657_v44 }
0x4bef   :  { %v9176_v49 = vpop.f32.mrf.mxu1 }
0x4bf0   :  { %v9186_v19 = vadd.f32 %v9182_v32, %v12510_v34  ;;  %v9177_v40 = vadd.f32 %v9657_v44, %v9176_v49 }
0x4bf2   :  { %v9185_v36 = vadd.f32 %v9177_v40, %v12513_v27  ;;  %v9194_v58 = vsel %vm50_vm0, %v9186_v19, 0.0 }
0x4bf3   :  { %9195 = vadd.xlane.f32.xlu1 %v9194_v58 }
0x4bf4   :  { %v9191_v59 = vsel %vm50_vm0, %v9185_v36, 0.0 }
0x4bf5   :  { %9192 = vadd.xlane.f32.xlu0 %v9191_v59 }
0x4c7c   :  { %v9196_v52 = vpop.xlane.xlu1 %9195 }
0x4c7d   :  { %v9198_v51 = vmul.f32 0.03125, %v9196_v52 }
0x4c7e   :  { %v9193_v57 = vpop.xlane.xlu0 %9192 }
0x4c7f   :  { %v9200_v47 = vsub.f32 %v9186_v19, %v9198_v51  ;;  %v9197_v60 = vmul.f32 0.03125, %v9193_v57 }
0x4c81   :  { %v9199_v22 = vsub.f32 %v9185_v36, %v9197_v60  ;;  %v9202_v61 = vmul.f32 %v9200_v47, %v9200_v47  ;;  %v9218_v37 = vmul.f32 %v9662_v35, %v9200_v47 }
0x4c83   :  { %v9206_v56 = vsel %vm50_vm0, %v9202_v61, 0.0  ;;  %v9201_v43 = vmul.f32 %v9199_v22, %v9199_v22  ;;  %v9217_v17 = vmul.f32 %v9662_v35, %v9199_v22 }
0x4c84   :  { %9207 = vadd.xlane.f32.xlu1 %v9206_v56 }
0x4c85   :  { %v9203_v34 = vsel %vm50_vm0, %v9201_v43, 0.0 }
0x4c86   :  { %9204 = vadd.xlane.f32.xlu0 %v9203_v34 }
0x4d0d   :  { %v9208_v27 = vpop.xlane.xlu1 %9207 }
0x4d0e   :  { %v9210_v62 = vmul.f32 0.032258064, %v9208_v27 }
0x4d0f   :  { %v9205_v63 = vpop.xlane.xlu0 %9204 }
0x4d10   :  { %10998 = vrsqrt.f32 %v9210_v62  ;;  %v9209_v48 = vmul.f32 0.032258064, %v9205_v63  ;;  %vm9228_vm11 = vcmp.eq.f32.partialorder %v9210_v62, inf  ;;  %v9231_v3 = vand.u32 2147483648, %v9210_v62 }
0x4d11   :  { %vm9230_vm9 = vcmp.eq.f32.partialorder %v9210_v62, 0.0 }
0x4d12   :  { %11000 = vrsqrt.f32 %v9209_v48  ;;  %vm9221_vm10 = vcmp.eq.f32.partialorder %v9209_v48, inf  ;;  %v9224_v55 = vand.u32 2147483648, %v9209_v48  ;;  %vm9223_vm12 = vcmp.eq.f32.partialorder %v9209_v48, 0.0 }
0x4d1d   :  { %v10999_v41 = vpop.eup %10998 }
0x4d1e   :  { %v9227_v53 = vmul.f32 %v10999_v41, %v9210_v62 }
0x4d1f   :  { %v11001_v5 = vpop.eup %11000 }
0x4d20   :  { %v9229_v11 = vsel %vm9228_vm11, %v9210_v62, %v9227_v53  ;;  %v9220_v13 = vmul.f32 %v11001_v5, %v9209_v48 }
0x4d21   :  { %v9232_v12 = vsel %vm9230_vm9, %v9231_v3, %v9229_v11 }
0x4d22   :  { %v9234_v54 = vadd.f32 1e-06, %v9232_v12  ;;  %v9222_v0 = vsel %vm9221_vm10, %v9209_v48, %v9220_v13 }
0x4d23   :  { %v9225_v38 = vsel %vm9223_vm12, %v9224_v55, %v9222_v0 }
0x4d24   :  { %11002 = vrcp.f32 %v9234_v54  ;;  %v9233_v46 = vadd.f32 1e-06, %v9225_v38 }
0x4d26   :  { %11004 = vrcp.f32 %v9233_v46 }
0x4d31   :  { %v11003_v2 = vpop.eup %11002 }
0x4d32   :  { %v9238_v16 = vmul.f32 %v11003_v2, %v9218_v37 }
0x4d33   :  { %v11005_v26 = vpop.eup %11004 }
0x4d34   :  { %v9246_v20 = vadd.f32 %v9663_v15, %v9238_v16  ;;  %v9236_v9 = vmul.f32 %v11005_v26, %v9217_v17 }
0x4d36   :  { %9248 = vst.msk [vmem:[#allocation2 + $0x8] sm:$0xff] %vm50_vm0, %v9246_v20  ;;  %v9245_v33 = vadd.f32 %v9663_v15, %v9236_v9 }
0x4d38   :  { %9247 = vst.msk [vmem:[#allocation2] sm:$0xff] %vm50_vm0, %v9245_v33 }
0x4d39   :  { %11023 = shalt.err (!%p11020_p4)
}
0x4d3a   :  { %s11046_s9 = smov 128   ;;  %s11047_s2 = smov 8  }
0x4d3b   :  { %9260 = dma.vmem_to_hbm [thread:$0]  %s9255_s1, 256, %s12602_s10, [#allocation3], %s11046_s9, %s11046_s9, %s11047_s2  }
0x4d3c   :  { %11032 = dma.done.wait [#allocation3], 256  }
0x4d3d   :  { %11033 = vsyncadd [#allocation3], 4294967040 }
0x4d3e   :  { %9264 = vsyncpa [#allocation3], 1 }

</bundles_post_ra>
